<compile_context>
chip_gen: v6e
topology: v6e:2x2x1
jax: 0.10.0
libtpu: 0.0.40
codegen_flags: <defaults>
</compile_context>

<pallas_src>
import jax
import jax.numpy as jnp
from jax.experimental import pallas as pl
from jax.experimental.pallas import tpu as pltpu


def _mlp_kernel(q_ref, bias0_ref,
                w0q_ref, b0q_ref, w1q_ref, b1q_ref,
                w0x_ref,
                w1_ref, b1_ref, w2_ref, b2_ref,
                w3_ref, b3_ref, w4_ref, b4_ref,
                o_ref):
    f32, bf16 = jnp.float32, jnp.bfloat16

    def layer(a_bf16, w_ref, b_ref):
        # bf16 MXU matmul with f32 accumulation; bias + ReLU in f32 (v5e-safe);
        # single cast to bf16 for the next layer's input.
        acc = jnp.dot(a_bf16, w_ref[...], preferred_element_type=f32)
        return jnp.maximum(acc + b_ref[...], 0.0).astype(bf16)

    # ---- fc0_query (K = 3): VPU broadcast multiply-adds in f32 (no MXU pass) ----
    q = q_ref[...]                                      # (TQ, P) f32
    P = q.shape[-1]                                     # static (3)
    xq = b0q_ref[...]                                   # (1, 128) f32
    for c in range(P):                                  # static unroll
        xq = xq + q[:, c:c + 1] * w0q_ref[c:c + 1, :]   # (TQ, 128)
    xq = jnp.maximum(xq, 0.0).astype(bf16)

    # ---- fc1_query, fc0..fc3: channel-last MXU matmuls ----
    xq = layer(xq, w1q_ref, b1q_ref)                    # (TQ, 256)
    x = layer(xq, w0x_ref, bias0_ref)                   # (TQ, 312)  fc0 w/ fused bias
    x = layer(x, w1_ref, b1_ref)                        # (TQ, 312)
    x = layer(x, w2_ref, b2_ref)                        # (TQ, 256)
    x = layer(x, w3_ref, b3_ref)                        # (TQ, 128)

    # ---- fc4 (output_dim == 1): VPU multiply + cross-lane sum (XLU),
    #      stored as a lane-dense (1, TQ) row (unmasked vst). ----
    prod = x.astype(f32) * w4_ref[...]                  # (TQ, 128) f32
    y = jnp.sum(prod, axis=-1)                          # (TQ,)
    o_ref[...] = y[None, :] + b4_ref[...]               # (1, TQ)


def pack_params(params):
    """One-time weight packing: transpose to (C_in, C_out), cast MXU weights to
    bf16, keep VPU-path weights (fc0_query, fc4) and all biases in f32."""
    f32, bf16 = jnp.float32, jnp.bfloat16
    W0 = params["w0"]                                   # (312, 128 + 256 + n_z_cut)
    packed = {
        # cloth branch (tiny per-batch MLP, plain JAX glue)
        "w0_cloth": params["w0_cloth"].astype(f32), "b0_cloth": params["b0_cloth"].astype(f32),
        "w1_cloth": params["w1_cloth"].astype(f32), "b1_cloth": params["b1_cloth"].astype(f32),
        # fc0 split: x_cloth / z_cut columns folded into a per-batch bias at call time
        "w0c": W0[:, :128].astype(f32),
        "w0z": W0[:, 384:].astype(f32),
        "b0": params["b0"].astype(f32),
        # kernel-facing weights
        "w0q": params["w0_query"].T.astype(f32),        # (3, 128)   VPU layer
        "b0q": params["b0_query"][None, :].astype(f32),
        "w1q": params["w1_query"].T.astype(bf16),       # (128, 256)
        "b1q": params["b1_query"][None, :].astype(f32),
        "w0x": W0[:, 128:384].T.astype(bf16),           # (256, 312)
        "w1": params["w1"].T.astype(bf16), "b1": params["b1"][None, :].astype(f32),
        "w2": params["w2"].T.astype(bf16), "b2": params["b2"][None, :].astype(f32),
        "w3": params["w3"].T.astype(bf16), "b3": params["b3"][None, :].astype(f32),
        "w4": params["w4"].astype(f32),                 # (1, 128)   VPU/XLU layer
        "b4": params["b4"][None, :].astype(f32),        # (1, 1)
    }
    return packed


def network_forward(z_cut, z_style, query, packed, tq=1024):
    B, Q, P = query.shape
    f32 = jnp.float32

    # ---- cloth branch: tiny per-batch MLP on z_style ----
    xc = jax.nn.relu(z_style @ packed["w0_cloth"].T + packed["b0_cloth"])
    xc = jax.nn.relu(xc @ packed["w1_cloth"].T + packed["b1_cloth"])        # (B, 128)

    # ---- fold per-batch-constant part of fc0 into one bias ----
    bias0 = (xc @ packed["w0c"].T + z_cut @ packed["w0z"].T + packed["b0"])
    bias0 = bias0[:, None, :].astype(f32)                                    # (B, 1, 312)
    C0 = bias0.shape[-1]

    # ---- tiling: large query tiles (multiple of 128), pad remainder ----
    tq = min(int(tq), pl.cdiv(Q, 128) * 128)
    tq = max(128, (tq // 128) * 128)
    q_pad = pl.cdiv(Q, tq) * tq
    # v7x has 2 TensorCores: keep the grid >= 2 balanced steps when possible.
    if B * (q_pad // tq) < 2 and q_pad >= 256:
        tq = max(128, ((q_pad // 2) // 128) * 128)
        q_pad = pl.cdiv(Q, tq) * tq

    query_k = query.astype(f32)
    if q_pad != Q:
        query_k = jnp.pad(query_k, ((0, 0), (0, q_pad - Q), (0, 0)))

    def full(a):
        return pl.BlockSpec(a.shape, lambda b, qi: (0,) * a.ndim)

    w0q, b0q = packed["w0q"], packed["b0q"]
    w1q, b1q = packed["w1q"], packed["b1q"]
    w0x = packed["w0x"]
    w1, b1 = packed["w1"], packed["b1"]
    w2, b2 = packed["w2"], packed["b2"]
    w3, b3 = packed["w3"], packed["b3"]
    w4, b4 = packed["w4"], packed["b4"]

    out = pl.pallas_call(
        _mlp_kernel,
        out_shape=jax.ShapeDtypeStruct((B, 1, q_pad), f32),
        grid_spec=pltpu.PrefetchScalarGridSpec(
            num_scalar_prefetch=0,
            grid=(B, q_pad // tq),
            in_specs=[
                pl.BlockSpec((None, tq, P), lambda b, qi: (b, qi, 0)),      # query tile
                pl.BlockSpec((None, 1, C0), lambda b, qi: (b, 0, 0)),       # fused fc0 bias
                full(w0q), full(b0q), full(w1q), full(b1q),
                full(w0x),
                full(w1), full(b1), full(w2), full(b2),
                full(w3), full(b3), full(w4), full(b4),
            ],
            out_specs=pl.BlockSpec((None, 1, tq), lambda b, qi: (b, 0, qi)),
        ),
        compiler_params=pltpu.CompilerParams(
            dimension_semantics=("parallel", "parallel"),
            vmem_limit_bytes=32 * 1024 * 1024),
    )(query_k, bias0, w0q, b0q, w1q, b1q, w0x,
      w1, b1, w2, b2, w3, b3, w4, b4)

    return out[:, 0, :Q]                                # (B, Q) == x[:, 0]


def init_params(key):
    """Deterministic weight-norm-style init.  Effective weight = g * v / ||v||."""
    layer_shapes = [
        ("0_cloth", 128, 1), ("1_cloth", 128, 128),
        ("0_query", 128, 3), ("1_query", 256, 128),
        ("0", 312, 128 + 256 + 12), ("1", 312, 312),
        ("2", 256, 312), ("3", 128, 256), ("4", 1, 128),
    ]
    params = {}
    keys = jax.random.split(key, 3 * len(layer_shapes))
    for i, (name, out_c, in_c) in enumerate(layer_shapes):
        kv, kg, kb = keys[3 * i], keys[3 * i + 1], keys[3 * i + 2]
        v = jax.random.normal(kv, (out_c, in_c), jnp.float32) * 0.2
        g = jax.random.uniform(kg, (out_c,), jnp.float32, minval=0.5, maxval=1.5)
        b = jax.random.normal(kb, (out_c,), jnp.float32) * 0.05
        norm = jnp.sqrt(jnp.sum(v * v, axis=1, keepdims=True))
        params["w" + name] = g[:, None] * v / norm          # weight-norm effective W
        params["b" + name] = b
    return params


def reference(z_cut, z_style, query, p):
    """Pure-JAX f32 reference mirroring the PyTorch forward."""
    relu = jax.nn.relu
    B, Q, _ = query.shape
    xc = relu(z_style @ p["w0_cloth"].T + p["b0_cloth"])
    xc = relu(xc @ p["w1_cloth"].T + p["b1_cloth"])                     # (B, 128)
    xq = relu(jnp.einsum("bqc,oc->bqo", query, p["w0_query"]) + p["b0_query"])
    xq = relu(jnp.einsum("bqc,oc->bqo", xq, p["w1_query"]) + p["b1_query"])
    xcb = jnp.broadcast_to(xc[:, None, :], (B, Q, 128))
    zcb = jnp.broadcast_to(z_cut[:, None, :], (B, Q, z_cut.shape[-1]))
    x = jnp.concatenate([xcb, xq, zcb], axis=-1)                        # (B, Q, 396)
    for name in ["0", "1", "2", "3"]:
        x = relu(jnp.einsum("bqc,oc->bqo", x, p["w" + name]) + p["b" + name])
    x = jnp.einsum("bqc,oc->bqo", x, p["w4"]) + p["b4"]
    return x[:, :, 0]


if __name__ == "__main__":
    key = jax.random.PRNGKey(0)
    kp, k1, k2, k3 = jax.random.split(key, 4)
    params = init_params(kp)
    packed = pack_params(params)          # one-time weight packing (perf item 8)

    B, Q = 2, 256
    z_style = jax.random.normal(k1, (B, 1), jnp.float32)
    z_cut = jax.random.normal(k2, (B, 12), jnp.float32)
    query = jax.random.normal(k3, (B, Q, 3), jnp.float32)

    out = network_forward(z_cut, z_style, query, packed)
    out = jax.block_until_ready(out)

    ref = reference(z_cut, z_style, query, params)
    assert out.shape == (B, Q), out.shape
    # bf16 matmul inputs with f32 accumulation -> bf16-level tolerance vs f32 ref.
    if not jnp.allclose(out, ref, rtol=5e-2, atol=5e-2):
        err = float(jnp.max(jnp.abs(out - ref)))
        raise AssertionError(
            f"Pallas kernel output mismatch vs JAX reference (max abs err {err})")
    print("KERNEL_OK")
</pallas_src>

<mosaic_0001>
module attributes {stable_mosaic.version = 11 : i64} {
  func.func @_mlp_kernel(%arg0: i32, %arg1: i32, %arg2: memref<1x256x3xf32, #tpu.memory_space<vmem>>, %arg3: memref<1x1x312xf32, #tpu.memory_space<vmem>>, %arg4: memref<3x128xf32, #tpu.memory_space<vmem>>, %arg5: memref<1x128xf32, #tpu.memory_space<vmem>>, %arg6: memref<128x256xbf16, #tpu.memory_space<vmem>>, %arg7: memref<1x256xf32, #tpu.memory_space<vmem>>, %arg8: memref<256x312xbf16, #tpu.memory_space<vmem>>, %arg9: memref<312x312xbf16, #tpu.memory_space<vmem>>, %arg10: memref<1x312xf32, #tpu.memory_space<vmem>>, %arg11: memref<312x256xbf16, #tpu.memory_space<vmem>>, %arg12: memref<1x256xf32, #tpu.memory_space<vmem>>, %arg13: memref<256x128xbf16, #tpu.memory_space<vmem>>, %arg14: memref<1x128xf32, #tpu.memory_space<vmem>>, %arg15: memref<1x128xf32, #tpu.memory_space<vmem>>, %arg16: memref<1x1xf32, #tpu.memory_space<vmem>>, %arg17: memref<1x1x256xf32, #tpu.memory_space<vmem>>) attributes {dimension_semantics = [#tpu.dimension_semantics<parallel>, #tpu.dimension_semantics<parallel>], iteration_bounds = array<i64: 2, 1>, scalar_prefetch = 0 : i64, scratch_operands = 0 : i64, tpu.core_type = #tpu.core_type<tc>, window_params = [{transform_indices = @transform_0, window_bounds = array<i64: 1, 256, 3>}, {transform_indices = @transform_1, window_bounds = array<i64: 1, 1, 312>}, {pipeline_mode = #tpu.pipeline_mode<synchronous>, transform_indices = @transform_2, window_bounds = array<i64: 3, 128>}, {pipeline_mode = #tpu.pipeline_mode<synchronous>, transform_indices = @transform_3, window_bounds = array<i64: 1, 128>}, {pipeline_mode = #tpu.pipeline_mode<synchronous>, transform_indices = @transform_4, window_bounds = array<i64: 128, 256>}, {pipeline_mode = #tpu.pipeline_mode<synchronous>, transform_indices = @transform_5, window_bounds = array<i64: 1, 256>}, {pipeline_mode = #tpu.pipeline_mode<synchronous>, transform_indices = @transform_6, window_bounds = array<i64: 256, 312>}, {pipeline_mode = #tpu.pipeline_mode<synchronous>, transform_indices = @transform_7, window_bounds = array<i64: 312, 312>}, {pipeline_mode = #tpu.pipeline_mode<synchronous>, transform_indices = @transform_8, window_bounds = array<i64: 1, 312>}, {pipeline_mode = #tpu.pipeline_mode<synchronous>, transform_indices = @transform_9, window_bounds = array<i64: 312, 256>}, {pipeline_mode = #tpu.pipeline_mode<synchronous>, transform_indices = @transform_10, window_bounds = array<i64: 1, 256>}, {pipeline_mode = #tpu.pipeline_mode<synchronous>, transform_indices = @transform_11, window_bounds = array<i64: 256, 128>}, {pipeline_mode = #tpu.pipeline_mode<synchronous>, transform_indices = @transform_12, window_bounds = array<i64: 1, 128>}, {pipeline_mode = #tpu.pipeline_mode<synchronous>, transform_indices = @transform_13, window_bounds = array<i64: 1, 128>}, {pipeline_mode = #tpu.pipeline_mode<synchronous>, transform_indices = @transform_14, window_bounds = array<i64: 1, 1>}, {transform_indices = @transform_15, window_bounds = array<i64: 1, 1, 256>}]} {
    %c0 = arith.constant 0 : index
    %c0_0 = arith.constant 0 : index
    %c0_1 = arith.constant 0 : index
    %0 = vector.load %arg2[%c0, %c0_0, %c0_1] : memref<1x256x3xf32, #tpu.memory_space<vmem>>, vector<1x256x3xf32>
    %1 = vector.shape_cast %0 : vector<1x256x3xf32> to vector<256x3xf32>
    %c0_2 = arith.constant 0 : index
    %c0_3 = arith.constant 0 : index
    %2 = vector.load %arg5[%c0_2, %c0_3] : memref<1x128xf32, #tpu.memory_space<vmem>>, vector<1x128xf32>
    %3 = vector.extract_strided_slice %1 {offsets = [0, 0], sizes = [256, 1], strides = [1, 1]} : vector<256x3xf32> to vector<256x1xf32>
    %c0_4 = arith.constant 0 : index
    %c0_5 = arith.constant 0 : index
    %4 = vector.load %arg4[%c0_4, %c0_5] : memref<3x128xf32, #tpu.memory_space<vmem>>, vector<1x128xf32>
    %5 = vector.broadcast %3 : vector<256x1xf32> to vector<256x128xf32>
    %6 = vector.broadcast %4 : vector<1x128xf32> to vector<256x128xf32>
    %7 = arith.mulf %5, %6 : vector<256x128xf32>
    %8 = vector.broadcast %2 : vector<1x128xf32> to vector<256x128xf32>
    %9 = arith.addf %8, %7 : vector<256x128xf32>
    %10 = vector.extract_strided_slice %1 {offsets = [0, 1], sizes = [256, 1], strides = [1, 1]} : vector<256x3xf32> to vector<256x1xf32>
    %c1 = arith.constant 1 : index
    %c0_6 = arith.constant 0 : index
    %11 = vector.load %arg4[%c1, %c0_6] : memref<3x128xf32, #tpu.memory_space<vmem>>, vector<1x128xf32>
    %12 = vector.broadcast %10 : vector<256x1xf32> to vector<256x128xf32>
    %13 = vector.broadcast %11 : vector<1x128xf32> to vector<256x128xf32>
    %14 = arith.mulf %12, %13 : vector<256x128xf32>
    %15 = arith.addf %9, %14 : vector<256x128xf32>
    %16 = vector.extract_strided_slice %1 {offsets = [0, 2], sizes = [256, 1], strides = [1, 1]} : vector<256x3xf32> to vector<256x1xf32>
    %c2 = arith.constant 2 : index
    %c0_7 = arith.constant 0 : index
    %17 = vector.load %arg4[%c2, %c0_7] : memref<3x128xf32, #tpu.memory_space<vmem>>, vector<1x128xf32>
    %18 = vector.broadcast %16 : vector<256x1xf32> to vector<256x128xf32>
    %19 = vector.broadcast %17 : vector<1x128xf32> to vector<256x128xf32>
    %20 = arith.mulf %18, %19 : vector<256x128xf32>
    %21 = arith.addf %15, %20 : vector<256x128xf32>
    %cst = arith.constant 0.000000e+00 : f32
    %22 = vector.broadcast %cst : f32 to vector<256x128xf32>
    %23 = arith.maximumf %21, %22 : vector<256x128xf32>
    %24 = arith.truncf %23 : vector<256x128xf32> to vector<256x128xbf16>
    %c0_8 = arith.constant 0 : index
    %c0_9 = arith.constant 0 : index
    %25 = vector.load %arg6[%c0_8, %c0_9] : memref<128x256xbf16, #tpu.memory_space<vmem>>, vector<128x256xbf16>
    %cst_10 = arith.constant dense<0.000000e+00> : vector<256x256xf32>
    %26 = tpu.matmul %24, %25, %cst_10 {dimension_numbers = #tpu.dot_dimension_numbers<[1], [0], [0], [1], [0, 0, 1, 1], [], []>} : vector<256x128xbf16>, vector<128x256xbf16>, vector<256x256xf32> -> vector<256x256xf32>
    %c0_11 = arith.constant 0 : index
    %c0_12 = arith.constant 0 : index
    %27 = vector.load %arg7[%c0_11, %c0_12] : memref<1x256xf32, #tpu.memory_space<vmem>>, vector<1x256xf32>
    %28 = vector.broadcast %27 : vector<1x256xf32> to vector<256x256xf32>
    %29 = arith.addf %26, %28 : vector<256x256xf32>
    %cst_13 = arith.constant 0.000000e+00 : f32
    %30 = vector.broadcast %cst_13 : f32 to vector<256x256xf32>
    %31 = arith.maximumf %29, %30 : vector<256x256xf32>
    %32 = arith.truncf %31 : vector<256x256xf32> to vector<256x256xbf16>
    %c0_14 = arith.constant 0 : index
    %c0_15 = arith.constant 0 : index
    %33 = vector.load %arg8[%c0_14, %c0_15] : memref<256x312xbf16, #tpu.memory_space<vmem>>, vector<256x312xbf16>
    %cst_16 = arith.constant dense<0.000000e+00> : vector<256x312xf32>
    %34 = tpu.matmul %32, %33, %cst_16 {dimension_numbers = #tpu.dot_dimension_numbers<[1], [0], [0], [1], [0, 0, 1, 1], [], []>} : vector<256x256xbf16>, vector<256x312xbf16>, vector<256x312xf32> -> vector<256x312xf32>
    %c0_17 = arith.constant 0 : index
    %c0_18 = arith.constant 0 : index
    %c0_19 = arith.constant 0 : index
    %35 = vector.load %arg3[%c0_17, %c0_18, %c0_19] : memref<1x1x312xf32, #tpu.memory_space<vmem>>, vector<1x1x312xf32>
    %36 = vector.shape_cast %35 : vector<1x1x312xf32> to vector<1x312xf32>
    %37 = vector.broadcast %36 : vector<1x312xf32> to vector<256x312xf32>
    %38 = arith.addf %34, %37 : vector<256x312xf32>
    %cst_20 = arith.constant 0.000000e+00 : f32
    %39 = vector.broadcast %cst_20 : f32 to vector<256x312xf32>
    %40 = arith.maximumf %38, %39 : vector<256x312xf32>
    %41 = arith.truncf %40 : vector<256x312xf32> to vector<256x312xbf16>
    %c0_21 = arith.constant 0 : index
    %c0_22 = arith.constant 0 : index
    %42 = vector.load %arg9[%c0_21, %c0_22] : memref<312x312xbf16, #tpu.memory_space<vmem>>, vector<312x312xbf16>
    %cst_23 = arith.constant dense<0.000000e+00> : vector<256x312xf32>
    %43 = tpu.matmul %41, %42, %cst_23 {dimension_numbers = #tpu.dot_dimension_numbers<[1], [0], [0], [1], [0, 0, 1, 1], [], []>} : vector<256x312xbf16>, vector<312x312xbf16>, vector<256x312xf32> -> vector<256x312xf32>
    %c0_24 = arith.constant 0 : index
    %c0_25 = arith.constant 0 : index
    %44 = vector.load %arg10[%c0_24, %c0_25] : memref<1x312xf32, #tpu.memory_space<vmem>>, vector<1x312xf32>
    %45 = vector.broadcast %44 : vector<1x312xf32> to vector<256x312xf32>
    %46 = arith.addf %43, %45 : vector<256x312xf32>
    %cst_26 = arith.constant 0.000000e+00 : f32
    %47 = vector.broadcast %cst_26 : f32 to vector<256x312xf32>
    %48 = arith.maximumf %46, %47 : vector<256x312xf32>
    %49 = arith.truncf %48 : vector<256x312xf32> to vector<256x312xbf16>
    %c0_27 = arith.constant 0 : index
    %c0_28 = arith.constant 0 : index
    %50 = vector.load %arg11[%c0_27, %c0_28] : memref<312x256xbf16, #tpu.memory_space<vmem>>, vector<312x256xbf16>
    %cst_29 = arith.constant dense<0.000000e+00> : vector<256x256xf32>
    %51 = tpu.matmul %49, %50, %cst_29 {dimension_numbers = #tpu.dot_dimension_numbers<[1], [0], [0], [1], [0, 0, 1, 1], [], []>} : vector<256x312xbf16>, vector<312x256xbf16>, vector<256x256xf32> -> vector<256x256xf32>
    %c0_30 = arith.constant 0 : index
    %c0_31 = arith.constant 0 : index
    %52 = vector.load %arg12[%c0_30, %c0_31] : memref<1x256xf32, #tpu.memory_space<vmem>>, vector<1x256xf32>
    %53 = vector.broadcast %52 : vector<1x256xf32> to vector<256x256xf32>
    %54 = arith.addf %51, %53 : vector<256x256xf32>
    %cst_32 = arith.constant 0.000000e+00 : f32
    %55 = vector.broadcast %cst_32 : f32 to vector<256x256xf32>
    %56 = arith.maximumf %54, %55 : vector<256x256xf32>
    %57 = arith.truncf %56 : vector<256x256xf32> to vector<256x256xbf16>
    %c0_33 = arith.constant 0 : index
    %c0_34 = arith.constant 0 : index
    %58 = vector.load %arg13[%c0_33, %c0_34] : memref<256x128xbf16, #tpu.memory_space<vmem>>, vector<256x128xbf16>
    %cst_35 = arith.constant dense<0.000000e+00> : vector<256x128xf32>
    %59 = tpu.matmul %57, %58, %cst_35 {dimension_numbers = #tpu.dot_dimension_numbers<[1], [0], [0], [1], [0, 0, 1, 1], [], []>} : vector<256x256xbf16>, vector<256x128xbf16>, vector<256x128xf32> -> vector<256x128xf32>
    %c0_36 = arith.constant 0 : index
    %c0_37 = arith.constant 0 : index
    %60 = vector.load %arg14[%c0_36, %c0_37] : memref<1x128xf32, #tpu.memory_space<vmem>>, vector<1x128xf32>
    %61 = vector.broadcast %60 : vector<1x128xf32> to vector<256x128xf32>
    %62 = arith.addf %59, %61 : vector<256x128xf32>
    %cst_38 = arith.constant 0.000000e+00 : f32
    %63 = vector.broadcast %cst_38 : f32 to vector<256x128xf32>
    %64 = arith.maximumf %62, %63 : vector<256x128xf32>
    %65 = arith.truncf %64 : vector<256x128xf32> to vector<256x128xbf16>
    %66 = arith.extf %65 : vector<256x128xbf16> to vector<256x128xf32>
    %c0_39 = arith.constant 0 : index
    %c0_40 = arith.constant 0 : index
    %67 = vector.load %arg15[%c0_39, %c0_40] : memref<1x128xf32, #tpu.memory_space<vmem>>, vector<1x128xf32>
    %68 = vector.broadcast %67 : vector<1x128xf32> to vector<256x128xf32>
    %69 = arith.mulf %66, %68 : vector<256x128xf32>
    %cst_41 = arith.constant dense<0.000000e+00> : vector<256xf32>
    %70 = vector.multi_reduction <add>, %69, %cst_41 [1] : vector<256x128xf32> to vector<256xf32>
    %71 = vector.shape_cast %70 : vector<256xf32> to vector<1x256xf32>
    %c0_42 = arith.constant 0 : index
    %c0_43 = arith.constant 0 : index
    %72 = vector.load %arg16[%c0_42, %c0_43] : memref<1x1xf32, #tpu.memory_space<vmem>>, vector<1x1xf32>
    %73 = vector.broadcast %72 : vector<1x1xf32> to vector<1x256xf32>
    %74 = arith.addf %71, %73 : vector<1x256xf32>
    %c0_44 = arith.constant 0 : index
    %c0_45 = arith.constant 0 : index
    %c0_46 = arith.constant 0 : index
    %75 = vector.load %arg17[%c0_44, %c0_45, %c0_46] : memref<1x1x256xf32, #tpu.memory_space<vmem>>, vector<1x1x256xf32>
    %76 = vector.shape_cast %75 : vector<1x1x256xf32> to vector<1x256xf32>
    %77 = vector.shape_cast %74 : vector<1x256xf32> to vector<1x1x256xf32>
    tpu.vector_store %arg17[%c0_44, %c0_45, %c0_46], %77 {strides = array<i32>} : memref<1x1x256xf32, #tpu.memory_space<vmem>>, vector<1x1x256xf32>,
    return
  }
  func.func @transform_0(%arg0: i32, %arg1: i32) -> (i32, i32, i32) {
    %c0_i32 = arith.constant 0 : i32
    %c0_i32_0 = arith.constant 0 : i32
    return %arg0, %arg1, %c0_i32 : i32, i32, i32
  }
  func.func @transform_1(%arg0: i32, %arg1: i32) -> (i32, i32, i32) {
    %c0_i32 = arith.constant 0 : i32
    %c0_i32_0 = arith.constant 0 : i32
    %c0_i32_1 = arith.constant 0 : i32
    return %arg0, %c0_i32, %c0_i32_0 : i32, i32, i32
  }
  func.func @transform_2(%arg0: i32, %arg1: i32) -> (i32, i32) {
    %c0_i32 = arith.constant 0 : i32
    %c0_i32_0 = arith.constant 0 : i32
    %c0_i32_1 = arith.constant 0 : i32
    return %c0_i32, %c0_i32_0 : i32, i32
  }
  func.func @transform_3(%arg0: i32, %arg1: i32) -> (i32, i32) {
    %c0_i32 = arith.constant 0 : i32
    %c0_i32_0 = arith.constant 0 : i32
    %c0_i32_1 = arith.constant 0 : i32
    return %c0_i32, %c0_i32_0 : i32, i32
  }
  func.func @transform_4(%arg0: i32, %arg1: i32) -> (i32, i32) {
    %c0_i32 = arith.constant 0 : i32
    %c0_i32_0 = arith.constant 0 : i32
    %c0_i32_1 = arith.constant 0 : i32
    return %c0_i32, %c0_i32_0 : i32, i32
  }
  func.func @transform_5(%arg0: i32, %arg1: i32) -> (i32, i32) {
    %c0_i32 = arith.constant 0 : i32
    %c0_i32_0 = arith.constant 0 : i32
    %c0_i32_1 = arith.constant 0 : i32
    return %c0_i32, %c0_i32_0 : i32, i32
  }
  func.func @transform_6(%arg0: i32, %arg1: i32) -> (i32, i32) {
    %c0_i32 = arith.constant 0 : i32
    %c0_i32_0 = arith.constant 0 : i32
    %c0_i32_1 = arith.constant 0 : i32
    return %c0_i32, %c0_i32_0 : i32, i32
  }
  func.func @transform_7(%arg0: i32, %arg1: i32) -> (i32, i32) {
    %c0_i32 = arith.constant 0 : i32
    %c0_i32_0 = arith.constant 0 : i32
    %c0_i32_1 = arith.constant 0 : i32
    return %c0_i32, %c0_i32_0 : i32, i32
  }
  func.func @transform_8(%arg0: i32, %arg1: i32) -> (i32, i32) {
    %c0_i32 = arith.constant 0 : i32
    %c0_i32_0 = arith.constant 0 : i32
    %c0_i32_1 = arith.constant 0 : i32
    return %c0_i32, %c0_i32_0 : i32, i32
  }
  func.func @transform_9(%arg0: i32, %arg1: i32) -> (i32, i32) {
    %c0_i32 = arith.constant 0 : i32
    %c0_i32_0 = arith.constant 0 : i32
    %c0_i32_1 = arith.constant 0 : i32
    return %c0_i32, %c0_i32_0 : i32, i32
  }
  func.func @transform_10(%arg0: i32, %arg1: i32) -> (i32, i32) {
    %c0_i32 = arith.constant 0 : i32
    %c0_i32_0 = arith.constant 0 : i32
    %c0_i32_1 = arith.constant 0 : i32
    return %c0_i32, %c0_i32_0 : i32, i32
  }
  func.func @transform_11(%arg0: i32, %arg1: i32) -> (i32, i32) {
    %c0_i32 = arith.constant 0 : i32
    %c0_i32_0 = arith.constant 0 : i32
    %c0_i32_1 = arith.constant 0 : i32
    return %c0_i32, %c0_i32_0 : i32, i32
  }
  func.func @transform_12(%arg0: i32, %arg1: i32) -> (i32, i32) {
    %c0_i32 = arith.constant 0 : i32
    %c0_i32_0 = arith.constant 0 : i32
    %c0_i32_1 = arith.constant 0 : i32
    return %c0_i32, %c0_i32_0 : i32, i32
  }
  func.func @transform_13(%arg0: i32, %arg1: i32) -> (i32, i32) {
    %c0_i32 = arith.constant 0 : i32
    %c0_i32_0 = arith.constant 0 : i32
    %c0_i32_1 = arith.constant 0 : i32
    return %c0_i32, %c0_i32_0 : i32, i32
  }
  func.func @transform_14(%arg0: i32, %arg1: i32) -> (i32, i32) {
    %c0_i32 = arith.constant 0 : i32
    %c0_i32_0 = arith.constant 0 : i32
    %c0_i32_1 = arith.constant 0 : i32
    return %c0_i32, %c0_i32_0 : i32, i32
  }
  func.func @transform_15(%arg0: i32, %arg1: i32) -> (i32, i32, i32) {
    %c0_i32 = arith.constant 0 : i32
    %c0_i32_0 = arith.constant 0 : i32
    return %arg0, %c0_i32, %arg1 : i32, i32, i32
  }
}

</mosaic_0001>

<bundles_post_ra>
// kernel: tpu_custom_call.1
= control target key start
LH: loop header
LB: loop body
LE: loop exit
PB: predicated region body
PF: predicated region fallthrough
CT: control target
= control target key end

     0   :  { %s12665_s0 = inlined_call_operand.vmem [shape: f32[2,256,3], index: 0, kind: input, shape index: {}]   ;;  %s12666_s1 = inlined_call_operand.vmem [shape: f32[2,1,312], index: 1, kind: input, shape index: {}]   ;;  %s12667_s2 = inlined_call_operand.vmem [shape: f32[3,128], index: 2, kind: input, shape index: {}]   ;;  %s12668_s3 = inlined_call_operand.vmem [shape: f32[1,128], index: 3, kind: input, shape index: {}]   ;;  %s12669_s4 = inlined_call_operand.vmem [shape: bf16[128,256], index: 4, kind: input, shape index: {}]   ;;  %s12670_s5 = inlined_call_operand.vmem [shape: f32[1,256], index: 5, kind: input, shape index: {}]   ;;  %s12671_s6 = inlined_call_operand.vmem [shape: bf16[256,312], index: 6, kind: input, shape index: {}]   ;;  %s12672_s7 = inlined_call_operand.vmem [shape: bf16[312,312], index: 7, kind: input, shape index: {}]   ;;  %s12673_s8 = inlined_call_operand.vmem [shape: f32[1,312], index: 8, kind: input, shape index: {}]   ;;  %s12674_s9 = inlined_call_operand.vmem [shape: bf16[312,256], index: 9, kind: input, shape index: {}]   ;;  %s12675_s10 = inlined_call_operand.vmem [shape: f32[1,256], index: 10, kind: input, shape index: {}]   ;;  %s12676_s11 = inlined_call_operand.vmem [shape: bf16[256,128], index: 11, kind: input, shape index: {}]   ;;  %s12677_s12 = inlined_call_operand.vmem [shape: f32[1,128], index: 12, kind: input, shape index: {}]   ;;  %s12678_s13 = inlined_call_operand.vmem [shape: f32[1,128], index: 13, kind: input, shape index: {}]   ;;  %s12679_s14 = inlined_call_operand.<no memory space> [shape: f32[1,1], index: 14, kind: input, shape index: {}]   ;;  %s12680_s15 = inlined_call_operand.hbm [shape: f32[2,1,256], index: 15, kind: output, shape index: {}]  }
   0x1   :  { %12702 = sst [smem:[#allocation44_spill]] %s12665_s0  ;;  %v20_v0 = vstv %s12679_s14 }
   0x2   :  { %12703 = sst [smem:[#allocation45_spill]] %s12666_s1  ;;  %21 = vst [vmem:[#allocation2] sm:$0x1] %v20_v0 }
   0x3   :  { %12704 = sst [smem:[#allocation46_spill]] %s12667_s2 }
   0x4   :  { %22 = vsyncpa [#allocation4], 0 }
   0x5   :  { %24 = vsyncpa [#allocation4 + $0x1], 0  ;;  %s9355_s20 = smov 0   ;;  %s9357_s21 = smov 0  }
   0x6   :  { %s9359_s22 = smov 0   ;;  %s9361_s23 = smov 0  }
   0x7   :  { %s9363_s24 = smov 0   ;;  %s9365_s25 = smov 0  }
   0x8 LB: > { %12705 = sst [smem:[#allocation6_spill]] %s9261_s24  ;;  %s8143_s14 = sadd.s32 4294967295, %s9265_s25   ;;  %s9265_s25 = sphi %s9365_s25, %s30_s25   ;;  %s9261_s24 = sphi %s9363_s24, %s12805_s24   ;;  %s9257_s23 = sphi %s9361_s23, %s12804_s23   ;;  %s9253_s22 = sphi %s9359_s22, %s12808_s22   ;;  %s9249_s21 = sphi %s9357_s21, %s12807_s21   ;;  %s9245_s20 = sphi %s9355_s20, %s12806_s20  }
   0x9   : > { %s8144_s26 = sadd.s32 4294967294, %s9265_s25   ;;  %s42_s27 = sadd.s32 1, %s9261_s24 }
   0xa   : > { %s378_s28 = sadd.s32 1, %s9253_s22  ;;  %p44_p0 = scmp.ge.s32.totalorder %s42_s27, 2 }
   0xb   : > { %p388_p1 = scmp.ne.s32.totalorder %s9253_s22, %s9249_s21  ;;  %p389_p2 = scmp.eq.s32.totalorder %s8143_s14, 1 }
   0xc   : > { %p394_p3 = scmp.ne.s32.totalorder %s9249_s21, %s9245_s20  ;;  %s12810_s27 = smov (%p44_p0, %s42_s27), 0 }
   0xd   : > { %12706 = sst [smem:[#allocation7_spill]] %s12810_s27  ;;  %p9395_p4 = por %p389_p2, %p388_p1 }
   0xe   : > { %p395_p5 = scmp.eq.s32.totalorder %s8144_s26, 1  ;;  %s373_s30 = ssub.s32 %s9261_s24, %s12810_s27 }
   0xf   : > { %p8147_p6 = scmp.ge.s32.totalorder %s9265_s25, 1  ;;  %p376_p7 = scmp.eq.s32.totalorder %s373_s30, 0 }
  0x10   : > { %p9402_p8 = por %p395_p5, %p394_p3  ;;  %p472_p9 = scmp.lt.s32.totalorder %s9265_s25, 3 }
  0x11   : > { %s9408_s17 = scalar_select %p376_p7, %s9253_s22, %s378_s28  }
  0x12   : > { %p473_p10 = pnand %p8147_p6, %p472_p9 }
  0x13   : > { %12709 = sst [smem:[#allocation8_spill]] %s9408_s17 }
  0x14   : > { %476 = sbr.rel (%p473_p10) target bundleno = 2073 (0x819), region = 80 }
  0x19   : > { %p529_p11 = scmp.lt.s32.totalorder %s9257_s23, 1  ;;  %v9267_v1 = vmov 2   ;;  %v9268_v2 = vmov 1   ;;  %v8943_v3 = vld [vmem:[%s12669_s4 + $0x74] ss:$8 sps:$4 sm:$0xff]   ;;  %v12685_v6 = vmov 0  }
  0x1a   : > { %8884 = vset.pattern.permute.xlu0 %v9267_v1  ;;  %8883 = vset.pattern.permute.xlu1 %v9268_v2  ;;  %v8945_v4 = vld [vmem:[%s12669_s4 + $0x70] ss:$8 sps:$4 sm:$0xff]   ;;  %v8946_v5 = vld [vmem:[%s12669_s4 + $0x64] ss:$8 sps:$4 sm:$0xff]   ;;  %v8948_v7 = vld [vmem:[%s12669_s4 + $0x60] ss:$8 sps:$4 sm:$0xff]  }
  0x1b   : > { %s9420_s28 = scalar_select %p529_p11, %s9257_s23, 1  ;;  %1394 = vmatprep.mubr.bf16.mxu0 %v12685_v6  ;;  %1362 = vmatprep.subr.bf16.mxu0 %v8943_v3  ;;  %v8949_v8 = vld [vmem:[%s12669_s4 + $0x54] ss:$8 sps:$4 sm:$0xff]   ;;  %v8951_v11 = vld [vmem:[%s12669_s4 + $0x50] ss:$8 sps:$4 sm:$0xff]   ;;  %vm2942_vm0 = vcmask 1043456  }
  0x1c   : > { %1363 = vmatpush1.bf16.msra.mxu0 %v8945_v4  ;;  %s12710_s0 = sld [smem:[#allocation44_spill]]  ;;  %v8952_v12 = vld [vmem:[%s12669_s4 + $0x44] ss:$8 sps:$4 sm:$0xff]   ;;  %v8954_v13 = vld [vmem:[%s12669_s4 + $0x40] ss:$8 sps:$4 sm:$0xff]   ;;  %vm2893_vm1 = vcmask 457728  }
  0x1d   : > { %s8392_s24 = sshll.u32 %s9420_s28, 8  ;;  %1364 = vmatprep.subr.bf16.mxu0 %v8946_v5  ;;  %v8955_v14 = vld [vmem:[%s12669_s4 + $0x34] ss:$8 sps:$4 sm:$0xff]   ;;  %v8957_v17 = vld [vmem:[%s12669_s4 + $0x30] ss:$8 sps:$4 sm:$0xff]   ;;  %s12711_s2 = sld [smem:[#allocation46_spill]] }
  0x1e   : > { %v8958_v18 = vld [vmem:[%s12669_s4 + $0x24] ss:$8 sps:$4 sm:$0xff]   ;;  %v8960_v20 = vld [vmem:[%s12669_s4 + $0x20] ss:$8 sps:$4 sm:$0xff]   ;;  %v8961_v21 = vld [vmem:[%s12669_s4 + $0x14] ss:$8 sps:$4 sm:$0xff]  }
  0x1f   : > { %v8963_v23 = vld [vmem:[%s12669_s4 + $0x10] ss:$8 sps:$4 sm:$0xff]   ;;  %v8964_v24 = vld [vmem:[%s12669_s4 + $0x4] ss:$8 sps:$4 sm:$0xff]   ;;  %v8966_v25 = vld [vmem:[%s12669_s4] ss:$8 sps:$4 sm:$0xff]  }
  0x20   : > { %1365 = vmatpush1.bf16.msra.mxu0 %v8948_v7  ;;  %v9582_v53 = vld [vmem:[%s12668_s3] ss:$0 sm:$0xff]  ;;  %s8823_s14 = smul.u32 3, %s9420_s28  ;;  %s12715_s1 = sld [smem:[#allocation45_spill]]  ;;  %vm7838_vm2 = vcmask 130112   ;;  %vm7845_vm3 = vcmask 195712  }
  0x21   : > { %1366 = vmatprep.subr.bf16.mxu0 %v8949_v8  ;;  %vm7852_vm4 = vcmask 261312   ;;  %vm7859_vm5 = vcmask 326912   ;;  %vm7866_vm6 = vcmask 392512   ;;  %vm7873_vm7 = vcmask 458112   ;;  %s525_s19 = sand.u32 1, %s9249_s21  }
  0x22   : > { %s9433_s26 = scalar_lea.vmem %s12710_s0, %s8392_s24  ;;  %vm7880_vm8 = vcmask 523712   ;;  %vm7887_vm9 = vcmask 589312   ;;  %vm7894_vm10 = vcmask 654912   ;;  %vm7901_vm11 = vcmask 720512   ;;  %s8148_s0 = sshll.u32 %s525_s19, 1 }
  0x23   : > { %v544_v9 = vld [vmem:[%s9433_s26] sm:$0xff]  ;;  %v545_v10 = vld [vmem:[%s9433_s26 + $0x8] sm:$0xff]  ;;  %v547_v15 = vld [vmem:[%s9433_s26 + $0x18] sm:$0xff]  ;;  %vm7908_vm12 = vcmask 786112   ;;  %vm7915_vm13 = vcmask 851712   ;;  %vm7922_vm14 = vcmask 917312  }
  0x24   : > { %1011 = vperm.xlu0 %8884, %v544_v9   ;;  %814 = vperm.xlu1 %8883, %v544_v9   ;;  %v546_v16 = vld [vmem:[%s9433_s26 + $0x10] sm:$0xff]  ;;  %v549_v19 = vld [vmem:[%s9433_s26 + $0x28] sm:$0xff]  ;;  %v551_v22 = vld [vmem:[%s9433_s26 + $0x38] sm:$0xff]  ;;  %vm7929_vm15 = vcmask 982912   ;;  %s8039_s18 = scalar_lea.sflag [#allocation4], %s525_s19 }
  0x25   : > { %1367 = vmatpush1.bf16.msra.mxu0 %v8951_v11  ;;  %v548_v26 = vld [vmem:[%s9433_s26 + $0x20] sm:$0xff]  ;;  %v550_v27 = vld [vmem:[%s9433_s26 + $0x30] sm:$0xff]  ;;  %v553_v29 = vld [vmem:[%s9433_s26 + $0x48] sm:$0xff] }
  0x26   : > { %1368 = vmatprep.subr.bf16.mxu0 %v8952_v12  ;;  %v552_v28 = vld [vmem:[%s9433_s26 + $0x40] sm:$0xff]  ;;  %v555_v30 = vld [vmem:[%s9433_s26 + $0x58] sm:$0xff]  ;;  %v554_v31 = vld [vmem:[%s9433_s26 + $0x50] sm:$0xff]  ;;  %s541_s30 = scalar_lea.vmem %s12715_s1, %s8823_s14  ;;  %s8393_s14 = sshll.u32 %s9257_s23, 5 }
  0x27   : > { %v557_v32 = vld [vmem:[%s9433_s26 + $0x68] sm:$0xff]  ;;  %v9499_v33 = vld [vmem:[%s9433_s26 + $0x78] sm:$0xff]  ;;  %v556_v34 = vld [vmem:[%s9433_s26 + $0x60] sm:$0xff]  ;;  %s8053_s17 = scalar_lea.hbm %s12680_s15, %s8393_s14  ;;  %s9271_s23 = smov [#allocation3]  }
  0x28   : > { %8885 = vset.pattern.permute.xlu0 %v12685_v6  ;;  %818 = vperm.xlu1 %8883, %v545_v10   ;;  %v9506_v35 = vld [vmem:[%s9433_s26 + $0x70] sm:$0xff]  ;;  %v9509_v36 = vld [vmem:[%s9433_s26 + $0x80] sm:$0xff]  ;;  %v9524_v39 = vld [vmem:[%s9433_s26 + $0x88] sm:$0xff] }
  0x29   : > { %580 = vperm.xlu0 %8885, %v544_v9   ;;  %1369 = vmatpush1.bf16.msra.mxu0 %v8954_v13  ;;  %v9516_v37 = vld [vmem:[%s9433_s26 + $0x90] sm:$0xff]  ;;  %v9519_v38 = vld [vmem:[%s9433_s26 + $0xa0] sm:$0xff]  ;;  %v9530_v40 = vld [vmem:[%s9433_s26 + $0x98] sm:$0xff] }
  0x2a   : > { %1370 = vmatprep.subr.bf16.mxu0 %v8955_v14  ;;  %v9535_v41 = vld [vmem:[%s9433_s26 + $0xa8] sm:$0xff]  ;;  %v9540_v42 = vld [vmem:[%s9433_s26 + $0xb8] sm:$0xff]  ;;  %v9554_v45 = vld [vmem:[%s9433_s26 + $0xb0] sm:$0xff] }
  0x2b   : > { %v9544_v43 = vld [vmem:[%s9433_s26 + $0xc8] sm:$0xff]  ;;  %v9549_v44 = vld [vmem:[%s9433_s26 + $0xd8] sm:$0xff]  ;;  %v9560_v46 = vld [vmem:[%s9433_s26 + $0xc0] sm:$0xff] }
  0x2c   : > { %8886 = vset.pattern.permute.xlu1 %v9267_v1  ;;  %v9564_v47 = vld [vmem:[%s9433_s26 + $0xd0] sm:$0xff]  ;;  %v9571_v50 = vld [vmem:[%s12711_s2] ss:$0 sm:$0xff]  ;;  %v9577_v52 = vld [vmem:[%s12711_s2 + $0x1] ss:$0 sm:$0xff] }
  0x2d   : > { %585 = vperm.xlu0 %8885, %v545_v10   ;;  %1015 = vperm.xlu1 %8886, %v545_v10   ;;  %v9589_v56 = vld [vmem:[%s12711_s2 + $0x2] ss:$0 sm:$0xff]  ;;  %v9607_v12 = vld [vmem:[%s9433_s26 + $0xe8] sm:$0xff] }
  0x2e   : > { %1371 = vmatpush1.bf16.msra.mxu0 %v8957_v17  ;;  %v9595_v61 = vld [vmem:[%s9433_s26 + $0xe0] sm:$0xff] }
  0x2f   : > { %1372 = vmatprep.subr.bf16.mxu0 %v8958_v18 }
  0x31   : > { %595 = vperm.xlu0 %8885, %v547_v15   ;;  %8887 = vset.pattern.permute.xlu1 %v12685_v6 }
  0x32   : > { %590 = vperm.xlu1 %8887, %v546_v16   ;;  %1373 = vmatpush1.bf16.msra.mxu0 %v8960_v20 }
  0x33   : > { %1374 = vmatprep.subr.bf16.mxu0 %v8961_v21 }
  0x35   : > { %605 = vperm.xlu0 %8885, %v549_v19  }
  0x36   : > { %8888 = vset.pattern.permute.xlu1 %v9268_v2  ;;  %1375 = vmatpush1.bf16.msra.mxu0 %v8963_v23 }
  0x37   : > { %822 = vperm.xlu1 %8888, %v546_v16   ;;  %1376 = vmatprep.subr.bf16.mxu0 %v8964_v24 }
  0x39   : > { %615 = vperm.xlu0 %8885, %v551_v22  }
  0x3a   : > { %1377 = vmatpush1.bf16.msra.mxu0 %v8966_v25 }
  0x3b   : > { %826 = vperm.xlu1 %8888, %v547_v15  }
  0x3d   : > { %8894 = vset.pattern.permute.xlu0 %v9267_v1 }
  0x3e   : > { %1019 = vperm.xlu0 %8894, %v546_v16  }
  0x3f   : > { %8889 = vset.pattern.permute.xlu1 %v9267_v1 }
  0x40   : > { %1023 = vperm.xlu1 %8889, %v547_v15  }
  0x42   : > { %1027 = vperm.xlu0 %8894, %v548_v26  }
  0x44   : > { %8890 = vset.pattern.permute.xlu1 %v12685_v6 }
  0x45   : > { %600 = vperm.xlu1 %8890, %v548_v26  }
  0x46   : > { %1035 = vperm.xlu0 %8894, %v550_v27  }
  0x49   : > { %8891 = vset.pattern.permute.xlu1 %v9268_v2 }
  0x4a   : > { %830 = vperm.xlu1 %8891, %v548_v26   ;;  %1043 = vperm.xlu0 %8894, %v552_v28  }
  0x4e   : > { %834 = vperm.xlu1 %8891, %v549_v19   ;;  %8899 = vset.pattern.permute.xlu0 %v12685_v6 }
  0x4f   : > { %625 = vperm.xlu0 %8899, %v553_v29  }
  0x52   : > { %8892 = vset.pattern.permute.xlu1 %v9267_v1 }
  0x53   : > { %1031 = vperm.xlu1 %8892, %v549_v19   ;;  %635 = vperm.xlu0 %8899, %v555_v30  }
  0x57   : > { %8893 = vset.pattern.permute.xlu1 %v12685_v6  ;;  %8903 = vset.pattern.permute.xlu0 %v9267_v1 }
  0x58   : > { %610 = vperm.xlu1 %8893, %v550_v27   ;;  %1051 = vperm.xlu0 %8903, %v554_v31  }
  0x5c   : > { %8895 = vset.pattern.permute.xlu1 %v9268_v2  ;;  %8906 = vset.pattern.permute.xlu0 %v12685_v6 }
  0x5d   : > { %838 = vperm.xlu1 %8895, %v550_v27   ;;  %645 = vperm.xlu0 %8906, %v557_v32  }
  0x61   : > { %842 = vperm.xlu1 %8895, %v551_v22   ;;  %655 = vperm.xlu0 %8906, %v9499_v33  }
  0x65   : > { %8896 = vset.pattern.permute.xlu1 %v9267_v1  ;;  %8910 = vset.pattern.permute.xlu0 %v9267_v1 }
  0x66   : > { %1039 = vperm.xlu1 %8896, %v551_v22   ;;  %1059 = vperm.xlu0 %8910, %v556_v34  }
  0x6a   : > { %8897 = vset.pattern.permute.xlu1 %v12685_v6  ;;  %1067 = vperm.xlu0 %8910, %v9506_v35  }
  0x6b   : > { %620 = vperm.xlu1 %8897, %v552_v28  }
  0x6e   : > { %1075 = vperm.xlu0 %8910, %v9509_v36  }
  0x6f   : > { %8898 = vset.pattern.permute.xlu1 %v9268_v2 }
  0x70   : > { %846 = vperm.xlu1 %8898, %v552_v28  }
  0x72   : > { %1083 = vperm.xlu0 %8910, %v9516_v37  }
  0x74   : > { %850 = vperm.xlu1 %8898, %v553_v29  }
  0x76   : > { %1091 = vperm.xlu0 %8910, %v9519_v38  }
  0x78   : > { %8900 = vset.pattern.permute.xlu1 %v9267_v1 }
  0x79   : > { %1047 = vperm.xlu1 %8900, %v553_v29  }
  0x7a   : > { %8921 = vset.pattern.permute.xlu0 %v12685_v6 }
  0x7b   : > { %665 = vperm.xlu0 %8921, %v9524_v39  }
  0x7d   : > { %8901 = vset.pattern.permute.xlu1 %v12685_v6 }
  0x7e   : > { %630 = vperm.xlu1 %8901, %v554_v31  }
  0x7f   : > { %675 = vperm.xlu0 %8921, %v9530_v40  }
  0x82   : > { %8902 = vset.pattern.permute.xlu1 %v9268_v2 }
  0x83   : > { %854 = vperm.xlu1 %8902, %v554_v31   ;;  %685 = vperm.xlu0 %8921, %v9535_v41  }
  0x87   : > { %858 = vperm.xlu1 %8902, %v555_v30   ;;  %695 = vperm.xlu0 %8921, %v9540_v42  }
  0x8b   : > { %8904 = vset.pattern.permute.xlu1 %v9267_v1  ;;  %705 = vperm.xlu0 %8921, %v9544_v43  }
  0x8c   : > { %1055 = vperm.xlu1 %8904, %v555_v30  }
  0x8f   : > { %715 = vperm.xlu0 %8921, %v9549_v44  }
  0x90   : > { %8905 = vset.pattern.permute.xlu1 %v12685_v6 }
  0x91   : > { %640 = vperm.xlu1 %8905, %v556_v34  }
  0x93   : > { %8930 = vset.pattern.permute.xlu0 %v9267_v1 }
  0x94   : > { %1099 = vperm.xlu0 %8930, %v9554_v45  }
  0x95   : > { %8907 = vset.pattern.permute.xlu1 %v9268_v2 }
  0x96   : > { %862 = vperm.xlu1 %8907, %v556_v34  }
  0x98   : > { %1107 = vperm.xlu0 %8930, %v9560_v46  }
  0x9a   : > { %866 = vperm.xlu1 %8907, %v557_v32  }
  0x9c   : > { %1115 = vperm.xlu0 %8930, %v9564_v47  }
  0x9e   : > { %8908 = vset.pattern.permute.xlu1 %v9267_v1 }
  0x9f   : > { %1063 = vperm.xlu1 %8908, %v557_v32   ;;  %v815_v48 = vpop.permute.xlu1 %814  ;;  %v1012_v49 = vpop.permute.xlu0 %1011 }
  0xa0   : > { %v945_v57 = vmul.f32 %v9577_v52, %v815_v48  ;;  %v1142_v62 = vmul.f32 %v9589_v56, %v1012_v49  ;;  %1123 = vperm.xlu0 %8930, %v9595_v61  }
  0xa3   : > { %8909 = vset.pattern.permute.xlu1 %v12685_v6  ;;  %v819_v51 = vpop.permute.xlu1 %818 }
  0xa4   : > { %v581_v54 = vpop.permute.xlu0 %580  ;;  %650 = vperm.xlu1 %8909, %v9506_v35   ;;  %v946_v3 = vmul.f32 %v9577_v52, %v819_v51  ;;  %8935 = vset.pattern.permute.xlu0 %v12685_v6 }
  0xa5   : > { %v742_v55 = vmul.f32 %v9571_v50, %v581_v54  ;;  %725 = vperm.xlu0 %8935, %v9607_v12   ;;  %v9633_v54 = vld [vmem:[%s9433_s26 + $0xf0] sm:$0xff] }
  0xa7   : > { %v780_v58 = vadd.f32 %v9582_v53, %v742_v55 }
  0xa8   : > { %v586_v59 = vpop.permute.xlu0 %585  ;;  %8911 = vset.pattern.permute.xlu1 %v9268_v2  ;;  %v1016_v60 = vpop.permute.xlu1 %1015 }
  0xa9   : > { %v977_v63 = vadd.f32 %v945_v57, %v780_v58  ;;  %v743_v0 = vmul.f32 %v9571_v50, %v586_v59  ;;  %870 = vperm.xlu1 %8911, %v9506_v35   ;;  %v1143_v8 = vmul.f32 %v9589_v56, %v1016_v60 }
  0xab   : > { %v781_v4 = vadd.f32 %v9582_v53, %v743_v0  ;;  %v1174_v10 = vadd.f32 %v1142_v62, %v977_v63 }
  0xac   : > { %v596_v5 = vpop.permute.xlu0 %595 }
  0xad   : > { %v978_v7 = vadd.f32 %v946_v3, %v781_v4  ;;  %874 = vperm.xlu1 %8911, %v9499_v33   ;;  %v591_v9 = vpop.permute.xlu1 %590  ;;  %v1206_v15 = vmax.f32 %v1174_v10, 0.0  ;;  %v745_v18 = vmul.f32 %v9571_v50, %v596_v5 }
  0xae   : > { %v744_v19 = vmul.f32 %v9571_v50, %v591_v9 }
  0xaf   : > { %v1175_v11 = vadd.f32 %v1143_v8, %v978_v7  ;;  %v783_v23 = vadd.f32 %v9582_v53, %v745_v18 }
  0xb0   : > { %v606_v13 = vpop.permute.xlu0 %605  ;;  %v782_v24 = vadd.f32 %v9582_v53, %v744_v19 }
  0xb1   : > { %v1207_v14 = vmax.f32 %v1175_v11, 0.0  ;;  %8912 = vset.pattern.permute.xlu1 %v9267_v1  ;;  %v747_v57 = vmul.f32 %v9571_v50, %v606_v13 }
  0xb2   : > { %1071 = vperm.xlu1 %8912, %v9499_v33   ;;  %v823_v16 = vpop.permute.xlu1 %822  ;;  %v9628_v33 = vld [vmem:[%s9433_s26 + $0xf8] sm:$0xff]  ;;  %s527_s26 = scalar_lea.vmem [#allocation3], %s8148_s0  ;;  %s9193_s0 = sshll.u32 %s9271_s23, 4  ;;  %s9194_s0 = int_to_ptr.vmem [resolvable:$false] %s9193_s0 }
  0xb3   : > { %v1238_v17 = vpack.c.bf16 %v1207_v14, %v1206_v15  ;;  %v947_v21 = vmul.f32 %v9577_v52, %v823_v16  ;;  %735 = vperm.xlu0 %8935, %v9628_v33   ;;  %v785_v63 = vadd.f32 %v9582_v53, %v747_v57  ;;  %s8055_s27 = sshll.u32 %s527_s26, 4  ;;  %s9195_s1 = scalar_lea.vmem %s9194_s0, 64  ;;  %s8056_s27 = int_to_ptr.vmem [resolvable:$true] %s8055_s27 }
  0xb4   : > { %v9614_v20 = vpop.permute.xlu0 %615  ;;  %s9189_s24 = scalar_lea.vmem %s8056_s27, 32  ;;  %p9196_p1 = scmp.lt.s32.totalorder %s8056_s27, %s9194_s0 }
  0xb5   : > { %1395 = vmatmul.mubr.bf16.vlgmr.msra.gmra.mxu0 %v1238_v17  ;;  %v979_v27 = vadd.f32 %v947_v21, %v782_v24  ;;  %p9190_p12 = scmp.ne.s32.totalorder %s8056_s27, %s9189_s24  ;;  %p9197_p2 = scmp.lt.s32.totalorder %s9195_s1, %s9189_s24 }
  0xb6   : > { %8913 = vset.pattern.permute.xlu1 %v12685_v6  ;;  %v827_v22 = vpop.permute.xlu1 %826  ;;  %1404 = vmatprep.mubr.bf16.mxu0 %v12685_v6 }
  0xb7   : > { %660 = vperm.xlu1 %8913, %v9509_v36   ;;  %v948_v25 = vmul.f32 %v9577_v52, %v827_v22  ;;  %8939 = vset.pattern.permute.xlu0 %v9267_v1  ;;  %p9191_p13 = pnand %p9190_p12, %p9395_p4  ;;  %p9198_p3 = por %p9197_p2, %p9196_p1 }
  0xb8   : > { %1131 = vperm.xlu0 %8939, %v9633_v54  }
  0xb9   : > { %v1020_v26 = vpop.permute.xlu0 %1019  ;;  %v980_v30 = vadd.f32 %v948_v25, %v783_v23  ;;  %p9192_p0 = pneg %p9191_p13 }
  0xba   : > { %v1144_v28 = vmul.f32 %v9589_v56, %v1020_v26 }
  0xbb   : > { %8914 = vset.pattern.permute.xlu1 %v9268_v2  ;;  %v1024_v29 = vpop.permute.xlu1 %1023  ;;  %p9199_p5 = pnand %p9198_p3, %p9192_p0 }
  0xbc   : > { %v1176_v31 = vadd.f32 %v1144_v28, %v979_v27  ;;  %v1145_v32 = vmul.f32 %v9589_v56, %v1024_v29  ;;  %878 = vperm.xlu1 %8914, %v9509_v36   ;;  %8941 = vset.pattern.permute.xlu0 %v12685_v6 }
  0xbd   : > { %v1028_v59 = vpop.permute.xlu0 %1027 }
  0xbe   : > { %v1177_v34 = vadd.f32 %v1145_v32, %v980_v30  ;;  %v1208_v35 = vmax.f32 %v1176_v31, 0.0  ;;  %v1146_v0 = vmul.f32 %v9589_v56, %v1028_v59 }
  0xc0   : > { %v1209_v48 = vmax.f32 %v1177_v34, 0.0  ;;  %882 = vperm.xlu1 %8914, %v9524_v39   ;;  %v601_v49 = vpop.permute.xlu1 %600 }
  0xc1   : > { %v746_v36 = vmul.f32 %v9571_v50, %v601_v49  ;;  %v1036_v18 = vpop.permute.xlu0 %1035 }
  0xc2   : > { %v1239_v51 = vpack.c.bf16 %v1209_v48, %v1208_v35 }
  0xc3   : > { %v784_v60 = vadd.f32 %v9582_v53, %v746_v36 }
  0xc4   : > { %8915 = vset.pattern.permute.xlu1 %v9267_v1  ;;  %1405 = vmatmul.mubr.bf16.gmra.mxu0 %v1239_v51 }
  0xc5   : > { %1079 = vperm.xlu1 %8915, %v9524_v39   ;;  %v831_v55 = vpop.permute.xlu1 %830  ;;  %1414 = vmatprep.mubr.bf16.mxu0 %v12685_v6  ;;  %v1044_v29 = vpop.permute.xlu0 %1043 }
  0xc6   : > { %v949_v58 = vmul.f32 %v9577_v52, %v831_v55  ;;  %v1150_v57 = vmul.f32 %v9589_v56, %v1044_v29 }
  0xc8   : > { %v981_v39 = vadd.f32 %v949_v58, %v784_v60 }
  0xc9   : > { %8916 = vset.pattern.permute.xlu1 %v12685_v6  ;;  %v835_v62 = vpop.permute.xlu1 %834 }
  0xca   : > { %670 = vperm.xlu1 %8916, %v9516_v37   ;;  %v950_v3 = vmul.f32 %v9577_v52, %v835_v62  ;;  %v1178_v5 = vadd.f32 %v1146_v0, %v981_v39  ;;  %v626_v35 = vpop.permute.xlu0 %625 }
  0xcb   : > { %v751_v51 = vmul.f32 %v9571_v50, %v626_v35 }
  0xcc   : > { %v982_v7 = vadd.f32 %v950_v3, %v785_v63  ;;  %v1210_v10 = vmax.f32 %v1178_v5, 0.0  ;;  %v8967_v3 = vld [vmem:[%s12671_s6 + $0xa8] ss:$12 sps:$4 sm:$0xff]  }
  0xcd   : > { %v789_v59 = vadd.f32 %v9582_v53, %v751_v51 }
  0xce   : > { %8917 = vset.pattern.permute.xlu1 %v9268_v2  ;;  %v1032_v4 = vpop.permute.xlu1 %1031 }
  0xcf   : > { %v1147_v8 = vmul.f32 %v9589_v56, %v1032_v4  ;;  %886 = vperm.xlu1 %8917, %v9516_v37   ;;  %v749_v37 = vmul.f32 %v9571_v50, %v9614_v20  ;;  %v8969_v4 = vld [vmem:[%s12671_s6 + $0xac] ss:$12 sps:$4 sm:$0xff]  }
  0xd0   : > { %1988 = vmatprep.subr.bf16.mxu0 %v8969_v4  ;;  %8790 = vmatprep.subr.bf16.mxu1 %v8969_v4 }
  0xd1   : > { %v1179_v9 = vadd.f32 %v1147_v8, %v982_v7  ;;  %v787_v22 = vadd.f32 %v9582_v53, %v749_v37  ;;  %1989 = vmatpush1.bf16.msra.mxu0 %v8967_v3  ;;  %8806 = vmatpush1.bf16.msra.mxu1 %v8967_v3 }
  0xd3   : > { %v1211_v11 = vmax.f32 %v1179_v9, 0.0  ;;  %890 = vperm.xlu1 %8917, %v9530_v40   ;;  %v611_v13 = vpop.permute.xlu1 %610  ;;  %v636_v9 = vpop.permute.xlu0 %635 }
  0xd4   : > { %v748_v15 = vmul.f32 %v9571_v50, %v611_v13  ;;  %v8970_v13 = vld [vmem:[%s12671_s6 + $0x90] ss:$12 sps:$4 sm:$0xff]  }
  0xd5   : > { %v1240_v14 = vpack.c.bf16 %v1211_v11, %v1210_v10 }
  0xd6   : > { %v786_v19 = vadd.f32 %v9582_v53, %v748_v15  ;;  %v753_v15 = vmul.f32 %v9571_v50, %v636_v9 }
  0xd7   : > { %8918 = vset.pattern.permute.xlu1 %v9267_v1  ;;  %1415 = vmatmul.mubr.bf16.gmra.mxu0 %v1240_v14  ;;  %v8972_v14 = vld [vmem:[%s12671_s6 + $0x94] ss:$12 sps:$4 sm:$0xff]   ;;  %v1052_v37 = vpop.permute.xlu0 %1051 }
  0xd8   : > { %1087 = vperm.xlu1 %8918, %v9530_v40   ;;  %v839_v16 = vpop.permute.xlu1 %838  ;;  %1424 = vmatprep.mubr.bf16.mxu0 %v12685_v6  ;;  %v1148_v40 = vmul.f32 %v9589_v56, %v1036_v18  ;;  %v791_v18 = vadd.f32 %v9582_v53, %v753_v15 }
  0xd9   : > { %v951_v17 = vmul.f32 %v9577_v52, %v839_v16  ;;  %1990 = vmatprep.subr.bf16.mxu0 %v8972_v14  ;;  %8791 = vmatprep.subr.bf16.mxu1 %v8972_v14 }
  0xda   : > { %1991 = vmatpush1.bf16.msra.mxu0 %v8970_v13  ;;  %8807 = vmatpush1.bf16.msra.mxu1 %v8970_v13 }
  0xdb   : > { %v983_v23 = vadd.f32 %v951_v17, %v786_v19 }
  0xdc   : > { %8919 = vset.pattern.permute.xlu1 %v12685_v6  ;;  %v843_v21 = vpop.permute.xlu1 %842 }
  0xdd   : > { %680 = vperm.xlu1 %8919, %v9519_v38   ;;  %v952_v24 = vmul.f32 %v9577_v52, %v843_v21  ;;  %v1180_v25 = vadd.f32 %v1148_v40, %v983_v23  ;;  %v1152_v21 = vmul.f32 %v9589_v56, %v1052_v37  ;;  %v8985_v37 = vld [vmem:[%s12671_s6 + $0x18] ss:$12 sps:$4 sm:$0xff]  }
  0xdf   : > { %v984_v26 = vadd.f32 %v952_v24, %v787_v22  ;;  %v1212_v30 = vmax.f32 %v1180_v25, 0.0  ;;  %v646_v25 = vpop.permute.xlu0 %645 }
  0xe1   : > { %8920 = vset.pattern.permute.xlu1 %v9268_v2  ;;  %v1040_v20 = vpop.permute.xlu1 %1039 }
  0xe2   : > { %v1149_v27 = vmul.f32 %v9589_v56, %v1040_v20  ;;  %894 = vperm.xlu1 %8920, %v9519_v38  }
  0xe4   : > { %v1181_v28 = vadd.f32 %v1149_v27, %v984_v26  ;;  %v8973_v27 = vld [vmem:[%s12671_s6 + $0x78] ss:$12 sps:$4 sm:$0xff]  }
  0xe6   : > { %v1213_v31 = vmax.f32 %v1181_v28, 0.0  ;;  %898 = vperm.xlu1 %8920, %v9535_v41   ;;  %v621_v32 = vpop.permute.xlu1 %620  ;;  %v8975_v28 = vld [vmem:[%s12671_s6 + $0x7c] ss:$12 sps:$4 sm:$0xff]  }
  0xe7   : > { %v750_v48 = vmul.f32 %v9571_v50, %v621_v32  ;;  %1992 = vmatprep.subr.bf16.mxu0 %v8975_v28  ;;  %8792 = vmatprep.subr.bf16.mxu1 %v8975_v28  ;;  %v656_v32 = vpop.permute.xlu0 %655  ;;  %v8990_v28 = vld [vmem:[%s12671_s6 + $0x4] ss:$12 sps:$4 sm:$0xff]  }
  0xe8   : > { %v1241_v34 = vpack.c.bf16 %v1213_v31, %v1212_v30  ;;  %1993 = vmatpush1.bf16.msra.mxu0 %v8973_v27  ;;  %8808 = vmatpush1.bf16.msra.mxu1 %v8973_v27  ;;  %v757_v15 = vmul.f32 %v9571_v50, %v656_v32 }
  0xe9   : > { %v788_v36 = vadd.f32 %v9582_v53, %v750_v48  ;;  %v8976_v48 = vld [vmem:[%s12671_s6 + $0x60] ss:$12 sps:$4 sm:$0xff]  }
  0xea   : > { %8922 = vset.pattern.permute.xlu1 %v9267_v1  ;;  %1425 = vmatmul.mubr.bf16.gmra.mxu0 %v1241_v34 }
  0xeb   : > { %1095 = vperm.xlu1 %8922, %v9535_v41   ;;  %v847_v49 = vpop.permute.xlu1 %846  ;;  %1434 = vmatprep.mubr.bf16.mxu0 %v12685_v6 }
  0xec   : > { %v953_v38 = vmul.f32 %v9577_v52, %v847_v49  ;;  %v8978_v49 = vld [vmem:[%s12671_s6 + $0x64] ss:$12 sps:$4 sm:$0xff]  }
  0xed   : > { %1994 = vmatprep.subr.bf16.mxu0 %v8978_v49  ;;  %8793 = vmatprep.subr.bf16.mxu1 %v8978_v49 }
  0xee   : > { %v985_v58 = vadd.f32 %v953_v38, %v788_v36  ;;  %v755_v38 = vmul.f32 %v9571_v50, %v646_v25  ;;  %v1060_v36 = vpop.permute.xlu0 %1059  ;;  %1995 = vmatpush1.bf16.msra.mxu0 %v8976_v48  ;;  %8809 = vmatpush1.bf16.msra.mxu1 %v8976_v48 }
  0xef   : > { %8923 = vset.pattern.permute.xlu1 %v12685_v6  ;;  %v851_v55 = vpop.permute.xlu1 %850 }
  0xf0   : > { %690 = vperm.xlu1 %8923, %v9554_v45   ;;  %v954_v41 = vmul.f32 %v9577_v52, %v851_v55  ;;  %v1182_v62 = vadd.f32 %v1150_v57, %v985_v58  ;;  %v8979_v57 = vld [vmem:[%s12671_s6 + $0x48] ss:$12 sps:$4 sm:$0xff]   ;;  %v8981_v58 = vld [vmem:[%s12671_s6 + $0x4c] ss:$12 sps:$4 sm:$0xff]  }
  0xf1   : > { %1996 = vmatprep.subr.bf16.mxu0 %v8981_v58  ;;  %8794 = vmatprep.subr.bf16.mxu1 %v8981_v58  ;;  %v8999_v58 = vld [vmem:[%s12671_s6 + $0x13c] ss:$12 sps:$4 sm:$0xff]  }
  0xf2   : > { %v986_v63 = vadd.f32 %v954_v41, %v789_v59  ;;  %v1214_v8 = vmax.f32 %v1182_v62, 0.0  ;;  %v793_v59 = vadd.f32 %v9582_v53, %v755_v38  ;;  %1997 = vmatpush1.bf16.msra.mxu0 %v8979_v57  ;;  %8810 = vmatpush1.bf16.msra.mxu1 %v8979_v57  ;;  %v1068_v9 = vpop.permute.xlu0 %1067  ;;  %v8996_v38 = vld [vmem:[%s12671_s6 + $0x154] ss:$12 sps:$4 sm:$0xff]  }
  0xf4   : > { %8924 = vset.pattern.permute.xlu1 %v9268_v2  ;;  %v1048_v60 = vpop.permute.xlu1 %1047 }
  0xf5   : > { %v1151_v39 = vmul.f32 %v9589_v56, %v1048_v60  ;;  %902 = vperm.xlu1 %8924, %v9554_v45   ;;  %v1154_v60 = vmul.f32 %v9589_v56, %v1060_v36 }
  0xf6   : > { %v1076_v14 = vpop.permute.xlu0 %1075 }
  0xf7   : > { %v1183_v0 = vadd.f32 %v1151_v39, %v986_v63  ;;  %v1158_v57 = vmul.f32 %v9589_v56, %v1076_v14 }
  0xf9   : > { %v1215_v5 = vmax.f32 %v1183_v0, 0.0  ;;  %906 = vperm.xlu1 %8924, %v9540_v42   ;;  %v631_v7 = vpop.permute.xlu1 %630 }
  0xfa   : > { %v752_v45 = vmul.f32 %v9571_v50, %v631_v7 }
  0xfb   : > { %v1242_v10 = vpack.c.bf16 %v1215_v5, %v1214_v8 }
  0xfd   : > { %8925 = vset.pattern.permute.xlu1 %v9267_v1  ;;  %1435 = vmatmul.mubr.bf16.gmra.mxu0 %v1242_v10  ;;  %v8984_v10 = vld [vmem:[%s12671_s6 + $0x34] ss:$12 sps:$4 sm:$0xff]  }
  0xfe   : > { %1103 = vperm.xlu1 %8925, %v9540_v42   ;;  %v855_v11 = vpop.permute.xlu1 %854  ;;  %1444 = vmatprep.mubr.bf16.mxu0 %v12685_v6  ;;  %v790_v42 = vadd.f32 %v9582_v53, %v752_v45 }
  0xff   : > { %v955_v16 = vmul.f32 %v9577_v52, %v855_v11  ;;  %v8982_v11 = vld [vmem:[%s12671_s6 + $0x30] ss:$12 sps:$4 sm:$0xff]   ;;  %1998 = vmatprep.subr.bf16.mxu0 %v8984_v10  ;;  %8795 = vmatprep.subr.bf16.mxu1 %v8984_v10 }
 0x100   : > { %1999 = vmatpush1.bf16.msra.mxu0 %v8982_v11  ;;  %8811 = vmatpush1.bf16.msra.mxu1 %v8982_v11  ;;  %v9008_v11 = vld [vmem:[%s12671_s6 + $0xf4] ss:$12 sps:$4 sm:$0xff]  }
 0x101   : > { %v987_v19 = vadd.f32 %v955_v16, %v790_v42  ;;  %v8987_v42 = vld [vmem:[%s12671_s6 + $0x1c] ss:$12 sps:$4 sm:$0xff]  }
 0x102   : > { %8926 = vset.pattern.permute.xlu1 %v12685_v6  ;;  %v859_v17 = vpop.permute.xlu1 %858  ;;  %2000 = vmatprep.subr.bf16.mxu0 %v8987_v42 }
 0x103   : > { %700 = vperm.xlu1 %8926, %v9560_v46   ;;  %v956_v22 = vmul.f32 %v9577_v52, %v859_v17  ;;  %v1184_v40 = vadd.f32 %v1152_v21, %v987_v19  ;;  %v1156_v21 = vmul.f32 %v9589_v56, %v1068_v9  ;;  %8796 = vmatprep.subr.bf16.mxu1 %v8987_v42 }
 0x104   : > { %2001 = vmatpush1.bf16.msra.mxu0 %v8985_v37  ;;  %8812 = vmatpush1.bf16.msra.mxu1 %v8985_v37 }
 0x105   : > { %v988_v24 = vadd.f32 %v956_v22, %v791_v18  ;;  %v1216_v29 = vmax.f32 %v1184_v40, 0.0  ;;  %v795_v18 = vadd.f32 %v9582_v53, %v757_v15  ;;  %2002 = vmatprep.subr.bf16.mxu0 %v8990_v28  ;;  %8797 = vmatprep.subr.bf16.mxu1 %v8990_v28  ;;  %v9006_v15 = vld [vmem:[%s12671_s6 + $0xf0] ss:$12 sps:$4 sm:$0xff]  }
 0x107   : > { %8927 = vset.pattern.permute.xlu1 %v9268_v2  ;;  %v1056_v23 = vpop.permute.xlu1 %1055 }
 0x108   : > { %v1153_v20 = vmul.f32 %v9589_v56, %v1056_v23  ;;  %910 = vperm.xlu1 %8927, %v9560_v46   ;;  %v9773_v23 = vpop.permute.xlu0 %1083 }
 0x10a   : > { %v1185_v26 = vadd.f32 %v1153_v20, %v988_v24 }
 0x10c   : > { %v1217_v30 = vmax.f32 %v1185_v26, 0.0  ;;  %914 = vperm.xlu1 %8927, %v9544_v43   ;;  %v641_v31 = vpop.permute.xlu1 %640  ;;  %v9778_v27 = vpop.permute.xlu0 %1091 }
 0x10d   : > { %v754_v34 = vmul.f32 %v9571_v50, %v641_v31 }
 0x10e   : > { %v1243_v46 = vpack.c.bf16 %v1217_v30, %v1216_v29  ;;  %v8988_v29 = vld [vmem:[%s12671_s6] ss:$12 sps:$4 sm:$0xff]  }
 0x10f   : > { %2003 = vmatpush1.bf16.msra.mxu0 %v8988_v29  ;;  %8813 = vmatpush1.bf16.msra.mxu1 %v8988_v29 }
 0x110   : > { %8928 = vset.pattern.permute.xlu1 %v9267_v1  ;;  %1445 = vmatmul.mubr.bf16.gmra.mxu0 %v1243_v46  ;;  %v8993_v46 = vld [vmem:[%s12671_s6 + $0x16c] ss:$12 sps:$4 sm:$0xff]  }
 0x111   : > { %1111 = vperm.xlu1 %8928, %v9544_v43   ;;  %v863_v35 = vpop.permute.xlu1 %862  ;;  %1454 = vmatprep.mubr.bf16.mxu0 %v12685_v6  ;;  %v792_v43 = vadd.f32 %v9582_v53, %v754_v34  ;;  %v8991_v34 = vld [vmem:[%s12671_s6 + $0x168] ss:$12 sps:$4 sm:$0xff]  }
 0x112   : > { %v957_v51 = vmul.f32 %v9577_v52, %v863_v35  ;;  %v666_v35 = vpop.permute.xlu0 %665  ;;  %2004 = vmatprep.subr.bf16.mxu0 %v8993_v46  ;;  %8798 = vmatprep.subr.bf16.mxu1 %v8993_v46 }
 0x113   : > { %v759_v36 = vmul.f32 %v9571_v50, %v666_v35  ;;  %2005 = vmatpush2.bf16.msra.mxu0 %v8991_v34  ;;  %8814 = vmatpush2.bf16.msra.mxu1 %v8991_v34 }
 0x114   : > { %v989_v41 = vadd.f32 %v957_v51, %v792_v43  ;;  %v8994_v43 = vld [vmem:[%s12671_s6 + $0x150] ss:$12 sps:$4 sm:$0xff]   ;;  %2006 = vmatprep.subr.bf16.mxu0 %v8996_v38  ;;  %8799 = vmatprep.subr.bf16.mxu1 %v8996_v38 }
 0x115   : > { %8929 = vset.pattern.permute.xlu1 %v12685_v6  ;;  %v867_v55 = vpop.permute.xlu1 %866 }
 0x116   : > { %710 = vperm.xlu1 %8929, %v9564_v47   ;;  %v958_v62 = vmul.f32 %v9577_v52, %v867_v55  ;;  %v1186_v39 = vadd.f32 %v1154_v60, %v989_v41  ;;  %v797_v41 = vadd.f32 %v9582_v53, %v759_v36 }
 0x117   : > { %2007 = vmatpush2.bf16.msra.mxu0 %v8994_v43  ;;  %8815 = vmatpush2.bf16.msra.mxu1 %v8994_v43 }
 0x118   : > { %v990_v0 = vadd.f32 %v958_v62, %v793_v59  ;;  %v1218_v5 = vmax.f32 %v1186_v39, 0.0  ;;  %v8997_v62 = vld [vmem:[%s12671_s6 + $0x138] ss:$12 sps:$4 sm:$0xff]   ;;  %2008 = vmatprep.subr.bf16.mxu0 %v8999_v58  ;;  %8800 = vmatprep.subr.bf16.mxu1 %v8999_v58 }
 0x119   : > { %v9002_v39 = vld [vmem:[%s12671_s6 + $0x124] ss:$12 sps:$4 sm:$0xff]  }
 0x11a   : > { %8931 = vset.pattern.permute.xlu1 %v9268_v2  ;;  %v1064_v63 = vpop.permute.xlu1 %1063 }
 0x11b   : > { %v1155_v3 = vmul.f32 %v9589_v56, %v1064_v63  ;;  %918 = vperm.xlu1 %8931, %v9564_v47   ;;  %2009 = vmatpush2.bf16.msra.mxu0 %v8997_v62 }
 0x11c   : > { %2010 = vmatprep.subr.bf16.mxu0 %v9002_v39  ;;  %8816 = vmatpush2.bf16.msra.mxu1 %v8997_v62 }
 0x11d   : > { %v1187_v4 = vadd.f32 %v1155_v3, %v990_v0  ;;  %8801 = vmatprep.subr.bf16.mxu1 %v9002_v39 }
 0x11f   : > { %v1219_v7 = vmax.f32 %v1187_v4, 0.0  ;;  %922 = vperm.xlu1 %8931, %v9549_v44   ;;  %v651_v8 = vpop.permute.xlu1 %650 }
 0x120   : > { %v756_v47 = vmul.f32 %v9571_v50, %v651_v8 }
 0x121   : > { %v1244_v45 = vpack.c.bf16 %v1219_v7, %v1218_v5  ;;  %v9000_v5 = vld [vmem:[%s12671_s6 + $0x120] ss:$12 sps:$4 sm:$0xff]  }
 0x122   : > { %2011 = vmatpush2.bf16.msra.mxu0 %v9000_v5  ;;  %8817 = vmatpush2.bf16.msra.mxu1 %v9000_v5 }
 0x123   : > { %8932 = vset.pattern.permute.xlu1 %v9267_v1  ;;  %1455 = vmatmul.mubr.bf16.gmra.mxu0 %v1244_v45  ;;  %v9003_v45 = vld [vmem:[%s12671_s6 + $0x108] ss:$12 sps:$4 sm:$0xff]  }
 0x124   : > { %1119 = vperm.xlu1 %8932, %v9549_v44   ;;  %v871_v13 = vpop.permute.xlu1 %870  ;;  %1464 = vmatprep.mubr.bf16.mxu0 %v12685_v6  ;;  %v794_v44 = vadd.f32 %v9582_v53, %v756_v47  ;;  %v676_v47 = vpop.permute.xlu0 %675 }
 0x125   : > { %v959_v16 = vmul.f32 %v9577_v52, %v871_v13  ;;  %v761_v37 = vmul.f32 %v9571_v50, %v676_v47 }
 0x127   : > { %v991_v19 = vadd.f32 %v959_v16, %v794_v44  ;;  %v1160_v44 = vmul.f32 %v9589_v56, %v9773_v23  ;;  %v9012_v23 = vld [vmem:[%s12671_s6 + $0xc0] ss:$12 sps:$4 sm:$0xff]  }
 0x128   : > { %8933 = vset.pattern.permute.xlu1 %v12685_v6  ;;  %v875_v17 = vpop.permute.xlu1 %874 }
 0x129   : > { %720 = vperm.xlu1 %8933, %v9595_v61   ;;  %v960_v22 = vmul.f32 %v9577_v52, %v875_v17  ;;  %v1188_v24 = vadd.f32 %v1156_v21, %v991_v19  ;;  %v9009_v17 = vld [vmem:[%s12671_s6 + $0xd8] ss:$12 sps:$4 sm:$0xff]   ;;  %v799_v19 = vadd.f32 %v9582_v53, %v761_v37 }
 0x12b   : > { %v992_v20 = vadd.f32 %v960_v22, %v795_v18  ;;  %v1220_v30 = vmax.f32 %v1188_v24, 0.0  ;;  %v9014_v22 = vld [vmem:[%s12671_s6 + $0xc4] ss:$12 sps:$4 sm:$0xff]  }
 0x12d   : > { %8934 = vset.pattern.permute.xlu1 %v9268_v2  ;;  %v1072_v40 = vpop.permute.xlu1 %1071 }
 0x12e   : > { %v1157_v25 = vmul.f32 %v9589_v56, %v1072_v40  ;;  %926 = vperm.xlu1 %8934, %v9595_v61  }
 0x130   : > { %v1189_v26 = vadd.f32 %v1157_v25, %v992_v20 }
 0x132   : > { %v1221_v31 = vmax.f32 %v1189_v26, 0.0  ;;  %930 = vperm.xlu1 %8934, %v9607_v12   ;;  %v661_v32 = vpop.permute.xlu1 %660 }
 0x133   : > { %v758_v48 = vmul.f32 %v9571_v50, %v661_v32  ;;  %v686_v32 = vpop.permute.xlu0 %685 }
 0x134   : > { %v1245_v61 = vpack.c.bf16 %v1221_v31, %v1220_v30  ;;  %v763_v35 = vmul.f32 %v9571_v50, %v686_v32 }
 0x136   : > { %8936 = vset.pattern.permute.xlu1 %v9267_v1  ;;  %1465 = vmatmul.mubr.bf16.gmra.mxu0 %v1245_v61  ;;  %v801_v43 = vadd.f32 %v9582_v53, %v763_v35 }
 0x137   : > { %1127 = vperm.xlu1 %8936, %v9607_v12   ;;  %v879_v49 = vpop.permute.xlu1 %878  ;;  %1474 = vmatprep.mubr.bf16.mxu0 %v12685_v6  ;;  %v796_v12 = vadd.f32 %v9582_v53, %v758_v48  ;;  %v696_v38 = vpop.permute.xlu0 %695 }
 0x138   : > { %v961_v51 = vmul.f32 %v9577_v52, %v879_v49 }
 0x13a   : > { %v993_v59 = vadd.f32 %v961_v51, %v796_v12  ;;  %v1162_v51 = vmul.f32 %v9589_v56, %v9778_v27 }
 0x13b   : > { %8937 = vset.pattern.permute.xlu1 %v12685_v6  ;;  %v883_v55 = vpop.permute.xlu1 %882 }
 0x13c   : > { %730 = vperm.xlu1 %8937, %v9633_v54   ;;  %v962_v60 = vmul.f32 %v9577_v52, %v883_v55  ;;  %v1190_v0 = vadd.f32 %v1158_v57, %v993_v59  ;;  %v9015_v55 = vld [vmem:[%s12671_s6 + $0x170] ss:$12 sps:$4 sm:$0xff]  }
 0x13e   : > { %v994_v3 = vadd.f32 %v962_v60, %v797_v41  ;;  %v1222_v10 = vmax.f32 %v1190_v0, 0.0  ;;  %v706_v60 = vpop.permute.xlu0 %705 }
 0x140   : > { %8938 = vset.pattern.permute.xlu1 %v9268_v2  ;;  %v1080_v63 = vpop.permute.xlu1 %1079  ;;  %v9005_v2 = vld [vmem:[%s12671_s6 + $0x10c] ss:$12 sps:$4 sm:$0xff]  }
 0x141   : > { %v1159_v4 = vmul.f32 %v9589_v56, %v1080_v63  ;;  %934 = vperm.xlu1 %8938, %v9633_v54   ;;  %2012 = vmatprep.subr.bf16.mxu0 %v9005_v2 }
 0x142   : > { %8802 = vmatprep.subr.bf16.mxu1 %v9005_v2  ;;  %2013 = vmatpush2.bf16.msra.mxu0 %v9003_v45  ;;  %v716_v0 = vpop.permute.xlu0 %715 }
 0x143   : > { %v1191_v7 = vadd.f32 %v1159_v4, %v994_v3  ;;  %8818 = vmatpush2.bf16.msra.mxu1 %v9003_v45  ;;  %2014 = vmatprep.subr.bf16.mxu0 %v9008_v11 }
 0x144   : > { %8803 = vmatprep.subr.bf16.mxu1 %v9008_v11 }
 0x145   : > { %v1223_v8 = vmax.f32 %v1191_v7, 0.0  ;;  %938 = vperm.xlu1 %8938, %v9628_v33   ;;  %v671_v9 = vpop.permute.xlu1 %670  ;;  %v765_v7 = vmul.f32 %v9571_v50, %v696_v38 }
 0x146   : > { %v760_v13 = vmul.f32 %v9571_v50, %v671_v9  ;;  %2015 = vmatpush2.bf16.msra.mxu0 %v9006_v15 }
 0x147   : > { %v1246_v54 = vpack.c.bf16 %v1223_v8, %v1222_v10  ;;  %8819 = vmatpush2.bf16.msra.mxu1 %v9006_v15  ;;  %v1100_v8 = vpop.permute.xlu0 %1099 }
 0x148   : > { %v1164_v11 = vmul.f32 %v9589_v56, %v1100_v8 }
 0x149   : > { %8940 = vset.pattern.permute.xlu1 %v9267_v1  ;;  %1475 = vmatmul.mubr.bf16.gmra.mxu0 %v1246_v54  ;;  %v9011_v1 = vld [vmem:[%s12671_s6 + $0xdc] ss:$12 sps:$4 sm:$0xff]   ;;  %v803_v54 = vadd.f32 %v9582_v53, %v765_v7 }
 0x14a   : > { %1135 = vperm.xlu1 %8940, %v9628_v33   ;;  %v887_v14 = vpop.permute.xlu1 %886  ;;  %1484 = vmatprep.mubr.bf16.mxu0 %v12685_v6  ;;  %v798_v33 = vadd.f32 %v9582_v53, %v760_v13 }
 0x14b   : > { %v963_v16 = vmul.f32 %v9577_v52, %v887_v14  ;;  %2016 = vmatprep.subr.bf16.mxu0 %v9011_v1  ;;  %8804 = vmatprep.subr.bf16.mxu1 %v9011_v1 }
 0x14c   : > { %2017 = vmatpush2.bf16.msra.mxu0 %v9009_v17  ;;  %8820 = vmatpush2.bf16.msra.mxu1 %v9009_v17 }
 0x14d   : > { %v995_v18 = vadd.f32 %v963_v16, %v798_v33  ;;  %2018 = vmatprep.subr.bf16.mxu0 %v9014_v22  ;;  %8805 = vmatprep.subr.bf16.mxu1 %v9014_v22  ;;  %v1108_v22 = vpop.permute.xlu0 %1107 }
 0x14e   : > { %v891_v42 = vpop.permute.xlu1 %890  ;;  %8942 = vset.pattern.permute.xlu1 %v12685_v6 }
 0x14f   : > { %v964_v21 = vmul.f32 %v9577_v52, %v891_v42  ;;  %v1192_v24 = vadd.f32 %v1160_v44, %v995_v18 }
 0x150   : > { %2019 = vmatpush2.bf16.msra.mxu0 %v9012_v23  ;;  %8821 = vmatpush2.bf16.msra.mxu1 %v9012_v23 }
 0x151   : > { %v996_v20 = vadd.f32 %v964_v21, %v799_v19  ;;  %v1224_v30 = vmax.f32 %v1192_v24, 0.0  ;;  %8394 = vmatprep.subr.bf16.mxu0 %v9015_v55  ;;  %v767_v19 = vmul.f32 %v9571_v50, %v706_v60  ;;  %v769_v55 = vmul.f32 %v9571_v50, %v716_v0 }
 0x153   : > { %v1088_v40 = vpop.permute.xlu1 %1087  ;;  %v805_v24 = vadd.f32 %v9582_v53, %v767_v19 }
 0x154   : > { %v1161_v25 = vmul.f32 %v9589_v56, %v1088_v40 }
 0x156   : > { %v1193_v26 = vadd.f32 %v1161_v25, %v996_v20  ;;  %v1166_v25 = vmul.f32 %v9589_v56, %v1108_v22 }
 0x158   : > { %v1225_v28 = vmax.f32 %v1193_v26, 0.0  ;;  %v681_v29 = vpop.permute.xlu1 %680 }
 0x159   : > { %v762_v61 = vmul.f32 %v9571_v50, %v681_v29 }
 0x15a   : > { %v1247_v31 = vpack.c.bf16 %v1225_v28, %v1224_v30 }
 0x15b   : > { %v800_v48 = vadd.f32 %v9582_v53, %v762_v61 }
 0x15c   : > { %1485 = vmatmul.mubr.bf16.gmra.mxu0 %v1247_v31 }
 0x15d   : > { %v895_v46 = vpop.permute.xlu1 %894  ;;  %1494 = vmatprep.mubr.bf16.mxu0 %v12685_v6 }
 0x15e   : > { %v965_v34 = vmul.f32 %v9577_v52, %v895_v46 }
 0x160   : > { %v997_v36 = vadd.f32 %v965_v34, %v800_v48 }
 0x161   : > { %v899_v49 = vpop.permute.xlu1 %898 }
 0x162   : > { %v966_v12 = vmul.f32 %v9577_v52, %v899_v49  ;;  %v1194_v58 = vadd.f32 %v1162_v51, %v997_v36 }
 0x164   : > { %v998_v59 = vadd.f32 %v966_v12, %v801_v43  ;;  %v1226_v27 = vmax.f32 %v1194_v58, 0.0  ;;  %v1116_v12 = vpop.permute.xlu0 %1115 }
 0x165   : > { %v1168_v60 = vmul.f32 %v9589_v56, %v1116_v12 }
 0x166   : > { %v1096_v57 = vpop.permute.xlu1 %1095 }
 0x167   : > { %v1163_v41 = vmul.f32 %v9589_v56, %v1096_v57 }
 0x169   : > { %v1195_v62 = vadd.f32 %v1163_v41, %v998_v59 }
 0x16b   : > { %v1227_v63 = vmax.f32 %v1195_v62, 0.0  ;;  %v691_v39 = vpop.permute.xlu1 %690 }
 0x16c   : > { %v764_v4 = vmul.f32 %v9571_v50, %v691_v39  ;;  %v807_v39 = vadd.f32 %v9582_v53, %v769_v55 }
 0x16d   : > { %v1248_v3 = vpack.c.bf16 %v1227_v63, %v1226_v27 }
 0x16e   : > { %v802_v9 = vadd.f32 %v9582_v53, %v764_v4 }
 0x16f   : > { %1495 = vmatmul.mubr.bf16.gmra.mxu0 %v1248_v3 }
 0x170   : > { %v903_v5 = vpop.permute.xlu1 %902  ;;  %1504 = vmatprep.mubr.bf16.mxu0 %v12685_v6 }
 0x171   : > { %v967_v2 = vmul.f32 %v9577_v52, %v903_v5 }
 0x173   : > { %v999_v45 = vadd.f32 %v967_v2, %v802_v9 }
 0x174   : > { %v907_v10 = vpop.permute.xlu1 %906 }
 0x175   : > { %v968_v47 = vmul.f32 %v9577_v52, %v907_v10  ;;  %v1196_v14 = vadd.f32 %v1164_v11, %v999_v45  ;;  %v9895_v32 = vpop.f32.mrf.mxu0  ;;  %v1124_v10 = vpop.permute.xlu0 %1123 }
 0x177   : > { %v1000_v15 = vadd.f32 %v968_v47, %v803_v54  ;;  %v1228_v1 = vmax.f32 %v1196_v14, 0.0  ;;  %v9897_v48 = vpop.f32.mrf.mxu0 }
 0x179   : > { %v1104_v13 = vpop.permute.xlu1 %1103  ;;  %v9901_v36 = vpop.f32.mrf.mxu0 }
 0x17a   : > { %v1165_v16 = vmul.f32 %v9589_v56, %v1104_v13  ;;  %v726_v11 = vpop.permute.xlu0 %725 }
 0x17b   : > { %v9906_v59 = vpop.f32.mrf.mxu0 }
 0x17c   : > { %v1197_v37 = vadd.f32 %v1165_v16, %v1000_v15 }
 0x17e   : > { %v1229_v33 = vmax.f32 %v1197_v37, 0.0  ;;  %v701_v42 = vpop.permute.xlu1 %700  ;;  %v9185_v37 = vld [vmem:[%s12711_s2] ss:$0 sm:$0xff] }
 0x17f   : > { %v766_v17 = vmul.f32 %v9571_v50, %v701_v42 }
 0x180   : > { %v1249_v44 = vpack.c.bf16 %v1229_v33, %v1228_v1  ;;  %v771_v1 = vmul.f32 %v9185_v37, %v726_v11 }
 0x181   : > { %v804_v40 = vadd.f32 %v9582_v53, %v766_v17 }
 0x182   : > { %1505 = vmatmul.mubr.bf16.gmra.mxu0 %v1249_v44 }
 0x183   : > { %v911_v18 = vpop.permute.xlu1 %910  ;;  %1514 = vmatprep.mubr.bf16.mxu0 %v12685_v6 }
 0x184   : > { %v969_v21 = vmul.f32 %v9577_v52, %v911_v18  ;;  %v9910_v63 = vpop.f32.mrf.mxu0 }
 0x186   : > { %v1001_v20 = vadd.f32 %v969_v21, %v804_v40  ;;  %v9914_v0 = vpop.f32.mrf.mxu0  ;;  %v1170_v21 = vmul.f32 %v9589_v56, %v1124_v10 }
 0x187   : > { %v915_v23 = vpop.permute.xlu1 %914 }
 0x188   : > { %v970_v26 = vmul.f32 %v9577_v52, %v915_v23  ;;  %v1198_v29 = vadd.f32 %v1166_v25, %v1001_v20  ;;  %v9916_v54 = vpop.f32.mrf.mxu0 }
 0x18a   : > { %v1002_v30 = vadd.f32 %v970_v26, %v805_v24  ;;  %v1230_v46 = vmax.f32 %v1198_v29, 0.0  ;;  %v9918_v47 = vpop.f32.mrf.mxu0  ;;  %v9188_v24 = vld [vmem:[%s12711_s2 + $0x2] ss:$0 sm:$0xff] }
 0x18c   : > { %v1112_v28 = vpop.permute.xlu1 %1111 }
 0x18d   : > { %v1167_v31 = vmul.f32 %v9589_v56, %v1112_v28 }
 0x18f   : > { %v1199_v61 = vadd.f32 %v1167_v31, %v1002_v30  ;;  %v12683_v31 = vlaneseq }
 0x191   : > { %v1231_v34 = vmax.f32 %v1199_v61, 0.0  ;;  %v711_v35 = vpop.permute.xlu1 %710 }
 0x192   : > { %v768_v38 = vmul.f32 %v9571_v50, %v711_v35 }
 0x193   : > { %v1250_v49 = vpack.c.bf16 %v1231_v34, %v1230_v46  ;;  %v736_v46 = vpop.permute.xlu0 %735 }
 0x194   : > { %v806_v57 = vadd.f32 %v9582_v53, %v768_v38 }
 0x195   : > { %1515 = vmatmul.mubr.bf16.gmra.mxu0 %v1250_v49  ;;  %v9947_v49 = vshrl.u32 %v12683_v31, 7 }
 0x196   : > { %v919_v51 = vpop.permute.xlu1 %918  ;;  %1524 = vmatprep.mubr.bf16.mxu0 %v12685_v6 }
 0x197   : > { %v971_v43 = vmul.f32 %v9577_v52, %v919_v51  ;;  %v9922_v15 = vpop.f32.mrf.mxu0  ;;  %12712 = vst [vmem:[#allocation9_spill] sm:$0xff] %v9947_v49  ;;  %v1132_v12 = vpop.permute.xlu0 %1131 }
 0x199   : > { %v1003_v41 = vadd.f32 %v971_v43, %v806_v57  ;;  %v9929_v44 = vpop.f32.mrf.mxu0  ;;  %v9952_v43 = vsub.s32 1, %v9947_v49  ;;  %v773_v57 = vmul.f32 %v9185_v37, %v736_v46 }
 0x19a   : > { %v923_v58 = vpop.permute.xlu1 %922 }
 0x19b   : > { %v972_v62 = vmul.f32 %v9577_v52, %v923_v58  ;;  %v1200_v3 = vadd.f32 %v1168_v60, %v1003_v41  ;;  %v9938_v40 = vpop.f32.mrf.mxu0  ;;  %12713 = vst [vmem:[#allocation10_spill] sm:$0xff] %v9952_v43  ;;  %v1270_v60 = vld [vmem:[%s12670_s5] sm:$0x3] }
 0x19d   : > { %v1004_v4 = vadd.f32 %v972_v62, %v807_v39  ;;  %v1232_v2 = vmax.f32 %v1200_v3, 0.0  ;;  %v1422_v26 = vpop.f32.mrf.mxu0  ;;  %v1172_v39 = vmul.f32 %v9188_v24, %v1132_v12  ;;  %v9960_v3 = vrot.slane %v1270_v60, %v9952_v43 }
 0x19f   : > { %v1120_v27 = vpop.permute.xlu1 %1119  ;;  %v1399_v11 = vadd.f32 %v9897_v48, %v9960_v3  ;;  %v1419_v46 = vadd.f32 %v9929_v44, %v9960_v3  ;;  %v9020_v44 = vld [vmem:[%s12671_s6 + $0x80] ss:$12 sps:$4 sm:$0xff]  }
 0x1a0   : > { %v1169_v5 = vmul.f32 %v9589_v56, %v1120_v27 }
 0x1a2   : > { %v1201_v7 = vadd.f32 %v1169_v5, %v1004_v4  ;;  %v1403_v5 = vadd.f32 %v9906_v59, %v9960_v3 }
 0x1a4   : > { %v1233_v8 = vmax.f32 %v1201_v7, 0.0  ;;  %v721_v9 = vpop.permute.xlu1 %720 }
 0x1a5   : > { %v770_v13 = vmul.f32 %v9571_v50, %v721_v9  ;;  %v9186_v50 = vld [vmem:[%s12668_s3] ss:$0 sm:$0xff] }
 0x1a6   : > { %v1251_v45 = vpack.c.bf16 %v1233_v8, %v1232_v2  ;;  %v809_v18 = vadd.f32 %v9186_v50, %v771_v1  ;;  %v811_v4 = vadd.f32 %v9186_v50, %v773_v57  ;;  %v9965_v8 = vsub.s32 0, %v9947_v49  ;;  %v9021_v57 = vld [vmem:[%s12671_s6 + $0x128] ss:$12 sps:$4 sm:$0xff]  }
 0x1a7   : > { %v808_v33 = vadd.f32 %v9582_v53, %v770_v13 }
 0x1a8   : > { %1525 = vmatmul.mubr.bf16.gmra.mxu0 %v1251_v45  ;;  %12714 = vst [vmem:[#allocation11_spill] sm:$0xff] %v9965_v8 }
 0x1a9   : > { %v927_v14 = vpop.permute.xlu1 %926  ;;  %1534 = vmatprep.mubr.bf16.mxu0 %v12685_v6 }
 0x1aa   : > { %v973_v16 = vmul.f32 %v9577_v52, %v927_v14  ;;  %v9187_v52 = vld [vmem:[%s12711_s2 + $0x1] ss:$0 sm:$0xff]  ;;  %v9943_v61 = vpop.f32.mrf.mxu0 }
 0x1ac   : > { %v1005_v17 = vadd.f32 %v973_v16, %v808_v33  ;;  %v9949_v38 = vpop.f32.mrf.mxu0  ;;  %v1558_v16 = vmax.f32 %v1403_v5, 0.0  ;;  %v1556_v33 = vmax.f32 %v1399_v11, 0.0  ;;  %v9023_v5 = vld [vmem:[%s12671_s6 + $0x110] ss:$12 sps:$4 sm:$0xff]  }
 0x1ad   : > { %v931_v42 = vpop.permute.xlu1 %930 }
 0x1ae   : > { %v974_v19 = vmul.f32 %v9187_v52, %v931_v42  ;;  %v1202_v53 = vadd.f32 %v1170_v21, %v1005_v17  ;;  %v9954_v41 = vpop.f32.mrf.mxu0  ;;  %v9980_v48 = vpack.c.bf16 %v1558_v16, %v1556_v33  ;;  %v9025_v16 = vld [vmem:[%s12671_s6 + $0xf8] ss:$12 sps:$4 sm:$0xff]  }
 0x1b0   : > { %v1006_v23 = vadd.f32 %v974_v19, %v809_v18  ;;  %v1234_v28 = vmax.f32 %v1202_v53, 0.0  ;;  %v1432_v7 = vpop.f32.mrf.mxu0  ;;  %v1413_v18 = vadd.f32 %v9918_v47, %v9960_v3  ;;  %v1409_v19 = vadd.f32 %v9914_v0, %v9960_v3  ;;  %v9016_v47 = vld [vmem:[%s12671_s6 + $0xb0] ss:$12 sps:$4 sm:$0xff]   ;;  %v9017_v0 = vld [vmem:[%s12671_s6 + $0x158] ss:$12 sps:$4 sm:$0xff]  }
 0x1b2   : > { %v1128_v22 = vpop.permute.xlu1 %1127  ;;  %v1562_v53 = vmax.f32 %v1413_v18, 0.0  ;;  %v9026_v18 = vld [vmem:[%s12671_s6 + $0x38] ss:$12 sps:$4 sm:$0xff]  }
 0x1b3   : > { %v1171_v20 = vmul.f32 %v9188_v24, %v1128_v22 }
 0x1b5   : > { %v1203_v25 = vadd.f32 %v1171_v20, %v1006_v23  ;;  %v1560_v23 = vmax.f32 %v1409_v19, 0.0 }
 0x1b7   : > { %v1235_v29 = vmax.f32 %v1203_v25, 0.0  ;;  %v731_v30 = vpop.permute.xlu1 %730  ;;  %v1423_v25 = vadd.f32 %v1422_v26, %v9960_v3 }
 0x1b8   : > { %v772_v34 = vmul.f32 %v9185_v37, %v731_v30  ;;  %v9972_v37 = vrot.slane %v1270_v60, %v9965_v8 }
 0x1b9   : > { %v1252_v56 = vpack.c.bf16 %v1235_v29, %v1234_v28  ;;  %v10002_v29 = vpack.c.bf16 %v1562_v53, %v1560_v23 }
 0x1ba   : > { %v810_v55 = vadd.f32 %v9186_v50, %v772_v34  ;;  %v1401_v17 = vadd.f32 %v9901_v36, %v9972_v37  ;;  %v1407_v30 = vadd.f32 %v9910_v63, %v9972_v37  ;;  %v1566_v34 = vmax.f32 %v1423_v25, 0.0 }
 0x1bb   : > { %1535 = vmatmul.mubr.bf16.gmra.mxu0 %v1252_v56  ;;  %v9019_v56 = vld [vmem:[%s12671_s6 + $0x140] ss:$12 sps:$4 sm:$0xff]  }
 0x1bc   : > { %v935_v35 = vpop.permute.xlu1 %934  ;;  %1544 = vmatprep.mubr.bf16.mxu0 %v12685_v6  ;;  %v1557_v22 = vmax.f32 %v1401_v17, 0.0  ;;  %v1427_v17 = vadd.f32 %v9943_v61, %v9972_v37  ;;  %v9027_v61 = vld [vmem:[%s12671_s6 + $0xe0] ss:$12 sps:$4 sm:$0xff]  }
 0x1bd   : > { %v975_v51 = vmul.f32 %v9187_v52, %v935_v35  ;;  %v9969_v13 = vpop.f32.mrf.mxu0  ;;  %v1559_v35 = vmax.f32 %v1407_v30, 0.0 }
 0x1be   : > { %v1567_v23 = vmax.f32 %v1427_v17, 0.0  ;;  %v9040_v17 = vld [vmem:[%s12672_s7 + $0x60] ss:$12 sps:$4 sm:$0xff]  }
 0x1bf   : > { %v1007_v62 = vadd.f32 %v975_v51, %v810_v55  ;;  %v9974_v42 = vpop.f32.mrf.mxu0  ;;  %v1564_v51 = vmax.f32 %v1419_v46, 0.0  ;;  %v1421_v55 = vadd.f32 %v9938_v40, %v9972_v37  ;;  %v9022_v40 = vld [vmem:[%s12671_s6 + $0x68] ss:$12 sps:$4 sm:$0xff]  }
 0x1c0   : > { %v939_v58 = vpop.permute.xlu1 %938 }
 0x1c1   : > { %v976_v27 = vmul.f32 %v9187_v52, %v939_v58  ;;  %v1204_v9 = vadd.f32 %v1172_v39, %v1007_v62  ;;  %v1397_v52 = vadd.f32 %v9895_v32, %v9972_v37  ;;  %v9986_v21 = vpop.f32.mrf.mxu0  ;;  %v1411_v32 = vadd.f32 %v9916_v54, %v9972_v37  ;;  %v9018_v54 = vld [vmem:[%s12671_s6 + $0x98] ss:$12 sps:$4 sm:$0xff]  }
 0x1c2   : > { %v1433_v58 = vadd.f32 %v1432_v7, %v9960_v3  ;;  %v10031_v62 = vpack.c.bf16 %v1566_v34, %v1564_v51  ;;  %v1417_v39 = vadd.f32 %v9922_v15, %v9972_v37  ;;  %v1441_v30 = vadd.f32 %v9986_v21, %v9972_v37  ;;  %v9031_v21 = vld [vmem:[%s12672_s7 + $0xa8] ss:$12 sps:$4 sm:$0xff]  }
 0x1c3   : > { %v1008_v10 = vadd.f32 %v976_v27, %v811_v4  ;;  %v1236_v1 = vmax.f32 %v1204_v9, 0.0  ;;  %v1555_v36 = vmax.f32 %v1397_v52, 0.0  ;;  %v1561_v26 = vmax.f32 %v1411_v32, 0.0 }
 0x1c4   : > { %v1429_v27 = vadd.f32 %v9949_v38, %v9960_v3  ;;  %v1565_v4 = vmax.f32 %v1421_v55, 0.0  ;;  %v1570_v7 = vmax.f32 %v1433_v58, 0.0  ;;  %v9033_v38 = vld [vmem:[%s12672_s7 + $0xac] ss:$12 sps:$4 sm:$0xff]   ;;  %v1437_v51 = vadd.f32 %v9969_v13, %v9972_v37  ;;  %v9030_v13 = vld [vmem:[%s12671_s6 + $0x8] ss:$12 sps:$4 sm:$0xff]  }
 0x1c5   : > { %v1136_v2 = vpop.permute.xlu1 %1135  ;;  %v9992_v20 = vpack.c.bf16 %v1557_v22, %v1555_v36  ;;  %v10021_v12 = vpack.c.bf16 %v1561_v26, %v1559_v35  ;;  %2952 = vmatprep.subr.bf16.mxu1 %v9033_v38  ;;  %v9029_v26 = vld [vmem:[%s12671_s6 + $0xc8] ss:$12 sps:$4 sm:$0xff]  }
 0x1c6   : > { %v1173_v45 = vmul.f32 %v9188_v24, %v1136_v2  ;;  %v1442_v24 = vpop.f32.mrf.mxu0  ;;  %v1563_v2 = vmax.f32 %v1417_v39, 0.0  ;;  %v1568_v9 = vmax.f32 %v1429_v27, 0.0  ;;  %v9036_v58 = vld [vmem:[%s12672_s7 + $0x94] ss:$12 sps:$4 sm:$0xff]   ;;  %v1573_v39 = vmax.f32 %v1441_v30, 0.0  ;;  %v2562_v38 = vld [vmem:[%s12672_s7 + $0x1c8] sm:$0xff] }
 0x1c8   : > { %v1205_v14 = vadd.f32 %v1173_v45, %v1008_v10  ;;  %v9024_v45 = vld [vmem:[%s12671_s6 + $0x50] ss:$12 sps:$4 sm:$0xff]   ;;  %v10051_v11 = vpack.c.bf16 %v1565_v4, %v1563_v2  ;;  %v10059_v33 = vpack.c.bf16 %v1570_v7, %v1568_v9 }
 0x1ca   : > { %v1237_v59 = vmax.f32 %v1205_v14, 0.0  ;;  %v1431_v14 = vadd.f32 %v9954_v41, %v9972_v37 }
 0x1cc   : > { %v1253_v50 = vpack.c.bf16 %v1237_v59, %v1236_v1  ;;  %v1443_v1 = vadd.f32 %v1442_v24, %v9960_v3  ;;  %v1569_v52 = vmax.f32 %v1431_v14, 0.0  ;;  %v8277_v14 = vcombine.high %v2562_v38, %v2562_v38 }
 0x1ce   : > { %1545 = vmatmul.mubr.bf16.gmra.mxu0 %v1253_v50  ;;  %v1439_v50 = vadd.f32 %v9974_v42, %v9960_v3  ;;  %v1574_v53 = vmax.f32 %v1443_v1, 0.0  ;;  %v10080_v25 = vpack.c.bf16 %v1569_v52, %v1567_v23 }
 0x1cf   : > { %2020 = vmatprep.mubr.bf16.mxu0 %v9980_v48 }
 0x1d0   : > { %v10000_v28 = vpop.f32.mrf.mxu0 }
 0x1d1   : > { %v1447_v9 = vadd.f32 %v10000_v28, %v9972_v37 }
 0x1d2   : > { %v10016_v63 = vpop.f32.mrf.mxu0 }
 0x1d3   : > { %v1449_v55 = vadd.f32 %v10016_v63, %v9960_v3  ;;  %v1571_v63 = vmax.f32 %v1437_v51, 0.0  ;;  %v1575_v28 = vmax.f32 %v1447_v9, 0.0  ;;  %v9054_v51 = vld [vmem:[%s12672_s7] ss:$12 sps:$4 sm:$0xff]   ;;  %v9060_v9 = vld [vmem:[%s12672_s7 + $0x150] ss:$12 sps:$4 sm:$0xff]  }
 0x1d4   : > { %v10029_v60 = vpop.f32.mrf.mxu0 }
 0x1d5   : > { %v1576_v4 = vmax.f32 %v1449_v55, 0.0  ;;  %v10117_v7 = vpack.c.bf16 %v1573_v39, %v1571_v63  ;;  %v9062_v63 = vld [vmem:[%s12672_s7 + $0x154] ss:$12 sps:$4 sm:$0xff]  }
 0x1d6   : > { %2021 = vmatmul.mubr.bf16.vlgmr.msra.gmra.mxu0 %v9992_v20  ;;  %v1452_v15 = vpop.f32.mrf.mxu0 }
 0x1d7   : > { %2030 = vmatprep.mubr.bf16.mxu0 %v10002_v29  ;;  %8395 = vmatpush3.bf16.msra.mxu0 %v9016_v47  ;;  %v1572_v47 = vmax.f32 %v1439_v50, 0.0 }
 0x1d8   : > { %8396 = vmatprep.subr.bf16.mxu0 %v9017_v0  ;;  %v9028_v0 = vld [vmem:[%s12671_s6 + $0x20] ss:$12 sps:$4 sm:$0xff]  }
 0x1d9   : > { %v10088_v35 = vpack.c.bf16 %v1574_v53, %v1572_v47 }
 0x1db   : > { %8397 = vmatpush3.bf16.msra.mxu0 %v9018_v54 }
 0x1dc   : > { %8398 = vmatprep.subr.bf16.mxu0 %v9019_v56  ;;  %v1453_v56 = vadd.f32 %v1452_v15, %v9960_v3  ;;  %v1451_v15 = vadd.f32 %v10029_v60, %v9972_v37  ;;  %v9042_v60 = vld [vmem:[%s12672_s7 + $0x64] ss:$12 sps:$4 sm:$0xff]  }
 0x1de   : > { %2031 = vmatmul.mubr.bf16.gmra.mxu0 %v10021_v12  ;;  %v1578_v27 = vmax.f32 %v1453_v56, 0.0  ;;  %v9056_v56 = vld [vmem:[%s12672_s7 + $0x4] ss:$12 sps:$4 sm:$0xff]  }
 0x1df   : > { %2040 = vmatprep.mubr.bf16.mxu0 %v10031_v62  ;;  %8399 = vmatpush3.bf16.msra.mxu0 %v9020_v44 }
 0x1e0   : > { %8400 = vmatprep.subr.bf16.mxu0 %v9021_v57  ;;  %v10121_v2 = vpack.c.bf16 %v1578_v27, %v1576_v4 }
 0x1e3   : > { %v1456_v10 = vpop.f32.mrf.mxu0  ;;  %8401 = vmatpush3.bf16.msra.mxu0 %v9022_v40  ;;  %v9034_v40 = vld [vmem:[%s12672_s7 + $0x90] ss:$12 sps:$4 sm:$0xff]  }
 0x1e4   : > { %8402 = vmatprep.subr.bf16.mxu0 %v9023_v5  ;;  %v1457_v42 = vadd.f32 %v1456_v10, %v9972_v37  ;;  %v9039_v5 = vld [vmem:[%s12672_s7 + $0x7c] ss:$12 sps:$4 sm:$0xff]  }
 0x1e5   : > { %v1458_v59 = vpop.f32.mrf.mxu0 }
 0x1e6   : > { %2041 = vmatmul.mubr.bf16.gmra.mxu0 %v10051_v11  ;;  %v1459_v19 = vadd.f32 %v1458_v59, %v9960_v3  ;;  %v1579_v34 = vmax.f32 %v1457_v42, 0.0  ;;  %v9043_v42 = vld [vmem:[%s12672_s7 + $0x48] ss:$12 sps:$4 sm:$0xff]  }
 0x1e7   : > { %v1460_v41 = vpop.f32.mrf.mxu0  ;;  %2050 = vmatprep.mubr.bf16.mxu0 %v10059_v33  ;;  %8403 = vmatpush3.bf16.msra.mxu0 %v9024_v45  ;;  %v9037_v45 = vld [vmem:[%s12672_s7 + $0x78] ss:$12 sps:$4 sm:$0xff]  }
 0x1e8   : > { %v1461_v22 = vadd.f32 %v1460_v41, %v9972_v37  ;;  %8404 = vmatprep.subr.bf16.mxu0 %v9025_v16  ;;  %v1580_v46 = vmax.f32 %v1459_v19, 0.0  ;;  %v1577_v16 = vmax.f32 %v1451_v15, 0.0 }
 0x1e9   : > { %v1462_v36 = vpop.f32.mrf.mxu0 }
 0x1ea   : > { %v1463_v24 = vadd.f32 %v1462_v36, %v9960_v3  ;;  %v1581_v32 = vmax.f32 %v1461_v22, 0.0  ;;  %v10145_v52 = vpack.c.bf16 %v1577_v16, %v1575_v28  ;;  %v9066_v16 = vld [vmem:[%s12672_s7 + $0x120] ss:$12 sps:$4 sm:$0xff]  }
 0x1eb   : > { %8405 = vmatpush3.bf16.msra.mxu0 %v9026_v18  ;;  %v9045_v18 = vld [vmem:[%s12672_s7 + $0x4c] ss:$12 sps:$4 sm:$0xff]  }
 0x1ec   : > { %v1582_v54 = vmax.f32 %v1463_v24, 0.0  ;;  %8406 = vmatprep.subr.bf16.mxu0 %v9027_v61  ;;  %v10100_v57 = vpack.c.bf16 %v1581_v32, %v1579_v34  ;;  %v9050_v24 = vld [vmem:[%s12672_s7 + $0x34] ss:$12 sps:$4 sm:$0xff]   ;;  %v8276_v32 = vcombine.low %v2562_v38, %v2562_v38 }
 0x1ee   : > { %2051 = vmatmul.mubr.bf16.gmra.mxu0 %v10080_v25  ;;  %v10093_v44 = vpack.c.bf16 %v1582_v54, %v1580_v46  ;;  %v9048_v46 = vld [vmem:[%s12672_s7 + $0x30] ss:$12 sps:$4 sm:$0xff]  }
 0x1ef   : > { %2060 = vmatprep.mubr.bf16.mxu0 %v10088_v35  ;;  %8407 = vmatpush3.bf16.msra.mxu0 %v9028_v0  ;;  %v9053_v54 = vld [vmem:[%s12672_s7 + $0x1c] ss:$12 sps:$4 sm:$0xff]  }
 0x1f0   : > { %2080 = vmatprep.mubr.bf16.mxu1 %v10093_v44  ;;  %8408 = vmatprep.subr.bf16.mxu0 %v9029_v26  ;;  %v9051_v26 = vld [vmem:[%s12672_s7 + $0x18] ss:$12 sps:$4 sm:$0xff]  }
 0x1f1   : > { %2081 = vmatmul.mubr.bf16.vlgmr.msra.gmra.mxu1 %v10100_v57 }
 0x1f2   : > { %2953 = vmatpush1.bf16.msra.mxu1 %v9031_v21  ;;  %v9059_v21 = vld [vmem:[%s12672_s7 + $0x16c] ss:$12 sps:$4 sm:$0xff]  }
 0x1f3   : > { %8409 = vmatpush3.bf16.msra.mxu0 %v9030_v13  ;;  %2954 = vmatprep.subr.bf16.mxu1 %v9036_v58  ;;  %v9057_v58 = vld [vmem:[%s12672_s7 + $0x168] ss:$12 sps:$4 sm:$0xff]  }
 0x1f4   : > { %8279 = vmatprep.subr.msk.bf16.mxu0 %vm2942_vm0, %v8277_v14  ;;  %v9074_v14 = vld [vmem:[%s12672_s7 + $0x1b4] ss:$12 sps:$4 sm:$0xff]  }
 0x1f6   : > { %v1466_v10 = vpop.f32.mrf.mxu0  ;;  %2061 = vmatmul.mubr.bf16.gmra.mxu0 %v10117_v7  ;;  %2955 = vmatpush1.bf16.msra.mxu1 %v9034_v40 }
 0x1f7   : > { %2070 = vmatprep.mubr.bf16.mxu0 %v10121_v2  ;;  %2956 = vmatprep.subr.bf16.mxu1 %v9039_v5  ;;  %v1467_v19 = vadd.f32 %v1466_v10, %v9972_v37  ;;  %v9065_v10 = vld [vmem:[%s12672_s7 + $0x13c] ss:$12 sps:$4 sm:$0xff]  }
 0x1f8   : > { %v1468_v1 = vpop.f32.mrf.mxu0 }
 0x1f9   : > { %v1469_v50 = vadd.f32 %v1468_v1, %v9960_v3  ;;  %v1583_v47 = vmax.f32 %v1467_v19, 0.0  ;;  %v9071_v1 = vld [vmem:[%s12672_s7 + $0x10c] ss:$12 sps:$4 sm:$0xff]  }
 0x1fa   : > { %v1470_v59 = vpop.f32.mrf.mxu0  ;;  %2957 = vmatpush1.bf16.msra.mxu1 %v9037_v45  ;;  %v9072_v45 = vld [vmem:[%s12672_s7 + $0x1b0] ss:$12 sps:$4 sm:$0xff]  }
 0x1fb   : > { %v1471_v41 = vadd.f32 %v1470_v59, %v9972_v37  ;;  %2958 = vmatprep.subr.bf16.mxu1 %v9042_v60  ;;  %v1584_v36 = vmax.f32 %v1469_v50, 0.0  ;;  %v9063_v60 = vld [vmem:[%s12672_s7 + $0x138] ss:$12 sps:$4 sm:$0xff]  }
 0x1fc   : > { %v1472_v22 = vpop.f32.mrf.mxu0 }
 0x1fd   : > { %v1473_v61 = vadd.f32 %v1472_v22, %v9960_v3  ;;  %v1585_v53 = vmax.f32 %v1471_v41, 0.0 }
 0x1fe   : > { %2071 = vmatmul.mubr.bf16.gmra.mxu0 %v10145_v52  ;;  %2959 = vmatpush1.bf16.msra.mxu1 %v9040_v17  ;;  %v9069_v17 = vld [vmem:[%s12672_s7 + $0x108] ss:$12 sps:$4 sm:$0xff]  }
 0x1ff   : > { %v1586_v23 = vmax.f32 %v1473_v61, 0.0  ;;  %2213 = vmatprep.mubr.bf16.mxu0 %v9980_v48  ;;  %2960 = vmatprep.subr.bf16.mxu1 %v9045_v18  ;;  %v10159_v30 = vpack.c.bf16 %v1585_v53, %v1583_v47  ;;  %v2944_v48 = vsel %vm2942_vm0, %v8276_v32, 0  ;;  %v9077_v18 = vld [vmem:[%s12672_s7 + $0xf4] ss:$12 sps:$4 sm:$0xff]   ;;  %v9075_v61 = vld [vmem:[%s12672_s7 + $0xf0] ss:$12 sps:$4 sm:$0xff]  }
 0x200   : > { %v9078_v32 = vld [vmem:[%s12672_s7 + $0xd8] ss:$12 sps:$4 sm:$0xff]  }
 0x201   : > { %v10157_v0 = vpack.c.bf16 %v1586_v23, %v1584_v36  ;;  %v9080_v36 = vld [vmem:[%s12672_s7 + $0xdc] ss:$12 sps:$4 sm:$0xff]  }
 0x202   : > { %2961 = vmatpush1.bf16.msra.mxu1 %v9043_v42 }
 0x203   : > { %2090 = vmatprep.mubr.bf16.mxu1 %v10157_v0  ;;  %2962 = vmatprep.subr.bf16.mxu1 %v9050_v24 }
 0x204   : > { %2091 = vmatmul.mubr.bf16.gmra.mxu1 %v10159_v30 }
 0x206   : > { %2214 = vmatmul.mubr.bf16.vlgmr.msra.gmra.mxu0 %v9992_v20  ;;  %2963 = vmatpush1.bf16.msra.mxu1 %v9048_v46  ;;  %v9083_v46 = vld [vmem:[%s12672_s7 + $0xc4] ss:$12 sps:$4 sm:$0xff]  }
 0x207   : > { %2221 = vmatprep.mubr.bf16.mxu0 %v10002_v29  ;;  %3154 = vmatpush1.bf16.msra.mxu0 %v2944_v48 }
 0x208   : > { %2964 = vmatprep.subr.bf16.mxu1 %v9053_v54  ;;  %3155 = vmatprep.subr.bf16.mxu0 %v9074_v14  ;;  %v9087_v14 = vld [vmem:[%s12672_s7 + $0x180] ss:$12 sps:$4 sm:$0xff]  }
 0x209   : > { %v1476_v34 = vpop.f32.mrf.mxu0 }
 0x20a   : > { %2965 = vmatpush1.bf16.msra.mxu1 %v9051_v26  ;;  %v1477_v39 = vadd.f32 %v1476_v34, %v9972_v37 }
 0x20b   : > { %v1478_v20 = vpop.f32.mrf.mxu0  ;;  %2966 = vmatprep.subr.bf16.mxu1 %v9056_v56  ;;  %3156 = vmatpush1.bf16.msra.mxu0 %v9072_v45 }
 0x20c   : > { %v1479_v29 = vadd.f32 %v1478_v20, %v9960_v3  ;;  %v1587_v15 = vmax.f32 %v1477_v39, 0.0 }
 0x20d   : > { %v1480_v55 = vpop.f32.mrf.mxu0 }
 0x20e   : > { %v1481_v13 = vadd.f32 %v1480_v55, %v9972_v37  ;;  %2222 = vmatmul.mubr.bf16.gmra.mxu0 %v10021_v12  ;;  %2967 = vmatpush1.bf16.msra.mxu1 %v9054_v51  ;;  %v1588_v5 = vmax.f32 %v1479_v29, 0.0 }
 0x20f   : > { %v1482_v27 = vpop.f32.mrf.mxu0  ;;  %2229 = vmatprep.mubr.bf16.mxu0 %v10031_v62  ;;  %2968 = vmatprep.subr.bf16.mxu1 %v9059_v21 }
 0x210   : > { %v1483_v40 = vadd.f32 %v1482_v27, %v9960_v3  ;;  %v1589_v4 = vmax.f32 %v1481_v13, 0.0  ;;  %v9084_v13 = vld [vmem:[%s12672_s7 + $0x198] ss:$12 sps:$4 sm:$0xff]  }
 0x212   : > { %v1590_v12 = vmax.f32 %v1483_v40, 0.0  ;;  %2969 = vmatpush2.bf16.msra.mxu1 %v9057_v58  ;;  %v10201_v62 = vpack.c.bf16 %v1589_v4, %v1587_v15  ;;  %v9086_v58 = vld [vmem:[%s12672_s7 + $0x19c] ss:$12 sps:$4 sm:$0xff]  }
 0x213   : > { %2970 = vmatprep.subr.bf16.mxu1 %v9062_v63  ;;  %3157 = vmatprep.subr.bf16.mxu0 %v9086_v58 }
 0x214   : > { %v10196_v38 = vpack.c.bf16 %v1590_v12, %v1588_v5  ;;  %3158 = vmatpush1.bf16.msra.mxu0 %v9084_v13 }
 0x216   : > { %2100 = vmatprep.mubr.bf16.mxu1 %v10196_v38  ;;  %2230 = vmatmul.mubr.bf16.gmra.mxu0 %v10051_v11  ;;  %v9068_v11 = vld [vmem:[%s12672_s7 + $0x124] ss:$12 sps:$4 sm:$0xff]  }
 0x217   : > { %2101 = vmatmul.mubr.bf16.gmra.mxu1 %v10201_v62  ;;  %2237 = vmatprep.mubr.bf16.mxu0 %v10059_v33 }
 0x218   : > { %2971 = vmatpush2.bf16.msra.mxu1 %v9060_v9 }
 0x219   : > { %2972 = vmatprep.subr.bf16.mxu1 %v9065_v10 }
 0x21c   : > { %v1486_v33 = vpop.f32.mrf.mxu0  ;;  %2973 = vmatpush2.bf16.msra.mxu1 %v9063_v60 }
 0x21d   : > { %2974 = vmatprep.subr.bf16.mxu1 %v9068_v11  ;;  %v1487_v19 = vadd.f32 %v1486_v33, %v9972_v37 }
 0x21e   : > { %v1488_v28 = vpop.f32.mrf.mxu0  ;;  %2238 = vmatmul.mubr.bf16.gmra.mxu0 %v10080_v25 }
 0x21f   : > { %2245 = vmatprep.mubr.bf16.mxu0 %v10088_v35  ;;  %v1489_v50 = vadd.f32 %v1488_v28, %v9960_v3  ;;  %v1591_v23 = vmax.f32 %v1487_v19, 0.0 }
 0x220   : > { %v1490_v59 = vpop.f32.mrf.mxu0  ;;  %2975 = vmatpush2.bf16.msra.mxu1 %v9066_v16 }
 0x221   : > { %v1491_v41 = vadd.f32 %v1490_v59, %v9972_v37  ;;  %2976 = vmatprep.subr.bf16.mxu1 %v9071_v1  ;;  %v1592_v53 = vmax.f32 %v1489_v50, 0.0 }
 0x222   : > { %v1492_v25 = vpop.f32.mrf.mxu0 }
 0x223   : > { %v1493_v35 = vadd.f32 %v1492_v25, %v9960_v3  ;;  %v1593_v22 = vmax.f32 %v1491_v41, 0.0 }
 0x224   : > { %2977 = vmatpush2.bf16.msra.mxu1 %v9069_v17 }
 0x225   : > { %v1594_v42 = vmax.f32 %v1493_v35, 0.0  ;;  %2978 = vmatprep.subr.bf16.mxu1 %v9077_v18  ;;  %v1637_v47 = vpack.c.bf16 %v1593_v22, %v1591_v23 }
 0x226   : > { %2246 = vmatmul.mubr.bf16.gmra.mxu0 %v10117_v7  ;;  %v9081_v7 = vld [vmem:[%s12672_s7 + $0xc0] ss:$12 sps:$4 sm:$0xff]  }
 0x227   : > { %2253 = vmatprep.mubr.bf16.mxu0 %v10121_v2  ;;  %v1638_v24 = vpack.c.bf16 %v1594_v42, %v1592_v53 }
 0x228   : > { %2979 = vmatpush2.bf16.msra.mxu1 %v9075_v61 }
 0x229   : > { %2110 = vmatprep.mubr.bf16.mxu1 %v1638_v24  ;;  %2980 = vmatprep.subr.bf16.mxu1 %v9080_v36 }
 0x22a   : > { %2111 = vmatmul.mubr.bf16.gmra.mxu1 %v1637_v47 }
 0x22c   : > { %2981 = vmatpush2.bf16.msra.mxu1 %v9078_v32 }
 0x22d   : > { %2982 = vmatprep.subr.bf16.mxu1 %v9083_v46 }
 0x22e   : > { %2254 = vmatmul.mubr.bf16.gmra.mxu0 %v10145_v52 }
 0x22f   : > { %v1496_v2 = vpop.f32.mrf.mxu0  ;;  %2261 = vmatprep.mubr.bf16.mxu0 %v10093_v44 }
 0x230   : > { %2983 = vmatpush2.bf16.msra.mxu1 %v9081_v7  ;;  %v1497_v34 = vadd.f32 %v1496_v2, %v9972_v37 }
 0x231   : > { %v1498_v48 = vpop.f32.mrf.mxu0 }
 0x232   : > { %v1499_v26 = vadd.f32 %v1498_v48, %v9960_v3  ;;  %v1595_v44 = vmax.f32 %v1497_v34, 0.0  ;;  %v10298_v34 = vld [vmem:[%s12672_s7 + $0x1d0] ss:$0 sps:$4 sm:$0xff]  }
 0x233   : > { %v1500_v54 = vpop.f32.mrf.mxu0 }
 0x234   : > { %v1501_v56 = vadd.f32 %v1500_v54, %v9972_v37  ;;  %v1596_v52 = vmax.f32 %v1499_v26, 0.0  ;;  %v9090_v26 = vld [vmem:[%s12672_s7 + $0x170] ss:$12 sps:$4 sm:$0xff]  }
 0x235   : > { %v1502_v51 = vpop.f32.mrf.mxu0  ;;  %8506 = vmatprep.subr.bf16.mxu1 %v9090_v26 }
 0x236   : > { %v1503_v20 = vadd.f32 %v1502_v51, %v9960_v3  ;;  %2262 = vmatmul.mubr.bf16.gmra.mxu0 %v10100_v57  ;;  %v1597_v21 = vmax.f32 %v1501_v56, 0.0 }
 0x237   : > { %2269 = vmatprep.mubr.bf16.mxu0 %v10157_v0 }
 0x238   : > { %v1598_v55 = vmax.f32 %v1503_v20, 0.0  ;;  %v1639_v39 = vpack.c.bf16 %v1597_v21, %v1595_v44 }
 0x23a   : > { %v1640_v29 = vpack.c.bf16 %v1598_v55, %v1596_v52 }
 0x23c   : > { %2120 = vmatprep.mubr.bf16.mxu1 %v1640_v29 }
 0x23d   : > { %2121 = vmatmul.mubr.bf16.gmra.mxu1 %v1639_v39 }
 0x23e   : > { %2270 = vmatmul.mubr.bf16.gmra.mxu0 %v10159_v30 }
 0x23f   : > { %2277 = vmatprep.mubr.bf16.mxu0 %v10196_v38 }
 0x242   : > { %v1506_v57 = vpop.f32.mrf.mxu0 }
 0x243   : > { %v1507_v4 = vadd.f32 %v1506_v57, %v9972_v37 }
 0x244   : > { %v1508_v0 = vpop.f32.mrf.mxu0 }
 0x245   : > { %v1509_v63 = vadd.f32 %v1508_v0, %v9960_v3  ;;  %v1599_v10 = vmax.f32 %v1507_v4, 0.0 }
 0x246   : > { %v1510_v27 = vpop.f32.mrf.mxu0  ;;  %2278 = vmatmul.mubr.bf16.gmra.mxu0 %v10201_v62  ;;  %v9089_v62 = vld [vmem:[%s12672_s7 + $0x184] ss:$12 sps:$4 sm:$0xff]  }
 0x247   : > { %v1511_v40 = vadd.f32 %v1510_v27, %v9972_v37  ;;  %2285 = vmatprep.mubr.bf16.mxu0 %v1638_v24  ;;  %v1600_v9 = vmax.f32 %v1509_v63, 0.0  ;;  %3159 = vmatprep.subr.bf16.mxu0 %v9089_v62 }
 0x248   : > { %v1512_v5 = vpop.f32.mrf.mxu0  ;;  %3160 = vmatpush1.bf16.msra.mxu0 %v9087_v14 }
 0x249   : > { %v1513_v12 = vadd.f32 %v1512_v5, %v9960_v3  ;;  %v1601_v15 = vmax.f32 %v1511_v40, 0.0  ;;  %8822 = vmatprep.subr.msk.bf16.mxu0 %vm2942_vm0, %v10298_v34 }
 0x24b   : > { %v1602_v30 = vmax.f32 %v1513_v12, 0.0  ;;  %v1641_v45 = vpack.c.bf16 %v1601_v15, %v1599_v10 }
 0x24d   : > { %v1642_v38 = vpack.c.bf16 %v1602_v30, %v1600_v9  ;;  %v10313_v30 = vld [vmem:[%s541_s30] sm:$0x7] }
 0x24e   : > { %2286 = vmatmul.mubr.bf16.gmra.mxu0 %v1637_v47  ;;  %v10318_v62 = vrot.slane %v10313_v30, %v9952_v43 }
 0x24f   : > { %2130 = vmatprep.mubr.bf16.mxu1 %v1642_v38  ;;  %2293 = vmatprep.mubr.bf16.mxu0 %v1640_v29 }
 0x250   : > { %2131 = vmatmul.mubr.bf16.gmra.mxu1 %v1641_v45 }
 0x255   : > { %v1516_v60 = vpop.f32.mrf.mxu0 }
 0x256   : > { %2294 = vmatmul.mubr.bf16.gmra.mxu0 %v1639_v39  ;;  %v1517_v28 = vadd.f32 %v1516_v60, %v9972_v37 }
 0x257   : > { %v1518_v11 = vpop.f32.mrf.mxu0  ;;  %2301 = vmatprep.mubr.bf16.mxu0 %v1642_v38 }
 0x258   : > { %v1519_v16 = vadd.f32 %v1518_v11, %v9960_v3  ;;  %v1603_v19 = vmax.f32 %v1517_v28, 0.0  ;;  %v10322_v11 = vrot.slane %v10313_v30, %v9965_v8 }
 0x259   : > { %v1520_v33 = vpop.f32.mrf.mxu0 }
 0x25a   : > { %v1521_v1 = vadd.f32 %v1520_v33, %v9972_v37  ;;  %v1604_v41 = vmax.f32 %v1519_v16, 0.0 }
 0x25b   : > { %v1522_v59 = vpop.f32.mrf.mxu0 }
 0x25c   : > { %v1523_v17 = vadd.f32 %v1522_v59, %v9960_v3  ;;  %v1605_v50 = vmax.f32 %v1521_v1, 0.0 }
 0x25e   : > { %v1606_v18 = vmax.f32 %v1523_v17, 0.0  ;;  %2302 = vmatmul.mubr.bf16.gmra.mxu0 %v1641_v45  ;;  %v1643_v35 = vpack.c.bf16 %v1605_v50, %v1603_v19 }
 0x260   : > { %v1644_v25 = vpack.c.bf16 %v1606_v18, %v1604_v41 }
 0x262   : > { %2140 = vmatprep.mubr.bf16.mxu1 %v1644_v25  ;;  %2309 = vmatprep.mubr.bf16.mxu0 %v1644_v25 }
 0x263   : > { %2141 = vmatmul.mubr.bf16.gmra.mxu1 %v1643_v35 }
 0x266   : > { %2310 = vmatmul.mubr.bf16.gmra.mxu0 %v1643_v35 }
 0x268   : > { %v1526_v22 = vpop.f32.mrf.mxu0 }
 0x269   : > { %v1527_v23 = vadd.f32 %v1526_v22, %v9972_v37 }
 0x26a   : > { %v1528_v61 = vpop.f32.mrf.mxu0 }
 0x26b   : > { %v1529_v42 = vadd.f32 %v1528_v61, %v9960_v3  ;;  %v1607_v2 = vmax.f32 %v1527_v23, 0.0 }
 0x26c   : > { %v1530_v53 = vpop.f32.mrf.mxu0 }
 0x26d   : > { %v1531_v36 = vadd.f32 %v1530_v53, %v9972_v37  ;;  %v1608_v46 = vmax.f32 %v1529_v42, 0.0  ;;  %v9091_v42 = vld [vmem:[%s12672_s7 + $0xb0] ss:$12 sps:$4 sm:$0xff]  }
 0x26e   : > { %v1532_v24 = vpop.f32.mrf.mxu0 }
 0x26f   : > { %v1533_v47 = vadd.f32 %v1532_v24, %v9960_v3  ;;  %v1609_v32 = vmax.f32 %v1531_v36, 0.0  ;;  %v9093_v24 = vld [vmem:[%s12672_s7 + $0x158] ss:$12 sps:$4 sm:$0xff]  }
 0x271   : > { %v1610_v7 = vmax.f32 %v1533_v47, 0.0  ;;  %v1645_v54 = vpack.c.bf16 %v1609_v32, %v1607_v2 }
 0x273   : > { %v1646_v48 = vpack.c.bf16 %v1610_v7, %v1608_v46 }
 0x275   : > { %2150 = vmatprep.mubr.bf16.mxu1 %v1646_v48  ;;  %2317 = vmatprep.mubr.bf16.mxu0 %v1646_v48  ;;  %v9094_v48 = vld [vmem:[%s12672_s7 + $0x98] ss:$12 sps:$4 sm:$0xff]  }
 0x276   : > { %2151 = vmatmul.mubr.bf16.gmra.mxu1 %v1645_v54  ;;  %2318 = vmatmul.mubr.bf16.gmra.mxu0 %v1645_v54 }
 0x27b   : > { %v1536_v56 = vpop.f32.mrf.mxu0 }
 0x27c   : > { %v1537_v55 = vadd.f32 %v1536_v56, %v9972_v37  ;;  %v9095_v56 = vld [vmem:[%s12672_s7 + $0x140] ss:$12 sps:$4 sm:$0xff]  }
 0x27d   : > { %v1538_v51 = vpop.f32.mrf.mxu0 }
 0x27e   : > { %v1539_v21 = vadd.f32 %v1538_v51, %v9960_v3  ;;  %v1611_v57 = vmax.f32 %v1537_v55, 0.0 }
 0x27f   : > { %v1540_v20 = vpop.f32.mrf.mxu0 }
 0x280   : > { %v1541_v52 = vadd.f32 %v1540_v20, %v9972_v37  ;;  %v1612_v58 = vmax.f32 %v1539_v21, 0.0 }
 0x281   : > { %v1542_v44 = vpop.f32.mrf.mxu0 }
 0x282   : > { %v1543_v29 = vadd.f32 %v1542_v44, %v9960_v3  ;;  %v1613_v13 = vmax.f32 %v1541_v52, 0.0  ;;  %v9096_v44 = vld [vmem:[%s12672_s7 + $0x80] ss:$12 sps:$4 sm:$0xff]  }
 0x284   : > { %v1614_v39 = vmax.f32 %v1543_v29, 0.0  ;;  %v1647_v27 = vpack.c.bf16 %v1613_v13, %v1611_v57 }
 0x286   : > { %v1648_v0 = vpack.c.bf16 %v1614_v39, %v1612_v58  ;;  %v9098_v58 = vld [vmem:[%s12672_s7 + $0x128] ss:$12 sps:$4 sm:$0xff]  }
 0x288   : > { %2160 = vmatprep.mubr.bf16.mxu1 %v1648_v0  ;;  %2325 = vmatprep.mubr.bf16.mxu0 %v1648_v0 }
 0x289   : > { %2161 = vmatmul.mubr.bf16.gmra.mxu1 %v1647_v27  ;;  %2326 = vmatmul.mubr.bf16.gmra.mxu0 %v1647_v27 }
 0x28e   : > { %v1546_v63 = vpop.f32.mrf.mxu0 }
 0x28f   : > { %v1547_v15 = vadd.f32 %v1546_v63, %v9972_v37 }
 0x290   : > { %v1548_v40 = vpop.f32.mrf.mxu0 }
 0x291   : > { %v1549_v5 = vadd.f32 %v1548_v40, %v9960_v3  ;;  %v1615_v33 = vmax.f32 %v1547_v15, 0.0  ;;  %v9099_v40 = vld [vmem:[%s12672_s7 + $0x68] ss:$12 sps:$4 sm:$0xff]  }
 0x292   : > { %v1550_v4 = vpop.f32.mrf.mxu0 }
 0x293   : > { %v1551_v12 = vadd.f32 %v1550_v4, %v9972_v37  ;;  %v1616_v14 = vmax.f32 %v1549_v5, 0.0 }
 0x294   : > { %v1552_v9 = vpop.f32.mrf.mxu0 }
 0x295   : > { %v1553_v10 = vadd.f32 %v1552_v9, %v9960_v3  ;;  %v1617_v38 = vmax.f32 %v1551_v12, 0.0 }
 0x296   : > { %v2022_v45 = vpop.f32.mrf.mxu0 }
 0x297   : > { %v1618_v60 = vmax.f32 %v1553_v10, 0.0  ;;  %v1649_v1 = vpack.c.bf16 %v1617_v38, %v1615_v33  ;;  %v2023_v17 = vadd.f32 %v2022_v45, %v10322_v11 }
 0x298   : > { %v2024_v16 = vpop.f32.mrf.mxu0 }
 0x299   : > { %v1650_v37 = vpack.c.bf16 %v1618_v60, %v1616_v14  ;;  %v2025_v59 = vadd.f32 %v2024_v16, %v10318_v62  ;;  %v2342_v22 = vmax.f32 %v2023_v17, 0.0  ;;  %v9100_v16 = vld [vmem:[%s12672_s7 + $0x110] ss:$12 sps:$4 sm:$0xff]  }
 0x29a   : > { %v2026_v28 = vpop.f32.mrf.mxu0 }
 0x29b   : > { %v2027_v3 = vadd.f32 %v2026_v28, %v10322_v11  ;;  %2170 = vmatprep.mubr.bf16.mxu1 %v1650_v37  ;;  %2333 = vmatprep.mubr.bf16.mxu0 %v1650_v37  ;;  %v2343_v25 = vmax.f32 %v2025_v59, 0.0  ;;  %v9101_v37 = vld [vmem:[%s12672_s7 + $0x50] ss:$12 sps:$4 sm:$0xff]  }
 0x29c   : > { %v2028_v50 = vpop.f32.mrf.mxu0  ;;  %2171 = vmatmul.mubr.bf16.gmra.mxu1 %v1649_v1  ;;  %2334 = vmatmul.mubr.bf16.gmra.mxu0 %v1649_v1 }
 0x29d   : > { %v2029_v41 = vadd.f32 %v2028_v50, %v10318_v62  ;;  %3177 = vmatprep.mubr.bf16.mxu0 %v12685_v6  ;;  %v2345_v18 = vmax.f32 %v2027_v3, 0.0 }
 0x29e   : > { %v2032_v19 = vpop.f32.mrf.mxu0 }
 0x29f   : > { %v2346_v35 = vmax.f32 %v2029_v41, 0.0  ;;  %v10334_v36 = vpack.c.bf16 %v2345_v18, %v2342_v22  ;;  %v2033_v46 = vadd.f32 %v2032_v19, %v10322_v11 }
 0x2a0   : > { %v2034_v61 = vpop.f32.mrf.mxu0 }
 0x2a1   : > { %v10329_v53 = vpack.c.bf16 %v2346_v35, %v2343_v25  ;;  %v2035_v47 = vadd.f32 %v2034_v61, %v10318_v62  ;;  %v2348_v21 = vmax.f32 %v2033_v46, 0.0 }
 0x2a2   : > { %v2036_v23 = vpop.f32.mrf.mxu0 }
 0x2a3   : > { %v2037_v32 = vadd.f32 %v2036_v23, %v10322_v11  ;;  %2984 = vmatprep.mubr.bf16.mxu1 %v10329_v53  ;;  %v2349_v51 = vmax.f32 %v2035_v47, 0.0 }
 0x2a4   : > { %v2038_v7 = vpop.f32.mrf.mxu0  ;;  %2985 = vmatmul.mubr.bf16.vlgmr.msra.gmra.mxu1 %v10334_v36 }
 0x2a5   : > { %v2039_v2 = vadd.f32 %v2038_v7, %v10318_v62  ;;  %8507 = vmatpush3.bf16.msra.mxu1 %v9091_v42  ;;  %v2351_v54 = vmax.f32 %v2037_v32, 0.0 }
 0x2a6   : > { %v2042_v26 = vpop.f32.mrf.mxu0  ;;  %8508 = vmatprep.subr.bf16.mxu1 %v9093_v24 }
 0x2a7   : > { %v2352_v20 = vmax.f32 %v2039_v2, 0.0  ;;  %v10356_v29 = vpack.c.bf16 %v2351_v54, %v2348_v21  ;;  %v2043_v0 = vadd.f32 %v2042_v26, %v10322_v11 }
 0x2a8   : > { %v2044_v52 = vpop.f32.mrf.mxu0 }
 0x2a9   : > { %v10351_v55 = vpack.c.bf16 %v2352_v20, %v2349_v51  ;;  %8509 = vmatpush3.bf16.msra.mxu1 %v9094_v48  ;;  %v2045_v39 = vadd.f32 %v2044_v52, %v10318_v62  ;;  %v2354_v9 = vmax.f32 %v2043_v0, 0.0  ;;  %v9104_v0 = vld [vmem:[%s12672_s7 + $0x38] ss:$12 sps:$4 sm:$0xff]  }
 0x2aa   : > { %v2046_v13 = vpop.f32.mrf.mxu0  ;;  %8510 = vmatprep.subr.bf16.mxu1 %v9095_v56 }
 0x2ab   : > { %v2047_v57 = vadd.f32 %v2046_v13, %v10322_v11  ;;  %2994 = vmatprep.mubr.bf16.mxu1 %v10351_v55  ;;  %v2355_v12 = vmax.f32 %v2045_v39, 0.0 }
 0x2ac   : > { %v2048_v27 = vpop.f32.mrf.mxu0  ;;  %2995 = vmatmul.mubr.bf16.gmra.mxu1 %v10356_v29 }
 0x2ad   : > { %v2049_v63 = vadd.f32 %v2048_v27, %v10318_v62  ;;  %8511 = vmatpush3.bf16.msra.mxu1 %v9096_v44  ;;  %v2357_v4 = vmax.f32 %v2047_v57, 0.0  ;;  %v9103_v57 = vld [vmem:[%s12672_s7 + $0xf8] ss:$12 sps:$4 sm:$0xff]  }
 0x2ae   : > { %v2052_v5 = vpop.f32.mrf.mxu0  ;;  %8512 = vmatprep.subr.bf16.mxu1 %v9098_v58 }
 0x2af   : > { %v2358_v15 = vmax.f32 %v2049_v63, 0.0  ;;  %v10372_v45 = vpack.c.bf16 %v2357_v4, %v2354_v9  ;;  %v2053_v1 = vadd.f32 %v2052_v5, %v10322_v11  ;;  %v10415_v4 = vsub.s32 2, %v9947_v49 }
 0x2b0   : > { %v2054_v10 = vpop.f32.mrf.mxu0 }
 0x2b1   : > { %v10370_v38 = vpack.c.bf16 %v2358_v15, %v2355_v12  ;;  %8513 = vmatpush3.bf16.msra.mxu1 %v9099_v40  ;;  %v2055_v60 = vadd.f32 %v2054_v10, %v10318_v62  ;;  %v10384_v28 = vpop.f32.mrf.mxu1  ;;  %v2360_v19 = vmax.f32 %v2053_v1, 0.0  ;;  %12716 = vst [vmem:[#allocation12_spill] sm:$0xff] %v10415_v4 }
 0x2b2   : > { %v2056_v14 = vpop.f32.mrf.mxu0  ;;  %8514 = vmatprep.subr.bf16.mxu1 %v9100_v16 }
 0x2b3   : > { %v2057_v33 = vadd.f32 %v2056_v14, %v10322_v11  ;;  %3004 = vmatprep.mubr.bf16.mxu1 %v10370_v38  ;;  %v2361_v41 = vmax.f32 %v2055_v60, 0.0  ;;  %v2084_v25 = vpop.f32.mrf.mxu1 }
 0x2b4   : > { %v2058_v59 = vpop.f32.mrf.mxu0  ;;  %3005 = vmatmul.mubr.bf16.gmra.mxu1 %v10372_v45  ;;  %v2085_v5 = vadd.f32 %v2084_v25, %v10318_v62 }
 0x2b5   : > { %v2059_v3 = vadd.f32 %v2058_v59, %v10318_v62  ;;  %v2363_v17 = vmax.f32 %v2057_v33, 0.0  ;;  %8515 = vmatpush3.bf16.msra.mxu1 %v9101_v37  ;;  %v2086_v47 = vpop.f32.mrf.mxu1  ;;  %v10421_v59 = vrot.slane %v10313_v30, %v10415_v4  ;;  %v2083_v30 = vadd.f32 %v10384_v28, %v10322_v11 }
 0x2b6   : > { %v2062_v50 = vpop.f32.mrf.mxu0  ;;  %8516 = vmatprep.subr.bf16.mxu1 %v9103_v57 }
 0x2b7   : > { %v2364_v18 = vmax.f32 %v2059_v3, 0.0  ;;  %v10390_v61 = vpack.c.bf16 %v2363_v17, %v2360_v19  ;;  %v2063_v32 = vadd.f32 %v2062_v50, %v10322_v11  ;;  %v2088_v51 = vpop.f32.mrf.mxu1  ;;  %v2379_v3 = vmax.f32 %v2085_v5, 0.0 }
 0x2b8   : > { %v2064_v35 = vpop.f32.mrf.mxu0  ;;  %v2089_v13 = vadd.f32 %v2088_v51, %v10318_v62 }
 0x2b9   : > { %v10388_v22 = vpack.c.bf16 %v2364_v18, %v2361_v41  ;;  %v2065_v23 = vadd.f32 %v2064_v35, %v10318_v62  ;;  %v2366_v56 = vmax.f32 %v2063_v32, 0.0  ;;  %8517 = vmatpush3.bf16.msra.mxu1 %v9104_v0  ;;  %v2087_v41 = vadd.f32 %v2086_v47, %v10322_v11 }
 0x2ba   : > { %v2066_v42 = vpop.f32.mrf.mxu0  ;;  %v2382_v14 = vmax.f32 %v2089_v13, 0.0  ;;  %v2950_v0 = vsel %vm2942_vm0, %v10298_v34, 0  ;;  %v9105_v34 = vld [vmem:[%s12672_s7 + $0xe0] ss:$12 sps:$4 sm:$0xff]  }
 0x2bb   : > { %v2067_v24 = vadd.f32 %v2066_v42, %v10322_v11  ;;  %3014 = vmatprep.mubr.bf16.mxu1 %v10388_v22  ;;  %v2367_v54 = vmax.f32 %v2065_v23, 0.0  ;;  %8518 = vmatprep.subr.bf16.mxu1 %v9105_v34 }
 0x2bc   : > { %v2068_v46 = vpop.f32.mrf.mxu0  ;;  %3015 = vmatmul.mubr.bf16.gmra.mxu1 %v10390_v61  ;;  %v10430_v42 = vpack.c.bf16 %v2382_v14, %v2379_v3 }
 0x2bd   : > { %v2069_v7 = vadd.f32 %v2068_v46, %v10318_v62  ;;  %v2369_v2 = vmax.f32 %v2067_v24, 0.0  ;;  %v2381_v46 = vmax.f32 %v2087_v41, 0.0 }
 0x2be   : > { %v2072_v48 = vpop.f32.mrf.mxu0 }
 0x2bf   : > { %v2370_v26 = vmax.f32 %v2069_v7, 0.0  ;;  %v10400_v52 = vpack.c.bf16 %v2369_v2, %v2366_v56  ;;  %v2073_v27 = vadd.f32 %v2072_v48, %v10322_v11 }
 0x2c0   : > { %v2074_v20 = vpop.f32.mrf.mxu0 }
 0x2c1   : > { %v10398_v21 = vpack.c.bf16 %v2370_v26, %v2367_v54  ;;  %v2075_v58 = vadd.f32 %v2074_v20, %v10318_v62  ;;  %v2372_v16 = vmax.f32 %v2073_v27, 0.0  ;;  %v2378_v54 = vmax.f32 %v2083_v30, 0.0  ;;  %v9097_v27 = vld [vmem:[%s12672_s7 + $0x1b8] ss:$12 sps:$4 sm:$0xff]  }
 0x2c2   : > { %v2076_v44 = vpop.f32.mrf.mxu0 }
 0x2c3   : > { %v2077_v39 = vadd.f32 %v2076_v44, %v10322_v11  ;;  %3024 = vmatprep.mubr.bf16.mxu1 %v10398_v21  ;;  %v2373_v60 = vmax.f32 %v2075_v58, 0.0  ;;  %v10439_v44 = vpack.c.bf16 %v2381_v46, %v2378_v54 }
 0x2c4   : > { %v2078_v63 = vpop.f32.mrf.mxu0  ;;  %v2092_v40 = vpop.f32.mrf.mxu1  ;;  %3025 = vmatmul.mubr.bf16.gmra.mxu1 %v10400_v52 }
 0x2c5   : > { %v2079_v12 = vadd.f32 %v2078_v63, %v10318_v62  ;;  %v2375_v15 = vmax.f32 %v2077_v39, 0.0  ;;  %v2093_v63 = vadd.f32 %v2092_v40, %v10322_v11  ;;  %v9106_v40 = vld [vmem:[%s12672_s7 + $0x20] ss:$12 sps:$4 sm:$0xff]  }
 0x2c6   : > { %v2094_v9 = vpop.f32.mrf.mxu1  ;;  %v8410_v10 = vpop.f32.mrf.mxu0  ;;  %8519 = vmatpush3.bf16.msra.mxu1 %v9106_v40 }
 0x2c7   : > { %v2376_v33 = vmax.f32 %v2079_v12, 0.0  ;;  %v10426_v18 = vpack.c.bf16 %v2375_v15, %v2372_v16  ;;  %v2095_v24 = vadd.f32 %v2094_v9, %v10318_v62  ;;  %v2384_v16 = vmax.f32 %v2093_v63, 0.0 }
 0x2c8   : > { %v2096_v37 = vpop.f32.mrf.mxu1  ;;  %v8411_v1 = vpop.f32.mrf.mxu0 }
 0x2c9   : > { %v8412_v17 = vadd.f32 %v8411_v1, %v8410_v10  ;;  %v10423_v50 = vpack.c.bf16 %v2376_v33, %v2373_v60  ;;  %v2385_v56 = vmax.f32 %v2095_v24, 0.0  ;;  %v2097_v13 = vadd.f32 %v2096_v37, %v10322_v11  ;;  %v9102_v33 = vld [vmem:[%s12672_s7 + $0x1a0] ss:$12 sps:$4 sm:$0xff]  }
 0x2ca   : > { %v2098_v19 = vpop.f32.mrf.mxu1  ;;  %v8413_v25 = vpop.f32.mrf.mxu0 }
 0x2cb   : > { %v2099_v35 = vadd.f32 %v2098_v19, %v10318_v62  ;;  %3034 = vmatprep.mubr.bf16.mxu1 %v10423_v50  ;;  %v2216_v47 = vadd.f32 %v8412_v17, %v10421_v59  ;;  %v2387_v9 = vmax.f32 %v2097_v13, 0.0 }
 0x2cc   : > { %v8414_v23 = vpop.f32.mrf.mxu0  ;;  %3035 = vmatmul.mubr.bf16.gmra.mxu1 %v10426_v18 }
 0x2cd   : > { %v8415_v32 = vadd.f32 %v8414_v23, %v8413_v25  ;;  %3044 = vmatprep.mubr.bf16.mxu1 %v10430_v42  ;;  %v2388_v2 = vmax.f32 %v2099_v35, 0.0  ;;  %v2344_v51 = vmax.f32 %v2216_v47, 0.0  ;;  %v10468_v19 = vpack.c.bf16 %v2387_v9, %v2384_v16  ;;  %v9107_v23 = vld [vmem:[%s12672_s7 + $0x188] ss:$12 sps:$4 sm:$0xff]  }
 0x2ce   : > { %v8416_v7 = vpop.f32.mrf.mxu0 }
 0x2cf   : > { %v2219_v48 = vadd.f32 %v8415_v32, %v10421_v59  ;;  %v10444_v57 = vpack.c.bf16 %v2388_v2, %v2385_v56 }
 0x2d0   : > { %v8417_v26 = vpop.f32.mrf.mxu0 }
 0x2d1   : > { %v2347_v28 = vmax.f32 %v2219_v48, 0.0  ;;  %v8418_v20 = vadd.f32 %v8417_v26, %v8416_v7 }
 0x2d2   : > { %v8419_v58 = vpop.f32.mrf.mxu0 }
 0x2d3   : > { %v10442_v39 = vpack.c.bf16 %v2347_v28, %v2344_v51  ;;  %v2224_v12 = vadd.f32 %v8418_v20, %v10421_v59 }
 0x2d4   : > { %v8420_v5 = vpop.f32.mrf.mxu0  ;;  %3045 = vmatmul.mubr.bf16.gmra.mxu1 %v10439_v44 }
 0x2d5   : > { %v8421_v15 = vadd.f32 %v8420_v5, %v8419_v58  ;;  %3054 = vmatprep.mubr.bf16.mxu1 %v10444_v57  ;;  %8280 = vmatmul.mubr.msk.bf16.vlgmr.msra.gmra.mxu0 %vm2893_vm1, %v10442_v39  ;;  %v2350_v1 = vmax.f32 %v2224_v12, 0.0 }
 0x2d6   : > { %v8422_v10 = vpop.f32.mrf.mxu0  ;;  %3187 = vmatprep.mubr.bf16.mxu0 %v12685_v6  ;;  %8751 = vmatpush3.bf16.msra.mxu0 %v2950_v0 }
 0x2d7   : > { %v2227_v14 = vadd.f32 %v8421_v15, %v10421_v59  ;;  %v2102_v60 = vpop.f32.mrf.mxu1  ;;  %8752 = vmatprep.subr.bf16.mxu0 %v9097_v27 }
 0x2d8   : > { %v8423_v37 = vpop.f32.mrf.mxu0  ;;  %v2103_v46 = vadd.f32 %v2102_v60, %v10322_v11 }
 0x2d9   : > { %v2353_v3 = vmax.f32 %v2227_v14, 0.0  ;;  %v8424_v17 = vadd.f32 %v8423_v37, %v8422_v10  ;;  %v2104_v41 = vpop.f32.mrf.mxu1  ;;  %v9108_v14 = vld [vmem:[%s12672_s7 + $0xc8] ss:$12 sps:$4 sm:$0xff]  }
 0x2da   : > { %v8425_v25 = vpop.f32.mrf.mxu0  ;;  %8753 = vmatpush3.bf16.msra.mxu0 %v9097_v27  ;;  %v2105_v24 = vadd.f32 %v2104_v41, %v10318_v62  ;;  %v2390_v58 = vmax.f32 %v2103_v46, 0.0  ;;  %8520 = vmatprep.subr.bf16.mxu1 %v9108_v14 }
 0x2db   : > { %v10470_v35 = vpack.c.bf16 %v2353_v3, %v2350_v1  ;;  %v2106_v30 = vpop.f32.mrf.mxu1  ;;  %8754 = vmatprep.subr.bf16.mxu0 %v9102_v33  ;;  %v2232_v7 = vadd.f32 %v8424_v17, %v10421_v59  ;;  %v9109_v17 = vld [vmem:[%s12672_s7 + $0x8] ss:$12 sps:$4 sm:$0xff]  }
 0x2dc   : > { %v2107_v47 = vadd.f32 %v2106_v30, %v10322_v11  ;;  %v8426_v32 = vpop.f32.mrf.mxu0  ;;  %3055 = vmatmul.mubr.bf16.gmra.mxu1 %v10468_v19  ;;  %v2391_v28 = vmax.f32 %v2105_v24, 0.0 }
 0x2dd   : > { %v8427_v2 = vadd.f32 %v8426_v32, %v8425_v25  ;;  %v2108_v48 = vpop.f32.mrf.mxu1  ;;  %8281 = vmatmul.mubr.msk.bf16.gmra.mxu0 %vm2893_vm1, %v10470_v35  ;;  %v2356_v0 = vmax.f32 %v2232_v7, 0.0  ;;  %8521 = vmatpush3.bf16.msra.mxu1 %v9109_v17 }
 0x2de   : > { %v2109_v54 = vadd.f32 %v2108_v48, %v10318_v62  ;;  %v8428_v26 = vpop.f32.mrf.mxu0  ;;  %3197 = vmatprep.mubr.bf16.mxu0 %v12685_v6  ;;  %8755 = vmatpush3.bf16.msra.mxu0 %v9102_v33  ;;  %v2393_v56 = vmax.f32 %v2107_v47, 0.0 }
 0x2df   : > { %v2235_v51 = vadd.f32 %v8427_v2, %v10421_v59  ;;  %8756 = vmatprep.subr.bf16.mxu0 %v9107_v23 }
 0x2e0   : > { %v2394_v20 = vmax.f32 %v2109_v54, 0.0  ;;  %v8429_v13 = vpop.f32.mrf.mxu0  ;;  %v10487_v15 = vpack.c.bf16 %v2393_v56, %v2390_v58 }
 0x2e1   : > { %v2359_v27 = vmax.f32 %v2235_v51, 0.0  ;;  %v8430_v63 = vadd.f32 %v8429_v13, %v8428_v26 }
 0x2e2   : > { %v8431_v5 = vpop.f32.mrf.mxu0  ;;  %v10485_v12 = vpack.c.bf16 %v2394_v20, %v2391_v28  ;;  %8757 = vmatpush3.bf16.msra.mxu0 %v9107_v23 }
 0x2e3   : > { %v10489_v9 = vpack.c.bf16 %v2359_v27, %v2356_v0  ;;  %v2240_v34 = vadd.f32 %v8430_v63, %v10421_v59 }
 0x2e4   : > { %v8432_v10 = vpop.f32.mrf.mxu0  ;;  %3064 = vmatprep.mubr.bf16.mxu1 %v10485_v12 }
 0x2e5   : > { %v8433_v40 = vadd.f32 %v8432_v10, %v8431_v5  ;;  %3065 = vmatmul.mubr.bf16.gmra.mxu1 %v10487_v15  ;;  %8282 = vmatmul.mubr.msk.bf16.gmra.mxu0 %vm2893_vm1, %v10489_v9  ;;  %v2362_v37 = vmax.f32 %v2240_v34, 0.0 }
 0x2e6   : > { %v8434_v60 = vpop.f32.mrf.mxu0  ;;  %3207 = vmatprep.mubr.bf16.mxu0 %v12685_v6 }
 0x2e7   : > { %v2243_v33 = vadd.f32 %v8433_v40, %v10421_v59 }
 0x2e8   : > { %v8435_v16 = vpop.f32.mrf.mxu0 }
 0x2e9   : > { %v2365_v1 = vmax.f32 %v2243_v33, 0.0  ;;  %v8436_v3 = vadd.f32 %v8435_v16, %v8434_v60 }
 0x2ea   : > { %v2112_v41 = vpop.f32.mrf.mxu1  ;;  %v8437_v25 = vpop.f32.mrf.mxu0 }
 0x2eb   : > { %v10504_v30 = vpack.c.bf16 %v2365_v1, %v2362_v37  ;;  %v2248_v47 = vadd.f32 %v8436_v3, %v10421_v59  ;;  %v2113_v26 = vadd.f32 %v2112_v41, %v10322_v11 }
 0x2ec   : > { %v2114_v23 = vpop.f32.mrf.mxu1  ;;  %v8438_v24 = vpop.f32.mrf.mxu0 }
 0x2ed   : > { %v8439_v32 = vadd.f32 %v8438_v24, %v8437_v25  ;;  %8283 = vmatmul.mubr.msk.bf16.gmra.mxu0 %vm2893_vm1, %v10504_v30  ;;  %v2115_v2 = vadd.f32 %v2114_v23, %v10318_v62  ;;  %v2368_v28 = vmax.f32 %v2248_v47, 0.0  ;;  %v2396_v34 = vmax.f32 %v2113_v26, 0.0 }
 0x2ee   : > { %v2116_v46 = vpop.f32.mrf.mxu1  ;;  %v8440_v7 = vpop.f32.mrf.mxu0  ;;  %3217 = vmatprep.mubr.bf16.mxu0 %v12685_v6 }
 0x2ef   : > { %v2251_v48 = vadd.f32 %v8439_v32, %v10421_v59  ;;  %v2117_v54 = vadd.f32 %v2116_v46, %v10322_v11  ;;  %v2397_v63 = vmax.f32 %v2115_v2, 0.0 }
 0x2f0   : > { %v2118_v56 = vpop.f32.mrf.mxu1  ;;  %v8441_v51 = vpop.f32.mrf.mxu0 }
 0x2f1   : > { %v2371_v20 = vmax.f32 %v2251_v48, 0.0  ;;  %v2119_v13 = vadd.f32 %v2118_v56, %v10318_v62  ;;  %v8442_v58 = vadd.f32 %v8441_v51, %v8440_v7  ;;  %v2399_v0 = vmax.f32 %v2117_v54, 0.0 }
 0x2f2   : > { %v8443_v27 = vpop.f32.mrf.mxu0 }
 0x2f3   : > { %v10515_v5 = vpack.c.bf16 %v2371_v20, %v2368_v28  ;;  %v2400_v10 = vmax.f32 %v2119_v13, 0.0  ;;  %v2256_v14 = vadd.f32 %v8442_v58, %v10421_v59  ;;  %v10522_v16 = vpack.c.bf16 %v2399_v0, %v2396_v34 }
 0x2f4   : > { %v8444_v40 = vpop.f32.mrf.mxu0 }
 0x2f5   : > { %v8445_v60 = vadd.f32 %v8444_v40, %v8443_v27  ;;  %8284 = vmatmul.mubr.msk.bf16.gmra.mxu0 %vm2893_vm1, %v10515_v5  ;;  %v10520_v33 = vpack.c.bf16 %v2400_v10, %v2397_v63  ;;  %v2374_v17 = vmax.f32 %v2256_v14, 0.0 }
 0x2f6   : > { %v8446_v37 = vpop.f32.mrf.mxu0  ;;  %3227 = vmatprep.mubr.bf16.mxu0 %v12685_v6 }
 0x2f7   : > { %v2259_v1 = vadd.f32 %v8445_v60, %v10421_v59  ;;  %3074 = vmatprep.mubr.bf16.mxu1 %v10520_v33 }
 0x2f8   : > { %v8447_v3 = vpop.f32.mrf.mxu0  ;;  %3075 = vmatmul.mubr.bf16.gmra.mxu1 %v10522_v16 }
 0x2f9   : > { %v2377_v41 = vmax.f32 %v2259_v1, 0.0  ;;  %v8448_v25 = vadd.f32 %v8447_v3, %v8446_v37 }
 0x2fa   : > { %v8449_v23 = vpop.f32.mrf.mxu0 }
 0x2fb   : > { %v10528_v24 = vpack.c.bf16 %v2377_v41, %v2374_v17  ;;  %v2264_v32 = vadd.f32 %v8448_v25, %v10421_v59 }
 0x2fc   : > { %v8450_v47 = vpop.f32.mrf.mxu0 }
 0x2fd   : > { %v8451_v46 = vadd.f32 %v8450_v47, %v8449_v23  ;;  %v2122_v7 = vpop.f32.mrf.mxu1  ;;  %8285 = vmatmul.mubr.msk.bf16.gmra.mxu0 %vm2893_vm1, %v10528_v24  ;;  %v2380_v56 = vmax.f32 %v2264_v32, 0.0 }
 0x2fe   : > { %v8452_v2 = vpop.f32.mrf.mxu0  ;;  %3237 = vmatprep.mubr.bf16.mxu0 %v12685_v6  ;;  %v2123_v63 = vadd.f32 %v2122_v7, %v10322_v11 }
 0x2ff   : > { %v2267_v48 = vadd.f32 %v8451_v46, %v10421_v59  ;;  %v2124_v54 = vpop.f32.mrf.mxu1 }
 0x300   : > { %v8453_v26 = vpop.f32.mrf.mxu0  ;;  %v2125_v13 = vadd.f32 %v2124_v54, %v10318_v62  ;;  %v2402_v41 = vmax.f32 %v2123_v63, 0.0 }
 0x301   : > { %v2383_v51 = vmax.f32 %v2267_v48, 0.0  ;;  %v8454_v28 = vadd.f32 %v8453_v26, %v8452_v2  ;;  %v2126_v20 = vpop.f32.mrf.mxu1 }
 0x302   : > { %v2127_v58 = vadd.f32 %v2126_v20, %v10322_v11  ;;  %v8455_v0 = vpop.f32.mrf.mxu0  ;;  %v2403_v1 = vmax.f32 %v2125_v13, 0.0 }
 0x303   : > { %v10537_v27 = vpack.c.bf16 %v2383_v51, %v2380_v56  ;;  %v2128_v10 = vpop.f32.mrf.mxu1  ;;  %v2272_v14 = vadd.f32 %v8454_v28, %v10421_v59 }
 0x304   : > { %v2129_v34 = vadd.f32 %v2128_v10, %v10318_v62  ;;  %v8456_v40 = vpop.f32.mrf.mxu0  ;;  %v2405_v60 = vmax.f32 %v2127_v58, 0.0 }
 0x305   : > { %v8457_v37 = vadd.f32 %v8456_v40, %v8455_v0  ;;  %8286 = vmatmul.mubr.msk.bf16.gmra.mxu0 %vm2893_vm1, %v10537_v27  ;;  %v2386_v32 = vmax.f32 %v2272_v14, 0.0 }
 0x306   : > { %v2406_v3 = vmax.f32 %v2129_v34, 0.0  ;;  %v8458_v17 = vpop.f32.mrf.mxu0  ;;  %3247 = vmatprep.mubr.bf16.mxu0 %v12685_v6  ;;  %v10548_v46 = vpack.c.bf16 %v2405_v60, %v2402_v41 }
 0x307   : > { %v2275_v25 = vadd.f32 %v8457_v37, %v10421_v59 }
 0x308   : > { %v8459_v23 = vpop.f32.mrf.mxu0  ;;  %v10546_v47 = vpack.c.bf16 %v2406_v3, %v2403_v1 }
 0x309   : > { %v2389_v7 = vmax.f32 %v2275_v25, 0.0  ;;  %v8460_v2 = vadd.f32 %v8459_v23, %v8458_v17 }
 0x30a   : > { %v8461_v48 = vpop.f32.mrf.mxu0  ;;  %3084 = vmatprep.mubr.bf16.mxu1 %v10546_v47 }
 0x30b   : > { %v10551_v54 = vpack.c.bf16 %v2389_v7, %v2386_v32  ;;  %3085 = vmatmul.mubr.bf16.gmra.mxu1 %v10548_v46  ;;  %v2280_v56 = vadd.f32 %v8460_v2, %v10421_v59 }
 0x30c   : > { %v8462_v26 = vpop.f32.mrf.mxu0 }
 0x30d   : > { %v8463_v51 = vadd.f32 %v8462_v26, %v8461_v48  ;;  %8287 = vmatmul.mubr.msk.bf16.gmra.mxu0 %vm2893_vm1, %v10551_v54  ;;  %v2392_v0 = vmax.f32 %v2280_v56, 0.0 }
 0x30e   : > { %v8464_v28 = vpop.f32.mrf.mxu0  ;;  %3257 = vmatprep.mubr.bf16.mxu0 %v12685_v6 }
 0x30f   : > { %v2283_v20 = vadd.f32 %v8463_v51, %v10421_v59 }
 0x310   : > { %v2132_v13 = vpop.f32.mrf.mxu1  ;;  %v8465_v58 = vpop.f32.mrf.mxu0 }
 0x311   : > { %v2395_v63 = vmax.f32 %v2283_v20, 0.0  ;;  %v8466_v10 = vadd.f32 %v8465_v58, %v8464_v28  ;;  %v2133_v25 = vadd.f32 %v2132_v13, %v10322_v11 }
 0x312   : > { %v2134_v34 = vpop.f32.mrf.mxu1  ;;  %v8467_v40 = vpop.f32.mrf.mxu0 }
 0x313   : > { %v10559_v14 = vpack.c.bf16 %v2395_v63, %v2392_v0  ;;  %v2288_v60 = vadd.f32 %v8466_v10, %v10421_v59  ;;  %v2135_v3 = vadd.f32 %v2134_v34, %v10318_v62  ;;  %v2408_v0 = vmax.f32 %v2133_v25, 0.0 }
 0x314   : > { %v2136_v37 = vpop.f32.mrf.mxu1  ;;  %v8468_v1 = vpop.f32.mrf.mxu0 }
 0x315   : > { %v2137_v17 = vadd.f32 %v2136_v37, %v10322_v11  ;;  %v8469_v41 = vadd.f32 %v8468_v1, %v8467_v40  ;;  %8288 = vmatmul.mubr.msk.bf16.gmra.mxu0 %vm2893_vm1, %v10559_v14  ;;  %v2398_v48 = vmax.f32 %v2288_v60, 0.0  ;;  %v2409_v51 = vmax.f32 %v2135_v3, 0.0 }
 0x316   : > { %v2138_v23 = vpop.f32.mrf.mxu1  ;;  %v8470_v32 = vpop.f32.mrf.mxu0  ;;  %3267 = vmatprep.mubr.bf16.mxu0 %v12685_v6 }
 0x317   : > { %v2291_v7 = vadd.f32 %v8469_v41, %v10421_v59  ;;  %v2139_v2 = vadd.f32 %v2138_v23, %v10318_v62  ;;  %v2411_v26 = vmax.f32 %v2137_v17, 0.0 }
 0x318   : > { %v8471_v56 = vpop.f32.mrf.mxu0 }
 0x319   : > { %v2401_v28 = vmax.f32 %v2291_v7, 0.0  ;;  %v2412_v20 = vmax.f32 %v2139_v2, 0.0  ;;  %v8472_v58 = vadd.f32 %v8471_v56, %v8470_v32  ;;  %v10574_v34 = vpack.c.bf16 %v2411_v26, %v2408_v0 }
 0x31a   : > { %v8473_v63 = vpop.f32.mrf.mxu0 }
 0x31b   : > { %v10570_v10 = vpack.c.bf16 %v2401_v28, %v2398_v48  ;;  %v10572_v13 = vpack.c.bf16 %v2412_v20, %v2409_v51  ;;  %v2296_v37 = vadd.f32 %v8472_v58, %v10421_v59 }
 0x31c   : > { %v8474_v40 = vpop.f32.mrf.mxu0 }
 0x31d   : > { %v8475_v1 = vadd.f32 %v8474_v40, %v8473_v63  ;;  %3094 = vmatprep.mubr.bf16.mxu1 %v10572_v13  ;;  %8289 = vmatmul.mubr.msk.bf16.gmra.mxu0 %vm2893_vm1, %v10570_v10  ;;  %v2404_v41 = vmax.f32 %v2296_v37, 0.0 }
 0x31e   : > { %v8476_v60 = vpop.f32.mrf.mxu0  ;;  %3095 = vmatmul.mubr.bf16.gmra.mxu1 %v10574_v34  ;;  %3277 = vmatprep.mubr.bf16.mxu0 %v12685_v6 }
 0x31f   : > { %v2299_v3 = vadd.f32 %v8475_v1, %v10421_v59 }
 0x320   : > { %v8477_v17 = vpop.f32.mrf.mxu0 }
 0x321   : > { %v2407_v25 = vmax.f32 %v2299_v3, 0.0  ;;  %v8478_v23 = vadd.f32 %v8477_v17, %v8476_v60 }
 0x322   : > { %v8479_v32 = vpop.f32.mrf.mxu0 }
 0x323   : > { %v10583_v7 = vpack.c.bf16 %v2407_v25, %v2404_v41  ;;  %v2142_v2 = vpop.f32.mrf.mxu1  ;;  %v2304_v26 = vadd.f32 %v8478_v23, %v10421_v59 }
 0x324   : > { %v8480_v48 = vpop.f32.mrf.mxu0  ;;  %v2143_v1 = vadd.f32 %v2142_v2, %v10322_v11 }
 0x325   : > { %v8481_v56 = vadd.f32 %v8480_v48, %v8479_v32  ;;  %v2144_v51 = vpop.f32.mrf.mxu1  ;;  %8290 = vmatmul.mubr.msk.bf16.gmra.mxu0 %vm2893_vm1, %v10583_v7  ;;  %v2410_v37 = vmax.f32 %v2304_v26, 0.0  ;;  %v12717_v26 = vmov 0  }
 0x326   : > { %v8482_v28 = vpop.f32.mrf.mxu0  ;;  %3287 = vmatprep.mubr.bf16.mxu0 %v12685_v6  ;;  %v2145_v0 = vadd.f32 %v2144_v51, %v10318_v62  ;;  %v2414_v6 = vmax.f32 %v2143_v1, 0.0 }
 0x327   : > { %v2307_v20 = vadd.f32 %v8481_v56, %v10421_v59  ;;  %v2146_v58 = vpop.f32.mrf.mxu1 }
 0x328   : > { %v2147_v63 = vadd.f32 %v2146_v58, %v10322_v11  ;;  %v8483_v40 = vpop.f32.mrf.mxu0  ;;  %v2415_v48 = vmax.f32 %v2145_v0, 0.0  ;;  %v9112_v0 = vld [vmem:[%s12674_s9 + $0x74] ss:$8 sps:$4 sm:$0xff]  }
 0x329   : > { %v2413_v60 = vmax.f32 %v2307_v20, 0.0  ;;  %v8484_v3 = vadd.f32 %v8483_v40, %v8482_v28  ;;  %v2148_v17 = vpop.f32.mrf.mxu1  ;;  %4104 = vmatprep.subr.bf16.mxu1 %v9112_v0 }
 0x32a   : > { %v2149_v41 = vadd.f32 %v2148_v17, %v10318_v62  ;;  %v8485_v25 = vpop.f32.mrf.mxu0  ;;  %v2417_v32 = vmax.f32 %v2147_v63, 0.0 }
 0x32b   : > { %v10594_v23 = vpack.c.bf16 %v2413_v60, %v2410_v37  ;;  %v2312_v51 = vadd.f32 %v8484_v3, %v10421_v59 }
 0x32c   : > { %v2418_v56 = vmax.f32 %v2149_v41, 0.0  ;;  %v8486_v31 = vpop.f32.mrf.mxu0  ;;  %v10602_v28 = vpack.c.bf16 %v2417_v32, %v2414_v6 }
 0x32d   : > { %v8487_v58 = vadd.f32 %v8486_v31, %v8485_v25  ;;  %8291 = vmatmul.mubr.msk.bf16.gmra.mxu0 %vm2893_vm1, %v10594_v23  ;;  %v2416_v63 = vmax.f32 %v2312_v51, 0.0 }
 0x32e   : > { %v10599_v2 = vpack.c.bf16 %v2418_v56, %v2415_v48  ;;  %3297 = vmatprep.mubr.bf16.mxu0 %v12717_v26  ;;  %12718 = vst [vmem:[#allocation13_spill] sm:$0xff] %v10602_v28 }
 0x32f   : > { %v2315_v20 = vadd.f32 %v8487_v58, %v10421_v59 }
 0x330   : > { %3104 = vmatprep.mubr.bf16.mxu1 %v10599_v2 }
 0x331   : > { %v2419_v40 = vmax.f32 %v2315_v20, 0.0  ;;  %3105 = vmatmul.mubr.bf16.gmra.mxu1 %v10602_v28 }
 0x333   : > { %v10610_v31 = vpack.c.bf16 %v2419_v40, %v2416_v63 }
 0x335   : > { %8292 = vmatmul.mubr.msk.bf16.gmra.mxu0 %vm2893_vm1, %v10610_v31 }
 0x336   : > { %v2152_v6 = vpop.f32.mrf.mxu1  ;;  %v8488_v37 = vpop.f32.mrf.mxu0  ;;  %3307 = vmatprep.mubr.bf16.mxu0 %v12717_v26 }
 0x337   : > { %v2153_v48 = vadd.f32 %v2152_v6, %v10322_v11 }
 0x338   : > { %v2154_v1 = vpop.f32.mrf.mxu1  ;;  %v8489_v60 = vpop.f32.mrf.mxu0 }
 0x339   : > { %v8490_v3 = vadd.f32 %v8489_v60, %v8488_v37  ;;  %v2155_v25 = vadd.f32 %v2154_v1, %v10318_v62  ;;  %v2420_v60 = vmax.f32 %v2153_v48, 0.0 }
 0x33a   : > { %v2156_v17 = vpop.f32.mrf.mxu1  ;;  %v8491_v41 = vpop.f32.mrf.mxu0 }
 0x33b   : > { %v2157_v32 = vadd.f32 %v2156_v17, %v10322_v11  ;;  %v2320_v58 = vadd.f32 %v8490_v3, %v10421_v59  ;;  %v2421_v40 = vmax.f32 %v2155_v25, 0.0 }
 0x33c   : > { %v2158_v56 = vpop.f32.mrf.mxu1  ;;  %v8492_v51 = vpop.f32.mrf.mxu0 }
 0x33d   : > { %v2159_v20 = vadd.f32 %v2158_v56, %v10318_v62  ;;  %v8493_v0 = vadd.f32 %v8492_v51, %v8491_v41  ;;  %v2423_v63 = vmax.f32 %v2157_v32, 0.0  ;;  %v2422_v4 = vmax.f32 %v2320_v58, 0.0 }
 0x33f   : > { %v2424_v49 = vmax.f32 %v2159_v20, 0.0  ;;  %v2323_v37 = vadd.f32 %v8493_v0, %v10421_v59  ;;  %v10623_v17 = vpack.c.bf16 %v2423_v63, %v2420_v60 }
 0x341   : > { %v2425_v8 = vmax.f32 %v2323_v37, 0.0  ;;  %v10621_v1 = vpack.c.bf16 %v2424_v49, %v2421_v40  ;;  %12720 = vst [vmem:[#allocation15_spill] sm:$0xff] %v10623_v17 }
 0x343   : > { %12719 = vst [vmem:[#allocation14_spill] sm:$0xff] %v10621_v1  ;;  %v10625_v6 = vpack.c.bf16 %v2425_v8, %v2422_v4  ;;  %3114 = vmatprep.mubr.bf16.mxu1 %v10621_v1 }
 0x344   : > { %3115 = vmatmul.mubr.bf16.gmra.mxu1 %v10623_v17 }
 0x345   : > { %8293 = vmatmul.mubr.msk.bf16.gmra.mxu0 %vm2893_vm1, %v10625_v6 }
 0x346   : > { %3317 = vmatprep.mubr.bf16.mxu0 %v12717_v26 }
 0x349   : > { %v2162_v3 = vpop.f32.mrf.mxu1  ;;  %v8494_v41 = vpop.f32.mrf.mxu0 }
 0x34a   : > { %v2163_v4 = vadd.f32 %v2162_v3, %v10322_v11 }
 0x34b   : > { %v2164_v25 = vpop.f32.mrf.mxu1  ;;  %v8495_v32 = vpop.f32.mrf.mxu0 }
 0x34c   : > { %v8496_v48 = vadd.f32 %v8495_v32, %v8494_v41  ;;  %v2165_v51 = vadd.f32 %v2164_v25, %v10318_v62  ;;  %v2426_v32 = vmax.f32 %v2163_v4, 0.0 }
 0x34d   : > { %v2166_v49 = vpop.f32.mrf.mxu1  ;;  %v8497_v56 = vpop.f32.mrf.mxu0 }
 0x34e   : > { %v2167_v8 = vadd.f32 %v2166_v49, %v10322_v11  ;;  %v2328_v0 = vadd.f32 %v8496_v48, %v10421_v59  ;;  %v2427_v60 = vmax.f32 %v2165_v51, 0.0 }
 0x34f   : > { %v2168_v58 = vpop.f32.mrf.mxu1  ;;  %v8498_v20 = vpop.f32.mrf.mxu0 }
 0x350   : > { %v2169_v63 = vadd.f32 %v2168_v58, %v10318_v62  ;;  %v8499_v40 = vadd.f32 %v8498_v20, %v8497_v56  ;;  %v2429_v37 = vmax.f32 %v2167_v8, 0.0  ;;  %v2428_v17 = vmax.f32 %v2328_v0, 0.0 }
 0x352   : > { %v2430_v43 = vmax.f32 %v2169_v63, 0.0  ;;  %v2331_v41 = vadd.f32 %v8499_v40, %v10421_v59  ;;  %v10640_v49 = vpack.c.bf16 %v2429_v37, %v2426_v32 }
 0x354   : > { %v2431_v1 = vmax.f32 %v2331_v41, 0.0  ;;  %v10638_v25 = vpack.c.bf16 %v2430_v43, %v2427_v60  ;;  %12722 = vst [vmem:[#allocation17_spill] sm:$0xff] %v10640_v49 }
 0x356   : > { %12721 = vst [vmem:[#allocation16_spill] sm:$0xff] %v10638_v25  ;;  %v10642_v3 = vpack.c.bf16 %v2431_v1, %v2428_v17  ;;  %3124 = vmatprep.mubr.bf16.mxu1 %v10638_v25 }
 0x357   : > { %3125 = vmatmul.mubr.bf16.gmra.mxu1 %v10640_v49 }
 0x358   : > { %8294 = vmatmul.mubr.msk.bf16.gmra.mxu0 %vm2893_vm1, %v10642_v3 }
 0x359   : > { %3327 = vmatprep.mubr.bf16.mxu0 %v12717_v26 }
 0x35c   : > { %v2172_v48 = vpop.f32.mrf.mxu1  ;;  %v8500_v56 = vpop.f32.mrf.mxu0 }
 0x35d   : > { %v2173_v17 = vadd.f32 %v2172_v48, %v10322_v11 }
 0x35e   : > { %v2174_v51 = vpop.f32.mrf.mxu1  ;;  %v8501_v8 = vpop.f32.mrf.mxu0 }
 0x35f   : > { %v8502_v4 = vadd.f32 %v8501_v8, %v8500_v56  ;;  %v2175_v20 = vadd.f32 %v2174_v51, %v10318_v62  ;;  %v2432_v25 = vmax.f32 %v2173_v17, 0.0 }
 0x360   : > { %v2176_v43 = vpop.f32.mrf.mxu1  ;;  %v8503_v58 = vpop.f32.mrf.mxu0 }
 0x361   : > { %v2177_v1 = vadd.f32 %v2176_v43, %v10322_v11  ;;  %v2336_v40 = vadd.f32 %v8502_v4, %v10421_v59  ;;  %v2433_v49 = vmax.f32 %v2175_v20, 0.0  ;;  %v9115_v20 = vld [vmem:[%s12674_s9 + $0x64] ss:$8 sps:$4 sm:$0xff]  }
 0x362   : > { %v2178_v0 = vpop.f32.mrf.mxu1  ;;  %v8504_v63 = vpop.f32.mrf.mxu0 }
 0x363   : > { %v2179_v37 = vadd.f32 %v2178_v0, %v10318_v62  ;;  %v8505_v60 = vadd.f32 %v8504_v63, %v8503_v58  ;;  %v2435_v41 = vmax.f32 %v2177_v1, 0.0  ;;  %v2434_v43 = vmax.f32 %v2336_v40, 0.0  ;;  %v9119_v40 = vld [vmem:[%s12674_s9 + $0x40] ss:$8 sps:$4 sm:$0xff]  }
 0x364   : > { %v10654_v32 = vpop.f32.mrf.mxu1 }
 0x365   : > { %v2436_v56 = vmax.f32 %v2179_v37, 0.0  ;;  %v2339_v8 = vadd.f32 %v8505_v60, %v10421_v59  ;;  %v10661_v48 = vpack.c.bf16 %v2435_v41, %v2432_v25  ;;  %v3842_v60 = vld [vmem:[%s12674_s9 + $0x130] sm:$0xff] }
 0x366   : > { %v10657_v51 = vpop.f32.mrf.mxu1  ;;  %v8351_v41 = vcombine.high %v3842_v60, %v3842_v60 }
 0x367   : > { %v2437_v28 = vmax.f32 %v2339_v8, 0.0  ;;  %v10659_v11 = vpack.c.bf16 %v2436_v56, %v2433_v49  ;;  %v9110_v49 = vld [vmem:[%s12674_s9 + $0x70] ss:$8 sps:$4 sm:$0xff]   ;;  %v8350_v56 = vcombine.low %v3842_v60, %v3842_v60 }
 0x368   : > { %v10663_v4 = vpop.f32.mrf.mxu1  ;;  %8352 = vmatprep.subr.msk.bf16.mxu0 %vm2942_vm0, %v8351_v41 }
 0x369   : > { %v10665_v62 = vpack.c.bf16 %v2437_v28, %v2434_v43  ;;  %3134 = vmatprep.mubr.bf16.mxu1 %v10659_v11 }
 0x36a   : > { %v10668_v58 = vpop.f32.mrf.mxu1  ;;  %3135 = vmatmul.mubr.bf16.gmra.mxu1 %v10661_v48 }
 0x36b   : > { %8295 = vmatmul.mubr.msk.bf16.gmra.mxu0 %vm2893_vm1, %v10665_v62  ;;  %3370 = vmatprep.mubr.bf16.mxu1 %v10329_v53 }
 0x36c   : > { %v10674_v59 = vpop.f32.mrf.mxu1  ;;  %8758 = vmatprep.mubr.msk.bf16.mxu0 %vm2893_vm1, %v10442_v39  ;;  %v9113_v39 = vld [vmem:[%s12674_s9 + $0x60] ss:$8 sps:$4 sm:$0xff]  }
 0x36e   : > { %v10678_v25 = vpop.f32.mrf.mxu1 }
 0x370   : > { %v10680_v28 = vpop.f32.mrf.mxu1 }
 0x372   : > { %v10688_v1 = vpop.f32.mrf.mxu1  ;;  %3371 = vmatmul.mubr.bf16.vlgmr.msra.gmra.mxu1 %v10334_v36  ;;  %v9118_v36 = vld [vmem:[%s12674_s9 + $0x54] ss:$8 sps:$4 sm:$0xff]  }
 0x373   : > { %3378 = vmatprep.mubr.bf16.mxu1 %v10351_v55  ;;  %8759 = vmatmul.mubr.msk.bf16.vlgmr.msra.gmra.mxu0 %vm2893_vm1, %v10470_v35  ;;  %v9116_v35 = vld [vmem:[%s12674_s9 + $0x50] ss:$8 sps:$4 sm:$0xff]  }
 0x374   : > { %v10694_v53 = vpop.f32.mrf.mxu1  ;;  %8762 = vmatprep.mubr.msk.bf16.mxu0 %vm2893_vm1, %v10489_v9  ;;  %4105 = vmatpush1.bf16.msra.mxu1 %v9110_v49  ;;  %v9121_v9 = vld [vmem:[%s12674_s9 + $0x44] ss:$8 sps:$4 sm:$0xff]  }
 0x375   : > { %4106 = vmatprep.subr.bf16.mxu1 %v9115_v20  ;;  %v9133_v49 = vld [vmem:[%s12674_s9 + $0x4] ss:$8 sps:$4 sm:$0xff]  }
 0x376   : > { %v10704_v17 = vpop.f32.mrf.mxu1 }
 0x378   : > { %v10706_v55 = vpop.f32.mrf.mxu1  ;;  %4107 = vmatpush1.bf16.msra.mxu1 %v9113_v39  ;;  %v9131_v39 = vld [vmem:[%s12674_s9] ss:$8 sps:$4 sm:$0xff]  }
 0x379   : > { %4108 = vmatprep.subr.bf16.mxu1 %v9118_v36 }
 0x37a   : > { %v10714_v0 = vpop.f32.mrf.mxu1  ;;  %3379 = vmatmul.mubr.bf16.gmra.mxu1 %v10356_v29  ;;  %v9124_v29 = vld [vmem:[%s12674_s9 + $0x34] ss:$8 sps:$4 sm:$0xff]  }
 0x37b   : > { %3386 = vmatprep.mubr.bf16.mxu1 %v10370_v38  ;;  %8763 = vmatmul.mubr.msk.bf16.gmra.mxu0 %vm2893_vm1, %v10504_v30  ;;  %v9122_v30 = vld [vmem:[%s12674_s9 + $0x30] ss:$8 sps:$4 sm:$0xff]  }
 0x37c   : > { %v10720_v63 = vpop.f32.mrf.mxu1  ;;  %8766 = vmatprep.mubr.msk.bf16.mxu0 %vm2893_vm1, %v10515_v5  ;;  %4109 = vmatpush1.bf16.msra.mxu1 %v9116_v35  ;;  %v9127_v5 = vld [vmem:[%s12674_s9 + $0x24] ss:$8 sps:$4 sm:$0xff]  }
 0x37d   : > { %4110 = vmatprep.subr.bf16.mxu1 %v9121_v9  ;;  %v9162_v35 = vld [vmem:[%s12674_s9 + $0x124] ss:$8 sps:$4 sm:$0xff]  }
 0x37e   : > { %v10730_v37 = vpop.f32.mrf.mxu1 }
 0x380   : > { %v10732_v38 = vpop.f32.mrf.mxu1  ;;  %4111 = vmatpush1.bf16.msra.mxu1 %v9119_v40 }
 0x381   : > { %4112 = vmatprep.subr.bf16.mxu1 %v9124_v29 }
 0x382   : > { %3387 = vmatmul.mubr.bf16.gmra.mxu1 %v10372_v45  ;;  %v10747_v8 = vpop.f32.mrf.mxu1  ;;  %v9125_v45 = vld [vmem:[%s12674_s9 + $0x20] ss:$8 sps:$4 sm:$0xff]  }
 0x383   : > { %3394 = vmatprep.mubr.bf16.mxu1 %v10388_v22  ;;  %8767 = vmatmul.mubr.msk.bf16.gmra.mxu0 %vm2893_vm1, %v10528_v24  ;;  %v9130_v22 = vld [vmem:[%s12674_s9 + $0x14] ss:$8 sps:$4 sm:$0xff]   ;;  %v4099_v24 = vsel %vm2942_vm0, %v8350_v56, 0  ;;  %v9143_v56 = vld [vmem:[%s12674_s9 + $0xc0] ss:$8 sps:$4 sm:$0xff]   ;;  %vm7936_vm0 = vcmask 1048512  }
 0x384   : > { %8770 = vmatprep.mubr.msk.bf16.mxu0 %vm2893_vm1, %v10537_v27  ;;  %4113 = vmatpush1.bf16.msra.mxu1 %v9122_v30  ;;  %v10759_v43 = vpop.f32.mrf.mxu1  ;;  %v9128_v27 = vld [vmem:[%s12674_s9 + $0x10] ss:$8 sps:$4 sm:$0xff]  }
 0x385   : > { %4114 = vmatprep.subr.bf16.mxu1 %v9127_v5  ;;  %4306 = vmatpush1.bf16.msra.mxu0 %v4099_v24  ;;  %v9145_v5 = vld [vmem:[%s12674_s9 + $0xc4] ss:$8 sps:$4 sm:$0xff]  }
 0x386   : > { %v10771_v20 = vpop.f32.mrf.mxu1  ;;  %4307 = vmatprep.subr.bf16.mxu0 %v9162_v35  ;;  %v9151_v24 = vld [vmem:[%s12674_s9 + $0xa4] ss:$8 sps:$4 sm:$0xff]  }
 0x387   : > { %v9157_v35 = vld [vmem:[%s12674_s9 + $0x84] ss:$8 sps:$4 sm:$0xff]  }
 0x388   : > { %4115 = vmatpush1.bf16.msra.mxu1 %v9125_v45  ;;  %v10781_v36 = vpop.f32.mrf.mxu1 }
 0x389   : > { %4116 = vmatprep.subr.bf16.mxu1 %v9130_v22 }
 0x38a   : > { %3395 = vmatmul.mubr.bf16.gmra.mxu1 %v10390_v61  ;;  %v9136_v61 = vld [vmem:[%s12674_s9 + $0xf4] ss:$8 sps:$4 sm:$0xff]   ;;  %v10799_v9 = vpop.f32.mrf.mxu1 }
 0x38b   : > { %3402 = vmatprep.mubr.bf16.mxu1 %v10398_v21  ;;  %8771 = vmatmul.mubr.msk.bf16.gmra.mxu0 %vm2893_vm1, %v10551_v54  ;;  %v9134_v21 = vld [vmem:[%s12674_s9 + $0xf0] ss:$8 sps:$4 sm:$0xff]   ;;  %v9139_v54 = vld [vmem:[%s12674_s9 + $0xe4] ss:$8 sps:$4 sm:$0xff]  }
 0x38c   : > { %8774 = vmatprep.mubr.msk.bf16.mxu0 %vm2893_vm1, %v10559_v14  ;;  %4117 = vmatpush1.bf16.msra.mxu1 %v9128_v27  ;;  %v9160_v14 = vld [vmem:[%s12674_s9 + $0x120] ss:$8 sps:$4 sm:$0xff]   ;;  %v10813_v29 = vpop.f32.mrf.mxu1 }
 0x38d   : > { %4118 = vmatprep.subr.bf16.mxu1 %v9133_v49  ;;  %4308 = vmatpush1.bf16.msra.mxu0 %v9160_v14 }
 0x38e   : > { %v10829_v41 = vpop.f32.mrf.mxu1 }
 0x390   : > { %4119 = vmatpush1.bf16.msra.mxu1 %v9131_v39  ;;  %v9149_v39 = vld [vmem:[%s12674_s9 + $0xa0] ss:$8 sps:$4 sm:$0xff]  }
 0x391   : > { %4120 = vmatprep.subr.bf16.mxu1 %v9136_v61 }
 0x392   : > { %3403 = vmatmul.mubr.bf16.gmra.mxu1 %v10400_v52  ;;  %v9137_v52 = vld [vmem:[%s12674_s9 + $0xe0] ss:$8 sps:$4 sm:$0xff]  }
 0x393   : > { %3410 = vmatprep.mubr.bf16.mxu1 %v10423_v50  ;;  %8775 = vmatmul.mubr.msk.bf16.gmra.mxu0 %vm2893_vm1, %v10570_v10  ;;  %v9142_v50 = vld [vmem:[%s12674_s9 + $0xd4] ss:$8 sps:$4 sm:$0xff]  }
 0x394   : > { %8778 = vmatprep.mubr.msk.bf16.mxu0 %vm2893_vm1, %v10583_v7  ;;  %4121 = vmatpush2.bf16.msra.mxu1 %v9134_v21  ;;  %v9140_v7 = vld [vmem:[%s12674_s9 + $0xd0] ss:$8 sps:$4 sm:$0xff]  }
 0x395   : > { %v10806_v40 = vpop.f32.mrf.mxu0  ;;  %4122 = vmatprep.subr.bf16.mxu1 %v9139_v54  ;;  %v9152_v54 = vld [vmem:[%s12674_s9 + $0x90] ss:$8 sps:$4 sm:$0xff]  }
 0x397   : > { %v10811_v10 = vpop.f32.mrf.mxu0 }
 0x398   : > { %4123 = vmatpush2.bf16.msra.mxu1 %v9137_v52 }
 0x399   : > { %v10818_v30 = vpop.f32.mrf.mxu0  ;;  %4124 = vmatprep.subr.bf16.mxu1 %v9142_v50 }
 0x39a   : > { %3411 = vmatmul.mubr.bf16.gmra.mxu1 %v10426_v18  ;;  %v9148_v18 = vld [vmem:[%s12674_s9 + $0xb4] ss:$8 sps:$4 sm:$0xff]  }
 0x39b   : > { %v10824_v60 = vpop.f32.mrf.mxu0  ;;  %3418 = vmatprep.mubr.bf16.mxu1 %v10430_v42  ;;  %8779 = vmatmul.mubr.msk.bf16.gmra.mxu0 %vm2893_vm1, %v10594_v23  ;;  %v10843_v23 = vpop.f32.mrf.mxu1 }
 0x39c   : > { %8782 = vmatprep.mubr.msk.bf16.mxu0 %vm2893_vm1, %v10610_v31  ;;  %4125 = vmatpush2.bf16.msra.mxu1 %v9140_v7  ;;  %v9146_v31 = vld [vmem:[%s12674_s9 + $0xb0] ss:$8 sps:$4 sm:$0xff]   ;;  %v9155_v7 = vld [vmem:[%s12674_s9 + $0x80] ss:$8 sps:$4 sm:$0xff]  }
 0x39d   : > { %v10836_v45 = vpop.f32.mrf.mxu0  ;;  %4126 = vmatprep.subr.bf16.mxu1 %v9145_v5  ;;  %v10859_v49 = vpop.f32.mrf.mxu1 }
 0x39f   : > { %v10841_v42 = vpop.f32.mrf.mxu0  ;;  %v10879_v21 = vpop.f32.mrf.mxu1 }
 0x3a0   : > { %4127 = vmatpush2.bf16.msra.mxu1 %v9143_v56  ;;  %12723 = vst [vmem:[#allocation18_spill] sm:$0xff] %v10879_v21 }
 0x3a1   : > { %v10848_v22 = vpop.f32.mrf.mxu0  ;;  %4128 = vmatprep.subr.bf16.mxu1 %v9148_v18  ;;  %v10895_v50 = vpop.f32.mrf.mxu1 }
 0x3a2   : > { %3419 = vmatmul.mubr.bf16.gmra.mxu1 %v10439_v44  ;;  %v9163_v44 = vld [vmem:[%s12674_s9 + $0x110] ss:$8 sps:$4 sm:$0xff]  }
 0x3a3   : > { %v10854_v27 = vpop.f32.mrf.mxu0  ;;  %3426 = vmatprep.mubr.bf16.mxu1 %v10444_v57  ;;  %8783 = vmatmul.mubr.msk.bf16.gmra.mxu0 %vm2893_vm1, %v10625_v6  ;;  %v9165_v57 = vld [vmem:[%s12674_s9 + $0x114] ss:$8 sps:$4 sm:$0xff]   ;;  %v10905_v56 = vpop.f32.mrf.mxu1 }
 0x3a4   : > { %8786 = vmatprep.mubr.msk.bf16.mxu0 %vm2893_vm1, %v10642_v3  ;;  %4129 = vmatpush2.bf16.msra.mxu1 %v9146_v31  ;;  %v9154_v6 = vld [vmem:[%s12674_s9 + $0x94] ss:$8 sps:$4 sm:$0xff]   ;;  %12724 = vst [vmem:[#allocation19_spill] sm:$0xff] %v10905_v56  ;;  %v12739_v56 = vld [vmem:[#allocation13_spill] sm:$0xff] }
 0x3a5   : > { %v10872_v61 = vpop.f32.mrf.mxu0  ;;  %4130 = vmatprep.subr.bf16.mxu1 %v9151_v24  ;;  %4309 = vmatprep.subr.bf16.mxu0 %v9165_v57  ;;  %v10913_v18 = vpop.f32.mrf.mxu1 }
 0x3a6   : > { %4310 = vmatpush1.bf16.msra.mxu0 %v9163_v44  ;;  %v9168_v44 = vld [vmem:[%s12674_s9 + $0x104] ss:$8 sps:$4 sm:$0xff]  }
 0x3a7   : > { %v10877_v3 = vpop.f32.mrf.mxu0  ;;  %v10925_v57 = vpop.f32.mrf.mxu1  ;;  %4311 = vmatprep.subr.bf16.mxu0 %v9168_v44 }
 0x3a8   : > { %4131 = vmatpush2.bf16.msra.mxu1 %v9149_v39  ;;  %v9166_v39 = vld [vmem:[%s12674_s9 + $0x100] ss:$8 sps:$4 sm:$0xff]   ;;  %12725 = vst [vmem:[#allocation20_spill] sm:$0xff] %v10925_v57 }
 0x3a9   : > { %v10884_v14 = vpop.f32.mrf.mxu0  ;;  %4132 = vmatprep.subr.bf16.mxu1 %v9154_v6  ;;  %v10933_v6 = vpop.f32.mrf.mxu1 }
 0x3aa   : > { %3427 = vmatmul.mubr.bf16.gmra.mxu1 %v10468_v19  ;;  %4312 = vmatpush1.bf16.msra.mxu0 %v9166_v39  ;;  %12726 = vst [vmem:[#allocation21_spill] sm:$0xff] %v10933_v6 }
 0x3ab   : > { %v10890_v52 = vpop.f32.mrf.mxu0  ;;  %3434 = vmatprep.mubr.bf16.mxu1 %v10485_v12  ;;  %8787 = vmatmul.mubr.msk.bf16.gmra.mxu0 %vm2893_vm1, %v10665_v62 }
 0x3ac   : > { %4133 = vmatpush2.bf16.msra.mxu1 %v9152_v54  ;;  %4329 = vmatprep.mubr.bf16.mxu0 %v12717_v26 }
 0x3ad   : > { %v10901_v5 = vpop.f32.mrf.mxu0  ;;  %4134 = vmatprep.subr.bf16.mxu1 %v9157_v35 }
 0x3af   : > { %v10903_v19 = vpop.f32.mrf.mxu0 }
 0x3b0   : > { %4135 = vmatpush2.bf16.msra.mxu1 %v9155_v7  ;;  %v10939_v7 = vpop.f32.mrf.mxu1 }
 0x3b1   : > { %v10907_v12 = vpop.f32.mrf.mxu0  ;;  %12728 = vst [vmem:[#allocation23_spill] sm:$0xff] %v10939_v7 }
 0x3b2   : > { %3435 = vmatmul.mubr.bf16.gmra.mxu1 %v10487_v15 }
 0x3b3   : > { %v10910_v62 = vpop.f32.mrf.mxu0  ;;  %3442 = vmatprep.mubr.bf16.mxu1 %v10520_v33 }
 0x3b5   : > { %v10915_v31 = vpop.f32.mrf.mxu0 }
 0x3b7   : > { %v10917_v24 = vpop.f32.mrf.mxu0 }
 0x3b9   : > { %v10927_v15 = vpop.f32.mrf.mxu0 }
 0x3ba   : > { %3443 = vmatmul.mubr.bf16.gmra.mxu1 %v10522_v16  ;;  %v10947_v16 = vpop.f32.mrf.mxu1 }
 0x3bb   : > { %v10930_v33 = vpop.f32.mrf.mxu0  ;;  %3450 = vmatprep.mubr.bf16.mxu1 %v10546_v47  ;;  %12729 = vst [vmem:[#allocation24_spill] sm:$0xff] %v10947_v16 }
 0x3bc   : > { %v10953_v57 = vpop.f32.mrf.mxu1 }
 0x3bd   : > { %v10935_v54 = vpop.f32.mrf.mxu0  ;;  %12732 = vst [vmem:[#allocation27_spill] sm:$0xff] %v10953_v57 }
 0x3be   : > { %12727 = vst [vmem:[#allocation22_spill] sm:$0xff] %v10935_v54 }
 0x3bf   : > { %v10937_v35 = vpop.f32.mrf.mxu0 }
 0x3c1   : > { %v10941_v26 = vpop.f32.mrf.mxu0 }
 0x3c2   : > { %3451 = vmatmul.mubr.bf16.gmra.mxu1 %v10548_v46  ;;  %v10961_v46 = vpop.f32.mrf.mxu1 }
 0x3c3   : > { %v10944_v44 = vpop.f32.mrf.mxu0  ;;  %3458 = vmatprep.mubr.bf16.mxu1 %v10572_v13  ;;  %12734 = vst [vmem:[#allocation29_spill] sm:$0xff] %v10961_v46 }
 0x3c4   : > { %v10967_v16 = vpop.f32.mrf.mxu1 }
 0x3c5   : > { %v10949_v39 = vpop.f32.mrf.mxu0  ;;  %12737 = vst [vmem:[#allocation32_spill] sm:$0xff] %v10967_v16  ;;  %v12748_v16 = vld [vmem:[#allocation15_spill] sm:$0xff] }
 0x3c6   : > { %12730 = vst [vmem:[#allocation25_spill] sm:$0xff] %v10949_v39 }
 0x3c7   : > { %v10951_v47 = vpop.f32.mrf.mxu0 }
 0x3c8   : > { %12731 = vst [vmem:[#allocation26_spill] sm:$0xff] %v10951_v47 }
 0x3c9   : > { %v10955_v6 = vpop.f32.mrf.mxu0 }
 0x3ca   : > { %12733 = vst [vmem:[#allocation28_spill] sm:$0xff] %v10955_v6  ;;  %3459 = vmatmul.mubr.bf16.gmra.mxu1 %v10574_v34  ;;  %v12741_v6 = vld [vmem:[#allocation14_spill] sm:$0xff]  ;;  %v10975_v34 = vpop.f32.mrf.mxu1 }
 0x3cb   : > { %v10958_v7 = vpop.f32.mrf.mxu0  ;;  %3466 = vmatprep.mubr.bf16.mxu1 %v10599_v2  ;;  %12742 = vst [vmem:[#allocation14_spill] sm:$0xff] %v10975_v34 }
 0x3cc   : > { %v10979_v2 = vpop.f32.mrf.mxu1 }
 0x3cd   : > { %v10963_v21 = vpop.f32.mrf.mxu0  ;;  %12744 = vst [vmem:[#allocation35_spill] sm:$0xff] %v10979_v2 }
 0x3ce   : > { %12735 = vst [vmem:[#allocation30_spill] sm:$0xff] %v10963_v21 }
 0x3cf   : > { %v10965_v13 = vpop.f32.mrf.mxu0 }
 0x3d0   : > { %12736 = vst [vmem:[#allocation31_spill] sm:$0xff] %v10965_v13  ;;  %v10985_v13 = vpop.f32.mrf.mxu1 }
 0x3d1   : > { %v10969_v39 = vpop.f32.mrf.mxu0  ;;  %12747 = vst [vmem:[#allocation38_spill] sm:$0xff] %v10985_v13 }
 0x3d2   : > { %12738 = vst [vmem:[#allocation33_spill] sm:$0xff] %v10969_v39  ;;  %3467 = vmatmul.mubr.bf16.gmra.mxu1 %v12739_v56  ;;  %v12750_v56 = vld [vmem:[#allocation16_spill] sm:$0xff] }
 0x3d3   : > { %v10972_v57 = vpop.f32.mrf.mxu0  ;;  %3474 = vmatprep.mubr.bf16.mxu1 %v12741_v6  ;;  %v10994_v6 = vld [vmem:[%s12673_s8] sm:$0x7] }
 0x3d4   : > { %12740 = vst [vmem:[#allocation13_spill] sm:$0xff] %v10972_v57  ;;  %12751 = vst [vmem:[#allocation16_spill] sm:$0xff] %v10994_v6 }
 0x3d5   : > { %v10977_v47 = vpop.f32.mrf.mxu0 }
 0x3d6   : > { %12743 = vst [vmem:[#allocation34_spill] sm:$0xff] %v10977_v47  ;;  %v12752_v47 = vld [vmem:[#allocation10_spill] sm:$0xff] }
 0x3d7   : > { %v10981_v46 = vpop.f32.mrf.mxu0  ;;  %v10998_v2 = vrot.slane %v10994_v6, %v12752_v47  ;;  %v12756_v47 = vld [vmem:[#allocation17_spill] sm:$0xff] }
 0x3d8   : > { %12745 = vst [vmem:[#allocation36_spill] sm:$0xff] %v10981_v46 }
 0x3d9   : > { %v10983_v21 = vpop.f32.mrf.mxu0 }
 0x3da   : > { %12746 = vst [vmem:[#allocation37_spill] sm:$0xff] %v10983_v21  ;;  %3475 = vmatmul.mubr.bf16.gmra.mxu1 %v12748_v16  ;;  %v11002_v21 = vpop.f32.mrf.mxu1  ;;  %v2993_v16 = vadd.f32 %v10668_v58, %v10998_v2  ;;  %v12757_v58 = vld [vmem:[#allocation11_spill] sm:$0xff] }
 0x3db   : > { %v10988_v39 = vpop.f32.mrf.mxu0  ;;  %3482 = vmatprep.mubr.bf16.mxu1 %v12750_v56  ;;  %12754 = vst [vmem:[#allocation40_spill] sm:$0xff] %v11002_v21  ;;  %v2989_v56 = vadd.f32 %v10657_v51, %v10998_v2  ;;  %v11022_v21 = vrot.slane %v10994_v6, %v12757_v58 }
 0x3dc   : > { %12749 = vst [vmem:[#allocation15_spill] sm:$0xff] %v10988_v39  ;;  %v3186_v39 = vadd.f32 %v10824_v60, %v2993_v16  ;;  %v11013_v57 = vpop.f32.mrf.mxu1 }
 0x3dd   : > { %v11000_v46 = vpop.f32.mrf.mxu0  ;;  %v2991_v16 = vadd.f32 %v10663_v4, %v11022_v21 }
 0x3de   : > { %12753 = vst [vmem:[#allocation39_spill] sm:$0xff] %v11000_v46  ;;  %v3182_v46 = vadd.f32 %v10811_v10, %v2989_v56  ;;  %v3664_v51 = vmax.f32 %v3186_v39, 0.0  ;;  %v2999_v39 = vadd.f32 %v10678_v25, %v10998_v2  ;;  %v3001_v25 = vadd.f32 %v10680_v28, %v11022_v21 }
 0x3df   : > { %v11006_v13 = vpop.f32.mrf.mxu0  ;;  %v3184_v58 = vadd.f32 %v10818_v30, %v2991_v16 }
 0x3e0   : > { %12755 = vst [vmem:[#allocation41_spill] sm:$0xff] %v11006_v13  ;;  %v11024_v13 = vpop.f32.mrf.mxu1  ;;  %v3661_v10 = vmax.f32 %v3182_v46, 0.0  ;;  %v3192_v46 = vadd.f32 %v10841_v42, %v2999_v39  ;;  %v3194_v42 = vadd.f32 %v10848_v22, %v3001_v25 }
 0x3e1   : > { %v11011_v34 = vpop.f32.mrf.mxu0  ;;  %12758 = vst [vmem:[#allocation17_spill] sm:$0xff] %v11024_v13 }
 0x3e2   : > { %3483 = vmatmul.mubr.bf16.gmra.mxu1 %v12756_v47  ;;  %v3003_v47 = vadd.f32 %v10688_v1, %v10998_v2  ;;  %v11037_v6 = vpop.f32.mrf.mxu1  ;;  %v3757_v4 = vpack.c.bf16 %v3664_v51, %v3661_v10  ;;  %v3013_v51 = vadd.f32 %v10714_v0, %v10998_v2 }
 0x3e3   : > { %v11017_v54 = vpop.f32.mrf.mxu0  ;;  %3490 = vmatprep.mubr.bf16.mxu1 %v10659_v11  ;;  %v2987_v11 = vadd.f32 %v10654_v32, %v11022_v21  ;;  %v3663_v32 = vmax.f32 %v3184_v58, 0.0 }
 0x3e4   : > { %v3206_v10 = vadd.f32 %v10890_v52, %v3013_v51 }
 0x3e5   : > { %v11026_v60 = vpop.f32.mrf.mxu0  ;;  %v3180_v1 = vadd.f32 %v10806_v40, %v2987_v11 }
 0x3e6   : > { %12759 = vst [vmem:[#allocation42_spill] sm:$0xff] %v11026_v60  ;;  %v3196_v60 = vadd.f32 %v10854_v27, %v3003_v47  ;;  %v3667_v47 = vmax.f32 %v3192_v46, 0.0  ;;  %v3676_v22 = vmax.f32 %v3206_v10, 0.0  ;;  %v3033_v10 = vadd.f32 %v10799_v9, %v10998_v2 }
 0x3e7   : > { %v11032_v56 = vpop.f32.mrf.mxu0  ;;  %v3660_v27 = vmax.f32 %v3180_v1, 0.0 }
 0x3e8   : > { %12760 = vst [vmem:[#allocation43_spill] sm:$0xff] %v11032_v56  ;;  %v11047_v56 = vpop.f32.mrf.mxu1  ;;  %v3670_v30 = vmax.f32 %v3196_v60, 0.0  ;;  %v3009_v60 = vadd.f32 %v10704_v17, %v10998_v2  ;;  %v3011_v17 = vadd.f32 %v10706_v55, %v11022_v21 }
 0x3e9   : > { %v11042_v13 = vpop.f32.mrf.mxu0  ;;  %v3756_v40 = vpack.c.bf16 %v3663_v32, %v3660_v27  ;;  %v3023_v32 = vadd.f32 %v10747_v8, %v10998_v2  ;;  %v3019_v27 = vadd.f32 %v10730_v37, %v10998_v2  ;;  %v3021_v37 = vadd.f32 %v10732_v38, %v11022_v21 }
 0x3ea   : > { %3491 = vmatmul.mubr.bf16.gmra.mxu1 %v10661_v48  ;;  %v2997_v48 = vadd.f32 %v10674_v59, %v11022_v21  ;;  %v11058_v58 = vpop.f32.mrf.mxu1  ;;  %v3760_v28 = vpack.c.bf16 %v3670_v30, %v3667_v47  ;;  %v3202_v59 = vadd.f32 %v10877_v3, %v3009_v60  ;;  %v3007_v30 = vadd.f32 %v10694_v53, %v11022_v21 }
 0x3eb   : > { %4136 = vmatprep.mubr.bf16.mxu1 %v3757_v4  ;;  %v11049_v16 = vpop.f32.mrf.mxu0  ;;  %v3669_v4 = vmax.f32 %v3194_v42, 0.0  ;;  %v3204_v3 = vadd.f32 %v10884_v14, %v3011_v17  ;;  %v3216_v51 = vadd.f32 %v10910_v62, %v3023_v32  ;;  %v3212_v8 = vadd.f32 %v10903_v19, %v3019_v27 }
 0x3ec   : > { %v3190_v39 = vadd.f32 %v10836_v45, %v2997_v48  ;;  %v11066_v0 = vpop.f32.mrf.mxu1  ;;  %v3673_v45 = vmax.f32 %v3202_v59, 0.0  ;;  %v3200_v48 = vadd.f32 %v10872_v61, %v3007_v30  ;;  %v3214_v19 = vadd.f32 %v10907_v12, %v3021_v37 }
 0x3ed   : > { %v11063_v11 = vpop.f32.mrf.mxu0  ;;  %v3675_v53 = vmax.f32 %v3204_v3, 0.0  ;;  %v3682_v42 = vmax.f32 %v3216_v51, 0.0  ;;  %v3679_v61 = vmax.f32 %v3212_v8, 0.0  ;;  %v3226_v38 = vadd.f32 %v10930_v33, %v3033_v10 }
 0x3ee   : > { %v3666_v46 = vmax.f32 %v3190_v39, 0.0  ;;  %v11073_v52 = vpop.f32.mrf.mxu1  ;;  %v3763_v55 = vpack.c.bf16 %v3676_v22, %v3673_v45  ;;  %v3672_v14 = vmax.f32 %v3200_v48, 0.0  ;;  %v3043_v33 = vadd.f32 %v10859_v49, %v10998_v2 }
 0x3ef   : > { %v11069_v1 = vpop.f32.mrf.mxu0  ;;  %v3766_v17 = vpack.c.bf16 %v3682_v42, %v3679_v61  ;;  %v3688_v12 = vmax.f32 %v3226_v38, 0.0  ;;  %v3039_v51 = vadd.f32 %v10829_v41, %v10998_v2  ;;  %v3041_v41 = vadd.f32 %v10843_v23, %v11022_v21 }
 0x3f0   : > { %v3759_v25 = vpack.c.bf16 %v3669_v4, %v3666_v46  ;;  %v3762_v39 = vpack.c.bf16 %v3675_v53, %v3672_v14  ;;  %v3029_v4 = vadd.f32 %v10771_v20, %v10998_v2  ;;  %v3031_v20 = vadd.f32 %v10781_v36, %v11022_v21 }
 0x3f1   : > { %v11083_v47 = vpop.f32.mrf.mxu0  ;;  %v3232_v49 = vadd.f32 %v10937_v35, %v3039_v51  ;;  %v3053_v14 = vadd.f32 %v10913_v18, %v10998_v2  ;;  %v3037_v35 = vadd.f32 %v10813_v29, %v11022_v21  ;;  %v12762_v18 = vld [vmem:[#allocation26_spill] sm:$0xff]  ;;  %v12766_v51 = vld [vmem:[#allocation28_spill] sm:$0xff] }
 0x3f2   : > { %4137 = vmatmul.mubr.bf16.vlgmr.msra.gmra.mxu1 %v3756_v40  ;;  %v11086_v40 = vpop.f32.mrf.mxu1  ;;  %v3222_v9 = vadd.f32 %v10917_v24, %v3029_v4  ;;  %v3224_v24 = vadd.f32 %v10927_v15, %v3031_v20  ;;  %v12761_v4 = vld [vmem:[#allocation22_spill] sm:$0xff] }
 0x3f3   : > { %4146 = vmatprep.mubr.bf16.mxu1 %v3760_v28  ;;  %v11089_v60 = vpop.f32.mrf.mxu0  ;;  %v3017_v28 = vadd.f32 %v10720_v63, %v11022_v21  ;;  %v3681_v63 = vmax.f32 %v3214_v19, 0.0  ;;  %v3246_v23 = vadd.f32 %v10958_v7, %v3053_v14  ;;  %v3230_v38 = vadd.f32 %v12761_v4, %v3037_v35  ;;  %v12764_v7 = vld [vmem:[#allocation24_spill] sm:$0xff]  ;;  %v12769_v14 = vld [vmem:[#allocation25_spill] sm:$0xff] }
 0x3f4   : > { %v11093_v62 = vpop.f32.mrf.mxu1 }
 0x3f5   : > { %v11105_v22 = vpop.f32.mrf.mxu0  ;;  %v3210_v46 = vadd.f32 %v10901_v5, %v3017_v28  ;;  %v3027_v5 = vadd.f32 %v10759_v43, %v11022_v21  ;;  %v3687_v43 = vmax.f32 %v3224_v24, 0.0  ;;  %v3234_v28 = vadd.f32 %v10941_v26, %v3041_v41  ;;  %v12763_v26 = vld [vmem:[#allocation19_spill] sm:$0xff] }
 0x3f6   : > { %v11100_v59 = vpop.f32.mrf.mxu1  ;;  %v3690_v20 = vmax.f32 %v3230_v38, 0.0  ;;  %v9169_v41 = vld [vmem:[%s12676_s11 + $0x78] sm:$0xff]  }
 0x3f7   : > { %v11111_v45 = vpop.f32.mrf.mxu0  ;;  %v3678_v30 = vmax.f32 %v3210_v46, 0.0  ;;  %v3220_v8 = vadd.f32 %v10915_v31, %v3027_v5  ;;  %v3691_v31 = vmax.f32 %v3232_v49, 0.0  ;;  %v3693_v29 = vmax.f32 %v3234_v28, 0.0  ;;  %v12765_v5 = vld [vmem:[#allocation18_spill] sm:$0xff]  ;;  %v12768_v49 = vld [vmem:[#allocation13_spill] sm:$0xff]  ;;  %8638 = vmatprep.subr.bf16.mxu1 %v9169_v41  ;;  %v12778_v41 = vld [vmem:[#allocation36_spill] sm:$0xff] }
 0x3f8   : > { %v11109_v32 = vpop.f32.mrf.mxu1 }
 0x3f9   : > { %v3765_v3 = vpack.c.bf16 %v3681_v63, %v3678_v30  ;;  %v11125_v48 = vpop.f32.mrf.mxu0  ;;  %v3684_v37 = vmax.f32 %v3220_v8, 0.0  ;;  %v3700_v63 = vmax.f32 %v3246_v23, 0.0  ;;  %v3063_v30 = vadd.f32 %v12764_v7, %v10998_v2 }
 0x3fa   : > { %4147 = vmatmul.mubr.bf16.gmra.mxu1 %v3759_v25  ;;  %v3685_v25 = vmax.f32 %v3222_v9, 0.0  ;;  %v11120_v27 = vpop.f32.mrf.mxu1  ;;  %v3771_v24 = vpack.c.bf16 %v3693_v29, %v3690_v20  ;;  %v12773_v20 = vld [vmem:[#allocation20_spill] sm:$0xff] }
 0x3fb   : > { %4156 = vmatprep.mubr.bf16.mxu1 %v3763_v55  ;;  %v3236_v55 = vadd.f32 %v10944_v44, %v3043_v33  ;;  %v11131_v42 = vpop.f32.mrf.mxu0  ;;  %v3768_v61 = vpack.c.bf16 %v3687_v43, %v3684_v37  ;;  %v3256_v43 = vadd.f32 %v12768_v49, %v3063_v30  ;;  %v9170_v37 = vld [vmem:[%s12676_s11 + $0x38] sm:$0xff]   ;;  %v3057_v7 = vadd.f32 %v12773_v20, %v11022_v21  ;;  %v12781_v20 = vld [vmem:[#allocation37_spill] sm:$0xff] }
 0x3fc   : > { %v3769_v36 = vpack.c.bf16 %v3688_v12, %v3685_v25  ;;  %v11129_v53 = vpop.f32.mrf.mxu1  ;;  %v3051_v12 = vadd.f32 %v12763_v26, %v11022_v21  ;;  %8639 = vmatpush3.bf16.msra.mxu1 %v9170_v37 }
 0x3fd   : > { %v3694_v15 = vmax.f32 %v3236_v55, 0.0  ;;  %v3706_v4 = vmax.f32 %v3256_v43, 0.0  ;;  %v12777_v43 = vld [vmem:[#allocation30_spill] sm:$0xff] }
 0x3fe   : > { %v3244_v55 = vadd.f32 %v12766_v51, %v3051_v12 }
 0x3ff   : > { %v3772_v19 = vpack.c.bf16 %v3694_v15, %v3691_v31 }
 0x400   : > { %v3699_v23 = vmax.f32 %v3244_v55, 0.0  ;;  %v12776_v55 = vld [vmem:[#allocation15_spill] sm:$0xff] }
 0x402   : > { %4157 = vmatmul.mubr.bf16.gmra.mxu1 %v3762_v39  ;;  %v3049_v39 = vadd.f32 %v10895_v50, %v10998_v2 }
 0x403   : > { %4166 = vmatprep.mubr.bf16.mxu1 %v3766_v17 }
 0x404   : > { %v11135_v44 = vpop.f32.mrf.mxu1  ;;  %v3242_v46 = vadd.f32 %v12762_v18, %v3049_v39  ;;  %v12771_v18 = vld [vmem:[#allocation23_spill] sm:$0xff] }
 0x405   : > { %v11139_v10 = vpop.f32.mrf.mxu0 }
 0x406   : > { %v11148_v17 = vpop.f32.mrf.mxu1  ;;  %v3697_v33 = vmax.f32 %v3242_v46, 0.0  ;;  %v3061_v46 = vadd.f32 %v12771_v18, %v11022_v21 }
 0x407   : > { %v11151_v9 = vpop.f32.mrf.mxu0 }
 0x408   : > { %v11155_v50 = vpop.f32.mrf.mxu1  ;;  %v3775_v15 = vpack.c.bf16 %v3700_v63, %v3697_v33  ;;  %v12772_v63 = vld [vmem:[#allocation14_spill] sm:$0xff]  ;;  %v12774_v33 = vld [vmem:[#allocation33_spill] sm:$0xff] }
 0x409   : > { %v11159_v25 = vpop.f32.mrf.mxu0  ;;  %v3073_v26 = vadd.f32 %v12772_v63, %v10998_v2  ;;  %v12780_v63 = vld [vmem:[#allocation27_spill] sm:$0xff] }
 0x40a   : > { %4167 = vmatmul.mubr.bf16.gmra.mxu1 %v3765_v3  ;;  %v3047_v3 = vadd.f32 %v12765_v5, %v11022_v21  ;;  %v11174_v35 = vpop.f32.mrf.mxu1  ;;  %v3254_v5 = vadd.f32 %v12774_v33, %v3061_v46  ;;  %v12782_v33 = vld [vmem:[#allocation38_spill] sm:$0xff] }
 0x40b   : > { %4176 = vmatprep.mubr.bf16.mxu1 %v3769_v36  ;;  %v12767_v36 = vld [vmem:[#allocation21_spill] sm:$0xff]  ;;  %v11177_v39 = vpop.f32.mrf.mxu0 }
 0x40c   : > { %v3059_v8 = vadd.f32 %v12767_v36, %v10998_v2  ;;  %v3240_v31 = vadd.f32 %v12769_v14, %v3047_v3  ;;  %v3266_v36 = vadd.f32 %v12776_v55, %v3073_v26  ;;  %v3705_v14 = vmax.f32 %v3254_v5, 0.0 }
 0x40d   : > { %v3067_v26 = vadd.f32 %v12780_v63, %v11022_v21  ;;  %v3079_v5 = vadd.f32 %v12782_v33, %v10998_v2 }
 0x40e   : > { %v3696_v29 = vmax.f32 %v3240_v31, 0.0 }
 0x410   : > { %v3774_v30 = vpack.c.bf16 %v3699_v23, %v3696_v29  ;;  %v12779_v23 = vld [vmem:[#allocation32_spill] sm:$0xff]  ;;  %v3083_v29 = vadd.f32 %v11013_v57, %v10998_v2  ;;  %v9171_v57 = vld [vmem:[%s12676_s11 + $0x70] sm:$0xff]  }
 0x411   : > { %v3071_v18 = vadd.f32 %v12779_v23, %v11022_v21  ;;  %8640 = vmatprep.subr.bf16.mxu1 %v9171_v57  ;;  %v3089_v57 = vadd.f32 %v11037_v6, %v10998_v2 }
 0x412   : > { %4177 = vmatmul.mubr.bf16.gmra.mxu1 %v3768_v61  ;;  %v12770_v61 = vld [vmem:[#allocation31_spill] sm:$0xff] }
 0x413   : > { %4186 = vmatprep.mubr.bf16.mxu1 %v3772_v19  ;;  %v3252_v28 = vadd.f32 %v12770_v61, %v3059_v8  ;;  %v3712_v61 = vmax.f32 %v3266_v36, 0.0  ;;  %v9172_v36 = vld [vmem:[%s12676_s11 + $0x30] sm:$0xff]  }
 0x414   : > { %8641 = vmatpush3.bf16.msra.mxu1 %v9172_v36 }
 0x415   : > { %v3703_v12 = vmax.f32 %v3252_v28, 0.0 }
 0x417   : > { %v11179_v19 = vpop.f32.mrf.mxu1  ;;  %v3778_v49 = vpack.c.bf16 %v3706_v4, %v3703_v12 }
 0x418   : > { %v11181_v38 = vpop.f32.mrf.mxu0 }
 0x419   : > { %v11190_v3 = vpop.f32.mrf.mxu1 }
 0x41a   : > { %4187 = vmatmul.mubr.bf16.gmra.mxu1 %v3771_v24  ;;  %v12775_v24 = vld [vmem:[#allocation29_spill] sm:$0xff]  ;;  %v11195_v8 = vpop.f32.mrf.mxu0 }
 0x41b   : > { %4196 = vmatprep.mubr.bf16.mxu1 %v3775_v15  ;;  %v3069_v51 = vadd.f32 %v12775_v24, %v10998_v2  ;;  %v3250_v15 = vadd.f32 %v12777_v43, %v3057_v7  ;;  %v11199_v31 = vpop.f32.mrf.mxu1  ;;  %v3264_v7 = vadd.f32 %v12781_v20, %v3071_v18  ;;  %v3276_v24 = vadd.f32 %v11017_v54, %v3083_v29 }
 0x41c   : > { %v11201_v28 = vpop.f32.mrf.mxu0 }
 0x41d   : > { %v3262_v37 = vadd.f32 %v12778_v41, %v3069_v51  ;;  %v3702_v46 = vmax.f32 %v3250_v15, 0.0  ;;  %v12784_v41 = vld [vmem:[#allocation41_spill] sm:$0xff]  ;;  %v3711_v54 = vmax.f32 %v3264_v7, 0.0  ;;  %v3718_v23 = vmax.f32 %v3276_v24, 0.0  ;;  %v12788_v7 = vld [vmem:[#allocation35_spill] sm:$0xff] }
 0x41e   : > { %v11215_v51 = vpop.f32.mrf.mxu0  ;;  %v3077_v33 = vadd.f32 %v12788_v7, %v11022_v21 }
 0x41f   : > { %v3709_v4 = vmax.f32 %v3262_v37, 0.0  ;;  %v3777_v12 = vpack.c.bf16 %v3705_v14, %v3702_v46  ;;  %v3272_v37 = vadd.f32 %v12784_v41, %v3079_v5  ;;  %v12786_v46 = vld [vmem:[#allocation40_spill] sm:$0xff] }
 0x420   : > { %v3081_v29 = vadd.f32 %v12786_v46, %v11022_v21  ;;  %v12790_v46 = vld [vmem:[#allocation43_spill] sm:$0xff] }
 0x421   : > { %v3781_v55 = vpack.c.bf16 %v3712_v61, %v3709_v4 }
 0x422   : > { %4197 = vmatmul.mubr.bf16.gmra.mxu1 %v3774_v30  ;;  %v11210_v30 = vpop.f32.mrf.mxu1  ;;  %v3274_v24 = vadd.f32 %v11011_v34, %v3081_v29  ;;  %v12791_v34 = vld [vmem:[#allocation12_spill] sm:$0xff] }
 0x423   : > { %4206 = vmatprep.mubr.bf16.mxu1 %v3778_v49  ;;  %v12783_v49 = vld [vmem:[#allocation34_spill] sm:$0xff] }
 0x424   : > { %v3260_v43 = vadd.f32 %v12783_v49, %v3067_v26  ;;  %v3093_v26 = vadd.f32 %v11058_v58, %v10998_v2  ;;  %v12789_v58 = vld [vmem:[#allocation39_spill] sm:$0xff] }
 0x425   : > { %v3270_v41 = vadd.f32 %v12789_v58, %v3077_v33  ;;  %v12793_v58 = vld [vmem:[#allocation17_spill] sm:$0xff] }
 0x426   : > { %v3708_v4 = vmax.f32 %v3260_v43, 0.0  ;;  %v3286_v36 = vadd.f32 %v11049_v16, %v3093_v26 }
 0x428   : > { %v3780_v5 = vpack.c.bf16 %v3711_v54, %v3708_v4  ;;  %v12792_v54 = vld [vmem:[#allocation16_spill] sm:$0xff]  ;;  %v3717_v4 = vmax.f32 %v3274_v24, 0.0  ;;  %v3099_v24 = vadd.f32 %v11073_v52, %v10998_v2 }
 0x429   : > { %v11257_v29 = vrot.slane %v12792_v54, %v12791_v34 }
 0x42a   : > { %v11224_v15 = vpop.f32.mrf.mxu1  ;;  %4207 = vmatmul.mubr.bf16.gmra.mxu1 %v3777_v12  ;;  %v3715_v12 = vmax.f32 %v3272_v37, 0.0  ;;  %v3292_v52 = vadd.f32 %v11069_v1, %v3099_v24 }
 0x42b   : > { %v11227_v14 = vpop.f32.mrf.mxu0  ;;  %4216 = vmatprep.mubr.bf16.mxu1 %v3781_v55 }
 0x42c   : > { %12785 = vst [vmem:[#allocation22_spill] sm:$0xff] %v11227_v14  ;;  %v11229_v61 = vpop.f32.mrf.mxu1  ;;  %v3784_v43 = vpack.c.bf16 %v3718_v23, %v3715_v12  ;;  %v3282_v14 = vadd.f32 %v12790_v46, %v3089_v57  ;;  %v3091_v23 = vadd.f32 %v11047_v56, %v11022_v21  ;;  %v3714_v12 = vmax.f32 %v3270_v41, 0.0 }
 0x42d   : > { %v11231_v18 = vpop.f32.mrf.mxu0  ;;  %v3087_v46 = vadd.f32 %v12793_v58, %v11022_v21 }
 0x42e   : > { %v11235_v63 = vpop.f32.mrf.mxu1  ;;  %v3721_v57 = vmax.f32 %v3282_v14, 0.0  ;;  %v9174_v14 = vld [vmem:[%s12676_s11 + $0x28] sm:$0xff]  }
 0x42f   : > { %v11239_v20 = vpop.f32.mrf.mxu0 }
 0x430   : > { %12787 = vst [vmem:[#allocation26_spill] sm:$0xff] %v11239_v20  ;;  %v11244_v55 = vpop.f32.mrf.mxu1  ;;  %v3724_v20 = vmax.f32 %v3286_v36, 0.0  ;;  %v3783_v36 = vpack.c.bf16 %v3717_v4, %v3714_v12 }
 0x431   : > { %v11249_v49 = vpop.f32.mrf.mxu0 }
 0x432   : > { %v8522_v37 = vpop.f32.mrf.mxu1  ;;  %4217 = vmatmul.mubr.bf16.gmra.mxu1 %v3780_v5  ;;  %v3103_v5 = vadd.f32 %v11093_v62, %v10998_v2  ;;  %v3787_v34 = vpack.c.bf16 %v3724_v20, %v3721_v57  ;;  %v9173_v62 = vld [vmem:[%s12676_s11 + $0x68] sm:$0xff]  }
 0x433   : > { %v11253_v7 = vpop.f32.mrf.mxu0  ;;  %4226 = vmatprep.mubr.bf16.mxu1 %v3784_v43  ;;  %8642 = vmatprep.subr.bf16.mxu1 %v9173_v62 }
 0x434   : > { %v8523_v6 = vpop.f32.mrf.mxu1  ;;  %v3296_v56 = vadd.f32 %v11089_v60, %v3103_v5  ;;  %8643 = vmatpush3.bf16.msra.mxu1 %v9174_v14 }
 0x435   : > { %v8524_v16 = vadd.f32 %v8523_v6, %v8522_v37  ;;  %v3533_v26 = vpop.f32.mrf.mxu0  ;;  %v3284_v37 = vadd.f32 %v11042_v13, %v3091_v23 }
 0x436   : > { %v8525_v33 = vpop.f32.mrf.mxu1 }
 0x437   : > { %v3373_v43 = vadd.f32 %v8524_v16, %v11257_v29  ;;  %v8761_v54 = vpop.f32.mrf.mxu0  ;;  %v12794_v16 = vld [vmem:[#allocation42_spill] sm:$0xff]  ;;  %v3723_v60 = vmax.f32 %v3284_v37, 0.0 }
 0x438   : > { %v8526_v6 = vpop.f32.mrf.mxu1  ;;  %v3280_v58 = vadd.f32 %v12794_v16, %v3087_v46  ;;  %v3727_v16 = vmax.f32 %v3292_v52, 0.0 }
 0x439   : > { %v8527_v41 = vadd.f32 %v8526_v6, %v8525_v33  ;;  %v3534_v13 = vadd.f32 %v3533_v26, %v3373_v43  ;;  %v3536_v20 = vpop.f32.mrf.mxu0  ;;  %v3730_v33 = vmax.f32 %v3296_v56, 0.0  ;;  %v3101_v6 = vadd.f32 %v11086_v40, %v11022_v21 }
 0x43a   : > { %v8528_v4 = vpop.f32.mrf.mxu1  ;;  %4227 = vmatmul.mubr.bf16.gmra.mxu1 %v3783_v36  ;;  %v3720_v46 = vmax.f32 %v3280_v58, 0.0  ;;  %v3113_v26 = vadd.f32 %v11129_v53, %v10998_v2  ;;  %v3097_v36 = vadd.f32 %v11066_v0, %v11022_v21  ;;  %v9176_v0 = vld [vmem:[%s12676_s11 + $0x20] sm:$0xff]  }
 0x43b   : > { %v3376_v23 = vadd.f32 %v8527_v41, %v11257_v29  ;;  %4236 = vmatprep.mubr.bf16.mxu1 %v3787_v34  ;;  %v3662_v43 = vmax.f32 %v3534_v13, 0.0  ;;  %v3294_v56 = vadd.f32 %v11083_v47, %v3101_v6  ;;  %v3109_v41 = vadd.f32 %v11109_v32, %v10998_v2  ;;  %v11289_v40 = vpop.f32.mrf.mxu0 }
 0x43c   : > { %v8529_v12 = vpop.f32.mrf.mxu1  ;;  %v3786_v37 = vpack.c.bf16 %v3723_v60, %v3720_v46  ;;  %v3306_v14 = vadd.f32 %v11131_v42, %v3113_v26  ;;  %v3790_v52 = vpack.c.bf16 %v3730_v33, %v3727_v16  ;;  %v3290_v47 = vadd.f32 %v11063_v11, %v3097_v36 }
 0x43d   : > { %v3537_v5 = vadd.f32 %v3536_v20, %v3376_v23  ;;  %v8530_v57 = vadd.f32 %v8529_v12, %v8528_v4  ;;  %v9175_v4 = vld [vmem:[%s12676_s11 + $0x60] sm:$0xff]   ;;  %v3302_v32 = vadd.f32 %v11111_v45, %v3109_v41  ;;  %v3729_v60 = vmax.f32 %v3294_v56, 0.0  ;;  %v3549_v20 = vpop.f32.mrf.mxu0 }
 0x43e   : > { %v8531_v1 = vpop.f32.mrf.mxu1  ;;  %v12795_v33 = vmov 0   ;;  %8644 = vmatprep.subr.bf16.mxu1 %v9175_v4  ;;  %v3123_v11 = vadd.f32 %v11174_v35, %v10998_v2  ;;  %v3726_v6 = vmax.f32 %v3290_v47, 0.0 }
 0x43f   : > { %v3665_v24 = vmax.f32 %v3537_v5, 0.0  ;;  %v3381_v34 = vadd.f32 %v8530_v57, %v11257_v29  ;;  %v3736_v5 = vmax.f32 %v3306_v14, 0.0  ;;  %8645 = vmatpush3.bf16.msra.mxu1 %v9176_v0  ;;  %v3733_v46 = vmax.f32 %v3302_v32, 0.0  ;;  %v8765_v36 = vpop.f32.mrf.mxu0 }
 0x440   : > { %v8532_v62 = vpop.f32.mrf.mxu1  ;;  %v3789_v35 = vpack.c.bf16 %v3729_v60, %v3726_v6 }
 0x441   : > { %v3758_v58 = vpack.c.bf16 %v3665_v24, %v3662_v43  ;;  %v8533_v53 = vadd.f32 %v8532_v62, %v8531_v1  ;;  %v3542_v23 = vadd.f32 %v11253_v7, %v3381_v34  ;;  %v3111_v7 = vadd.f32 %v11120_v27, %v11022_v21  ;;  %v3552_v4 = vpop.f32.mrf.mxu0 }
 0x442   : > { %v8534_v13 = vpop.f32.mrf.mxu1  ;;  %4237 = vmatmul.mubr.bf16.gmra.mxu1 %v3786_v37  ;;  %v3119_v1 = vadd.f32 %v11148_v17, %v10998_v2  ;;  %v3107_v34 = vadd.f32 %v11100_v59, %v11022_v21  ;;  %v3793_v56 = vpack.c.bf16 %v3736_v5, %v3733_v46  ;;  %v3316_v27 = vadd.f32 %v11177_v39, %v3123_v11  ;;  %v9178_v46 = vld [vmem:[%s12676_s11 + $0x18] sm:$0xff]  }
 0x443   : > { %v3384_v42 = vadd.f32 %v8533_v53, %v11257_v29  ;;  %4246 = vmatprep.mubr.bf16.mxu1 %v3790_v52  ;;  %8353 = vmatmul.mubr.msk.bf16.vlgmr.msra.gmra.mxu0 %vm2893_vm1, %v3758_v58  ;;  %v3668_v26 = vmax.f32 %v3542_v23, 0.0  ;;  %v3129_v23 = vadd.f32 %v11190_v3, %v10998_v2  ;;  %v9177_v3 = vld [vmem:[%s12676_s11 + $0x58] sm:$0xff]  }
 0x444   : > { %v8535_v12 = vpop.f32.mrf.mxu1  ;;  %4339 = vmatprep.mubr.bf16.mxu0 %v12795_v33  ;;  %v3300_v14 = vadd.f32 %v11105_v22, %v3107_v34  ;;  %v3312_v58 = vadd.f32 %v11151_v9, %v3119_v1  ;;  %v3742_v0 = vmax.f32 %v3316_v27, 0.0  ;;  %v3133_v22 = vadd.f32 %v11210_v30, %v10998_v2  ;;  %8646 = vmatprep.subr.bf16.mxu1 %v9177_v3 }
 0x445   : > { %v3545_v45 = vadd.f32 %v8761_v54, %v3384_v42  ;;  %v8536_v57 = vadd.f32 %v8535_v12, %v8534_v13  ;;  %v3304_v54 = vadd.f32 %v11125_v48, %v3111_v7  ;;  %v3121_v48 = vadd.f32 %v11155_v50, %v11022_v21  ;;  %8647 = vmatpush3.bf16.msra.mxu1 %v9178_v46 }
 0x446   : > { %v8537_v16 = vpop.f32.mrf.mxu1  ;;  %v3732_v32 = vmax.f32 %v3300_v14, 0.0  ;;  %v3117_v13 = vadd.f32 %v11135_v44, %v11022_v21  ;;  %v3739_v60 = vmax.f32 %v3312_v58, 0.0  ;;  %v3326_v6 = vadd.f32 %v11215_v51, %v3133_v22 }
 0x447   : > { %v3671_v43 = vmax.f32 %v3545_v45, 0.0  ;;  %v3389_v24 = vadd.f32 %v8536_v57, %v11257_v29  ;;  %v3735_v59 = vmax.f32 %v3304_v54, 0.0  ;;  %v3314_v11 = vadd.f32 %v11159_v25, %v3121_v48  ;;  %v11330_v45 = vpop.f32.mrf.mxu0 }
 0x448   : > { %v8538_v37 = vpop.f32.mrf.mxu1  ;;  %v3796_v57 = vpack.c.bf16 %v3742_v0, %v3739_v60  ;;  %v3322_v25 = vadd.f32 %v11195_v8, %v3129_v23  ;;  %v3143_v8 = vadd.f32 %v11244_v55, %v10998_v2  ;;  %v3141_v22 = vadd.f32 %v11235_v63, %v11022_v21 }
 0x449   : > { %v3761_v41 = vpack.c.bf16 %v3671_v43, %v3668_v26  ;;  %v8539_v62 = vadd.f32 %v8538_v37, %v8537_v16  ;;  %v3550_v53 = vadd.f32 %v3549_v20, %v3389_v24  ;;  %v3792_v5 = vpack.c.bf16 %v3735_v59, %v3732_v32  ;;  %v3565_v34 = vpop.f32.mrf.mxu0 }
 0x44a   : > { %v8540_v17 = vpop.f32.mrf.mxu1  ;;  %4247 = vmatmul.mubr.bf16.gmra.mxu1 %v3789_v35  ;;  %v3310_v16 = vadd.f32 %v11139_v10, %v3117_v13  ;;  %v3741_v43 = vmax.f32 %v3314_v11, 0.0  ;;  %v3131_v24 = vadd.f32 %v11199_v31, %v11022_v21  ;;  %v3748_v10 = vmax.f32 %v3326_v6, 0.0 }
 0x44b   : > { %v3392_v52 = vadd.f32 %v8539_v62, %v11257_v29  ;;  %4256 = vmatprep.mubr.bf16.mxu1 %v3793_v56  ;;  %8354 = vmatmul.mubr.msk.bf16.gmra.mxu0 %vm2893_vm1, %v3761_v41  ;;  %v3674_v50 = vmax.f32 %v3550_v53, 0.0  ;;  %v3127_v56 = vadd.f32 %v11179_v19, %v11022_v21  ;;  %v3745_v27 = vmax.f32 %v3322_v25, 0.0  ;;  %v8769_v55 = vpop.f32.mrf.mxu0 }
 0x44c   : > { %v8541_v39 = vpop.f32.mrf.mxu1  ;;  %4349 = vmatprep.mubr.bf16.mxu0 %v12795_v33  ;;  %v3738_v37 = vmax.f32 %v3310_v16, 0.0  ;;  %v3139_v31 = vadd.f32 %v11229_v61, %v10998_v2  ;;  %v3324_v53 = vadd.f32 %v11201_v28, %v3131_v24  ;;  %v3336_v59 = vadd.f32 %v11249_v49, %v3143_v8 }
 0x44d   : > { %v3553_v47 = vadd.f32 %v3552_v4, %v3392_v52  ;;  %v8542_v9 = vadd.f32 %v8541_v39, %v8540_v17  ;;  %v3799_v52 = vpack.c.bf16 %v3748_v10, %v3745_v27  ;;  %v3320_v19 = vadd.f32 %v11181_v38, %v3127_v56 }
 0x44e   : > { %v8543_v42 = vpop.f32.mrf.mxu1  ;;  %v3795_v58 = vpack.c.bf16 %v3741_v43, %v3738_v37  ;;  %v3332_v2 = vadd.f32 %v11231_v18, %v3139_v31  ;;  %v3747_v28 = vmax.f32 %v3324_v53, 0.0  ;;  %v3137_v18 = vadd.f32 %v11224_v15, %v11022_v21  ;;  %v9180_v21 = vld [vmem:[%s12676_s11 + $0x10] sm:$0xff]  }
 0x44f   : > { %v3677_v20 = vmax.f32 %v3553_v47, 0.0  ;;  %v3397_v12 = vadd.f32 %v8542_v9, %v11257_v29  ;;  %v3568_v47 = vpop.f32.mrf.mxu0  ;;  %v3754_v9 = vmax.f32 %v3336_v59, 0.0  ;;  %v3744_v13 = vmax.f32 %v3320_v19, 0.0  ;;  %v12797_v15 = vld [vmem:[#allocation22_spill] sm:$0xff] }
 0x450   : > { %v8544_v30 = vpop.f32.mrf.mxu1  ;;  %v3330_v3 = vadd.f32 %v12797_v15, %v3137_v18 }
 0x451   : > { %v3764_v7 = vpack.c.bf16 %v3677_v20, %v3674_v50  ;;  %v8545_v44 = vadd.f32 %v8544_v30, %v8543_v42  ;;  %v3558_v26 = vadd.f32 %v11289_v40, %v3397_v12  ;;  %v3751_v42 = vmax.f32 %v3332_v2, 0.0  ;;  %v8772_v11 = vpop.f32.mrf.mxu0  ;;  %v9181_v2 = vld [vmem:[%s12676_s11 + $0x48] sm:$0xff]  }
 0x452   : > { %v8546_v1 = vpop.f32.mrf.mxu1  ;;  %4257 = vmatmul.mubr.bf16.gmra.mxu1 %v3792_v5  ;;  %v3798_v12 = vpack.c.bf16 %v3747_v28, %v3744_v13  ;;  %v12796_v5 = vld [vmem:[#allocation26_spill] sm:$0xff] }
 0x453   : > { %v3400_v51 = vadd.f32 %v8545_v44, %v11257_v29  ;;  %4266 = vmatprep.mubr.bf16.mxu1 %v3796_v57  ;;  %8355 = vmatmul.mubr.msk.bf16.gmra.mxu0 %vm2893_vm1, %v3764_v7  ;;  %v3680_v62 = vmax.f32 %v3558_v26, 0.0  ;;  %v3334_v63 = vadd.f32 %v12796_v5, %v3141_v22  ;;  %v3802_v57 = vpack.c.bf16 %v3754_v9, %v3751_v42  ;;  %v9179_v44 = vld [vmem:[%s12676_s11 + $0x50] sm:$0xff]   ;;  %v3581_v26 = vpop.f32.mrf.mxu0 }
 0x454   : > { %v8547_v35 = vpop.f32.mrf.mxu1  ;;  %4359 = vmatprep.mubr.bf16.mxu0 %v12795_v33  ;;  %8648 = vmatprep.subr.bf16.mxu1 %v9179_v44 }
 0x455   : > { %v3561_v54 = vadd.f32 %v8765_v36, %v3400_v51  ;;  %v8548_v40 = vadd.f32 %v8547_v35, %v8546_v1  ;;  %v3753_v1 = vmax.f32 %v3334_v63, 0.0  ;;  %8649 = vmatpush3.bf16.msra.mxu1 %v9180_v21 }
 0x456   : > { %v8549_v41 = vpop.f32.mrf.mxu1  ;;  %8650 = vmatprep.subr.bf16.mxu1 %v9181_v2 }
 0x457   : > { %v3683_v14 = vmax.f32 %v3561_v54, 0.0  ;;  %v3405_v17 = vadd.f32 %v8548_v40, %v11257_v29  ;;  %v8773_v40 = vpop.f32.mrf.mxu0 }
 0x458   : > { %v8550_v36 = vpop.f32.mrf.mxu1 }
 0x459   : > { %v3767_v48 = vpack.c.bf16 %v3683_v14, %v3680_v62  ;;  %v8551_v4 = vadd.f32 %v8550_v36, %v8549_v41  ;;  %v3566_v61 = vadd.f32 %v3565_v34, %v3405_v17  ;;  %v3750_v34 = vmax.f32 %v3330_v3, 0.0  ;;  %v3584_v14 = vpop.f32.mrf.mxu0 }
 0x45a   : > { %v8552_v39 = vpop.f32.mrf.mxu1  ;;  %4267 = vmatmul.mubr.bf16.gmra.mxu1 %v3795_v58 }
 0x45b   : > { %v3408_v0 = vadd.f32 %v8551_v4, %v11257_v29  ;;  %4276 = vmatprep.mubr.bf16.mxu1 %v3799_v52  ;;  %8356 = vmatmul.mubr.msk.bf16.gmra.mxu0 %vm2893_vm1, %v3767_v48  ;;  %v3686_v60 = vmax.f32 %v3566_v61, 0.0  ;;  %v3801_v54 = vpack.c.bf16 %v3753_v1, %v3750_v34  ;;  %v8776_v48 = vpop.f32.mrf.mxu0  ;;  %v9182_v61 = vld [vmem:[%s12676_s11 + $0x8] sm:$0xff]   ;;  %v9183_v1 = vld [vmem:[%s12676_s11 + $0x40] sm:$0xff]  }
 0x45c   : > { %v8553_v49 = vpop.f32.mrf.mxu1  ;;  %4369 = vmatprep.mubr.bf16.mxu0 %v12795_v33  ;;  %8651 = vmatpush3.bf16.msra.mxu1 %v9182_v61 }
 0x45d   : > { %v3569_v38 = vadd.f32 %v3568_v47, %v3408_v0  ;;  %v8554_v32 = vadd.f32 %v8553_v49, %v8552_v39  ;;  %v3597_v47 = vpop.f32.mrf.mxu0  ;;  %8652 = vmatprep.subr.bf16.mxu1 %v9183_v1 }
 0x45e   : > { %v8555_v23 = vpop.f32.mrf.mxu1 }
 0x45f   : > { %v3689_v50 = vmax.f32 %v3569_v38, 0.0  ;;  %v3413_v20 = vadd.f32 %v8554_v32, %v11257_v29  ;;  %v8777_v42 = vpop.f32.mrf.mxu0 }
 0x460   : > { %v8556_v30 = vpop.f32.mrf.mxu1 }
 0x461   : > { %v3770_v6 = vpack.c.bf16 %v3689_v50, %v3686_v60  ;;  %v8557_v7 = vadd.f32 %v8556_v30, %v8555_v23  ;;  %v3574_v16 = vadd.f32 %v11330_v45, %v3413_v20 }
 0x462   : > { %v8558_v46 = vpop.f32.mrf.mxu1  ;;  %4277 = vmatmul.mubr.bf16.gmra.mxu1 %v3798_v12 }
 0x463   : > { %v3416_v25 = vadd.f32 %v8557_v7, %v11257_v29  ;;  %4286 = vmatprep.mubr.bf16.mxu1 %v3802_v57  ;;  %8357 = vmatmul.mubr.msk.bf16.gmra.mxu0 %vm2893_vm1, %v3770_v6  ;;  %v3692_v10 = vmax.f32 %v3574_v16, 0.0 }
 0x464   : > { %v8559_v51 = vpop.f32.mrf.mxu1  ;;  %4379 = vmatprep.mubr.bf16.mxu0 %v12795_v33 }
 0x465   : > { %v3577_v43 = vadd.f32 %v8769_v55, %v3416_v25  ;;  %v8560_v24 = vadd.f32 %v8559_v51, %v8558_v46 }
 0x466   : > { %v8561_v35 = vpop.f32.mrf.mxu1 }
 0x467   : > { %v3695_v8 = vmax.f32 %v3577_v43, 0.0  ;;  %v3421_v45 = vadd.f32 %v8560_v24, %v11257_v29 }
 0x468   : > { %v8562_v37 = vpop.f32.mrf.mxu1 }
 0x469   : > { %v3773_v56 = vpack.c.bf16 %v3695_v8, %v3692_v10  ;;  %v8563_v27 = vadd.f32 %v8562_v37, %v8561_v35  ;;  %v3582_v31 = vadd.f32 %v3581_v26, %v3421_v45  ;;  %v9184_v26 = vld [vmem:[%s12676_s11] sm:$0xff]  }
 0x46a   : > { %v8564_v41 = vpop.f32.mrf.mxu1  ;;  %4287 = vmatmul.mubr.bf16.gmra.mxu1 %v3801_v54 }
 0x46b   : > { %v3424_v62 = vadd.f32 %v8563_v27, %v11257_v29  ;;  %8358 = vmatmul.mubr.msk.bf16.gmra.mxu0 %vm2893_vm1, %v3773_v56  ;;  %v3698_v36 = vmax.f32 %v3582_v31, 0.0  ;;  %8653 = vmatpush3.bf16.msra.mxu1 %v9184_v26 }
 0x46c   : > { %v8565_v17 = vpop.f32.mrf.mxu1  ;;  %4389 = vmatprep.mubr.bf16.mxu0 %v12795_v33 }
 0x46d   : > { %v3585_v58 = vadd.f32 %v3584_v14, %v3424_v62  ;;  %v8566_v53 = vadd.f32 %v8565_v17, %v8564_v41 }
 0x46e   : > { %v8567_v55 = vpop.f32.mrf.mxu1 }
 0x46f   : > { %v3701_v52 = vmax.f32 %v3585_v58, 0.0  ;;  %v3429_v59 = vadd.f32 %v8566_v53, %v11257_v29 }
 0x470   : > { %v8568_v4 = vpop.f32.mrf.mxu1 }
 0x471   : > { %v3776_v19 = vpack.c.bf16 %v3701_v52, %v3698_v36  ;;  %v8569_v39 = vadd.f32 %v8568_v4, %v8567_v55  ;;  %v3590_v28 = vadd.f32 %v8772_v11, %v3429_v59  ;;  %v3600_v11 = vpop.f32.mrf.mxu0 }
 0x472   : > { %v8570_v0 = vpop.f32.mrf.mxu1 }
 0x473   : > { %v3432_v22 = vadd.f32 %v8569_v39, %v11257_v29  ;;  %8359 = vmatmul.mubr.msk.bf16.gmra.mxu0 %vm2893_vm1, %v3776_v19  ;;  %v3704_v13 = vmax.f32 %v3590_v28, 0.0  ;;  %v8780_v3 = vpop.f32.mrf.mxu0 }
 0x474   : > { %v8571_v49 = vpop.f32.mrf.mxu1  ;;  %4399 = vmatprep.mubr.bf16.mxu0 %v12795_v33 }
 0x475   : > { %v3593_v9 = vadd.f32 %v8773_v40, %v3432_v22  ;;  %v8572_v38 = vadd.f32 %v8571_v49, %v8570_v0  ;;  %v3613_v34 = vpop.f32.mrf.mxu0 }
 0x476   : > { %v8573_v32 = vpop.f32.mrf.mxu1 }
 0x477   : > { %v3707_v18 = vmax.f32 %v3593_v9, 0.0  ;;  %v3437_v23 = vadd.f32 %v8572_v38, %v11257_v29  ;;  %v8781_v56 = vpop.f32.mrf.mxu0 }
 0x478   : > { %v8574_v60 = vpop.f32.mrf.mxu1 }
 0x479   : > { %v3779_v50 = vpack.c.bf16 %v3707_v18, %v3704_v13  ;;  %v8575_v20 = vadd.f32 %v8574_v60, %v8573_v32  ;;  %v3598_v5 = vadd.f32 %v3597_v47, %v3437_v23  ;;  %v3616_v58 = vpop.f32.mrf.mxu0 }
 0x47a   : > { %v8576_v12 = vpop.f32.mrf.mxu1 }
 0x47b   : > { %v3440_v63 = vadd.f32 %v8575_v20, %v11257_v29  ;;  %8360 = vmatmul.mubr.msk.bf16.gmra.mxu0 %vm2893_vm1, %v3779_v50  ;;  %v3710_v44 = vmax.f32 %v3598_v5, 0.0  ;;  %v8784_v19 = vpop.f32.mrf.mxu0 }
 0x47c   : > { %v8577_v30 = vpop.f32.mrf.mxu1  ;;  %4409 = vmatprep.mubr.bf16.mxu0 %v12795_v33 }
 0x47d   : > { %v3601_v57 = vadd.f32 %v3600_v11, %v3440_v63  ;;  %v8578_v6 = vadd.f32 %v8577_v30, %v8576_v12  ;;  %v3629_v47 = vpop.f32.mrf.mxu0 }
 0x47e   : > { %v8579_v7 = vpop.f32.mrf.mxu1 }
 0x47f   : > { %v3713_v21 = vmax.f32 %v3601_v57, 0.0  ;;  %v3445_v15 = vadd.f32 %v8578_v6, %v11257_v29 }
 0x480   : > { %v8580_v46 = vpop.f32.mrf.mxu1 }
 0x481   : > { %v3782_v16 = vpack.c.bf16 %v3713_v21, %v3710_v44  ;;  %v8581_v25 = vadd.f32 %v8580_v46, %v8579_v7  ;;  %v3606_v43 = vadd.f32 %v8776_v48, %v3445_v15 }
 0x482   : > { %v8582_v51 = vpop.f32.mrf.mxu1 }
 0x483   : > { %v3448_v24 = vadd.f32 %v8581_v25, %v11257_v29  ;;  %8361 = vmatmul.mubr.msk.bf16.gmra.mxu0 %vm2893_vm1, %v3782_v16  ;;  %v3716_v54 = vmax.f32 %v3606_v43, 0.0 }
 0x484   : > { %v8583_v35 = vpop.f32.mrf.mxu1  ;;  %4419 = vmatprep.mubr.bf16.mxu0 %v12795_v33 }
 0x485   : > { %v3609_v10 = vadd.f32 %v8777_v42, %v3448_v24  ;;  %v8584_v8 = vadd.f32 %v8583_v35, %v8582_v51  ;;  %v8785_v42 = vpop.f32.mrf.mxu0 }
 0x486   : > { %v8585_v45 = vpop.f32.mrf.mxu1 }
 0x487   : > { %v3719_v40 = vmax.f32 %v3609_v10, 0.0  ;;  %v3453_v37 = vadd.f32 %v8584_v8, %v11257_v29  ;;  %v3632_v11 = vpop.f32.mrf.mxu0 }
 0x488   : > { %v8586_v27 = vpop.f32.mrf.mxu1 }
 0x489   : > { %v3785_v41 = vpack.c.bf16 %v3719_v40, %v3716_v54  ;;  %v8587_v31 = vadd.f32 %v8586_v27, %v8585_v45  ;;  %v3614_v14 = vadd.f32 %v3613_v34, %v3453_v37 }
 0x48a   : > { %v8588_v62 = vpop.f32.mrf.mxu1 }
 0x48b   : > { %v3456_v17 = vadd.f32 %v8587_v31, %v11257_v29  ;;  %8362 = vmatmul.mubr.msk.bf16.gmra.mxu0 %vm2893_vm1, %v3785_v41  ;;  %v3722_v59 = vmax.f32 %v3614_v14, 0.0 }
 0x48c   : > { %v8589_v53 = vpop.f32.mrf.mxu1  ;;  %4429 = vmatprep.mubr.bf16.mxu0 %v12795_v33 }
 0x48d   : > { %v3617_v55 = vadd.f32 %v3616_v58, %v3456_v17  ;;  %v8590_v36 = vadd.f32 %v8589_v53, %v8588_v62 }
 0x48e   : > { %v8591_v52 = vpop.f32.mrf.mxu1 }
 0x48f   : > { %v3725_v48 = vmax.f32 %v3617_v55, 0.0  ;;  %v3461_v4 = vadd.f32 %v8590_v36, %v11257_v29 }
 0x490   : > { %v8592_v39 = vpop.f32.mrf.mxu1 }
 0x491   : > { %v3788_v2 = vpack.c.bf16 %v3725_v48, %v3722_v59  ;;  %v8593_v61 = vadd.f32 %v8592_v39, %v8591_v52  ;;  %v3622_v28 = vadd.f32 %v8780_v3, %v3461_v4  ;;  %v8788_v3 = vpop.f32.mrf.mxu0 }
 0x492   : > { %v8594_v0 = vpop.f32.mrf.mxu1 }
 0x493   : > { %v3464_v22 = vadd.f32 %v8593_v61, %v11257_v29  ;;  %8363 = vmatmul.mubr.msk.bf16.gmra.mxu0 %vm2893_vm1, %v3788_v2  ;;  %v3728_v13 = vmax.f32 %v3622_v28, 0.0  ;;  %v3645_v43 = vpop.f32.mrf.mxu0 }
 0x494   : > { %v8595_v49 = vpop.f32.mrf.mxu1  ;;  %4439 = vmatprep.mubr.bf16.mxu0 %v12795_v33 }
 0x495   : > { %v3625_v9 = vadd.f32 %v8781_v56, %v3464_v22  ;;  %v8596_v38 = vadd.f32 %v8595_v49, %v8594_v0  ;;  %v8789_v40 = vpop.f32.mrf.mxu0 }
 0x496   : > { %v8597_v32 = vpop.f32.mrf.mxu1 }
 0x497   : > { %v3731_v18 = vmax.f32 %v3625_v9, 0.0  ;;  %v3469_v23 = vadd.f32 %v8596_v38, %v11257_v29  ;;  %v3648_v14 = vpop.f32.mrf.mxu0 }
 0x498   : > { %v8598_v60 = vpop.f32.mrf.mxu1 }
 0x499   : > { %v3791_v50 = vpack.c.bf16 %v3731_v18, %v3728_v13  ;;  %v8599_v20 = vadd.f32 %v8598_v60, %v8597_v32  ;;  %v3630_v5 = vadd.f32 %v3629_v47, %v3469_v23 }
 0x49a   : > { %v8600_v12 = vpop.f32.mrf.mxu1 }
 0x49b   : > { %v3472_v63 = vadd.f32 %v8599_v20, %v11257_v29  ;;  %8364 = vmatmul.mubr.msk.bf16.gmra.mxu0 %vm2893_vm1, %v3791_v50  ;;  %v3734_v44 = vmax.f32 %v3630_v5, 0.0 }
 0x49c   : > { %v8601_v30 = vpop.f32.mrf.mxu1  ;;  %4449 = vmatprep.mubr.bf16.mxu0 %v12795_v33 }
 0x49d   : > { %v3633_v57 = vadd.f32 %v3632_v11, %v3472_v63  ;;  %v8602_v6 = vadd.f32 %v8601_v30, %v8600_v12 }
 0x49e   : > { %v8603_v7 = vpop.f32.mrf.mxu1 }
 0x49f   : > { %v3737_v21 = vmax.f32 %v3633_v57, 0.0  ;;  %v3477_v15 = vadd.f32 %v8602_v6, %v11257_v29 }
 0x4a0   : > { %v8604_v46 = vpop.f32.mrf.mxu1 }
 0x4a1   : > { %v3794_v16 = vpack.c.bf16 %v3737_v21, %v3734_v44  ;;  %v8605_v25 = vadd.f32 %v8604_v46, %v8603_v7  ;;  %v3638_v26 = vadd.f32 %v8784_v19, %v3477_v15 }
 0x4a2   : > { %v8606_v1 = vpop.f32.mrf.mxu1 }
 0x4a3   : > { %v3480_v51 = vadd.f32 %v8605_v25, %v11257_v29  ;;  %8365 = vmatmul.mubr.msk.bf16.gmra.mxu0 %vm2893_vm1, %v3794_v16  ;;  %v3740_v8 = vmax.f32 %v3638_v26, 0.0 }
 0x4a4   : > { %v8607_v24 = vpop.f32.mrf.mxu1  ;;  %4459 = vmatprep.mubr.bf16.mxu0 %v12795_v33 }
 0x4a5   : > { %v3641_v34 = vadd.f32 %v8785_v42, %v3480_v51  ;;  %v8608_v35 = vadd.f32 %v8607_v24, %v8606_v1 }
 0x4a6   : > { %v8609_v10 = vpop.f32.mrf.mxu1 }
 0x4a7   : > { %v3743_v45 = vmax.f32 %v3641_v34, 0.0  ;;  %v3485_v54 = vadd.f32 %v8608_v35, %v11257_v29  ;;  %v12798_v34 = vld [vmem:[#allocation10_spill] sm:$0xff] }
 0x4a8   : > { %v8610_v37 = vpop.f32.mrf.mxu1 }
 0x4a9   : > { %v3797_v56 = vpack.c.bf16 %v3743_v45, %v3740_v8  ;;  %v8611_v27 = vadd.f32 %v8610_v37, %v8609_v10  ;;  %v3646_v31 = vadd.f32 %v3645_v43, %v3485_v54  ;;  %v3843_v43 = vld [vmem:[%s12675_s10] sm:$0x3]  ;;  %v12799_v10 = vld [vmem:[#allocation11_spill] sm:$0xff] }
 0x4aa   : > { %v8612_v41 = vpop.f32.mrf.mxu1  ;;  %v11485_v35 = vrot.slane %v3843_v43, %v12798_v34  ;;  %v11488_v8 = vrot.slane %v3843_v43, %v12799_v10 }
 0x4ab   : > { %v3488_v62 = vadd.f32 %v8611_v27, %v11257_v29  ;;  %8366 = vmatmul.mubr.msk.bf16.gmra.mxu0 %vm2893_vm1, %v3797_v56  ;;  %v3746_v36 = vmax.f32 %v3646_v31, 0.0 }
 0x4ac   : > { %v8613_v17 = vpop.f32.mrf.mxu1  ;;  %4469 = vmatprep.mubr.bf16.mxu0 %v12795_v33 }
 0x4ad   : > { %v3649_v58 = vadd.f32 %v3648_v14, %v3488_v62  ;;  %v8614_v53 = vadd.f32 %v8613_v17, %v8612_v41 }
 0x4ae   : > { %v8615_v55 = vpop.f32.mrf.mxu1 }
 0x4af   : > { %v3749_v52 = vmax.f32 %v3649_v58, 0.0  ;;  %v3493_v59 = vadd.f32 %v8614_v53, %v11257_v29 }
 0x4b0   : > { %v8616_v48 = vpop.f32.mrf.mxu1 }
 0x4b1   : > { %v3800_v4 = vpack.c.bf16 %v3749_v52, %v3746_v36  ;;  %v8617_v19 = vadd.f32 %v8616_v48, %v8615_v55  ;;  %v3654_v2 = vadd.f32 %v8788_v3, %v3493_v59 }
 0x4b2   : > { %v4138_v39 = vpop.f32.mrf.mxu1 }
 0x4b3   : > { %v3496_v61 = vadd.f32 %v8617_v19, %v11257_v29  ;;  %8367 = vmatmul.mubr.msk.bf16.gmra.mxu0 %vm2893_vm1, %v3800_v4  ;;  %v3752_v47 = vmax.f32 %v3654_v2, 0.0  ;;  %v4139_v27 = vadd.f32 %v4138_v39, %v11488_v8 }
 0x4b4   : > { %v4140_v0 = vpop.f32.mrf.mxu1  ;;  %4479 = vmatprep.mubr.bf16.mxu0 %v12795_v33 }
 0x4b5   : > { %v3657_v28 = vadd.f32 %v8789_v40, %v3496_v61  ;;  %v4141_v37 = vadd.f32 %v4140_v0, %v11485_v35 }
 0x4b6   : > { %v4142_v22 = vpop.f32.mrf.mxu1 }
 0x4b7   : > { %v3755_v49 = vmax.f32 %v3657_v28, 0.0  ;;  %v4143_v56 = vadd.f32 %v4142_v22, %v11488_v8 }
 0x4b8   : > { %v4144_v9 = vpop.f32.mrf.mxu1 }
 0x4b9   : > { %v3803_v38 = vpack.c.bf16 %v3755_v49, %v3752_v47  ;;  %v4145_v31 = vadd.f32 %v4144_v9, %v11485_v35 }
 0x4ba   : > { %v4148_v32 = vpop.f32.mrf.mxu1 }
 0x4bb   : > { %8368 = vmatmul.mubr.msk.bf16.gmra.mxu0 %vm2893_vm1, %v3803_v38  ;;  %v4149_v28 = vadd.f32 %v4148_v32, %v11488_v8 }
 0x4bc   : > { %v4150_v13 = vpop.f32.mrf.mxu1 }
 0x4bd   : > { %v4151_v39 = vadd.f32 %v4150_v13, %v11485_v35 }
 0x4be   : > { %v4152_v18 = vpop.f32.mrf.mxu1 }
 0x4bf   : > { %v4153_v61 = vadd.f32 %v4152_v18, %v11488_v8 }
 0x4c0   : > { %v4154_v23 = vpop.f32.mrf.mxu1 }
 0x4c1   : > { %v4155_v49 = vadd.f32 %v4154_v23, %v11485_v35 }
 0x4c2   : > { %v11431_v42 = vpop.f32.mrf.mxu1 }
 0x4c4   : > { %v11433_v29 = vpop.f32.mrf.mxu1 }
 0x4c5   : > { %v4161_v23 = vadd.f32 %v11433_v29, %v11485_v35 }
 0x4c6   : > { %v11435_v60 = vpop.f32.mrf.mxu1 }
 0x4c8   : > { %v11437_v50 = vpop.f32.mrf.mxu1 }
 0x4ca   : > { %v11439_v33 = vpop.f32.mrf.mxu1 }
 0x4cc   : > { %v11441_v20 = vpop.f32.mrf.mxu1 }
 0x4ce   : > { %v11443_v12 = vpop.f32.mrf.mxu1 }
 0x4d0   : > { %v11445_v5 = vpop.f32.mrf.mxu1 }
 0x4d2   : > { %v11447_v63 = vpop.f32.mrf.mxu1 }
 0x4d4   : > { %v11449_v11 = vpop.f32.mrf.mxu1 }
 0x4d6   : > { %v11451_v30 = vpop.f32.mrf.mxu1 }
 0x4d8   : > { %v11453_v57 = vpop.f32.mrf.mxu1 }
 0x4da   : > { %v11455_v6 = vpop.f32.mrf.mxu1 }
 0x4dc   : > { %v11457_v7 = vpop.f32.mrf.mxu1 }
 0x4de   : > { %v11459_v44 = vpop.f32.mrf.mxu1 }
 0x4e0   : > { %v11461_v21 = vpop.f32.mrf.mxu1 }
 0x4e2   : > { %v11463_v15 = vpop.f32.mrf.mxu1 }
 0x4e4   : > { %v11465_v3 = vpop.f32.mrf.mxu1 }
 0x4e6   : > { %v11467_v46 = vpop.f32.mrf.mxu1 }
 0x4e8   : > { %v11469_v16 = vpop.f32.mrf.mxu1 }
 0x4ea   : > { %v11471_v25 = vpop.f32.mrf.mxu1 }
 0x4ec   : > { %v11473_v1 = vpop.f32.mrf.mxu1 }
 0x4ee   : > { %v11475_v26 = vpop.f32.mrf.mxu1 }
 0x4f0   : > { %v11477_v51 = vpop.f32.mrf.mxu1 }
 0x4f2   : > { %v11482_v24 = vpop.f32.mrf.mxu1 }
 0x4f4   : > { %v11490_v54 = vpop.f32.mrf.mxu1 }
 0x4f6   : > { %v11496_v17 = vpop.f32.mrf.mxu1 }
 0x4f8   : > { %v11498_v4 = vpop.f32.mrf.mxu1 }
 0x4fa   : > { %v11504_v43 = vpop.f32.mrf.mxu1 }
 0x503   : > { %v4331_v45 = vpop.f32.mrf.mxu0 }
 0x504   : > { %v4332_v58 = vadd.f32 %v4331_v45, %v4139_v27 }
 0x505   : > { %v4333_v40 = vpop.f32.mrf.mxu0 }
 0x506   : > { %v4334_v62 = vadd.f32 %v4333_v40, %v4141_v37  ;;  %v4490_v19 = vmax.f32 %v4332_v58, 0.0  ;;  %v4159_v58 = vadd.f32 %v11431_v42, %v11488_v8 }
 0x507   : > { %v4335_v41 = vpop.f32.mrf.mxu0 }
 0x508   : > { %v4336_v14 = vadd.f32 %v4335_v41, %v4143_v56  ;;  %v4491_v59 = vmax.f32 %v4334_v62, 0.0  ;;  %v11506_v41 = vpop.f32.mrf.mxu1  ;;  %v4163_v62 = vadd.f32 %v11435_v60, %v11488_v8 }
 0x509   : > { %v4337_v53 = vpop.f32.mrf.mxu0 }
 0x50a   : > { %v4338_v55 = vadd.f32 %v4337_v53, %v4145_v31  ;;  %v4492_v36 = vmax.f32 %v4336_v14, 0.0 }
 0x50b   : > { %v4341_v52 = vpop.f32.mrf.mxu0 }
 0x50c   : > { %v4493_v48 = vmax.f32 %v4338_v55, 0.0  ;;  %v4554_v22 = vpack.c.bf16 %v4492_v36, %v4490_v19  ;;  %v4342_v45 = vadd.f32 %v4341_v52, %v4149_v28  ;;  %v4165_v36 = vadd.f32 %v11437_v50, %v11485_v35 }
 0x50d   : > { %v4343_v2 = vpop.f32.mrf.mxu0  ;;  %v4171_v50 = vadd.f32 %v11441_v20, %v11485_v35 }
 0x50e   : > { %v4555_v0 = vpack.c.bf16 %v4493_v48, %v4491_v59  ;;  %v4344_v9 = vadd.f32 %v4343_v2, %v4151_v39  ;;  %v4494_v32 = vmax.f32 %v4342_v45, 0.0  ;;  %v11516_v48 = vpop.f32.mrf.mxu1 }
 0x50f   : > { %v4345_v47 = vpop.f32.mrf.mxu0 }
 0x510   : > { %v4346_v38 = vadd.f32 %v4345_v47, %v4153_v61  ;;  %4753 = vmatprep.mubr.bf16.mxu1 %v4555_v0  ;;  %v4495_v27 = vmax.f32 %v4344_v9, 0.0  ;;  %v11518_v28 = vpop.f32.mrf.mxu1  ;;  %v4173_v47 = vadd.f32 %v11443_v12, %v11488_v8  ;;  %v4169_v9 = vadd.f32 %v11439_v33, %v11488_v8 }
 0x511   : > { %v4347_v40 = vpop.f32.mrf.mxu0  ;;  %4754 = vmatmul.mubr.bf16.vlgmr.msra.gmra.mxu1 %v4554_v22 }
 0x512   : > { %v4348_v37 = vadd.f32 %v4347_v40, %v4155_v49  ;;  %v4496_v56 = vmax.f32 %v4346_v38, 0.0  ;;  %v4175_v40 = vadd.f32 %v11445_v5, %v11485_v35  ;;  %v4181_v5 = vadd.f32 %v11449_v11, %v11485_v35 }
 0x513   : > { %v4351_v13 = vpop.f32.mrf.mxu0 }
 0x514   : > { %v4497_v18 = vmax.f32 %v4348_v37, 0.0  ;;  %v4556_v53 = vpack.c.bf16 %v4496_v56, %v4494_v32  ;;  %v4352_v19 = vadd.f32 %v4351_v13, %v4159_v58  ;;  %v11528_v13 = vpop.f32.mrf.mxu1  ;;  %v4183_v58 = vadd.f32 %v11451_v30, %v11488_v8 }
 0x515   : > { %v4353_v31 = vpop.f32.mrf.mxu0 }
 0x516   : > { %v4557_v14 = vpack.c.bf16 %v4497_v18, %v4495_v27  ;;  %v4354_v52 = vadd.f32 %v4353_v31, %v4161_v23  ;;  %v4498_v42 = vmax.f32 %v4352_v19, 0.0 }
 0x517   : > { %v4355_v55 = vpop.f32.mrf.mxu0 }
 0x518   : > { %v4356_v59 = vadd.f32 %v4355_v55, %v4163_v62  ;;  %4761 = vmatprep.mubr.bf16.mxu1 %v4557_v14  ;;  %v4499_v61 = vmax.f32 %v4354_v52, 0.0  ;;  %v11530_v62 = vpop.f32.mrf.mxu1  ;;  %v4179_v55 = vadd.f32 %v11447_v63, %v11488_v8 }
 0x519   : > { %v4357_v2 = vpop.f32.mrf.mxu0  ;;  %4762 = vmatmul.mubr.bf16.gmra.mxu1 %v4556_v53 }
 0x51a   : > { %v4358_v29 = vadd.f32 %v4357_v2, %v4165_v36  ;;  %v4500_v39 = vmax.f32 %v4356_v59, 0.0  ;;  %v4185_v59 = vadd.f32 %v11453_v57, %v11485_v35  ;;  %v4191_v57 = vadd.f32 %v11457_v7, %v11485_v35 }
 0x51b   : > { %v4361_v60 = vpop.f32.mrf.mxu0 }
 0x51c   : > { %v4501_v0 = vmax.f32 %v4358_v29, 0.0  ;;  %v4558_v38 = vpack.c.bf16 %v4500_v39, %v4498_v42  ;;  %v4362_v27 = vadd.f32 %v4361_v60, %v4169_v9  ;;  %v11540_v29 = vpop.f32.mrf.mxu1  ;;  %v4189_v9 = vadd.f32 %v11455_v6, %v11488_v8 }
 0x51d   : > { %v4363_v22 = vpop.f32.mrf.mxu0 }
 0x51e   : > { %v4559_v49 = vpack.c.bf16 %v4501_v0, %v4499_v61  ;;  %v4364_v37 = vadd.f32 %v4363_v22, %v4171_v50  ;;  %v4502_v33 = vmax.f32 %v4362_v27, 0.0  ;;  %v11542_v22 = vpop.f32.mrf.mxu1 }
 0x51f   : > { %v4365_v45 = vpop.f32.mrf.mxu0 }
 0x520   : > { %v4366_v56 = vadd.f32 %v4365_v45, %v4173_v47  ;;  %4769 = vmatprep.mubr.bf16.mxu1 %v4559_v49  ;;  %v4503_v31 = vmax.f32 %v4364_v37, 0.0  ;;  %v4193_v47 = vadd.f32 %v11459_v44, %v11488_v8  ;;  %v11552_v27 = vpop.f32.mrf.mxu1 }
 0x521   : > { %v4367_v18 = vpop.f32.mrf.mxu0  ;;  %4770 = vmatmul.mubr.bf16.gmra.mxu1 %v4558_v38 }
 0x522   : > { %v4368_v20 = vadd.f32 %v4367_v18, %v4175_v40  ;;  %v4504_v32 = vmax.f32 %v4366_v56, 0.0  ;;  %v4195_v40 = vadd.f32 %v11461_v21, %v11485_v35  ;;  %v4201_v21 = vadd.f32 %v11465_v3, %v11485_v35 }
 0x523   : > { %v4371_v12 = vpop.f32.mrf.mxu0 }
 0x524   : > { %v4505_v23 = vmax.f32 %v4368_v20, 0.0  ;;  %v4560_v36 = vpack.c.bf16 %v4504_v32, %v4502_v33  ;;  %v4372_v39 = vadd.f32 %v4371_v12, %v4179_v55 }
 0x525   : > { %v4373_v14 = vpop.f32.mrf.mxu0 }
 0x526   : > { %v4561_v53 = vpack.c.bf16 %v4505_v23, %v4503_v31  ;;  %v4374_v19 = vadd.f32 %v4373_v14, %v4181_v5  ;;  %v4506_v63 = vmax.f32 %v4372_v39, 0.0  ;;  %v11554_v23 = vpop.f32.mrf.mxu1  ;;  %v4203_v14 = vadd.f32 %v11467_v46, %v11488_v8 }
 0x527   : > { %v4375_v52 = vpop.f32.mrf.mxu0 }
 0x528   : > { %v4376_v2 = vadd.f32 %v4375_v52, %v4183_v58  ;;  %4777 = vmatprep.mubr.bf16.mxu1 %v4561_v53  ;;  %v4507_v0 = vmax.f32 %v4374_v19, 0.0  ;;  %v4199_v58 = vadd.f32 %v11463_v15, %v11488_v8  ;;  %v11564_v19 = vpop.f32.mrf.mxu1 }
 0x529   : > { %v4377_v60 = vpop.f32.mrf.mxu0  ;;  %4778 = vmatmul.mubr.bf16.gmra.mxu1 %v4560_v36  ;;  %v4205_v36 = vadd.f32 %v11469_v16, %v11485_v35  ;;  %v4211_v16 = vadd.f32 %v11473_v1, %v11485_v35 }
 0x52a   : > { %v4378_v11 = vadd.f32 %v4377_v60, %v4185_v59  ;;  %v4508_v61 = vmax.f32 %v4376_v2, 0.0 }
 0x52b   : > { %v4381_v30 = vpop.f32.mrf.mxu0 }
 0x52c   : > { %v4509_v42 = vmax.f32 %v4378_v11, 0.0  ;;  %v4562_v38 = vpack.c.bf16 %v4508_v61, %v4506_v63  ;;  %v4382_v18 = vadd.f32 %v4381_v30, %v4189_v9  ;;  %v11566_v30 = vpop.f32.mrf.mxu1 }
 0x52d   : > { %v4383_v50 = vpop.f32.mrf.mxu0 }
 0x52e   : > { %v4563_v49 = vpack.c.bf16 %v4509_v42, %v4507_v0  ;;  %v4384_v37 = vadd.f32 %v4383_v50, %v4191_v57  ;;  %v4510_v6 = vmax.f32 %v4382_v18, 0.0  ;;  %v4213_v42 = vadd.f32 %v11475_v26, %v11488_v8 }
 0x52f   : > { %v4385_v45 = vpop.f32.mrf.mxu0  ;;  %v4209_v50 = vadd.f32 %v11471_v25, %v11488_v8 }
 0x530   : > { %v4386_v56 = vadd.f32 %v4385_v45, %v4193_v47  ;;  %4785 = vmatprep.mubr.bf16.mxu1 %v4563_v49  ;;  %v4511_v12 = vmax.f32 %v4384_v37, 0.0  ;;  %v4215_v49 = vadd.f32 %v11477_v51, %v11485_v35  ;;  %v11576_v45 = vpop.f32.mrf.mxu1  ;;  %v4221_v51 = vadd.f32 %v11490_v54, %v11485_v35 }
 0x531   : > { %v4387_v20 = vpop.f32.mrf.mxu0  ;;  %4786 = vmatmul.mubr.bf16.gmra.mxu1 %v4562_v38 }
 0x532   : > { %v4388_v7 = vadd.f32 %v4387_v20, %v4195_v40  ;;  %v4512_v32 = vmax.f32 %v4386_v56, 0.0 }
 0x533   : > { %v4391_v44 = vpop.f32.mrf.mxu0 }
 0x534   : > { %v4513_v31 = vmax.f32 %v4388_v7, 0.0  ;;  %v4564_v53 = vpack.c.bf16 %v4512_v32, %v4510_v6  ;;  %v4392_v2 = vadd.f32 %v4391_v44, %v4199_v58  ;;  %v11578_v7 = vpop.f32.mrf.mxu1  ;;  %v4223_v44 = vadd.f32 %v11496_v17, %v11488_v8 }
 0x535   : > { %v4393_v33 = vpop.f32.mrf.mxu0 }
 0x536   : > { %v4565_v5 = vpack.c.bf16 %v4513_v31, %v4511_v12  ;;  %v4394_v52 = vadd.f32 %v4393_v33, %v4201_v21  ;;  %v4514_v15 = vmax.f32 %v4392_v2, 0.0  ;;  %v4219_v31 = vadd.f32 %v11482_v24, %v11488_v8  ;;  %v11588_v58 = vpop.f32.mrf.mxu1 }
 0x537   : > { %v4395_v55 = vpop.f32.mrf.mxu0  ;;  %v4225_v21 = vadd.f32 %v11498_v4, %v11485_v35  ;;  %v4231_v4 = vadd.f32 %v11506_v41, %v11485_v35 }
 0x538   : > { %v4396_v59 = vadd.f32 %v4395_v55, %v4203_v14  ;;  %4793 = vmatprep.mubr.bf16.mxu1 %v4565_v5  ;;  %v4515_v11 = vmax.f32 %v4394_v52, 0.0  ;;  %v11590_v2 = vpop.f32.mrf.mxu1 }
 0x539   : > { %v4397_v39 = vpop.f32.mrf.mxu0  ;;  %4794 = vmatmul.mubr.bf16.gmra.mxu1 %v4564_v53 }
 0x53a   : > { %v4398_v3 = vadd.f32 %v4397_v39, %v4205_v36  ;;  %v4516_v60 = vmax.f32 %v4396_v59, 0.0 }
 0x53b   : > { %v4401_v46 = vpop.f32.mrf.mxu0 }
 0x53c   : > { %v4517_v61 = vmax.f32 %v4398_v3, 0.0  ;;  %v4566_v57 = vpack.c.bf16 %v4516_v60, %v4514_v15  ;;  %v4402_v40 = vadd.f32 %v4401_v46, %v4209_v50  ;;  %v4233_v3 = vadd.f32 %v11516_v48, %v11488_v8 }
 0x53d   : > { %v4403_v0 = vpop.f32.mrf.mxu0  ;;  %v4229_v46 = vadd.f32 %v11504_v43, %v11488_v8  ;;  %v4235_v15 = vadd.f32 %v11518_v28, %v11485_v35  ;;  %v4241_v28 = vadd.f32 %v11530_v62, %v11485_v35 }
 0x53e   : > { %v4567_v63 = vpack.c.bf16 %v4517_v61, %v4515_v11  ;;  %v4404_v9 = vadd.f32 %v4403_v0, %v4211_v16  ;;  %v4518_v25 = vmax.f32 %v4402_v40, 0.0  ;;  %v4243_v40 = vadd.f32 %v11540_v29, %v11488_v8 }
 0x53f   : > { %v4405_v47 = vpop.f32.mrf.mxu0 }
 0x540   : > { %v4406_v38 = vadd.f32 %v4405_v47, %v4213_v42  ;;  %4801 = vmatprep.mubr.bf16.mxu1 %v4567_v63  ;;  %v4519_v18 = vmax.f32 %v4404_v9, 0.0  ;;  %v11600_v42 = vpop.f32.mrf.mxu1 }
 0x541   : > { %v4407_v37 = vpop.f32.mrf.mxu0  ;;  %4802 = vmatmul.mubr.bf16.gmra.mxu1 %v4566_v57 }
 0x542   : > { %v4408_v1 = vadd.f32 %v4407_v37, %v4215_v49  ;;  %v4520_v56 = vmax.f32 %v4406_v38, 0.0  ;;  %v11602_v9 = vpop.f32.mrf.mxu1 }
 0x543   : > { %v4411_v26 = vpop.f32.mrf.mxu0 }
 0x544   : > { %v4521_v20 = vmax.f32 %v4408_v1, 0.0  ;;  %v4568_v6 = vpack.c.bf16 %v4520_v56, %v4518_v25  ;;  %v4412_v53 = vadd.f32 %v4411_v26, %v4219_v31  ;;  %v4239_v1 = vadd.f32 %v11528_v13, %v11488_v8 }
 0x545   : > { %v4413_v32 = vpop.f32.mrf.mxu0 }
 0x546   : > { %v4569_v12 = vpack.c.bf16 %v4521_v20, %v4519_v18  ;;  %v4414_v14 = vadd.f32 %v4413_v32, %v4221_v51  ;;  %v4522_v24 = vmax.f32 %v4412_v53, 0.0  ;;  %v4245_v18 = vadd.f32 %v11542_v22, %v11485_v35  ;;  %v4272_v32 = vpop.f32.mrf.mxu1 }
 0x547   : > { %v4415_v33 = vpop.f32.mrf.mxu0  ;;  %v4253_v22 = vadd.f32 %v11564_v19, %v11488_v8  ;;  %v4249_v53 = vadd.f32 %v11552_v27, %v11488_v8 }
 0x548   : > { %v4416_v5 = vadd.f32 %v4415_v33, %v4223_v44  ;;  %4809 = vmatprep.mubr.bf16.mxu1 %v4569_v12  ;;  %v4523_v52 = vmax.f32 %v4414_v14, 0.0  ;;  %v4274_v33 = vpop.f32.mrf.mxu1  ;;  %v4251_v14 = vadd.f32 %v11554_v23, %v11485_v35 }
 0x549   : > { %v4417_v55 = vpop.f32.mrf.mxu0  ;;  %4810 = vmatmul.mubr.bf16.gmra.mxu1 %v4568_v6 }
 0x54a   : > { %v4418_v54 = vadd.f32 %v4417_v55, %v4225_v21  ;;  %v4524_v36 = vmax.f32 %v4416_v5, 0.0 }
 0x54b   : > { %v4421_v17 = vpop.f32.mrf.mxu0 }
 0x54c   : > { %v4525_v59 = vmax.f32 %v4418_v54, 0.0  ;;  %v4570_v11 = vpack.c.bf16 %v4524_v36, %v4522_v24  ;;  %v4422_v63 = vadd.f32 %v4421_v17, %v4229_v46  ;;  %v4255_v36 = vadd.f32 %v11566_v30, %v11485_v35 }
 0x54d   : > { %v4423_v39 = vpop.f32.mrf.mxu0  ;;  %v4263_v30 = vadd.f32 %v11588_v58, %v11488_v8 }
 0x54e   : > { %v4571_v60 = vpack.c.bf16 %v4525_v59, %v4523_v52  ;;  %v4424_v0 = vadd.f32 %v4423_v39, %v4231_v4  ;;  %v4526_v43 = vmax.f32 %v4422_v63, 0.0  ;;  %v4278_v59 = vpop.f32.mrf.mxu1 }
 0x54f   : > { %v4425_v61 = vpop.f32.mrf.mxu0 }
 0x550   : > { %v4426_v16 = vadd.f32 %v4425_v61, %v4233_v3  ;;  %4817 = vmatprep.mubr.bf16.mxu1 %v4571_v60  ;;  %v4527_v47 = vmax.f32 %v4424_v0, 0.0  ;;  %v4280_v46 = vpop.f32.mrf.mxu1  ;;  %v4261_v61 = vadd.f32 %v11578_v7, %v11485_v35  ;;  %v4259_v0 = vadd.f32 %v11576_v45, %v11488_v8 }
 0x551   : > { %v4427_v50 = vpop.f32.mrf.mxu0  ;;  %4818 = vmatmul.mubr.bf16.gmra.mxu1 %v4570_v11 }
 0x552   : > { %v4428_v41 = vadd.f32 %v4427_v50, %v4235_v15  ;;  %v4528_v57 = vmax.f32 %v4426_v16, 0.0  ;;  %v4265_v50 = vadd.f32 %v11590_v2, %v11485_v35  ;;  %v4273_v2 = vadd.f32 %v4272_v32, %v11488_v8 }
 0x553   : > { %v4431_v48 = vpop.f32.mrf.mxu0 }
 0x554   : > { %v4529_v49 = vmax.f32 %v4428_v41, 0.0  ;;  %v4572_v56 = vpack.c.bf16 %v4528_v57, %v4526_v43  ;;  %v4432_v51 = vadd.f32 %v4431_v48, %v4239_v1  ;;  %v4282_v48 = vpop.f32.mrf.mxu1  ;;  %v4271_v1 = vadd.f32 %v11602_v9, %v11485_v35 }
 0x555   : > { %v4433_v38 = vpop.f32.mrf.mxu0 }
 0x556   : > { %v4573_v37 = vpack.c.bf16 %v4529_v49, %v4527_v47  ;;  %v4434_v20 = vadd.f32 %v4433_v38, %v4241_v28  ;;  %v4530_v21 = vmax.f32 %v4432_v51, 0.0 }
 0x557   : > { %v4435_v26 = vpop.f32.mrf.mxu0 }
 0x558   : > { %v4436_v25 = vadd.f32 %v4435_v26, %v4243_v40  ;;  %4825 = vmatprep.mubr.bf16.mxu1 %v4573_v37  ;;  %v4531_v29 = vmax.f32 %v4434_v20, 0.0  ;;  %v4284_v40 = vpop.f32.mrf.mxu1  ;;  %v4269_v26 = vadd.f32 %v11600_v42, %v11488_v8  ;;  %v4281_v42 = vadd.f32 %v4280_v46, %v11485_v35 }
 0x559   : > { %v4437_v44 = vpop.f32.mrf.mxu0  ;;  %4826 = vmatmul.mubr.bf16.gmra.mxu1 %v4572_v56 }
 0x55a   : > { %v4438_v62 = vadd.f32 %v4437_v44, %v4245_v18  ;;  %v4532_v12 = vmax.f32 %v4436_v25, 0.0  ;;  %v4275_v25 = vadd.f32 %v4274_v33, %v11485_v35 }
 0x55b   : > { %v4441_v31 = vpop.f32.mrf.mxu0 }
 0x55c   : > { %v4533_v6 = vmax.f32 %v4438_v62, 0.0  ;;  %v4574_v55 = vpack.c.bf16 %v4532_v12, %v4530_v21  ;;  %v4442_v24 = vadd.f32 %v4441_v31, %v4249_v53  ;;  %v4288_v62 = vpop.f32.mrf.mxu1  ;;  %v4279_v53 = vadd.f32 %v4278_v59, %v11488_v8 }
 0x55d   : > { %v4443_v13 = vpop.f32.mrf.mxu0 }
 0x55e   : > { %v4575_v5 = vpack.c.bf16 %v4533_v6, %v4531_v29  ;;  %v4444_v17 = vadd.f32 %v4443_v13, %v4251_v14  ;;  %v4534_v11 = vmax.f32 %v4442_v24, 0.0  ;;  %v4290_v13 = vpop.f32.mrf.mxu1 }
 0x55f   : > { %v4445_v54 = vpop.f32.mrf.mxu0  ;;  %v4291_v59 = vadd.f32 %v4290_v13, %v11485_v35 }
 0x560   : > { %v4446_v52 = vadd.f32 %v4445_v54, %v4253_v22  ;;  %4833 = vmatprep.mubr.bf16.mxu1 %v4575_v5  ;;  %v4535_v19 = vmax.f32 %v4444_v17, 0.0  ;;  %v4283_v5 = vadd.f32 %v4282_v48, %v11488_v8  ;;  %v4292_v24 = vpop.f32.mrf.mxu1 }
 0x561   : > { %v4447_v39 = vpop.f32.mrf.mxu0  ;;  %4834 = vmatmul.mubr.bf16.gmra.mxu1 %v4574_v55 }
 0x562   : > { %v4448_v23 = vadd.f32 %v4447_v39, %v4255_v36  ;;  %v4536_v4 = vmax.f32 %v4446_v52, 0.0  ;;  %v4285_v36 = vadd.f32 %v4284_v40, %v11485_v35 }
 0x563   : > { %v4451_v3 = vpop.f32.mrf.mxu0 }
 0x564   : > { %v4537_v60 = vmax.f32 %v4448_v23, 0.0  ;;  %v4576_v16 = vpack.c.bf16 %v4536_v4, %v4534_v11  ;;  %v4452_v47 = vadd.f32 %v4451_v3, %v4259_v0  ;;  %v4294_v11 = vpop.f32.mrf.mxu1  ;;  %v4289_v0 = vadd.f32 %v4288_v62, %v11488_v8 }
 0x565   : > { %v4453_v27 = vpop.f32.mrf.mxu0 }
 0x566   : > { %v4577_v15 = vpack.c.bf16 %v4537_v60, %v4535_v19  ;;  %v4454_v41 = vadd.f32 %v4453_v27, %v4261_v61  ;;  %v4538_v37 = vmax.f32 %v4452_v47, 0.0 }
 0x567   : > { %v4455_v63 = vpop.f32.mrf.mxu0 }
 0x568   : > { %v4456_v57 = vadd.f32 %v4455_v63, %v4263_v30  ;;  %4841 = vmatprep.mubr.bf16.mxu1 %v4577_v15  ;;  %v4539_v58 = vmax.f32 %v4454_v41, 0.0  ;;  %v4293_v30 = vadd.f32 %v4292_v24, %v11488_v8 }
 0x569   : > { %v4457_v49 = vpop.f32.mrf.mxu0  ;;  %4842 = vmatmul.mubr.bf16.gmra.mxu1 %v4576_v16 }
 0x56a   : > { %v4458_v7 = vadd.f32 %v4457_v49, %v4265_v50  ;;  %v4540_v43 = vmax.f32 %v4456_v57, 0.0  ;;  %v4295_v50 = vadd.f32 %v4294_v11, %v11485_v35  ;;  %v11645_v35 = vld [vmem:[%s12677_s12] ss:$0 sm:$0xff] }
 0x56b   : > { %v4461_v38 = vpop.f32.mrf.mxu0 }
 0x56c   : > { %v4541_v28 = vmax.f32 %v4458_v7, 0.0  ;;  %v4578_v18 = vpack.c.bf16 %v4540_v43, %v4538_v37  ;;  %v4462_v12 = vadd.f32 %v4461_v38, %v4269_v26 }
 0x56d   : > { %v4463_v45 = vpop.f32.mrf.mxu0 }
 0x56e   : > { %v4579_v56 = vpack.c.bf16 %v4541_v28, %v4539_v58  ;;  %v4464_v51 = vadd.f32 %v4463_v45, %v4271_v1  ;;  %v4542_v14 = vmax.f32 %v4462_v12, 0.0 }
 0x56f   : > { %v4465_v20 = vpop.f32.mrf.mxu0 }
 0x570   : > { %v4466_v44 = vadd.f32 %v4465_v20, %v4273_v2  ;;  %4849 = vmatprep.mubr.bf16.mxu1 %v4579_v56  ;;  %v4543_v21 = vmax.f32 %v4464_v51, 0.0 }
 0x571   : > { %v4467_v31 = vpop.f32.mrf.mxu0  ;;  %4850 = vmatmul.mubr.bf16.gmra.mxu1 %v4578_v18 }
 0x572   : > { %v4468_v29 = vadd.f32 %v4467_v31, %v4275_v25  ;;  %v4544_v6 = vmax.f32 %v4466_v44, 0.0 }
 0x573   : > { %v4471_v9 = vpop.f32.mrf.mxu0 }
 0x574   : > { %v4545_v32 = vmax.f32 %v4468_v29, 0.0  ;;  %v4580_v55 = vpack.c.bf16 %v4544_v6, %v4542_v14  ;;  %v4472_v39 = vadd.f32 %v4471_v9, %v4279_v53  ;;  %v11652_v6 = vld [vmem:[%s12678_s13] ss:$0 sm:$0xff] }
 0x575   : > { %v4473_v22 = vpop.f32.mrf.mxu0 }
 0x576   : > { %v4581_v33 = vpack.c.bf16 %v4545_v32, %v4543_v21  ;;  %v4474_v17 = vadd.f32 %v4473_v22, %v4281_v42  ;;  %v4546_v27 = vmax.f32 %v4472_v39, 0.0 }
 0x577   : > { %v4475_v54 = vpop.f32.mrf.mxu0 }
 0x578   : > { %v4476_v52 = vadd.f32 %v4475_v54, %v4283_v5  ;;  %4857 = vmatprep.mubr.bf16.mxu1 %v4581_v33  ;;  %v4547_v60 = vmax.f32 %v4474_v17, 0.0 }
 0x579   : > { %v4477_v23 = vpop.f32.mrf.mxu0  ;;  %4858 = vmatmul.mubr.bf16.gmra.mxu1 %v4580_v55 }
 0x57a   : > { %v4478_v4 = vadd.f32 %v4477_v23, %v4285_v36  ;;  %v4548_v3 = vmax.f32 %v4476_v52, 0.0 }
 0x57b   : > { %v4481_v19 = vpop.f32.mrf.mxu0 }
 0x57c   : > { %v4549_v46 = vmax.f32 %v4478_v4, 0.0  ;;  %v4582_v16 = vpack.c.bf16 %v4548_v3, %v4546_v27  ;;  %v4482_v48 = vadd.f32 %v4481_v19, %v4289_v0 }
 0x57d   : > { %v4483_v61 = vpop.f32.mrf.mxu0 }
 0x57e   : > { %v4583_v15 = vpack.c.bf16 %v4549_v46, %v4547_v60  ;;  %v4484_v41 = vadd.f32 %v4483_v61, %v4291_v59  ;;  %v4550_v58 = vmax.f32 %v4482_v48, 0.0 }
 0x57f   : > { %v4485_v63 = vpop.f32.mrf.mxu0 }
 0x580   : > { %v4486_v57 = vadd.f32 %v4485_v63, %v4293_v30  ;;  %4865 = vmatprep.mubr.bf16.mxu1 %v4583_v15  ;;  %v4551_v43 = vmax.f32 %v4484_v41, 0.0 }
 0x581   : > { %v4487_v47 = vpop.f32.mrf.mxu0  ;;  %4866 = vmatmul.mubr.bf16.gmra.mxu1 %v4582_v16 }
 0x582   : > { %v4488_v49 = vadd.f32 %v4487_v47, %v4295_v50  ;;  %v4552_v7 = vmax.f32 %v4486_v57, 0.0 }
 0x584   : > { %v4553_v38 = vmax.f32 %v4488_v49, 0.0  ;;  %v4584_v40 = vpack.c.bf16 %v4552_v7, %v4550_v58 }
 0x586   : > { %v4585_v28 = vpack.c.bf16 %v4553_v38, %v4551_v43 }
 0x588   : > { %4873 = vmatprep.mubr.bf16.mxu1 %v4585_v28 }
 0x589   : > { %4874 = vmatmul.mubr.bf16.gmra.mxu1 %v4584_v40 }
 0x5d1   : > { %v8654_v8 = vpop.f32.mrf.mxu1 }
 0x5d3   : > { %v8655_v37 = vpop.f32.mrf.mxu1 }
 0x5d4   : > { %v8656_v45 = vadd.f32 %v8655_v37, %v8654_v8 }
 0x5d5   : > { %v8657_v1 = vpop.f32.mrf.mxu1 }
 0x5d6   : > { %v4756_v56 = vadd.f32 %v8656_v45, %v11645_v35 }
 0x5d7   : > { %v8658_v2 = vpop.f32.mrf.mxu1 }
 0x5d8   : > { %v8659_v26 = vadd.f32 %v8658_v2, %v8657_v1  ;;  %v4882_v51 = vmax.f32 %v4756_v56, 0.0 }
 0x5d9   : > { %v8660_v18 = vpop.f32.mrf.mxu1 }
 0x5da   : > { %v4759_v20 = vadd.f32 %v8659_v26, %v11645_v35 }
 0x5db   : > { %v8661_v25 = vpop.f32.mrf.mxu1 }
 0x5dc   : > { %v4883_v44 = vmax.f32 %v4759_v20, 0.0  ;;  %v8662_v62 = vadd.f32 %v8661_v25, %v8660_v18 }
 0x5dd   : > { %v8663_v12 = vpop.f32.mrf.mxu1 }
 0x5de   : > { %v4914_v31 = vpack.c.bf16 %v4883_v44, %v4882_v51  ;;  %v4764_v9 = vadd.f32 %v8662_v62, %v11645_v35 }
 0x5df   : > { %v8664_v29 = vpop.f32.mrf.mxu1 }
 0x5e0   : > { %v8665_v21 = vadd.f32 %v8664_v29, %v8663_v12  ;;  %v4931_v32 = vunpack.c.h.bf16 %v4914_v31  ;;  %v4930_v13 = vunpack.c.l.bf16 %v4914_v31  ;;  %v4884_v53 = vmax.f32 %v4764_v9, 0.0 }
 0x5e1   : > { %v8666_v14 = vpop.f32.mrf.mxu1 }
 0x5e2   : > { %v4767_v22 = vadd.f32 %v8665_v21, %v11645_v35  ;;  %v4970_v42 = vmul.f32 %v11652_v6, %v4931_v32  ;;  %v4969_v5 = vmul.f32 %v11652_v6, %v4930_v13 }
 0x5e3   : > { %v8667_v33 = vpop.f32.mrf.mxu1 }
 0x5e4   : > { %v4885_v55 = vmax.f32 %v4767_v22, 0.0  ;;  %v8668_v54 = vadd.f32 %v8667_v33, %v8666_v14  ;;  %5003 = vadd.xlane.f32.xlu0 %v4970_v42  ;;  %5001 = vadd.xlane.f32.xlu1 %v4969_v5 }
 0x5e5   : > { %v8669_v36 = vpop.f32.mrf.mxu1 }
 0x5e6   : > { %v4915_v17 = vpack.c.bf16 %v4885_v55, %v4884_v53  ;;  %v4772_v24 = vadd.f32 %v8668_v54, %v11645_v35 }
 0x5e7   : > { %v8670_v52 = vpop.f32.mrf.mxu1 }
 0x5e8   : > { %v8671_v39 = vadd.f32 %v8670_v52, %v8669_v36  ;;  %v4932_v23 = vunpack.c.l.bf16 %v4915_v17  ;;  %v4933_v4 = vunpack.c.h.bf16 %v4915_v17  ;;  %v4886_v27 = vmax.f32 %v4772_v24, 0.0 }
 0x5e9   : > { %v8672_v3 = vpop.f32.mrf.mxu1 }
 0x5ea   : > { %v4775_v19 = vadd.f32 %v8671_v39, %v11645_v35  ;;  %v4971_v60 = vmul.f32 %v11652_v6, %v4932_v23  ;;  %v4972_v46 = vmul.f32 %v11652_v6, %v4933_v4 }
 0x5eb   : > { %v8673_v11 = vpop.f32.mrf.mxu1 }
 0x5ec   : > { %v4887_v61 = vmax.f32 %v4775_v19, 0.0  ;;  %v8674_v59 = vadd.f32 %v8673_v11, %v8672_v3  ;;  %5005 = vadd.xlane.f32.xlu0 %v4971_v60  ;;  %5007 = vadd.xlane.f32.xlu1 %v4972_v46 }
 0x5ed   : > { %v8675_v30 = vpop.f32.mrf.mxu1 }
 0x5ee   : > { %v4916_v15 = vpack.c.bf16 %v4887_v61, %v4886_v27  ;;  %v4780_v16 = vadd.f32 %v8674_v59, %v11645_v35 }
 0x5ef   : > { %v8676_v0 = vpop.f32.mrf.mxu1 }
 0x5f0   : > { %v8677_v63 = vadd.f32 %v8676_v0, %v8675_v30  ;;  %v4934_v50 = vunpack.c.l.bf16 %v4916_v15  ;;  %v4935_v41 = vunpack.c.h.bf16 %v4916_v15  ;;  %v4888_v43 = vmax.f32 %v4780_v16, 0.0 }
 0x5f1   : > { %v8678_v57 = vpop.f32.mrf.mxu1 }
 0x5f2   : > { %v4783_v48 = vadd.f32 %v8677_v63, %v11645_v35  ;;  %v4973_v47 = vmul.f32 %v11652_v6, %v4934_v50  ;;  %v4974_v49 = vmul.f32 %v11652_v6, %v4935_v41 }
 0x5f3   : > { %v8679_v7 = vpop.f32.mrf.mxu1 }
 0x5f4   : > { %v4889_v38 = vmax.f32 %v4783_v48, 0.0  ;;  %v8680_v58 = vadd.f32 %v8679_v7, %v8678_v57  ;;  %5009 = vadd.xlane.f32.xlu0 %v4973_v47  ;;  %5011 = vadd.xlane.f32.xlu1 %v4974_v49 }
 0x5f5   : > { %v8681_v28 = vpop.f32.mrf.mxu1 }
 0x5f6   : > { %v4917_v40 = vpack.c.bf16 %v4889_v38, %v4888_v43  ;;  %v4788_v37 = vadd.f32 %v8680_v58, %v11645_v35 }
 0x5f7   : > { %v8682_v8 = vpop.f32.mrf.mxu1 }
 0x5f8   : > { %v8683_v45 = vadd.f32 %v8682_v8, %v8681_v28  ;;  %v4936_v1 = vunpack.c.l.bf16 %v4917_v40  ;;  %v4937_v2 = vunpack.c.h.bf16 %v4917_v40  ;;  %v4890_v51 = vmax.f32 %v4788_v37, 0.0 }
 0x5f9   : > { %v8684_v56 = vpop.f32.mrf.mxu1 }
 0x5fa   : > { %v4791_v26 = vadd.f32 %v8683_v45, %v11645_v35  ;;  %v4975_v18 = vmul.f32 %v11652_v6, %v4936_v1  ;;  %v4976_v20 = vmul.f32 %v11652_v6, %v4937_v2 }
 0x5fb   : > { %v8685_v25 = vpop.f32.mrf.mxu1 }
 0x5fc   : > { %v4891_v44 = vmax.f32 %v4791_v26, 0.0  ;;  %v8686_v62 = vadd.f32 %v8685_v25, %v8684_v56  ;;  %5013 = vadd.xlane.f32.xlu0 %v4975_v18  ;;  %5015 = vadd.xlane.f32.xlu1 %v4976_v20 }
 0x5fd   : > { %v8687_v12 = vpop.f32.mrf.mxu1 }
 0x5fe   : > { %v4918_v31 = vpack.c.bf16 %v4891_v44, %v4890_v51  ;;  %v4796_v9 = vadd.f32 %v8686_v62, %v11645_v35 }
 0x5ff   : > { %v8688_v29 = vpop.f32.mrf.mxu1 }
 0x600   : > { %v8689_v21 = vadd.f32 %v8688_v29, %v8687_v12  ;;  %v4938_v32 = vunpack.c.l.bf16 %v4918_v31  ;;  %v4939_v13 = vunpack.c.h.bf16 %v4918_v31  ;;  %v4892_v53 = vmax.f32 %v4796_v9, 0.0 }
 0x601   : > { %v8690_v14 = vpop.f32.mrf.mxu1 }
 0x602   : > { %v4799_v22 = vadd.f32 %v8689_v21, %v11645_v35  ;;  %v4977_v42 = vmul.f32 %v11652_v6, %v4938_v32  ;;  %v4978_v5 = vmul.f32 %v11652_v6, %v4939_v13 }
 0x603   : > { %v8691_v33 = vpop.f32.mrf.mxu1 }
 0x604   : > { %v4893_v55 = vmax.f32 %v4799_v22, 0.0  ;;  %v8692_v54 = vadd.f32 %v8691_v33, %v8690_v14  ;;  %5017 = vadd.xlane.f32.xlu0 %v4977_v42  ;;  %5019 = vadd.xlane.f32.xlu1 %v4978_v5 }
 0x605   : > { %v8693_v36 = vpop.f32.mrf.mxu1 }
 0x606   : > { %v4919_v17 = vpack.c.bf16 %v4893_v55, %v4892_v53  ;;  %v4804_v24 = vadd.f32 %v8692_v54, %v11645_v35 }
 0x607   : > { %v8694_v52 = vpop.f32.mrf.mxu1 }
 0x608   : > { %v8695_v39 = vadd.f32 %v8694_v52, %v8693_v36  ;;  %v4940_v23 = vunpack.c.l.bf16 %v4919_v17  ;;  %v4941_v4 = vunpack.c.h.bf16 %v4919_v17  ;;  %v4894_v27 = vmax.f32 %v4804_v24, 0.0 }
 0x609   : > { %v8696_v3 = vpop.f32.mrf.mxu1 }
 0x60a   : > { %v4807_v19 = vadd.f32 %v8695_v39, %v11645_v35  ;;  %v4979_v60 = vmul.f32 %v11652_v6, %v4940_v23  ;;  %v4980_v46 = vmul.f32 %v11652_v6, %v4941_v4 }
 0x60b   : > { %v8697_v11 = vpop.f32.mrf.mxu1 }
 0x60c   : > { %v4895_v61 = vmax.f32 %v4807_v19, 0.0  ;;  %v8698_v59 = vadd.f32 %v8697_v11, %v8696_v3  ;;  %5021 = vadd.xlane.f32.xlu0 %v4979_v60  ;;  %5023 = vadd.xlane.f32.xlu1 %v4980_v46 }
 0x60d   : > { %v8699_v30 = vpop.f32.mrf.mxu1 }
 0x60e   : > { %v4920_v15 = vpack.c.bf16 %v4895_v61, %v4894_v27  ;;  %v4812_v16 = vadd.f32 %v8698_v59, %v11645_v35 }
 0x60f   : > { %v8700_v0 = vpop.f32.mrf.mxu1 }
 0x610   : > { %v8701_v63 = vadd.f32 %v8700_v0, %v8699_v30  ;;  %v4942_v50 = vunpack.c.l.bf16 %v4920_v15  ;;  %v4943_v41 = vunpack.c.h.bf16 %v4920_v15  ;;  %v4896_v43 = vmax.f32 %v4812_v16, 0.0 }
 0x611   : > { %v8702_v57 = vpop.f32.mrf.mxu1 }
 0x612   : > { %v4815_v48 = vadd.f32 %v8701_v63, %v11645_v35  ;;  %v4981_v47 = vmul.f32 %v11652_v6, %v4942_v50  ;;  %v4982_v49 = vmul.f32 %v11652_v6, %v4943_v41 }
 0x613   : > { %v8703_v7 = vpop.f32.mrf.mxu1 }
 0x614   : > { %v4897_v38 = vmax.f32 %v4815_v48, 0.0  ;;  %v8704_v58 = vadd.f32 %v8703_v7, %v8702_v57  ;;  %5025 = vadd.xlane.f32.xlu0 %v4981_v47  ;;  %5027 = vadd.xlane.f32.xlu1 %v4982_v49 }
 0x615   : > { %v8705_v28 = vpop.f32.mrf.mxu1 }
 0x616   : > { %v4921_v40 = vpack.c.bf16 %v4897_v38, %v4896_v43  ;;  %v4820_v37 = vadd.f32 %v8704_v58, %v11645_v35 }
 0x617   : > { %v8706_v8 = vpop.f32.mrf.mxu1 }
 0x618   : > { %v8707_v45 = vadd.f32 %v8706_v8, %v8705_v28  ;;  %v4944_v1 = vunpack.c.l.bf16 %v4921_v40  ;;  %v4945_v2 = vunpack.c.h.bf16 %v4921_v40  ;;  %v4898_v51 = vmax.f32 %v4820_v37, 0.0 }
 0x619   : > { %v8708_v56 = vpop.f32.mrf.mxu1 }
 0x61a   : > { %v4823_v26 = vadd.f32 %v8707_v45, %v11645_v35  ;;  %v4983_v18 = vmul.f32 %v11652_v6, %v4944_v1  ;;  %v4984_v20 = vmul.f32 %v11652_v6, %v4945_v2 }
 0x61b   : > { %v8709_v25 = vpop.f32.mrf.mxu1 }
 0x61c   : > { %v4899_v44 = vmax.f32 %v4823_v26, 0.0  ;;  %v8710_v62 = vadd.f32 %v8709_v25, %v8708_v56  ;;  %5029 = vadd.xlane.f32.xlu0 %v4983_v18  ;;  %5031 = vadd.xlane.f32.xlu1 %v4984_v20 }
 0x61d   : > { %v8711_v12 = vpop.f32.mrf.mxu1 }
 0x61e   : > { %v4922_v31 = vpack.c.bf16 %v4899_v44, %v4898_v51  ;;  %v4828_v9 = vadd.f32 %v8710_v62, %v11645_v35 }
 0x61f   : > { %v8712_v29 = vpop.f32.mrf.mxu1 }
 0x620   : > { %v8713_v21 = vadd.f32 %v8712_v29, %v8711_v12  ;;  %v4946_v32 = vunpack.c.l.bf16 %v4922_v31  ;;  %v4947_v13 = vunpack.c.h.bf16 %v4922_v31  ;;  %v4900_v53 = vmax.f32 %v4828_v9, 0.0 }
 0x621   : > { %v8714_v14 = vpop.f32.mrf.mxu1 }
 0x622   : > { %v4831_v22 = vadd.f32 %v8713_v21, %v11645_v35  ;;  %v4985_v42 = vmul.f32 %v11652_v6, %v4946_v32  ;;  %v4986_v5 = vmul.f32 %v11652_v6, %v4947_v13 }
 0x623   : > { %v8715_v33 = vpop.f32.mrf.mxu1 }
 0x624   : > { %v4901_v55 = vmax.f32 %v4831_v22, 0.0  ;;  %v8716_v54 = vadd.f32 %v8715_v33, %v8714_v14  ;;  %5033 = vadd.xlane.f32.xlu0 %v4985_v42  ;;  %5035 = vadd.xlane.f32.xlu1 %v4986_v5 }
 0x625   : > { %v8717_v36 = vpop.f32.mrf.mxu1 }
 0x626   : > { %v4923_v17 = vpack.c.bf16 %v4901_v55, %v4900_v53  ;;  %v4836_v24 = vadd.f32 %v8716_v54, %v11645_v35 }
 0x627   : > { %v8718_v52 = vpop.f32.mrf.mxu1 }
 0x628   : > { %v8719_v39 = vadd.f32 %v8718_v52, %v8717_v36  ;;  %v4948_v23 = vunpack.c.l.bf16 %v4923_v17  ;;  %v4949_v4 = vunpack.c.h.bf16 %v4923_v17  ;;  %v4902_v27 = vmax.f32 %v4836_v24, 0.0 }
 0x629   : > { %v8720_v3 = vpop.f32.mrf.mxu1 }
 0x62a   : > { %v4839_v19 = vadd.f32 %v8719_v39, %v11645_v35  ;;  %v4987_v60 = vmul.f32 %v11652_v6, %v4948_v23  ;;  %v4988_v46 = vmul.f32 %v11652_v6, %v4949_v4 }
 0x62b   : > { %v8721_v11 = vpop.f32.mrf.mxu1 }
 0x62c   : > { %v4903_v61 = vmax.f32 %v4839_v19, 0.0  ;;  %v8722_v59 = vadd.f32 %v8721_v11, %v8720_v3  ;;  %5037 = vadd.xlane.f32.xlu0 %v4987_v60  ;;  %5039 = vadd.xlane.f32.xlu1 %v4988_v46 }
 0x62d   : > { %v8723_v30 = vpop.f32.mrf.mxu1 }
 0x62e   : > { %v4924_v15 = vpack.c.bf16 %v4903_v61, %v4902_v27  ;;  %v4844_v16 = vadd.f32 %v8722_v59, %v11645_v35 }
 0x62f   : > { %v8724_v0 = vpop.f32.mrf.mxu1 }
 0x630   : > { %v8725_v63 = vadd.f32 %v8724_v0, %v8723_v30  ;;  %v4950_v50 = vunpack.c.l.bf16 %v4924_v15  ;;  %v4951_v41 = vunpack.c.h.bf16 %v4924_v15  ;;  %v4904_v43 = vmax.f32 %v4844_v16, 0.0  ;;  %v5065_v16 = vld [vmem:[#allocation2] sm:$0x1] }
 0x631   : > { %v8726_v57 = vpop.f32.mrf.mxu1 }
 0x632   : > { %v4847_v48 = vadd.f32 %v8725_v63, %v11645_v35  ;;  %v4989_v47 = vmul.f32 %v11652_v6, %v4950_v50  ;;  %v4990_v49 = vmul.f32 %v11652_v6, %v4951_v41 }
 0x633   : > { %v8727_v7 = vpop.f32.mrf.mxu1 }
 0x634   : > { %v4905_v38 = vmax.f32 %v4847_v48, 0.0  ;;  %v8728_v58 = vadd.f32 %v8727_v7, %v8726_v57  ;;  %5041 = vadd.xlane.f32.xlu0 %v4989_v47  ;;  %5043 = vadd.xlane.f32.xlu1 %v4990_v49 }
 0x635   : > { %v8729_v28 = vpop.f32.mrf.mxu1 }
 0x636   : > { %v4925_v40 = vpack.c.bf16 %v4905_v38, %v4904_v43  ;;  %v4852_v37 = vadd.f32 %v8728_v58, %v11645_v35 }
 0x637   : > { %v8730_v8 = vpop.f32.mrf.mxu1 }
 0x638   : > { %v8731_v45 = vadd.f32 %v8730_v8, %v8729_v28  ;;  %v4952_v1 = vunpack.c.l.bf16 %v4925_v40  ;;  %v4953_v2 = vunpack.c.h.bf16 %v4925_v40  ;;  %v4906_v51 = vmax.f32 %v4852_v37, 0.0 }
 0x639   : > { %v8732_v56 = vpop.f32.mrf.mxu1 }
 0x63a   : > { %v4855_v26 = vadd.f32 %v8731_v45, %v11645_v35  ;;  %v4991_v18 = vmul.f32 %v11652_v6, %v4952_v1  ;;  %v4992_v20 = vmul.f32 %v11652_v6, %v4953_v2 }
 0x63b   : > { %v8733_v25 = vpop.f32.mrf.mxu1 }
 0x63c   : > { %v4907_v44 = vmax.f32 %v4855_v26, 0.0  ;;  %v8734_v62 = vadd.f32 %v8733_v25, %v8732_v56  ;;  %5045 = vadd.xlane.f32.xlu0 %v4991_v18  ;;  %5047 = vadd.xlane.f32.xlu1 %v4992_v20 }
 0x63d   : > { %v8735_v12 = vpop.f32.mrf.mxu1 }
 0x63e   : > { %v4926_v31 = vpack.c.bf16 %v4907_v44, %v4906_v51  ;;  %v4860_v9 = vadd.f32 %v8734_v62, %v11645_v35 }
 0x63f   : > { %v8736_v29 = vpop.f32.mrf.mxu1 }
 0x640   : > { %v8737_v21 = vadd.f32 %v8736_v29, %v8735_v12  ;;  %v4954_v32 = vunpack.c.l.bf16 %v4926_v31  ;;  %v4955_v42 = vunpack.c.h.bf16 %v4926_v31  ;;  %v4908_v33 = vmax.f32 %v4860_v9, 0.0 }
 0x641   : > { %v8738_v13 = vpop.f32.mrf.mxu1 }
 0x642   : > { %v4863_v14 = vadd.f32 %v8737_v21, %v11645_v35  ;;  %v4993_v22 = vmul.f32 %v11652_v6, %v4954_v32  ;;  %v4994_v17 = vmul.f32 %v11652_v6, %v4955_v42 }
 0x643   : > { %v8739_v5 = vpop.f32.mrf.mxu1 }
 0x644   : > { %v4909_v53 = vmax.f32 %v4863_v14, 0.0  ;;  %v8740_v55 = vadd.f32 %v8739_v5, %v8738_v13  ;;  %5049 = vadd.xlane.f32.xlu1 %v4993_v22  ;;  %v9270_v22 = vmov 1966171168  }
 0x645   : > { %v8741_v54 = vpop.f32.mrf.mxu1  ;;  %v6168_v42 = vunpack.c.l.s4 %v9270_v22 }
 0x646   : > { %v4927_v36 = vpack.c.bf16 %v4909_v53, %v4908_v33  ;;  %v4868_v24 = vadd.f32 %v8740_v55, %v11645_v35 }
 0x647   : > { %v8742_v52 = vpop.f32.mrf.mxu1  ;;  %v6169_v53 = vunpack.c.0.s8 %v6168_v42 }
 0x648   : > { %v8743_v39 = vadd.f32 %v8742_v52, %v8741_v54  ;;  %5051 = vadd.xlane.f32.xlu1 %v4994_v17  ;;  %v4956_v23 = vunpack.c.l.bf16 %v4927_v36  ;;  %v4957_v60 = vunpack.c.h.bf16 %v4927_v36  ;;  %v4910_v11 = vmax.f32 %v4868_v24, 0.0  ;;  %v12800_v17 = vld [vmem:[#allocation9_spill] sm:$0xff] }
 0x649   : > { %v8744_v4 = vpop.f32.mrf.mxu1  ;;  %v11720_v52 = vsub.s32 3, %v12800_v17  ;;  %v11723_v24 = vsub.s32 4, %v12800_v17 }
 0x64a   : > { %v4871_v3 = vadd.f32 %v8743_v39, %v11645_v35  ;;  %v4995_v19 = vmul.f32 %v11652_v6, %v4956_v23  ;;  %v4996_v15 = vmul.f32 %v11652_v6, %v4957_v60  ;;  %v11726_v39 = vsub.s32 5, %v12800_v17 }
 0x64b   : > { %v8745_v46 = vpop.f32.mrf.mxu1  ;;  %v11729_v23 = vsub.s32 6, %v12800_v17 }
 0x64c   : > { %v4911_v27 = vmax.f32 %v4871_v3, 0.0  ;;  %v8746_v61 = vadd.f32 %v8745_v46, %v8744_v4  ;;  %5053 = vadd.xlane.f32.xlu1 %v4995_v19  ;;  %v11732_v4 = vsub.s32 7, %v12800_v17  ;;  %v11735_v3 = vsub.s32 %v6169_v53, %v12800_v17 }
 0x64d   : > { %v8747_v59 = vpop.f32.mrf.mxu1 }
 0x64e   : > { %v4928_v30 = vpack.c.bf16 %v4911_v27, %v4910_v11  ;;  %v4876_v63 = vadd.f32 %v8746_v61, %v11645_v35 }
 0x64f   : > { %v8748_v0 = vpop.f32.mrf.mxu1 }
 0x650   : > { %v8749_v50 = vadd.f32 %v8748_v0, %v8747_v59  ;;  %5055 = vadd.xlane.f32.xlu1 %v4996_v15  ;;  %v4958_v41 = vunpack.c.l.bf16 %v4928_v30  ;;  %v4959_v47 = vunpack.c.h.bf16 %v4928_v30  ;;  %v4912_v49 = vmax.f32 %v4876_v63, 0.0 }
 0x652   : > { %v4879_v57 = vadd.f32 %v8749_v50, %v11645_v35  ;;  %5068 = vperm.xlu0 %8941, %v5065_v16   ;;  %v4997_v48 = vmul.f32 %v11652_v6, %v4958_v41  ;;  %v4998_v38 = vmul.f32 %v11652_v6, %v4959_v47 }
 0x654   : > { %v4913_v7 = vmax.f32 %v4879_v57, 0.0  ;;  %5057 = vadd.xlane.f32.xlu1 %v4997_v48 }
 0x656   : > { %v4929_v43 = vpack.c.bf16 %v4913_v7, %v4912_v49 }
 0x658   : > { %5059 = vadd.xlane.f32.xlu1 %v4998_v38  ;;  %v4960_v58 = vunpack.c.l.bf16 %v4929_v43  ;;  %v4961_v40 = vunpack.c.h.bf16 %v4929_v43 }
 0x65a   : > { %v4999_v28 = vmul.f32 %v11652_v6, %v4960_v58  ;;  %v5000_v8 = vmul.f32 %v11652_v6, %v4961_v40 }
 0x65c   : > { %5061 = vadd.xlane.f32.xlu1 %v4999_v28 }
 0x660   : > { %5063 = vadd.xlane.f32.xlu1 %v5000_v8 }
 0x66d   : > { %v5004_v35 = vpop.xlane.xlu0 %5003  ;;  %v5002_v37 = vpop.xlane.xlu1 %5001 }
 0x675   : > { %v5006_v45 = vpop.xlane.xlu0 %5005  ;;  %v5008_v1 = vpop.xlane.xlu1 %5007 }
 0x67d   : > { %v5010_v2 = vpop.xlane.xlu0 %5009  ;;  %v5012_v56 = vpop.xlane.xlu1 %5011 }
 0x685   : > { %v5014_v26 = vpop.xlane.xlu0 %5013  ;;  %v5016_v18 = vpop.xlane.xlu1 %5015 }
 0x68d   : > { %v5018_v20 = vpop.xlane.xlu0 %5017  ;;  %v5020_v25 = vpop.xlane.xlu1 %5019 }
 0x695   : > { %v5022_v51 = vpop.xlane.xlu0 %5021  ;;  %v5024_v44 = vpop.xlane.xlu1 %5023 }
 0x69d   : > { %v5026_v62 = vpop.xlane.xlu0 %5025  ;;  %v5028_v12 = vpop.xlane.xlu1 %5027 }
 0x6a5   : > { %v5030_v31 = vpop.xlane.xlu0 %5029  ;;  %v5032_v29 = vpop.xlane.xlu1 %5031 }
 0x6ad   : > { %v5034_v9 = vpop.xlane.xlu0 %5033  ;;  %v5036_v21 = vpop.xlane.xlu1 %5035 }
 0x6b5   : > { %v5038_v6 = vpop.xlane.xlu0 %5037  ;;  %v5040_v32 = vpop.xlane.xlu1 %5039 }
 0x6bd   : > { %v5042_v13 = vpop.xlane.xlu0 %5041  ;;  %v5044_v14 = vpop.xlane.xlu1 %5043 }
 0x6c5   : > { %v5046_v5 = vpop.xlane.xlu0 %5045  ;;  %v5048_v33 = vpop.xlane.xlu1 %5047 }
 0x6cd   : > { %v5069_v55 = vpop.permute.xlu0 %5068  ;;  %v5050_v54 = vpop.xlane.xlu1 %5049 }
 0x6ce   : > { %v11717_v36 = vrot.slane %v5069_v55, %v12799_v10 }
 0x6d0   : > { %v11738_v19 = vadd.f32 %v11717_v36, %v5002_v37  ;;  %v5076_v60 = vadd.f32 %v11717_v36, %v5004_v35  ;;  %v11742_v46 = vadd.f32 %v11717_v36, %v5006_v45  ;;  %v11745_v11 = vadd.f32 %v11717_v36, %v5008_v1 }
 0x6d1   : > { %v11748_v27 = vadd.f32 %v11717_v36, %v5010_v2  ;;  %v11751_v61 = vadd.f32 %v11717_v36, %v5012_v56  ;;  %v11754_v59 = vadd.f32 %v11717_v36, %v5014_v26  ;;  %v11757_v30 = vadd.f32 %v11717_v36, %v5016_v18  ;;  %v5052_v15 = vpop.xlane.xlu1 %5051  ;;  %v12801_v26 = vld [vmem:[#allocation12_spill] sm:$0xff] }
 0x6d2   : > { %v11760_v0 = vadd.f32 %v11717_v36, %v5018_v20  ;;  %v11763_v16 = vadd.f32 %v11717_v36, %v5020_v25  ;;  %v11766_v63 = vadd.f32 %v11717_v36, %v5022_v51  ;;  %v11769_v50 = vadd.f32 %v11717_v36, %v5024_v44 }
 0x6d3   : > { %v11772_v41 = vadd.f32 %v11717_v36, %v5026_v62  ;;  %v11775_v57 = vadd.f32 %v11717_v36, %v5028_v12  ;;  %v11778_v48 = vadd.f32 %v11717_v36, %v5030_v31  ;;  %v11781_v47 = vadd.f32 %v11717_v36, %v5032_v29 }
 0x6d4   : > { %v11784_v49 = vadd.f32 %v11717_v36, %v5034_v9  ;;  %v11787_v7 = vadd.f32 %v11717_v36, %v5036_v21  ;;  %v11790_v43 = vadd.f32 %v11717_v36, %v5038_v6  ;;  %v11793_v38 = vadd.f32 %v11717_v36, %v5040_v32 }
 0x6d5   : > { %v11796_v58 = vadd.f32 %v11717_v36, %v5042_v13  ;;  %v11799_v28 = vadd.f32 %v11717_v36, %v5044_v14  ;;  %v11802_v40 = vadd.f32 %v11717_v36, %v5046_v5  ;;  %v11805_v8 = vadd.f32 %v11717_v36, %v5048_v33  ;;  %v5054_v35 = vpop.xlane.xlu1 %5053 }
 0x6d6   : > { %v11808_v37 = vadd.f32 %v11717_v36, %v5050_v54  ;;  %v11811_v45 = vadd.f32 %v11717_v36, %v5052_v15  ;;  %v11814_v1 = vadd.f32 %v11717_v36, %v5054_v35  ;;  %v5174_v2 = vrot.slane %v5076_v60, %v12799_v10 }
 0x6d7   : > { %v5178_v56 = vrot.slane %v5076_v60, %v12798_v34  ;;  %v5182_v18 = vrot.slane %v5076_v60, %v12801_v26  ;;  %v5186_v20 = vrot.slane %v5076_v60, %v11720_v52  ;;  %v5190_v25 = vrot.slane %v5076_v60, %v11723_v24 }
 0x6d8   : > { %v5194_v51 = vrot.slane %v5076_v60, %v11726_v39  ;;  %v5198_v44 = vrot.slane %v5076_v60, %v11729_v23  ;;  %v5202_v62 = vrot.slane %v5076_v60, %v11732_v4  ;;  %v5142_v12 = vrot.slane %v11738_v19, %v12799_v10 }
 0x6d9   : > { %v5056_v31 = vpop.xlane.xlu1 %5055  ;;  %v6212_v29 = vcombine.low %v5174_v2, %v5178_v56  ;;  %v6213_v9 = vcombine.low %v5182_v18, %v5186_v20  ;;  %v5146_v21 = vrot.slane %v11738_v19, %v12798_v34  ;;  %v5150_v6 = vrot.slane %v11738_v19, %v12801_v26 }
 0x6da   : > { %v11831_v32 = vadd.f32 %v11717_v36, %v5056_v31  ;;  %v6214_v13 = vcombine.low %v5190_v25, %v5194_v51  ;;  %v6215_v14 = vcombine.low %v5198_v44, %v5202_v62  ;;  %v5154_v22 = vrot.slane %v11738_v19, %v11720_v52 }
 0x6db   : > { %v6222_v42 = vrot.slane %v6212_v29, %v11735_v3  ;;  %v6229_v5 = vrot.slane %v6213_v9, %v11735_v3  ;;  %v5158_v33 = vrot.slane %v11738_v19, %v11723_v24  ;;  %v5162_v53 = vrot.slane %v11738_v19, %v11726_v39 }
 0x6dc   : > { %v6236_v55 = vrot.slane %v6214_v13, %v11735_v3  ;;  %v6243_v54 = vrot.slane %v6215_v14, %v11735_v3  ;;  %v5166_v60 = vrot.slane %v11738_v19, %v11729_v23  ;;  %v5170_v15 = vrot.slane %v11738_v19, %v11732_v4 }
 0x6dd   : > { %v5058_v35 = vpop.xlane.xlu1 %5057  ;;  %v6244_v2 = vcombine.low %v6222_v42, %v6229_v5  ;;  %v6163_v56 = vcombine.low %v5142_v12, %v5146_v21  ;;  %v6164_v18 = vcombine.low %v5150_v6, %v5154_v22  ;;  %v6165_v20 = vcombine.low %v5158_v33, %v5162_v53 }
 0x6de   : > { %v11848_v25 = vadd.f32 %v11717_v36, %v5058_v35  ;;  %v6245_v51 = vcombine.low %v6236_v55, %v6243_v54  ;;  %v6166_v44 = vcombine.low %v5166_v60, %v5170_v15  ;;  %v5206_v62 = vrot.slane %v11742_v46, %v12799_v10 }
 0x6df   : > { %v6252_v31 = vrot.slane %v6244_v2, %v11735_v3  ;;  %v6173_v29 = vrot.slane %v6163_v56, %v11735_v3  ;;  %v6180_v9 = vrot.slane %v6164_v18, %v11735_v3  ;;  %v6187_v19 = vrot.slane %v6165_v20, %v11735_v3 }
 0x6e0   : > { %v6259_v12 = vrot.slane %v6245_v51, %v11735_v3  ;;  %v6194_v21 = vrot.slane %v6166_v44, %v11735_v3  ;;  %v5210_v6 = vrot.slane %v11742_v46, %v12798_v34  ;;  %v5214_v13 = vrot.slane %v11742_v46, %v12801_v26 }
 0x6e1   : > { %v6195_v14 = vcombine.low %v6173_v29, %v6180_v9  ;;  %v5060_v22 = vpop.xlane.xlu1 %5059  ;;  %v5218_v42 = vrot.slane %v11742_v46, %v11720_v52  ;;  %v5222_v5 = vrot.slane %v11742_v46, %v11723_v24  ;;  %v5226_v33 = vrot.slane %v11742_v46, %v11726_v39 }
 0x6e2   : > { %v6260_v53 = vcombine.low %v6252_v31, %v6259_v12  ;;  %v6196_v55 = vcombine.low %v6187_v19, %v6194_v21  ;;  %v11869_v54 = vadd.f32 %v11717_v36, %v5060_v22  ;;  %v5230_v60 = vrot.slane %v11742_v46, %v11729_v23 }
 0x6e3   : > { %v6203_v15 = vrot.slane %v6195_v14, %v11735_v3  ;;  %v5234_v35 = vrot.slane %v11742_v46, %v11732_v4  ;;  %v6261_v2 = vcombine.low %v5206_v62, %v5210_v6  ;;  %v6262_v56 = vcombine.low %v5214_v13, %v5218_v42 }
 0x6e4   : > { %7735 = vperm.xlu0 %8941, %v6260_v53   ;;  %v6210_v18 = vrot.slane %v6196_v55, %v11735_v3  ;;  %v6263_v20 = vcombine.low %v5222_v5, %v5226_v33  ;;  %v5654_v51 = vrot.slane %v11784_v49, %v12799_v10  ;;  %v5658_v44 = vrot.slane %v11784_v49, %v12798_v34 }
 0x6e5   : > { %v6264_v31 = vcombine.low %v5230_v60, %v5234_v35  ;;  %v6271_v29 = vrot.slane %v6261_v2, %v11735_v3  ;;  %v6278_v9 = vrot.slane %v6262_v56, %v11735_v3  ;;  %v5662_v46 = vrot.slane %v11784_v49, %v12801_v26  ;;  %v5062_v62 = vpop.xlane.xlu1 %5061 }
 0x6e6   : > { %v6211_v19 = vcombine.low %v6203_v15, %v6210_v18  ;;  %v6285_v12 = vrot.slane %v6263_v20, %v11735_v3  ;;  %v5666_v21 = vrot.slane %v11784_v49, %v11720_v52  ;;  %v5670_v6 = vrot.slane %v11784_v49, %v11723_v24 }
 0x6e7   : > { %v6292_v13 = vrot.slane %v6264_v31, %v11735_v3  ;;  %v6293_v14 = vcombine.low %v6271_v29, %v6278_v9  ;;  %v5674_v22 = vrot.slane %v11784_v49, %v11726_v39  ;;  %v5678_v42 = vrot.slane %v11784_v49, %v11729_v23 }
 0x6e8   : > { %7732 = vperm.xlu1 %8942, %v6211_v19   ;;  %v5682_v5 = vrot.slane %v11784_v49, %v11732_v4  ;;  %v6947_v33 = vcombine.low %v5654_v51, %v5658_v44  ;;  %v6948_v53 = vcombine.low %v5662_v46, %v5666_v21  ;;  %v11898_v55 = vadd.f32 %v11717_v36, %v5062_v62 }
 0x6e9   : > { %v6294_v60 = vcombine.low %v6285_v12, %v6292_v13  ;;  %v6301_v15 = vrot.slane %v6293_v14, %v11735_v3  ;;  %v6949_v35 = vcombine.low %v5670_v6, %v5674_v22  ;;  %v5238_v2 = vrot.slane %v11745_v11, %v12799_v10 }
 0x6ea   : > { %v6950_v56 = vcombine.low %v5678_v42, %v5682_v5  ;;  %v6957_v18 = vrot.slane %v6947_v33, %v11735_v3  ;;  %v6964_v20 = vrot.slane %v6948_v53, %v11735_v3  ;;  %v5242_v49 = vrot.slane %v11745_v11, %v12798_v34 }
 0x6eb   : > { %v6308_v51 = vrot.slane %v6294_v60, %v11735_v3  ;;  %v6971_v44 = vrot.slane %v6949_v35, %v11735_v3  ;;  %v5246_v31 = vrot.slane %v11745_v11, %v12801_v26  ;;  %v5250_v29 = vrot.slane %v11745_v11, %v11720_v52 }
 0x6ec   : > { %v6978_v9 = vrot.slane %v6950_v56, %v11735_v3  ;;  %v6979_v46 = vcombine.low %v6957_v18, %v6964_v20  ;;  %v5254_v62 = vrot.slane %v11745_v11, %v11723_v24  ;;  %v5258_v19 = vrot.slane %v11745_v11, %v11726_v39 }
 0x6ed   : > { %v6309_v12 = vcombine.low %v6301_v15, %v6308_v51  ;;  %v5262_v21 = vrot.slane %v11745_v11, %v11729_v23  ;;  %v5266_v6 = vrot.slane %v11745_v11, %v11732_v4  ;;  %v6310_v13 = vcombine.low %v5238_v2, %v5242_v49 }
 0x6ee   : > { %v6980_v14 = vcombine.low %v6971_v44, %v6978_v9  ;;  %v6987_v22 = vrot.slane %v6979_v46, %v11735_v3  ;;  %v6311_v42 = vcombine.low %v5246_v31, %v5250_v29  ;;  %v6312_v5 = vcombine.low %v5254_v62, %v5258_v19  ;;  %v5064_v44 = vpop.xlane.xlu1 %5063 }
 0x6ef   : > { %7738 = vperm.xlu0 %8941, %v6309_v12   ;;  %v6313_v33 = vcombine.low %v5262_v21, %v5266_v6  ;;  %v6320_v53 = vrot.slane %v6310_v13, %v11735_v3  ;;  %v5718_v60 = vrot.slane %v11790_v43, %v12799_v10  ;;  %v5722_v15 = vrot.slane %v11790_v43, %v12798_v34 }
 0x6f0   : > { %v6994_v35 = vrot.slane %v6980_v14, %v11735_v3  ;;  %v6327_v11 = vrot.slane %v6311_v42, %v11735_v3  ;;  %v6334_v2 = vrot.slane %v6312_v5, %v11735_v3  ;;  %v5726_v56 = vrot.slane %v11790_v43, %v12801_v26 }
 0x6f1   : > { %v6341_v18 = vrot.slane %v6313_v33, %v11735_v3  ;;  %v5730_v20 = vrot.slane %v11790_v43, %v11720_v52  ;;  %v5734_v49 = vrot.slane %v11790_v43, %v11723_v24  ;;  %v5738_v51 = vrot.slane %v11790_v43, %v11726_v39 }
 0x6f2   : > { %v6995_v31 = vcombine.low %v6987_v22, %v6994_v35  ;;  %v6342_v29 = vcombine.low %v6320_v53, %v6327_v11  ;;  %v5742_v9 = vrot.slane %v11790_v43, %v11729_v23  ;;  %v5746_v46 = vrot.slane %v11790_v43, %v11732_v4 }
 0x6f3   : > { %v6343_v62 = vcombine.low %v6334_v2, %v6341_v18  ;;  %v7045_v19 = vcombine.low %v5718_v60, %v5722_v15  ;;  %v7046_v12 = vcombine.low %v5726_v56, %v5730_v20  ;;  %v7047_v21 = vcombine.low %v5734_v49, %v5738_v51 }
 0x6f4   : > { %7780 = vperm.xlu1 %8942, %v6995_v31   ;;  %v6350_v6 = vrot.slane %v6342_v29, %v11735_v3  ;;  %v7048_v13 = vcombine.low %v5742_v9, %v5746_v46  ;;  %v11946_v14 = vadd.f32 %v11717_v36, %v5064_v44  ;;  %v5270_v22 = vrot.slane %v11748_v27, %v12799_v10 }
 0x6f5   : > { %v6357_v42 = vrot.slane %v6343_v62, %v11735_v3  ;;  %v7055_v5 = vrot.slane %v7045_v19, %v11735_v3  ;;  %v7062_v43 = vrot.slane %v7046_v12, %v11735_v3  ;;  %v7069_v33 = vrot.slane %v7047_v21, %v11735_v3 }
 0x6f6   : > { %v7076_v53 = vrot.slane %v7048_v13, %v11735_v3  ;;  %v5274_v60 = vrot.slane %v11748_v27, %v12798_v34  ;;  %v5278_v36 = vrot.slane %v11748_v27, %v12801_v26  ;;  %v5282_v15 = vrot.slane %v11748_v27, %v11720_v52 }
 0x6f7   : > { %v6358_v35 = vcombine.low %v6350_v6, %v6357_v42  ;;  %v7077_v11 = vcombine.low %v7055_v5, %v7062_v43  ;;  %v5286_v2 = vrot.slane %v11748_v27, %v11723_v24  ;;  %v5290_v56 = vrot.slane %v11748_v27, %v11726_v39 }
 0x6f8   : > { %v7078_v18 = vcombine.low %v7069_v33, %v7076_v53  ;;  %v5294_v20 = vrot.slane %v11748_v27, %v11729_v23  ;;  %v5298_v49 = vrot.slane %v11748_v27, %v11732_v4  ;;  %v6359_v51 = vcombine.low %v5270_v22, %v5274_v60 }
 0x6f9   : > { %7741 = vperm.xlu0 %8941, %v6358_v35   ;;  %v7085_v44 = vrot.slane %v7077_v11, %v11735_v3  ;;  %v6360_v31 = vcombine.low %v5278_v36, %v5282_v15  ;;  %v6361_v29 = vcombine.low %v5286_v2, %v5290_v56  ;;  %v5750_v9 = vrot.slane %v11793_v38, %v12799_v10 }
 0x6fa   : > { %v7092_v46 = vrot.slane %v7078_v18, %v11735_v3  ;;  %v6362_v62 = vcombine.low %v5294_v20, %v5298_v49  ;;  %v6369_v19 = vrot.slane %v6359_v51, %v11735_v3  ;;  %v5754_v12 = vrot.slane %v11793_v38, %v12798_v34 }
 0x6fb   : > { %v6376_v21 = vrot.slane %v6360_v31, %v11735_v3  ;;  %v6383_v27 = vrot.slane %v6361_v29, %v11735_v3  ;;  %v5758_v6 = vrot.slane %v11793_v38, %v12801_v26  ;;  %v5762_v13 = vrot.slane %v11793_v38, %v11720_v52 }
 0x6fc   : > { %v7093_v22 = vcombine.low %v7085_v44, %v7092_v46  ;;  %v6390_v42 = vrot.slane %v6362_v62, %v11735_v3  ;;  %v5766_v5 = vrot.slane %v11793_v38, %v11723_v24  ;;  %v5770_v43 = vrot.slane %v11793_v38, %v11726_v39 }
 0x6fd   : > { %v6391_v33 = vcombine.low %v6369_v19, %v6376_v21  ;;  %v5774_v53 = vrot.slane %v11793_v38, %v11729_v23  ;;  %v5778_v60 = vrot.slane %v11793_v38, %v11732_v4  ;;  %v7094_v36 = vcombine.low %v5750_v9, %v5754_v12 }
 0x6fe   : > { %7786 = vperm.xlu1 %8942, %v7093_v22   ;;  %v6392_v15 = vcombine.low %v6383_v27, %v6390_v42  ;;  %v7095_v35 = vcombine.low %v5758_v6, %v5762_v13  ;;  %v7096_v11 = vcombine.low %v5766_v5, %v5770_v43  ;;  %v5302_v2 = vrot.slane %v11751_v61, %v12799_v10 }
 0x6ff   : > { %v6399_v56 = vrot.slane %v6391_v33, %v11735_v3  ;;  %v7097_v18 = vcombine.low %v5774_v53, %v5778_v60  ;;  %v7104_v20 = vrot.slane %v7094_v36, %v11735_v3  ;;  %v5306_v49 = vrot.slane %v11751_v61, %v12798_v34 }
 0x700   : > { %v6406_v51 = vrot.slane %v6392_v15, %v11735_v3  ;;  %v7111_v38 = vrot.slane %v7095_v35, %v11735_v3  ;;  %v7118_v44 = vrot.slane %v7096_v11, %v11735_v3  ;;  %v5310_v31 = vrot.slane %v11751_v61, %v12801_v26 }
 0x701   : > { %v7125_v29 = vrot.slane %v7097_v18, %v11735_v3  ;;  %v5314_v9 = vrot.slane %v11751_v61, %v11720_v52  ;;  %v5318_v46 = vrot.slane %v11751_v61, %v11723_v24  ;;  %v5322_v62 = vrot.slane %v11751_v61, %v11726_v39 }
 0x702   : > { %v6407_v19 = vcombine.low %v6399_v56, %v6406_v51  ;;  %v7126_v12 = vcombine.low %v7104_v20, %v7111_v38  ;;  %v5326_v21 = vrot.slane %v11751_v61, %v11729_v23  ;;  %v5330_v27 = vrot.slane %v11751_v61, %v11732_v4 }
 0x703   : > { %v7127_v6 = vcombine.low %v7118_v44, %v7125_v29  ;;  %v6408_v13 = vcombine.low %v5302_v2, %v5306_v49  ;;  %v6409_v22 = vcombine.low %v5310_v31, %v5314_v9  ;;  %v6410_v42 = vcombine.low %v5318_v46, %v5322_v62 }
 0x704   : > { %7744 = vperm.xlu0 %8941, %v6407_v19   ;;  %v7134_v5 = vrot.slane %v7126_v12, %v11735_v3  ;;  %v6411_v43 = vcombine.low %v5326_v21, %v5330_v27  ;;  %v5782_v33 = vrot.slane %v11796_v58, %v12799_v10  ;;  %v5786_v53 = vrot.slane %v11796_v58, %v12798_v34 }
 0x705   : > { %v7141_v60 = vrot.slane %v7127_v6, %v11735_v3  ;;  %v6418_v36 = vrot.slane %v6408_v13, %v11735_v3  ;;  %v6425_v61 = vrot.slane %v6409_v22, %v11735_v3  ;;  %v6432_v15 = vrot.slane %v6410_v42, %v11735_v3 }
 0x706   : > { %v6439_v35 = vrot.slane %v6411_v43, %v11735_v3  ;;  %v5790_v11 = vrot.slane %v11796_v58, %v12801_v26  ;;  %v5794_v2 = vrot.slane %v11796_v58, %v11720_v52  ;;  %v5798_v56 = vrot.slane %v11796_v58, %v11723_v24 }
 0x707   : > { %v7142_v18 = vcombine.low %v7134_v5, %v7141_v60  ;;  %v6440_v20 = vcombine.low %v6418_v36, %v6425_v61  ;;  %v5802_v49 = vrot.slane %v11796_v58, %v11726_v39  ;;  %v5806_v51 = vrot.slane %v11796_v58, %v11729_v23 }
 0x708   : > { %v6441_v38 = vcombine.low %v6432_v15, %v6439_v35  ;;  %v5810_v44 = vrot.slane %v11796_v58, %v11732_v4  ;;  %v7143_v31 = vcombine.low %v5782_v33, %v5786_v53  ;;  %v7144_v29 = vcombine.low %v5790_v11, %v5794_v2 }
 0x709   : > { %7789 = vperm.xlu1 %8942, %v7142_v18   ;;  %v6448_v9 = vrot.slane %v6440_v20, %v11735_v3  ;;  %v7145_v46 = vcombine.low %v5798_v56, %v5802_v49  ;;  %v5334_v62 = vrot.slane %v11754_v59, %v12799_v10  ;;  %v5338_v19 = vrot.slane %v11754_v59, %v12798_v34 }
 0x70a   : > { %v6455_v12 = vrot.slane %v6441_v38, %v11735_v3  ;;  %v7146_v21 = vcombine.low %v5806_v51, %v5810_v44  ;;  %v7153_v27 = vrot.slane %v7143_v31, %v11735_v3  ;;  %v7160_v6 = vrot.slane %v7144_v29, %v11735_v3 }
 0x70b   : > { %v7167_v58 = vrot.slane %v7145_v46, %v11735_v3  ;;  %v5342_v13 = vrot.slane %v11754_v59, %v12801_v26  ;;  %v5346_v22 = vrot.slane %v11754_v59, %v11720_v52  ;;  %v5350_v42 = vrot.slane %v11754_v59, %v11723_v24 }
 0x70c   : > { %v6456_v5 = vcombine.low %v6448_v9, %v6455_v12  ;;  %v7174_v43 = vrot.slane %v7146_v21, %v11735_v3  ;;  %v7175_v33 = vcombine.low %v7153_v27, %v7160_v6  ;;  %v5354_v53 = vrot.slane %v11754_v59, %v11726_v39 }
 0x70d   : > { %v5358_v60 = vrot.slane %v11754_v59, %v11729_v23  ;;  %v5362_v36 = vrot.slane %v11754_v59, %v11732_v4  ;;  %v6457_v61 = vcombine.low %v5334_v62, %v5338_v19  ;;  %v6458_v15 = vcombine.low %v5342_v13, %v5346_v22 }
 0x70e   : > { %7747 = vperm.xlu0 %8941, %v6456_v5   ;;  %v7176_v35 = vcombine.low %v7167_v58, %v7174_v43  ;;  %v7183_v11 = vrot.slane %v7175_v33, %v11735_v3  ;;  %v6459_v2 = vcombine.low %v5350_v42, %v5354_v53  ;;  %v5814_v56 = vrot.slane %v11799_v28, %v12799_v10 }
 0x70f   : > { %v6460_v18 = vcombine.low %v5358_v60, %v5362_v36  ;;  %v6467_v20 = vrot.slane %v6457_v61, %v11735_v3  ;;  %v6474_v49 = vrot.slane %v6458_v15, %v11735_v3  ;;  %v5818_v51 = vrot.slane %v11799_v28, %v12798_v34 }
 0x710   : > { %v7190_v59 = vrot.slane %v7176_v35, %v11735_v3  ;;  %v6481_v38 = vrot.slane %v6459_v2, %v11735_v3  ;;  %v5822_v44 = vrot.slane %v11799_v28, %v12801_v26  ;;  %v5826_v31 = vrot.slane %v11799_v28, %v11720_v52 }
 0x711   : > { %v6488_v29 = vrot.slane %v6460_v18, %v11735_v3  ;;  %v6489_v9 = vcombine.low %v6467_v20, %v6474_v49  ;;  %v5830_v46 = vrot.slane %v11799_v28, %v11723_v24  ;;  %v5834_v62 = vrot.slane %v11799_v28, %v11726_v39 }
 0x712   : > { %v7191_v19 = vcombine.low %v7183_v11, %v7190_v59  ;;  %v5838_v12 = vrot.slane %v11799_v28, %v11729_v23  ;;  %v5842_v21 = vrot.slane %v11799_v28, %v11732_v4  ;;  %v7192_v27 = vcombine.low %v5814_v56, %v5818_v51 }
 0x713   : > { %v6490_v6 = vcombine.low %v6481_v38, %v6488_v29  ;;  %v6497_v58 = vrot.slane %v6489_v9, %v11735_v3  ;;  %v7193_v13 = vcombine.low %v5822_v44, %v5826_v31  ;;  %v7194_v22 = vcombine.low %v5830_v46, %v5834_v62 }
 0x714   : > { %7792 = vperm.xlu1 %8942, %v7191_v19   ;;  %v7195_v42 = vcombine.low %v5838_v12, %v5842_v21  ;;  %v7202_v5 = vrot.slane %v7192_v27, %v11735_v3  ;;  %v5366_v43 = vrot.slane %v11757_v30, %v12799_v10  ;;  %v5370_v33 = vrot.slane %v11757_v30, %v12798_v34 }
 0x715   : > { %v6504_v53 = vrot.slane %v6490_v6, %v11735_v3  ;;  %v7209_v28 = vrot.slane %v7193_v13, %v11735_v3  ;;  %v7216_v60 = vrot.slane %v7194_v22, %v11735_v3  ;;  %v5374_v36 = vrot.slane %v11757_v30, %v12801_v26 }
 0x716   : > { %v7223_v61 = vrot.slane %v7195_v42, %v11735_v3  ;;  %v5378_v15 = vrot.slane %v11757_v30, %v11720_v52  ;;  %v5382_v35 = vrot.slane %v11757_v30, %v11723_v24  ;;  %v5386_v11 = vrot.slane %v11757_v30, %v11726_v39 }
 0x717   : > { %v6505_v2 = vcombine.low %v6497_v58, %v6504_v53  ;;  %v7224_v56 = vcombine.low %v7202_v5, %v7209_v28  ;;  %v5390_v18 = vrot.slane %v11757_v30, %v11729_v23  ;;  %v5394_v20 = vrot.slane %v11757_v30, %v11732_v4 }
 0x718   : > { %v7225_v49 = vcombine.low %v7216_v60, %v7223_v61  ;;  %v6506_v51 = vcombine.low %v5366_v43, %v5370_v33  ;;  %v6507_v59 = vcombine.low %v5374_v36, %v5378_v15  ;;  %v6508_v38 = vcombine.low %v5382_v35, %v5386_v11 }
 0x719   : > { %7750 = vperm.xlu0 %8941, %v6505_v2   ;;  %v7232_v44 = vrot.slane %v7224_v56, %v11735_v3  ;;  %v6509_v31 = vcombine.low %v5390_v18, %v5394_v20  ;;  %v5846_v29 = vrot.slane %v11802_v40, %v12799_v10  ;;  %v5850_v9 = vrot.slane %v11802_v40, %v12798_v34 }
 0x71a   : > { %v7239_v46 = vrot.slane %v7225_v49, %v11735_v3  ;;  %v6516_v62 = vrot.slane %v6506_v51, %v11735_v3  ;;  %v6523_v30 = vrot.slane %v6507_v59, %v11735_v3  ;;  %v6530_v19 = vrot.slane %v6508_v38, %v11735_v3 }
 0x71b   : > { %v6537_v12 = vrot.slane %v6509_v31, %v11735_v3  ;;  %v5854_v21 = vrot.slane %v11802_v40, %v12801_v26  ;;  %v5858_v27 = vrot.slane %v11802_v40, %v11720_v52  ;;  %v5862_v6 = vrot.slane %v11802_v40, %v11723_v24 }
 0x71c   : > { %v7240_v58 = vcombine.low %v7232_v44, %v7239_v46  ;;  %v6538_v13 = vcombine.low %v6516_v62, %v6523_v30  ;;  %v5866_v22 = vrot.slane %v11802_v40, %v11726_v39  ;;  %v5870_v42 = vrot.slane %v11802_v40, %v11729_v23 }
 0x71d   : > { %v6539_v5 = vcombine.low %v6530_v19, %v6537_v12  ;;  %v5874_v43 = vrot.slane %v11802_v40, %v11732_v4  ;;  %v7241_v33 = vcombine.low %v5846_v29, %v5850_v9  ;;  %v7242_v53 = vcombine.low %v5854_v21, %v5858_v27 }
 0x71e   : > { %7795 = vperm.xlu1 %8942, %v7240_v58   ;;  %v6546_v28 = vrot.slane %v6538_v13, %v11735_v3  ;;  %v7243_v60 = vcombine.low %v5862_v6, %v5866_v22  ;;  %v5398_v36 = vrot.slane %v11760_v0, %v12799_v10  ;;  %v5402_v61 = vrot.slane %v11760_v0, %v12798_v34 }
 0x71f   : > { %v6553_v15 = vrot.slane %v6539_v5, %v11735_v3  ;;  %v7244_v35 = vcombine.low %v5870_v42, %v5874_v43  ;;  %v7251_v11 = vrot.slane %v7241_v33, %v11735_v3  ;;  %v7258_v2 = vrot.slane %v7242_v53, %v11735_v3 }
 0x720   : > { %v7265_v40 = vrot.slane %v7243_v60, %v11735_v3  ;;  %v5406_v56 = vrot.slane %v11760_v0, %v12801_v26  ;;  %v5410_v18 = vrot.slane %v11760_v0, %v11720_v52  ;;  %v5414_v20 = vrot.slane %v11760_v0, %v11723_v24 }
 0x721   : > { %v6554_v49 = vcombine.low %v6546_v28, %v6553_v15  ;;  %v7272_v51 = vrot.slane %v7244_v35, %v11735_v3  ;;  %v7273_v59 = vcombine.low %v7251_v11, %v7258_v2  ;;  %v5418_v38 = vrot.slane %v11760_v0, %v11726_v39 }
 0x722   : > { %v5422_v44 = vrot.slane %v11760_v0, %v11729_v23  ;;  %v5426_v31 = vrot.slane %v11760_v0, %v11732_v4  ;;  %v6555_v29 = vcombine.low %v5398_v36, %v5402_v61  ;;  %v6556_v9 = vcombine.low %v5406_v56, %v5410_v18 }
 0x723   : > { %7753 = vperm.xlu0 %8941, %v6554_v49   ;;  %v7274_v46 = vcombine.low %v7265_v40, %v7272_v51  ;;  %v7281_v62 = vrot.slane %v7273_v59, %v11735_v3  ;;  %v6557_v30 = vcombine.low %v5414_v20, %v5418_v38  ;;  %v5878_v19 = vrot.slane %v11805_v8, %v12799_v10 }
 0x724   : > { %v6558_v12 = vcombine.low %v5422_v44, %v5426_v31  ;;  %v6565_v21 = vrot.slane %v6555_v29, %v11735_v3  ;;  %v6572_v27 = vrot.slane %v6556_v9, %v11735_v3  ;;  %v5882_v6 = vrot.slane %v11805_v8, %v12798_v34 }
 0x725   : > { %v7288_v0 = vrot.slane %v7274_v46, %v11735_v3  ;;  %v6579_v58 = vrot.slane %v6557_v30, %v11735_v3  ;;  %v5886_v13 = vrot.slane %v11805_v8, %v12801_v26  ;;  %v5890_v22 = vrot.slane %v11805_v8, %v11720_v52 }
 0x726   : > { %v6586_v42 = vrot.slane %v6558_v12, %v11735_v3  ;;  %v6587_v5 = vcombine.low %v6565_v21, %v6572_v27  ;;  %v5894_v43 = vrot.slane %v11805_v8, %v11723_v24  ;;  %v5898_v33 = vrot.slane %v11805_v8, %v11726_v39 }
 0x727   : > { %v7289_v53 = vcombine.low %v7281_v62, %v7288_v0  ;;  %v5902_v28 = vrot.slane %v11805_v8, %v11729_v23  ;;  %v5906_v60 = vrot.slane %v11805_v8, %v11732_v4  ;;  %v7290_v36 = vcombine.low %v5878_v19, %v5882_v6 }
 0x728   : > { %v6588_v61 = vcombine.low %v6579_v58, %v6586_v42  ;;  %v6595_v15 = vrot.slane %v6587_v5, %v11735_v3  ;;  %v7291_v35 = vcombine.low %v5886_v13, %v5890_v22  ;;  %v7292_v11 = vcombine.low %v5894_v43, %v5898_v33 }
 0x729   : > { %7798 = vperm.xlu1 %8942, %v7289_v53   ;;  %v7293_v2 = vcombine.low %v5902_v28, %v5906_v60  ;;  %v7300_v40 = vrot.slane %v7290_v36, %v11735_v3  ;;  %v5430_v56 = vrot.slane %v11763_v16, %v12799_v10  ;;  %v5434_v18 = vrot.slane %v11763_v16, %v12798_v34 }
 0x72a   : > { %v6602_v20 = vrot.slane %v6588_v61, %v11735_v3  ;;  %v7307_v8 = vrot.slane %v7291_v35, %v11735_v3  ;;  %v7314_v49 = vrot.slane %v7292_v11, %v11735_v3  ;;  %v5438_v51 = vrot.slane %v11763_v16, %v12801_v26 }
 0x72b   : > { %v7321_v59 = vrot.slane %v7293_v2, %v11735_v3  ;;  %v5442_v38 = vrot.slane %v11763_v16, %v11720_v52  ;;  %v5446_v44 = vrot.slane %v11763_v16, %v11723_v24  ;;  %v5450_v31 = vrot.slane %v11763_v16, %v11726_v39 }
 0x72c   : > { %v6603_v29 = vcombine.low %v6595_v15, %v6602_v20  ;;  %v7322_v9 = vcombine.low %v7300_v40, %v7307_v8  ;;  %v5454_v46 = vrot.slane %v11763_v16, %v11729_v23  ;;  %v5458_v62 = vrot.slane %v11763_v16, %v11732_v4 }
 0x72d   : > { %v7323_v30 = vcombine.low %v7314_v49, %v7321_v59  ;;  %v6604_v19 = vcombine.low %v5430_v56, %v5434_v18  ;;  %v6605_v12 = vcombine.low %v5438_v51, %v5442_v38  ;;  %v6606_v21 = vcombine.low %v5446_v44, %v5450_v31 }
 0x72e   : > { %7756 = vperm.xlu0 %8941, %v6603_v29   ;;  %v7330_v27 = vrot.slane %v7322_v9, %v11735_v3  ;;  %v6607_v6 = vcombine.low %v5454_v46, %v5458_v62  ;;  %v5910_v0 = vrot.slane %v11808_v37, %v12799_v10  ;;  %v5914_v58 = vrot.slane %v11808_v37, %v12798_v34 }
 0x72f   : > { %v7337_v13 = vrot.slane %v7323_v30, %v11735_v3  ;;  %v6614_v22 = vrot.slane %v6604_v19, %v11735_v3  ;;  %v6621_v16 = vrot.slane %v6605_v12, %v11735_v3  ;;  %v6628_v42 = vrot.slane %v6606_v21, %v11735_v3 }
 0x730   : > { %v6635_v5 = vrot.slane %v6607_v6, %v11735_v3  ;;  %v5918_v43 = vrot.slane %v11808_v37, %v12801_v26  ;;  %v5922_v33 = vrot.slane %v11808_v37, %v11720_v52  ;;  %v5926_v53 = vrot.slane %v11808_v37, %v11723_v24 }
 0x731   : > { %v7338_v28 = vcombine.low %v7330_v27, %v7337_v13  ;;  %v6636_v60 = vcombine.low %v6614_v22, %v6621_v16  ;;  %v5930_v36 = vrot.slane %v11808_v37, %v11726_v39  ;;  %v5934_v61 = vrot.slane %v11808_v37, %v11729_v23 }
 0x732   : > { %v6637_v15 = vcombine.low %v6628_v42, %v6635_v5  ;;  %v5938_v35 = vrot.slane %v11808_v37, %v11732_v4  ;;  %v7339_v11 = vcombine.low %v5910_v0, %v5914_v58  ;;  %v7340_v2 = vcombine.low %v5918_v43, %v5922_v33 }
 0x733   : > { %7801 = vperm.xlu1 %8942, %v7338_v28   ;;  %v6644_v40 = vrot.slane %v6636_v60, %v11735_v3  ;;  %v7341_v56 = vcombine.low %v5926_v53, %v5930_v36  ;;  %v5462_v18 = vrot.slane %v11766_v63, %v12799_v10  ;;  %v5466_v20 = vrot.slane %v11766_v63, %v12798_v34 }
 0x734   : > { %v6651_v8 = vrot.slane %v6637_v15, %v11735_v3  ;;  %v7342_v49 = vcombine.low %v5934_v61, %v5938_v35  ;;  %v7349_v51 = vrot.slane %v7339_v11, %v11735_v3  ;;  %v7356_v59 = vrot.slane %v7340_v2, %v11735_v3 }
 0x735   : > { %v7363_v37 = vrot.slane %v7341_v56, %v11735_v3  ;;  %v5470_v38 = vrot.slane %v11766_v63, %v12801_v26  ;;  %v5474_v44 = vrot.slane %v11766_v63, %v11720_v52  ;;  %v5478_v31 = vrot.slane %v11766_v63, %v11723_v24 }
 0x736   : > { %v6652_v29 = vcombine.low %v6644_v40, %v6651_v8  ;;  %v7370_v9 = vrot.slane %v7342_v49, %v11735_v3  ;;  %v7371_v46 = vcombine.low %v7349_v51, %v7356_v59  ;;  %v5482_v62 = vrot.slane %v11766_v63, %v11726_v39 }
 0x737   : > { %v5486_v30 = vrot.slane %v11766_v63, %v11729_v23  ;;  %v5490_v19 = vrot.slane %v11766_v63, %v11732_v4  ;;  %v6653_v12 = vcombine.low %v5462_v18, %v5466_v20  ;;  %v6654_v21 = vcombine.low %v5470_v38, %v5474_v44 }
 0x738   : > { %7759 = vperm.xlu0 %8941, %v6652_v29   ;;  %v7372_v27 = vcombine.low %v7363_v37, %v7370_v9  ;;  %v7379_v6 = vrot.slane %v7371_v46, %v11735_v3  ;;  %v6655_v0 = vcombine.low %v5478_v31, %v5482_v62  ;;  %v5942_v58 = vrot.slane %v11811_v45, %v12799_v10 }
 0x739   : > { %v6656_v13 = vcombine.low %v5486_v30, %v5490_v19  ;;  %v6663_v22 = vrot.slane %v6653_v12, %v11735_v3  ;;  %v6670_v16 = vrot.slane %v6654_v21, %v11735_v3  ;;  %v5946_v42 = vrot.slane %v11811_v45, %v12798_v34 }
 0x73a   : > { %v7386_v63 = vrot.slane %v7372_v27, %v11735_v3  ;;  %v6677_v5 = vrot.slane %v6655_v0, %v11735_v3  ;;  %v5950_v43 = vrot.slane %v11811_v45, %v12801_v26  ;;  %v5954_v33 = vrot.slane %v11811_v45, %v11720_v52 }
 0x73b   : > { %v6684_v53 = vrot.slane %v6656_v13, %v11735_v3  ;;  %v6685_v28 = vcombine.low %v6663_v22, %v6670_v16  ;;  %v5958_v60 = vrot.slane %v11811_v45, %v11723_v24  ;;  %v5962_v36 = vrot.slane %v11811_v45, %v11726_v39 }
 0x73c   : > { %v7387_v61 = vcombine.low %v7379_v6, %v7386_v63  ;;  %v5966_v15 = vrot.slane %v11811_v45, %v11729_v23  ;;  %v5970_v35 = vrot.slane %v11811_v45, %v11732_v4  ;;  %v7388_v11 = vcombine.low %v5942_v58, %v5946_v42 }
 0x73d   : > { %v6686_v2 = vcombine.low %v6677_v5, %v6684_v53  ;;  %v6693_v40 = vrot.slane %v6685_v28, %v11735_v3  ;;  %v7389_v56 = vcombine.low %v5950_v43, %v5954_v33  ;;  %v7390_v18 = vcombine.low %v5958_v60, %v5962_v36 }
 0x73e   : > { %7804 = vperm.xlu1 %8942, %v7387_v61   ;;  %v7391_v20 = vcombine.low %v5966_v15, %v5970_v35  ;;  %v7398_v8 = vrot.slane %v7388_v11, %v11735_v3  ;;  %v5494_v49 = vrot.slane %v11769_v50, %v12799_v10  ;;  %v5498_v51 = vrot.slane %v11769_v50, %v12798_v34 }
 0x73f   : > { %v6700_v59 = vrot.slane %v6686_v2, %v11735_v3  ;;  %v7405_v45 = vrot.slane %v7389_v56, %v11735_v3  ;;  %v7412_v37 = vrot.slane %v7390_v18, %v11735_v3  ;;  %v5502_v38 = vrot.slane %v11769_v50, %v12801_v26 }
 0x740   : > { %v7419_v44 = vrot.slane %v7391_v20, %v11735_v3  ;;  %v5506_v31 = vrot.slane %v11769_v50, %v11720_v52  ;;  %v5510_v29 = vrot.slane %v11769_v50, %v11723_v24  ;;  %v5514_v9 = vrot.slane %v11769_v50, %v11726_v39 }
 0x741   : > { %v6701_v46 = vcombine.low %v6693_v40, %v6700_v59  ;;  %v7420_v62 = vcombine.low %v7398_v8, %v7405_v45  ;;  %v5518_v30 = vrot.slane %v11769_v50, %v11729_v23  ;;  %v5522_v19 = vrot.slane %v11769_v50, %v11732_v4 }
 0x742   : > { %v7421_v12 = vcombine.low %v7412_v37, %v7419_v44  ;;  %v6702_v21 = vcombine.low %v5494_v49, %v5498_v51  ;;  %v6703_v27 = vcombine.low %v5502_v38, %v5506_v31  ;;  %v6704_v6 = vcombine.low %v5510_v29, %v5514_v9 }
 0x743   : > { %7762 = vperm.xlu0 %8941, %v6701_v46   ;;  %v7428_v0 = vrot.slane %v7420_v62, %v11735_v3  ;;  %v6705_v58 = vcombine.low %v5518_v30, %v5522_v19  ;;  %v5974_v13 = vrot.slane %v11814_v1, %v12799_v10  ;;  %v5978_v22 = vrot.slane %v11814_v1, %v12798_v34 }
 0x744   : > { %v7435_v16 = vrot.slane %v7421_v12, %v11735_v3  ;;  %v6712_v42 = vrot.slane %v6702_v21, %v11735_v3  ;;  %v6719_v50 = vrot.slane %v6703_v27, %v11735_v3  ;;  %v6726_v63 = vrot.slane %v6704_v6, %v11735_v3 }
 0x745   : > { %v6733_v5 = vrot.slane %v6705_v58, %v11735_v3  ;;  %v5982_v43 = vrot.slane %v11814_v1, %v12801_v26  ;;  %v5986_v33 = vrot.slane %v11814_v1, %v11720_v52  ;;  %v5990_v53 = vrot.slane %v11814_v1, %v11723_v24 }
 0x746   : > { %v7436_v28 = vcombine.low %v7428_v0, %v7435_v16  ;;  %v6734_v60 = vcombine.low %v6712_v42, %v6719_v50  ;;  %v5994_v36 = vrot.slane %v11814_v1, %v11726_v39  ;;  %v5998_v61 = vrot.slane %v11814_v1, %v11729_v23 }
 0x747   : > { %v6735_v15 = vcombine.low %v6726_v63, %v6733_v5  ;;  %v6002_v35 = vrot.slane %v11814_v1, %v11732_v4  ;;  %v7437_v11 = vcombine.low %v5974_v13, %v5978_v22  ;;  %v7438_v2 = vcombine.low %v5982_v43, %v5986_v33 }
 0x748   : > { %7807 = vperm.xlu1 %8942, %v7436_v28   ;;  %v6742_v40 = vrot.slane %v6734_v60, %v11735_v3  ;;  %v7439_v56 = vcombine.low %v5990_v53, %v5994_v36  ;;  %v5686_v18 = vrot.slane %v11787_v7, %v12799_v10  ;;  %v5690_v20 = vrot.slane %v11787_v7, %v12798_v34 }
 0x749   : > { %v6749_v8 = vrot.slane %v6735_v15, %v11735_v3  ;;  %v7440_v49 = vcombine.low %v5998_v61, %v6002_v35  ;;  %v7447_v51 = vrot.slane %v7437_v11, %v11735_v3  ;;  %v7454_v59 = vrot.slane %v7438_v2, %v11735_v3 }
 0x74a   : > { %v7461_v1 = vrot.slane %v7439_v56, %v11735_v3  ;;  %v5694_v45 = vrot.slane %v11787_v7, %v12801_v26  ;;  %v5698_v37 = vrot.slane %v11787_v7, %v11720_v52  ;;  %v5702_v38 = vrot.slane %v11787_v7, %v11723_v24 }
 0x74b   : > { %v6750_v44 = vcombine.low %v6742_v40, %v6749_v8  ;;  %v7468_v31 = vrot.slane %v7440_v49, %v11735_v3  ;;  %v7469_v29 = vcombine.low %v7447_v51, %v7454_v59  ;;  %v5706_v9 = vrot.slane %v11787_v7, %v11726_v39 }
 0x74c   : > { %v5710_v46 = vrot.slane %v11787_v7, %v11729_v23  ;;  %v5714_v62 = vrot.slane %v11787_v7, %v11732_v4  ;;  %v6996_v30 = vcombine.low %v5686_v18, %v5690_v20  ;;  %v6997_v19 = vcombine.low %v5694_v45, %v5698_v37 }
 0x74d   : > { %7765 = vperm.xlu0 %8941, %v6750_v44   ;;  %v7470_v12 = vcombine.low %v7461_v1, %v7468_v31  ;;  %v7477_v21 = vrot.slane %v7469_v29, %v11735_v3  ;;  %v6998_v27 = vcombine.low %v5702_v38, %v5706_v9  ;;  %v6006_v6 = vrot.slane %v11831_v32, %v12799_v10 }
 0x74e   : > { %v6999_v0 = vcombine.low %v5710_v46, %v5714_v62  ;;  %v7006_v58 = vrot.slane %v6996_v30, %v11735_v3  ;;  %v7013_v13 = vrot.slane %v6997_v19, %v11735_v3  ;;  %v6010_v22 = vrot.slane %v11831_v32, %v12798_v34 }
 0x74f   : > { %v7484_v7 = vrot.slane %v7470_v12, %v11735_v3  ;;  %v7020_v16 = vrot.slane %v6998_v27, %v11735_v3  ;;  %v6014_v42 = vrot.slane %v11831_v32, %v12801_v26  ;;  %v6018_v50 = vrot.slane %v11831_v32, %v11720_v52 }
 0x750   : > { %v7027_v63 = vrot.slane %v6999_v0, %v11735_v3  ;;  %v7028_v5 = vcombine.low %v7006_v58, %v7013_v13  ;;  %v6022_v43 = vrot.slane %v11831_v32, %v11723_v24  ;;  %v6026_v33 = vrot.slane %v11831_v32, %v11726_v39 }
 0x751   : > { %v7485_v53 = vcombine.low %v7477_v21, %v7484_v7  ;;  %v6030_v28 = vrot.slane %v11831_v32, %v11729_v23  ;;  %v6034_v60 = vrot.slane %v11831_v32, %v11732_v4  ;;  %v7486_v36 = vcombine.low %v6006_v6, %v6010_v22 }
 0x752   : > { %v7029_v61 = vcombine.low %v7020_v16, %v7027_v63  ;;  %v7036_v15 = vrot.slane %v7028_v5, %v11735_v3  ;;  %v7487_v35 = vcombine.low %v6014_v42, %v6018_v50  ;;  %v7488_v11 = vcombine.low %v6022_v43, %v6026_v33 }
 0x753   : > { %7810 = vperm.xlu1 %8942, %v7485_v53   ;;  %v7489_v2 = vcombine.low %v6030_v28, %v6034_v60  ;;  %v7496_v40 = vrot.slane %v7486_v36, %v11735_v3  ;;  %v5526_v56 = vrot.slane %v11772_v41, %v12799_v10  ;;  %v5530_v18 = vrot.slane %v11772_v41, %v12798_v34 }
 0x754   : > { %v7043_v20 = vrot.slane %v7029_v61, %v11735_v3  ;;  %v7503_v32 = vrot.slane %v7487_v35, %v11735_v3  ;;  %v7510_v8 = vrot.slane %v7488_v11, %v11735_v3  ;;  %v5534_v49 = vrot.slane %v11772_v41, %v12801_v26 }
 0x755   : > { %v7517_v51 = vrot.slane %v7489_v2, %v11735_v3  ;;  %v5538_v59 = vrot.slane %v11772_v41, %v11720_v52  ;;  %v5542_v1 = vrot.slane %v11772_v41, %v11723_v24  ;;  %v5546_v45 = vrot.slane %v11772_v41, %v11726_v39 }
 0x756   : > { %v7044_v37 = vcombine.low %v7036_v15, %v7043_v20  ;;  %v7518_v38 = vcombine.low %v7496_v40, %v7503_v32  ;;  %v5550_v44 = vrot.slane %v11772_v41, %v11729_v23  ;;  %v5554_v31 = vrot.slane %v11772_v41, %v11732_v4 }
 0x757   : > { %v7519_v29 = vcombine.low %v7510_v8, %v7517_v51  ;;  %v6751_v9 = vcombine.low %v5526_v56, %v5530_v18  ;;  %v6752_v46 = vcombine.low %v5534_v49, %v5538_v59  ;;  %v6753_v62 = vcombine.low %v5542_v1, %v5546_v45 }
 0x758   : > { %7783 = vperm.xlu0 %8941, %v7044_v37   ;;  %v7526_v30 = vrot.slane %v7518_v38, %v11735_v3  ;;  %v6754_v19 = vcombine.low %v5550_v44, %v5554_v31  ;;  %v6038_v12 = vrot.slane %v11848_v25, %v12799_v10  ;;  %v6042_v21 = vrot.slane %v11848_v25, %v12798_v34 }
 0x759   : > { %v7533_v27 = vrot.slane %v7519_v29, %v11735_v3  ;;  %v6761_v6 = vrot.slane %v6751_v9, %v11735_v3  ;;  %v6768_v41 = vrot.slane %v6752_v46, %v11735_v3  ;;  %v6775_v0 = vrot.slane %v6753_v62, %v11735_v3 }
 0x75a   : > { %v6782_v58 = vrot.slane %v6754_v19, %v11735_v3  ;;  %v6046_v13 = vrot.slane %v11848_v25, %v12801_v26  ;;  %v6050_v22 = vrot.slane %v11848_v25, %v11720_v52  ;;  %v6054_v7 = vrot.slane %v11848_v25, %v11723_v24 }
 0x75b   : > { %v7534_v16 = vcombine.low %v7526_v30, %v7533_v27  ;;  %v6783_v42 = vcombine.low %v6761_v6, %v6768_v41  ;;  %v6058_v50 = vrot.slane %v11848_v25, %v11726_v39  ;;  %v6062_v63 = vrot.slane %v11848_v25, %v11729_v23 }
 0x75c   : > { %v6784_v5 = vcombine.low %v6775_v0, %v6782_v58  ;;  %v6066_v43 = vrot.slane %v11848_v25, %v11732_v4  ;;  %v7535_v33 = vcombine.low %v6038_v12, %v6042_v21  ;;  %v7536_v53 = vcombine.low %v6046_v13, %v6050_v22 }
 0x75d   : > { %7813 = vperm.xlu1 %8942, %v7534_v16   ;;  %v6791_v28 = vrot.slane %v6783_v42, %v11735_v3  ;;  %v7537_v60 = vcombine.low %v6054_v7, %v6058_v50  ;;  %v5558_v36 = vrot.slane %v11775_v57, %v12799_v10  ;;  %v5562_v61 = vrot.slane %v11775_v57, %v12798_v34 }
 0x75e   : > { %v6798_v15 = vrot.slane %v6784_v5, %v11735_v3  ;;  %v7538_v35 = vcombine.low %v6062_v63, %v6066_v43  ;;  %v7545_v11 = vrot.slane %v7535_v33, %v11735_v3  ;;  %v7552_v2 = vrot.slane %v7536_v53, %v11735_v3 }
 0x75f   : > { %v7559_v25 = vrot.slane %v7537_v60, %v11735_v3  ;;  %v5566_v40 = vrot.slane %v11775_v57, %v12801_v26  ;;  %v5570_v56 = vrot.slane %v11775_v57, %v11720_v52  ;;  %v5574_v18 = vrot.slane %v11775_v57, %v11723_v24 }
 0x760   : > { %v6799_v20 = vcombine.low %v6791_v28, %v6798_v15  ;;  %v7566_v32 = vrot.slane %v7538_v35, %v11735_v3  ;;  %v7567_v8 = vcombine.low %v7545_v11, %v7552_v2  ;;  %v5578_v49 = vrot.slane %v11775_v57, %v11726_v39 }
 0x761   : > { %v5582_v51 = vrot.slane %v11775_v57, %v11729_v23  ;;  %v5586_v59 = vrot.slane %v11775_v57, %v11732_v4  ;;  %v6800_v1 = vcombine.low %v5558_v36, %v5562_v61  ;;  %v6801_v45 = vcombine.low %v5566_v40, %v5570_v56 }
 0x762   : > { %7768 = vperm.xlu0 %8941, %v6799_v20   ;;  %v7568_v37 = vcombine.low %v7559_v25, %v7566_v32  ;;  %v7575_v38 = vrot.slane %v7567_v8, %v11735_v3  ;;  %v6802_v44 = vcombine.low %v5574_v18, %v5578_v49  ;;  %v6070_v31 = vrot.slane %v11869_v54, %v12799_v10 }
 0x763   : > { %v6803_v29 = vcombine.low %v5582_v51, %v5586_v59  ;;  %v6810_v9 = vrot.slane %v6800_v1, %v11735_v3  ;;  %v6817_v46 = vrot.slane %v6801_v45, %v11735_v3  ;;  %v6074_v62 = vrot.slane %v11869_v54, %v12798_v34 }
 0x764   : > { %v7582_v57 = vrot.slane %v7568_v37, %v11735_v3  ;;  %v6824_v30 = vrot.slane %v6802_v44, %v11735_v3  ;;  %v6078_v19 = vrot.slane %v11869_v54, %v12801_v26  ;;  %v6082_v12 = vrot.slane %v11869_v54, %v11720_v52 }
 0x765   : > { %v6831_v21 = vrot.slane %v6803_v29, %v11735_v3  ;;  %v6832_v27 = vcombine.low %v6810_v9, %v6817_v46  ;;  %v6086_v6 = vrot.slane %v11869_v54, %v11723_v24  ;;  %v6090_v41 = vrot.slane %v11869_v54, %v11726_v39 }
 0x766   : > { %v7583_v0 = vcombine.low %v7575_v38, %v7582_v57  ;;  %v6094_v58 = vrot.slane %v11869_v54, %v11729_v23  ;;  %v6098_v13 = vrot.slane %v11869_v54, %v11732_v4  ;;  %v7584_v22 = vcombine.low %v6070_v31, %v6074_v62 }
 0x767   : > { %v6833_v7 = vcombine.low %v6824_v30, %v6831_v21  ;;  %v6840_v16 = vrot.slane %v6832_v27, %v11735_v3  ;;  %v7585_v42 = vcombine.low %v6078_v19, %v6082_v12  ;;  %v7586_v50 = vcombine.low %v6086_v6, %v6090_v41 }
 0x768   : > { %7816 = vperm.xlu1 %8942, %v7583_v0   ;;  %v7587_v63 = vcombine.low %v6094_v58, %v6098_v13  ;;  %v7594_v5 = vrot.slane %v7584_v22, %v11735_v3  ;;  %v5590_v43 = vrot.slane %v11778_v48, %v12799_v10  ;;  %v5594_v33 = vrot.slane %v11778_v48, %v12798_v34 }
 0x769   : > { %v6847_v53 = vrot.slane %v6833_v7, %v11735_v3  ;;  %v7601_v54 = vrot.slane %v7585_v42, %v11735_v3  ;;  %v7608_v28 = vrot.slane %v7586_v50, %v11735_v3  ;;  %v5598_v60 = vrot.slane %v11778_v48, %v12801_v26 }
 0x76a   : > { %v7615_v36 = vrot.slane %v7587_v63, %v11735_v3  ;;  %v5602_v61 = vrot.slane %v11778_v48, %v11720_v52  ;;  %v5606_v15 = vrot.slane %v11778_v48, %v11723_v24  ;;  %v5610_v35 = vrot.slane %v11778_v48, %v11726_v39 }
 0x76b   : > { %v6848_v11 = vcombine.low %v6840_v16, %v6847_v53  ;;  %v7616_v2 = vcombine.low %v7594_v5, %v7601_v54  ;;  %v5614_v25 = vrot.slane %v11778_v48, %v11729_v23  ;;  %v5618_v40 = vrot.slane %v11778_v48, %v11732_v4 }
 0x76c   : > { %v7617_v56 = vcombine.low %v7608_v28, %v7615_v36  ;;  %v6849_v18 = vcombine.low %v5590_v43, %v5594_v33  ;;  %v6850_v20 = vcombine.low %v5598_v60, %v5602_v61  ;;  %v6851_v32 = vcombine.low %v5606_v15, %v5610_v35 }
 0x76d   : > { %7771 = vperm.xlu0 %8941, %v6848_v11   ;;  %v7624_v8 = vrot.slane %v7616_v2, %v11735_v3  ;;  %v6852_v49 = vcombine.low %v5614_v25, %v5618_v40  ;;  %v6102_v51 = vrot.slane %v11898_v55, %v12799_v10  ;;  %v6106_v59 = vrot.slane %v11898_v55, %v12798_v34 }
 0x76e   : > { %v7631_v1 = vrot.slane %v7617_v56, %v11735_v3  ;;  %v6859_v45 = vrot.slane %v6849_v18, %v11735_v3  ;;  %v6866_v48 = vrot.slane %v6850_v20, %v11735_v3  ;;  %v6873_v37 = vrot.slane %v6851_v32, %v11735_v3 }
 0x76f   : > { %v6880_v38 = vrot.slane %v6852_v49, %v11735_v3  ;;  %v6110_v44 = vrot.slane %v11898_v55, %v12801_v26  ;;  %v6114_v31 = vrot.slane %v11898_v55, %v11720_v52  ;;  %v6118_v29 = vrot.slane %v11898_v55, %v11723_v24 }
 0x770   : > { %v7632_v9 = vcombine.low %v7624_v8, %v7631_v1  ;;  %v6881_v46 = vcombine.low %v6859_v45, %v6866_v48  ;;  %v6122_v62 = vrot.slane %v11898_v55, %v11726_v39  ;;  %v6126_v57 = vrot.slane %v11898_v55, %v11729_v23 }
 0x771   : > { %v6882_v30 = vcombine.low %v6873_v37, %v6880_v38  ;;  %v6130_v19 = vrot.slane %v11898_v55, %v11732_v4  ;;  %v7633_v12 = vcombine.low %v6102_v51, %v6106_v59  ;;  %v7634_v21 = vcombine.low %v6110_v44, %v6114_v31 }
 0x772   : > { %7819 = vperm.xlu1 %8942, %v7632_v9   ;;  %v6889_v27 = vrot.slane %v6881_v46, %v11735_v3  ;;  %v7635_v6 = vcombine.low %v6118_v29, %v6122_v62  ;;  %v5622_v41 = vrot.slane %v11781_v47, %v12799_v10  ;;  %v5626_v0 = vrot.slane %v11781_v47, %v12798_v34  ;;  %v12527_v62 = vpop.permute.xlu0 %7735 }
 0x773   : > { %v6896_v58 = vrot.slane %v6882_v30, %v11735_v3  ;;  %v7636_v13 = vcombine.low %v6126_v57, %v6130_v19  ;;  %v7643_v22 = vrot.slane %v7633_v12, %v11735_v3  ;;  %v7650_v7 = vrot.slane %v7634_v21, %v11735_v3  ;;  %v12535_v12 = vpop.permute.xlu1 %7732 }
 0x774   : > { %v7657_v55 = vrot.slane %v7635_v6, %v11735_v3  ;;  %v5630_v16 = vrot.slane %v11781_v47, %v12801_v26  ;;  %v5634_v42 = vrot.slane %v11781_v47, %v11720_v52  ;;  %v5638_v50 = vrot.slane %v11781_v47, %v11723_v24 }
 0x775   : > { %v6897_v63 = vcombine.low %v6889_v27, %v6896_v58  ;;  %v7664_v5 = vrot.slane %v7636_v13, %v11735_v3  ;;  %v7665_v43 = vcombine.low %v7643_v22, %v7650_v7  ;;  %v5642_v33 = vrot.slane %v11781_v47, %v11726_v39 }
 0x776   : > { %v5646_v53 = vrot.slane %v11781_v47, %v11729_v23  ;;  %v5650_v54 = vrot.slane %v11781_v47, %v11732_v4  ;;  %v6898_v28 = vcombine.low %v5622_v41, %v5626_v0  ;;  %v6899_v60 = vcombine.low %v5630_v16, %v5634_v42  ;;  %v12529_v57 = vpop.permute.xlu0 %7738 }
 0x777   : > { %7774 = vperm.xlu0 %8941, %v6897_v63   ;;  %v7666_v36 = vcombine.low %v7657_v55, %v7664_v5  ;;  %v7673_v61 = vrot.slane %v7665_v43, %v11735_v3  ;;  %v6900_v15 = vcombine.low %v5638_v50, %v5642_v33  ;;  %v6134_v35 = vrot.slane %v11946_v14, %v12799_v10  ;;  %v7781_v27 = vpop.permute.xlu1 %7780 }
 0x778   : > { %v6901_v11 = vcombine.low %v5646_v53, %v5650_v54  ;;  %v6908_v2 = vrot.slane %v6898_v28, %v11735_v3  ;;  %v6915_v25 = vrot.slane %v6899_v60, %v11735_v3  ;;  %v6138_v40 = vrot.slane %v11946_v14, %v12798_v34 }
 0x779   : > { %v7680_v47 = vrot.slane %v7666_v36, %v11735_v3  ;;  %v6922_v56 = vrot.slane %v6900_v15, %v11735_v3  ;;  %v6142_v18 = vrot.slane %v11946_v14, %v12801_v26  ;;  %v6146_v20 = vrot.slane %v11946_v14, %v11720_v52 }
 0x77a   : > { %v6929_v10 = vrot.slane %v6901_v11, %v11735_v3  ;;  %v6930_v32 = vcombine.low %v6908_v2, %v6915_v25  ;;  %v6150_v8 = vrot.slane %v11946_v14, %v11723_v24  ;;  %v6154_v49 = vrot.slane %v11946_v14, %v11726_v39  ;;  %v12531_v30 = vpop.permute.xlu0 %7741 }
 0x77b   : > { %v7681_v34 = vcombine.low %v7673_v61, %v7680_v47  ;;  %v6158_v51 = vrot.slane %v11946_v14, %v11729_v23  ;;  %v6162_v59 = vrot.slane %v11946_v14, %v11732_v4  ;;  %v7682_v26 = vcombine.low %v6134_v35, %v6138_v40  ;;  %v7787_v41 = vpop.permute.xlu1 %7786 }
 0x77c   : > { %v6931_v1 = vcombine.low %v6922_v56, %v6929_v10  ;;  %v6938_v52 = vrot.slane %v6930_v32, %v11735_v3  ;;  %v7683_v45 = vcombine.low %v6142_v18, %v6146_v20  ;;  %v7684_v48 = vcombine.low %v6150_v8, %v6154_v49 }
 0x77d   : > { %7822 = vperm.xlu1 %8942, %v7681_v34   ;;  %v7685_v37 = vcombine.low %v6158_v51, %v6162_v59  ;;  %v7692_v24 = vrot.slane %v7682_v26, %v11735_v3  ;;  %v12802_v50 = vlaneseq }
 0x77e   : > { %v6945_v38 = vrot.slane %v6931_v1, %v11735_v3  ;;  %v7699_v39 = vrot.slane %v7683_v45, %v11735_v3  ;;  %v7706_v44 = vrot.slane %v7684_v48, %v11735_v3 }
 0x77f   : > { %v7713_v23 = vrot.slane %v7685_v37, %v11735_v3  ;;  %v12533_v19 = vpop.permute.xlu0 %7744  ;;  %v12550_v63 = vand.u32 127, %v12802_v50  ;;  %vm8035_vm1 = vcmp.lt.s32.totalorder %v12802_v50, 256 }
 0x780   : > { %v6946_v31 = vcombine.low %v6938_v52, %v6945_v38  ;;  %v7714_v4 = vcombine.low %v7692_v24, %v7699_v39 }
 0x781   : > { %v7715_v14 = vcombine.low %v7706_v44, %v7713_v23  ;;  %v7833_v33 = vadd.s32 4294967288, %v12550_v63  ;;  %v7840_v28 = vadd.s32 4294967280, %v12550_v63  ;;  %v7831_v36 = vsub.s32 %v12550_v63, %v12800_v17 }
 0x782   : > { %7777 = vperm.xlu0 %8941, %v6946_v31   ;;  %v7722_v29 = vrot.slane %v7714_v4, %v11735_v3  ;;  %v7847_v35 = vadd.s32 4294967272, %v12550_v63  ;;  %v7854_v40 = vadd.s32 4294967264, %v12550_v63  ;;  %v7861_v10 = vadd.s32 4294967256, %v12550_v63 }
 0x783   : > { %v7729_v9 = vrot.slane %v7715_v14, %v11735_v3  ;;  %v7836_v54 = vsub.s32 %v7833_v33, %v12800_v17  ;;  %v7941_v15 = vrot.slane %v7781_v27, %v7831_v36  ;;  %v7843_v11 = vsub.s32 %v7840_v28, %v12800_v17 }
 0x784   : > { %v7790_v58 = vpop.permute.xlu1 %7789  ;;  %v7850_v56 = vsub.s32 %v7847_v35, %v12800_v17  ;;  %v7857_v32 = vsub.s32 %v7854_v40, %v12800_v17  ;;  %v7868_v34 = vadd.s32 4294967248, %v12550_v63  ;;  %v7864_v59 = vsub.s32 %v7861_v10, %v12800_v17 }
 0x785   : > { %v7730_v46 = vcombine.low %v7722_v29, %v7729_v9  ;;  %v7950_v25 = vrot.slane %v7787_v41, %v7843_v11  ;;  %v7875_v52 = vadd.s32 4294967240, %v12550_v63  ;;  %v7882_v24 = vadd.s32 4294967232, %v12550_v63 }
 0x786   : > { %v7955_v20 = vrot.slane %v7790_v58, %v7850_v56  ;;  %v7871_v45 = vsub.s32 %v7868_v34, %v12800_v17  ;;  %v7889_v4 = vadd.s32 4294967224, %v12550_v63  ;;  %v7837_v29 = vrot.slane %v12527_v62, %v7836_v54 }
 0x787   : > { %7825 = vperm.xlu1 %8942, %v7730_v46   ;;  %v7878_v39 = vsub.s32 %v7875_v52, %v12800_v17  ;;  %v7885_v14 = vsub.s32 %v7882_v24, %v12800_v17  ;;  %v7832_v9 = vrot.slane %v12535_v12, %v7831_v36  ;;  %v7896_v41 = vadd.s32 4294967216, %v12550_v63 }
 0x788   : > { %v7903_v12 = vadd.s32 4294967208, %v12550_v63 }
 0x789   : > { %v12537_v21 = vpop.permute.xlu0 %7747  ;;  %v7839_v62 = vsel %vm7838_vm2, %v7837_v29, %v7832_v9  ;;  %v7899_v28 = vsub.s32 %v7896_v41, %v12800_v17 }
 0x78a   : > { %v7865_v36 = vrot.slane %v12537_v21, %v7864_v59  ;;  %v7906_v40 = vsub.s32 %v7903_v12, %v12800_v17  ;;  %v7931_v21 = vadd.s32 4294967176, %v12550_v63 }
 0x78f   : > { %v7793_v22 = vpop.permute.xlu1 %7792 }
 0x790   : > { %v7960_v49 = vrot.slane %v7793_v22, %v7857_v32  ;;  %v7844_v22 = vrot.slane %v12529_v57, %v7843_v11  ;;  %v7910_v57 = vadd.s32 4294967200, %v12550_v63 }
 0x794   : > { %v12539_v6 = vpop.permute.xlu0 %7750 }
 0x795   : > { %v7872_v35 = vrot.slane %v12539_v6, %v7871_v45  ;;  %v7913_v6 = vsub.s32 %v7910_v57, %v12800_v17 }
 0x799   : > { %v7796_v55 = vpop.permute.xlu1 %7795 }
 0x79a   : > { %v7965_v1 = vrot.slane %v7796_v55, %v7864_v59  ;;  %v7892_v55 = vsub.s32 %v7889_v4, %v12800_v17 }
 0x79e   : > { %v12541_v0 = vpop.permute.xlu0 %7753 }
 0x7a4   : > { %v7799_v42 = vpop.permute.xlu1 %7798 }
 0x7a5   : > { %v7970_v37 = vrot.slane %v7799_v42, %v7871_v45 }
 0x7a9   : > { %v12543_v13 = vpop.permute.xlu0 %7756 }
 0x7ae   : > { %v7802_v43 = vpop.permute.xlu1 %7801 }
 0x7af   : > { %v7975_v31 = vrot.slane %v7802_v43, %v7878_v39  ;;  %v7851_v43 = vrot.slane %v12531_v30, %v7850_v56 }
 0x7b3   : > { %v12545_v7 = vpop.permute.xlu0 %7759 }
 0x7b9   : > { %v7805_v60 = vpop.permute.xlu1 %7804 }
 0x7ba   : > { %v7980_v27 = vrot.slane %v7805_v60, %v7885_v14  ;;  %v7846_v60 = vsel %vm7845_vm3, %v7844_v22, %v7839_v62 }
 0x7be   : > { %v12547_v16 = vpop.permute.xlu0 %7762 }
 0x7bf   : > { %v7900_v34 = vrot.slane %v12547_v16, %v7899_v28 }
 0x7c3   : > { %v7808_v47 = vpop.permute.xlu1 %7807 }
 0x7c8   : > { %v12552_v5 = vpop.permute.xlu0 %7765 }
 0x7ce   : > { %v7811_v51 = vpop.permute.xlu1 %7810 }
 0x7cf   : > { %v7990_v11 = vrot.slane %v7811_v51, %v7899_v28  ;;  %v7907_v51 = vrot.slane %v12552_v5, %v7906_v40 }
 0x7d3   : > { %v7784_v53 = vpop.permute.xlu0 %7783 }
 0x7d4   : > { %v7945_v61 = vrot.slane %v7784_v53, %v7836_v54  ;;  %v7985_v53 = vrot.slane %v7808_v47, %v7892_v55  ;;  %v7858_v54 = vrot.slane %v12533_v19, %v7857_v32  ;;  %v7924_v19 = vadd.s32 4294967184, %v12550_v63 }
 0x7d5   : > { %v7893_v32 = vrot.slane %v12545_v7, %v7892_v55 }
 0x7d6   : > { %v7946_v2 = vsel %vm7838_vm2, %v7945_v61, %v7941_v15  ;;  %v7917_v61 = vadd.s32 4294967192, %v12550_v63  ;;  %v7853_v15 = vsel %vm7852_vm4, %v7851_v43, %v7846_v60  ;;  %v7927_v63 = vsub.s32 %v7924_v19, %v12800_v17 }
 0x7d7   : > { %v7951_v18 = vsel %vm7845_vm3, %v7950_v25, %v7946_v2  ;;  %v7879_v25 = vrot.slane %v12541_v0, %v7878_v39  ;;  %v7860_v56 = vsel %vm7859_vm5, %v7858_v54, %v7853_v15 }
 0x7d8   : > { %v7956_v8 = vsel %vm7852_vm4, %v7955_v20, %v7951_v18  ;;  %v7814_v38 = vpop.permute.xlu1 %7813  ;;  %v7886_v18 = vrot.slane %v12543_v13, %v7885_v14  ;;  %v7867_v10 = vsel %vm7866_vm6, %v7865_v36, %v7860_v56  ;;  %v7920_v0 = vsub.s32 %v7917_v61, %v12800_v17 }
 0x7d9   : > { %v7961_v26 = vsel %vm7859_vm5, %v7960_v49, %v7956_v8  ;;  %v7995_v8 = vrot.slane %v7814_v38, %v7906_v40  ;;  %v7874_v49 = vsel %vm7873_vm7, %v7872_v35, %v7867_v10 }
 0x7da   : > { %v7966_v48 = vsel %vm7866_vm6, %v7965_v1, %v7961_v26  ;;  %v7881_v13 = vsel %vm7880_vm8, %v7879_v25, %v7874_v49  ;;  %v7934_v26 = vsub.s32 %v7931_v21, %v12800_v17 }
 0x7db   : > { %v7971_v23 = vsel %vm7873_vm7, %v7970_v37, %v7966_v48  ;;  %v7888_v7 = vsel %vm7887_vm9, %v7886_v18, %v7881_v13 }
 0x7dc   : > { %v7976_v46 = vsel %vm7880_vm8, %v7975_v31, %v7971_v23  ;;  %v7895_v16 = vsel %vm7894_vm10, %v7893_v32, %v7888_v7 }
 0x7dd   : > { %v12576_v44 = vpop.permute.xlu0 %7768  ;;  %v7981_v33 = vsel %vm7887_vm9, %v7980_v27, %v7976_v46  ;;  %v7902_v24 = vsel %vm7901_vm11, %v7900_v34, %v7895_v16 }
 0x7de   : > { %v7986_v30 = vsel %vm7894_vm10, %v7985_v53, %v7981_v33  ;;  %v7914_v1 = vrot.slane %v12576_v44, %v7913_v6  ;;  %v7909_v39 = vsel %vm7908_vm12, %v7907_v51, %v7902_v24 }
 0x7df   : > { %v7991_v20 = vsel %vm7901_vm11, %v7990_v11, %v7986_v30 }
 0x7e0   : > { %v7996_v59 = vsel %vm7908_vm12, %v7995_v8, %v7991_v20  ;;  %v7916_v44 = vsel %vm7915_vm13, %v7914_v1, %v7909_v39 }
 0x7e3   : > { %v7817_v58 = vpop.permute.xlu1 %7816 }
 0x7e4   : > { %v8000_v52 = vrot.slane %v7817_v58, %v7913_v6 }
 0x7e6   : > { %v8001_v38 = vsel %vm7915_vm13, %v8000_v52, %v7996_v59 }
 0x7e8   : > { %v7772_v42 = vpop.permute.xlu0 %7771 }
 0x7e9   : > { %v7921_v48 = vrot.slane %v7772_v42, %v7920_v0 }
 0x7eb   : > { %v7923_v4 = vsel %vm7922_vm14, %v7921_v48, %v7916_v44 }
 0x7ed   : > { %v7820_v2 = vpop.permute.xlu1 %7819 }
 0x7ee   : > { %v8005_v17 = vrot.slane %v7820_v2, %v7920_v0 }
 0x7f0   : > { %v8006_v14 = vsel %vm7922_vm14, %v8005_v17, %v8001_v38 }
 0x7f2   : > { %v7775_v47 = vpop.permute.xlu0 %7774 }
 0x7f3   : > { %v7928_v5 = vrot.slane %v7775_v47, %v7927_v63 }
 0x7f5   : > { %v7930_v29 = vsel %vm7929_vm15, %v7928_v5, %v7923_v4 }
 0x7f8   : > { %v7823_v45 = vpop.permute.xlu1 %7822 }
 0x7f9   : > { %v8010_v31 = vrot.slane %v7823_v45, %v7927_v63 }
 0x7fb   : > { %v8011_v41 = vsel %vm7929_vm15, %v8010_v31, %v8006_v14 }
 0x7fd   : > { %v7778_v37 = vpop.permute.xlu0 %7777 }
 0x7fe   : > { %v7935_v23 = vrot.slane %v7778_v37, %v7934_v26 }
 0x800   : > { %v7937_v46 = vsel %vm7936_vm0, %v7935_v23, %v7930_v29 }
 0x802   : > { %v7826_v9 = vpop.permute.xlu1 %7825 }
 0x803   : > { %v8015_v27 = vrot.slane %v7826_v9, %v7934_v26 }
 0x805   : > { %v8016_v58 = vsel %vm7936_vm0, %v8015_v27, %v8011_v41 }
 0x806   : > { %v8017_v22 = vcombine.low %v7937_v46, %v8016_v58 }
 0x808   : > { %v8024_v55 = vrot.slane %v8017_v22, %v11735_v3 }
 0x80a   : > { %v8031_v42 = vrot.slane %v8024_v55, %v11735_v3 }
 0x80c   : > { %8037 = vst.msk [vmem:[%s527_s26] sm:$0x3] %vm8035_vm1, %v8031_v42 }
 0x80d   : > { %9202 = shalt.err (!%p9199_p5)
}
 0x80e   : > { %s9203_s2 = scalar_lea.hbm %s8053_s17, 32  ;;  %s9207_s26 = scalar_lea.hbm %s12680_s15, 64 }
 0x80f   : > { %p9204_p6 = scmp.ne.s32.totalorder %s8053_s17, %s9203_s2  ;;  %p9208_p10 = scmp.lt.s32.totalorder %s8053_s17, %s12680_s15 }
 0x810   : > { %p9209_p11 = scmp.lt.s32.totalorder %s9207_s26, %s9203_s2 }
 0x811   : > { %p9205_p7 = pnand %p9204_p6, %p9395_p4 }
 0x812   : > { %p9210_p12 = por %p9209_p11, %p9208_p10 }
 0x813   : > { %p9206_p9 = pneg %p9205_p7 }
 0x815   : > { %p9211_p13 = pnand %p9210_p12, %p9206_p9 }
 0x817   : > { %9214 = shalt.err (!%p9211_p13)
}
 0x818   : > { %8824 = dma.vmem_to_hbm [thread:$0]  (%p9395_p4), %s8056_s27, 32, %s8053_s17, %s8039_s18  }
 0x819 PF: > { %p8830_p0 = scmp.ge.s32.totalorder %s9265_s25, 2  ;;  %s8067_s1 = sand.u32 1, %s9245_s20  }
 0x81a   : > { %s8068_s24 = scalar_lea.sflag [#allocation4], %s8067_s1 }
 0x81b   : > { %p8827_p1 = pnand %p8830_p0, %p9402_p8 }
 0x81d   : > { %p8828_p2 = pneg %p8827_p1 }
 0x81f   : > { %9240 = dma.done.wait (%p8828_p2), %s8068_s24, 32  }
 0x820   : > { %9242 = vsyncadd (%p8828_p2), %s8068_s24, 4294967264  ;;  %s30_s25 = sadd.s32 1, %s9265_s25   ;;  %s12803_s2 = sld [smem:[#allocation8_spill]] }
 0x821   : > { %p27_p3 = scmp.ge.s32.totalorder %s30_s25, 4   ;;  %s12804_s23 = sld [smem:[#allocation6_spill]] }
 0x822   : > { %s12805_s24 = sld [smem:[#allocation7_spill]]  ;;  %s12806_s20 = smov %s9249_s21 }
 0x823   : > { %s12807_s21 = smov %s9253_s22  ;;  %29 = sbr.rel (!%p27_p3) target bundleno = 8 (0x8), region = 118 }
 0x826   : > { %s12808_s22 = smov %s12803_s2 }
 0x828   :  { %8073 = vsyncpa [#allocation4], 1 }
 0x829   :  { %8075 = vsyncpa [#allocation4 + $0x1], 1 }

</bundles_post_ra>
